<compile_context>
chip_gen: v7x
topology: tpu7x:2x2x1
jax: 0.10.0
libtpu: 0.0.40
codegen_flags: <defaults>
</compile_context>

<pallas_src>
import functools

import jax
import jax.numpy as jnp
from jax import lax
from jax.experimental import pallas as pl
from jax.experimental.pallas import tpu as pltpu

LANE = 128  # output / source chunk width (one lane-tile)


# ----------------------------- fused kernel --------------------------------


def fused_kernel(x_ref, w_ref, b_ref, idx_ref, o_ref, vals_s, idx_s, *,
                 n_src, n_chunks, min_value, max_value):
    # x: (Cin, Pp)  w: (Cout, Cin)  b: (Cout, 1)  idx: (Cout, Pp) float32
    # o: (Cout, LANE)   -- lane chunk `l` of the padded spatial axis
    # vals_s: (n_chunks, Cout, LANE) f32 scratch  (conv result, chunk-major)
    # idx_s : (n_chunks, Cout, LANE) i32 scratch  (indices, chunk-major)
    cout, L = o_ref.shape
    cin, pp = x_ref.shape
    l = pl.program_id(1)

    x = x_ref[...]
    w = w_ref[...]
    b = b_ref[...]

    # ---- pointwise conv + clamp over the whole padded spatial axis ----------
    # VPU broadcast-MACs (Cin=9 is too small for the MXU; see header note).
    # Hoisted bias broadcast + weight columns (not re-materialized per MAC).
    w_cols = [w[:, c:c + 1] for c in range(cin)]
    acc = jnp.broadcast_to(b, (cout, pp))
    for c in range(cin):                                   # static, Cin = 9
        acc = acc + w_cols[c] * x[c:c + 1, :]              # (Cout,1)*(1,Pp)
    vals = jnp.minimum(jnp.maximum(acc, min_value), max_value)
    # Padded spatial lanes (>= n_src) hold clamp(bias) garbage here; they are
    # never scattered (sweep bounded by n_src) and output lanes >= n_src are
    # masked / cropped, so this is harmless by construction.

    # Stage chunk-major so chunks can be indexed dynamically along a leading
    # (untiled) axis inside the loops below.
    for s in range(n_chunks):                              # static, small
        vals_s[s] = vals[:, s * LANE:(s + 1) * LANE]

    idx_i = idx_ref[...].astype(jnp.int32)                 # cast in-kernel

    # Lane positions covered by this grid step's output chunk.
    pos = l * L + lax.broadcasted_iota(jnp.int32, (cout, L), 1)

    # ---- identity-indices fast path -----------------------------------------
    jk = lax.broadcasted_iota(jnp.int32, (cout, pp), 1)
    n_bad = jnp.sum(jnp.where((jk < n_src) & (idx_i != jk), 1, 0))
    is_id = n_bad == 0

    @pl.when(is_id)
    def _fast():
        v_l = vals_s[l]                                    # dynamic 1st-axis
        o_ref[...] = jnp.where(pos < n_src, v_l, 0.0)

    # ---- general scatter sweep ----------------------------------------------
    @pl.when(jnp.logical_not(is_id))
    def _sweep():
        for s in range(n_chunks):                          # static
            idx_s[s] = idx_i[:, s * LANE:(s + 1) * LANE]

        zeros = jnp.zeros((cout, L), jnp.float32)
        n_full = n_src // LANE                             # full source chunks
        n_tail = n_src - n_full * LANE                     # static tail count

        def scatter_block(ii, vv, accs, count):
            # `count` static: unrolled compare/select, round-robin over the 4
            # independent accumulator chains (fills all 4 VALU slots).
            a = list(accs)
            for k in range(count):
                hit = ii[:, k:k + 1] == pos
                a[k & 3] = jnp.where(hit, vv[:, k:k + 1], a[k & 3])
            return tuple(a)

        def chunk_body(s, accs):
            return scatter_block(idx_s[s], vals_s[s], accs, LANE)

        accs = lax.fori_loop(0, n_full, chunk_body,
                             (zeros, zeros, zeros, zeros))
        if n_tail:                                         # last partial chunk
            accs = scatter_block(idx_s[n_full], vals_s[n_full], accs, n_tail)

        # Merge the 4 independent chains.  Unique indices => exactly one chain
        # holds each written position (others are 0), so a sum is exact.
        o_ref[...] = (accs[0] + accs[1]) + (accs[2] + accs[3])


# ----------------------------- wrapper --------------------------------------


def model_forward(x1_indices, x2, w, b, min_value=0.2, max_value=5.0):
    """x1_indices: (N, Cout, Ho, Wo) float unpool indices; x2: (N, Cin, H, W)."""
    n, cin, h, wd = x2.shape
    cout = w.shape[1]
    ho, wo = h - 2, wd - 2
    p = ho * wo
    p_pad = ((p + LANE - 1) // LANE) * LANE                # lane-dense last dim
    n_chunks = p_pad // LANE

    # Minimal layout plumbing: crop the 1-px border, flatten spatial onto the
    # lane axis, pad lanes to a multiple of 128.  Pad values are irrelevant
    # (masked / never swept / cropped); no float->int cast here (done in-kernel).
    x_t = jnp.pad(x2[:, :, 1:h - 1, 1:wd - 1].reshape(n, cin, p),
                  ((0, 0), (0, 0), (0, p_pad - p)))
    idx = jnp.pad(jnp.asarray(x1_indices, jnp.float32).reshape(n, cout, p),
                  ((0, 0), (0, 0), (0, p_pad - p)))
    w_t = jnp.transpose(w)                                 # (Cout, Cin)
    b_col = b.reshape(cout, 1)

    kern = functools.partial(fused_kernel, n_src=p, n_chunks=n_chunks,
                             min_value=min_value, max_value=max_value)
    # NOTE: input blocks are intentionally whole-array (full padded spatial
    # axis) -- tiny working set, lane-dense output, do not shrink / Buffered().
    out = pl.pallas_call(
        kern,
        grid=(n, n_chunks),
        in_specs=[
            pl.BlockSpec((None, cin, p_pad), lambda i, l: (i, 0, 0)),   # x
            pl.BlockSpec((cout, cin), lambda i, l: (0, 0)),             # w^T
            pl.BlockSpec((cout, 1), lambda i, l: (0, 0)),               # bias
            pl.BlockSpec((None, cout, p_pad), lambda i, l: (i, 0, 0)),  # indices
        ],
        out_specs=pl.BlockSpec((None, cout, LANE), lambda i, l: (i, 0, l)),
        out_shape=jax.ShapeDtypeStruct((n, cout, p_pad), jnp.float32),
        scratch_shapes=[
            pltpu.VMEM((n_chunks, cout, LANE), jnp.float32),   # staged conv
            pltpu.VMEM((n_chunks, cout, LANE), jnp.int32),     # staged indices
        ],
        compiler_params=pltpu.CompilerParams(
            dimension_semantics=("parallel", "parallel")),
    )(x_t, w_t, b_col, idx)

    return out[:, :, :p].reshape(n, cout, ho, wo)


# ----------------------------- main ------------------------------------------

if __name__ == "__main__":
    key = jax.random.PRNGKey(0)
    k_x2, k_w, k_b, k_perm = jax.random.split(key, 4)

    N, CIN, COUT, H, W = 2, 9, 10, 16, 16
    HO, WO = H - 2, W - 2
    P = HO * WO                                            # 196 -> pad 256

    x2 = jax.random.normal(k_x2, (N, CIN, H, W), dtype=jnp.float32)
    # ConvTranspose2d(9, 10, 1) parameters: weight (Cin, Cout), bias (Cout,)
    w = jax.random.normal(k_w, (CIN, COUT), dtype=jnp.float32) / jnp.sqrt(CIN)
    b = jax.random.normal(k_b, (COUT,), dtype=jnp.float32) * 0.1

    fwd = jax.jit(model_forward)

    # pure-JAX reference: conv + clamp, then scatter-based unpool
    xc = x2[:, :, 1:-1, 1:-1]
    ref_clamped = jnp.clip(
        jnp.einsum("nchw,co->nohw", xc, w) + b[None, :, None, None], 0.2, 5.0)

    def ref_unpool(vals, idx_int):
        v = vals.reshape(N, COUT, P)
        ii = idx_int.reshape(N, COUT, P)
        nn = jnp.arange(N)[:, None, None]
        cc = jnp.arange(COUT)[None, :, None]
        out = jnp.zeros((N, COUT, P), jnp.float32).at[nn, cc, ii].set(v)
        return out.reshape(N, COUT, HO, WO)

    # case 1: identity indices (what MaxPool2d(1,1, return_indices=True) gives)
    # -> exercises the in-kernel fast path
    idx_id = jnp.broadcast_to(
        jnp.arange(P, dtype=jnp.float32).reshape(1, 1, HO, WO),
        (N, COUT, HO, WO))
    out1 = jax.block_until_ready(fwd(idx_id, x2, w, b))
    assert out1.shape == (N, COUT, HO, WO)
    assert jnp.allclose(out1, ref_unpool(ref_clamped, idx_id.astype(jnp.int32)),
                        atol=1e-5, rtol=1e-5)

    # case 2: per-(n, c) shuffled indices exercise the general scatter sweep
    # (fori_loop chunk + static tail + 4-way accumulators)
    perms = jax.vmap(lambda kk: jax.random.permutation(kk, P))(
        jax.random.split(k_perm, N * COUT))
    idx_sh = perms.reshape(N, COUT, HO, WO).astype(jnp.float32)
    out2 = jax.block_until_ready(fwd(idx_sh, x2, w, b))
    assert jnp.allclose(out2, ref_unpool(ref_clamped, idx_sh.astype(jnp.int32)),
                        atol=1e-5, rtol=1e-5)

    print("KERNEL_OK")
</pallas_src>

<mosaic_0001>
module attributes {stable_mosaic.version = 11 : i64} {
  func.func @fused_kernel(%arg0: i32, %arg1: i32, %arg2: memref<1x9x256xf32, #tpu.memory_space<vmem>>, %arg3: memref<10x9xf32, #tpu.memory_space<vmem>>, %arg4: memref<10x1xf32, #tpu.memory_space<vmem>>, %arg5: memref<1x10x256xf32, #tpu.memory_space<vmem>>, %arg6: memref<1x10x128xf32, #tpu.memory_space<vmem>>, %arg7: memref<2x10x128xf32, #tpu.memory_space<vmem>>, %arg8: memref<2x10x128xi32, #tpu.memory_space<vmem>>) attributes {dimension_semantics = [#tpu.dimension_semantics<parallel>, #tpu.dimension_semantics<parallel>], iteration_bounds = array<i64: 2, 2>, scalar_prefetch = 0 : i64, scratch_operands = 2 : i64, tpu.core_type = #tpu.core_type<tc>, window_params = [{transform_indices = @transform_0, window_bounds = array<i64: 1, 9, 256>}, {pipeline_mode = #tpu.pipeline_mode<synchronous>, transform_indices = @transform_1, window_bounds = array<i64: 10, 9>}, {pipeline_mode = #tpu.pipeline_mode<synchronous>, transform_indices = @transform_2, window_bounds = array<i64: 10, 1>}, {transform_indices = @transform_3, window_bounds = array<i64: 1, 10, 256>}, {transform_indices = @transform_4, window_bounds = array<i64: 1, 10, 128>}]} {
    %c0 = arith.constant 0 : index
    %c0_0 = arith.constant 0 : index
    %c0_1 = arith.constant 0 : index
    %0 = vector.load %arg2[%c0, %c0_0, %c0_1] : memref<1x9x256xf32, #tpu.memory_space<vmem>>, vector<1x9x256xf32>
    %1 = vector.shape_cast %0 : vector<1x9x256xf32> to vector<9x256xf32>
    %c0_2 = arith.constant 0 : index
    %c0_3 = arith.constant 0 : index
    %2 = vector.load %arg3[%c0_2, %c0_3] : memref<10x9xf32, #tpu.memory_space<vmem>>, vector<10x9xf32>
    %c0_4 = arith.constant 0 : index
    %c0_5 = arith.constant 0 : index
    %3 = vector.load %arg4[%c0_4, %c0_5] : memref<10x1xf32, #tpu.memory_space<vmem>>, vector<10x1xf32>
    %4 = vector.extract_strided_slice %2 {offsets = [0, 0], sizes = [10, 1], strides = [1, 1]} : vector<10x9xf32> to vector<10x1xf32>
    %5 = vector.extract_strided_slice %2 {offsets = [0, 1], sizes = [10, 1], strides = [1, 1]} : vector<10x9xf32> to vector<10x1xf32>
    %6 = vector.extract_strided_slice %2 {offsets = [0, 2], sizes = [10, 1], strides = [1, 1]} : vector<10x9xf32> to vector<10x1xf32>
    %7 = vector.extract_strided_slice %2 {offsets = [0, 3], sizes = [10, 1], strides = [1, 1]} : vector<10x9xf32> to vector<10x1xf32>
    %8 = vector.extract_strided_slice %2 {offsets = [0, 4], sizes = [10, 1], strides = [1, 1]} : vector<10x9xf32> to vector<10x1xf32>
    %9 = vector.extract_strided_slice %2 {offsets = [0, 5], sizes = [10, 1], strides = [1, 1]} : vector<10x9xf32> to vector<10x1xf32>
    %10 = vector.extract_strided_slice %2 {offsets = [0, 6], sizes = [10, 1], strides = [1, 1]} : vector<10x9xf32> to vector<10x1xf32>
    %11 = vector.extract_strided_slice %2 {offsets = [0, 7], sizes = [10, 1], strides = [1, 1]} : vector<10x9xf32> to vector<10x1xf32>
    %12 = vector.extract_strided_slice %2 {offsets = [0, 8], sizes = [10, 1], strides = [1, 1]} : vector<10x9xf32> to vector<10x1xf32>
    %13 = vector.shape_cast %3 : vector<10x1xf32> to vector<10x1xf32>
    %14 = vector.broadcast %13 : vector<10x1xf32> to vector<10x256xf32>
    %15 = vector.extract_strided_slice %1 {offsets = [0, 0], sizes = [1, 256], strides = [1, 1]} : vector<9x256xf32> to vector<1x256xf32>
    %16 = vector.broadcast %4 : vector<10x1xf32> to vector<10x256xf32>
    %17 = vector.broadcast %15 : vector<1x256xf32> to vector<10x256xf32>
    %18 = arith.mulf %16, %17 : vector<10x256xf32>
    %19 = arith.addf %14, %18 : vector<10x256xf32>
    %20 = vector.extract_strided_slice %1 {offsets = [1, 0], sizes = [1, 256], strides = [1, 1]} : vector<9x256xf32> to vector<1x256xf32>
    %21 = vector.broadcast %5 : vector<10x1xf32> to vector<10x256xf32>
    %22 = vector.broadcast %20 : vector<1x256xf32> to vector<10x256xf32>
    %23 = arith.mulf %21, %22 : vector<10x256xf32>
    %24 = arith.addf %19, %23 : vector<10x256xf32>
    %25 = vector.extract_strided_slice %1 {offsets = [2, 0], sizes = [1, 256], strides = [1, 1]} : vector<9x256xf32> to vector<1x256xf32>
    %26 = vector.broadcast %6 : vector<10x1xf32> to vector<10x256xf32>
    %27 = vector.broadcast %25 : vector<1x256xf32> to vector<10x256xf32>
    %28 = arith.mulf %26, %27 : vector<10x256xf32>
    %29 = arith.addf %24, %28 : vector<10x256xf32>
    %30 = vector.extract_strided_slice %1 {offsets = [3, 0], sizes = [1, 256], strides = [1, 1]} : vector<9x256xf32> to vector<1x256xf32>
    %31 = vector.broadcast %7 : vector<10x1xf32> to vector<10x256xf32>
    %32 = vector.broadcast %30 : vector<1x256xf32> to vector<10x256xf32>
    %33 = arith.mulf %31, %32 : vector<10x256xf32>
    %34 = arith.addf %29, %33 : vector<10x256xf32>
    %35 = vector.extract_strided_slice %1 {offsets = [4, 0], sizes = [1, 256], strides = [1, 1]} : vector<9x256xf32> to vector<1x256xf32>
    %36 = vector.broadcast %8 : vector<10x1xf32> to vector<10x256xf32>
    %37 = vector.broadcast %35 : vector<1x256xf32> to vector<10x256xf32>
    %38 = arith.mulf %36, %37 : vector<10x256xf32>
    %39 = arith.addf %34, %38 : vector<10x256xf32>
    %40 = vector.extract_strided_slice %1 {offsets = [5, 0], sizes = [1, 256], strides = [1, 1]} : vector<9x256xf32> to vector<1x256xf32>
    %41 = vector.broadcast %9 : vector<10x1xf32> to vector<10x256xf32>
    %42 = vector.broadcast %40 : vector<1x256xf32> to vector<10x256xf32>
    %43 = arith.mulf %41, %42 : vector<10x256xf32>
    %44 = arith.addf %39, %43 : vector<10x256xf32>
    %45 = vector.extract_strided_slice %1 {offsets = [6, 0], sizes = [1, 256], strides = [1, 1]} : vector<9x256xf32> to vector<1x256xf32>
    %46 = vector.broadcast %10 : vector<10x1xf32> to vector<10x256xf32>
    %47 = vector.broadcast %45 : vector<1x256xf32> to vector<10x256xf32>
    %48 = arith.mulf %46, %47 : vector<10x256xf32>
    %49 = arith.addf %44, %48 : vector<10x256xf32>
    %50 = vector.extract_strided_slice %1 {offsets = [7, 0], sizes = [1, 256], strides = [1, 1]} : vector<9x256xf32> to vector<1x256xf32>
    %51 = vector.broadcast %11 : vector<10x1xf32> to vector<10x256xf32>
    %52 = vector.broadcast %50 : vector<1x256xf32> to vector<10x256xf32>
    %53 = arith.mulf %51, %52 : vector<10x256xf32>
    %54 = arith.addf %49, %53 : vector<10x256xf32>
    %55 = vector.extract_strided_slice %1 {offsets = [8, 0], sizes = [1, 256], strides = [1, 1]} : vector<9x256xf32> to vector<1x256xf32>
    %56 = vector.broadcast %12 : vector<10x1xf32> to vector<10x256xf32>
    %57 = vector.broadcast %55 : vector<1x256xf32> to vector<10x256xf32>
    %58 = arith.mulf %56, %57 : vector<10x256xf32>
    %59 = arith.addf %54, %58 : vector<10x256xf32>
    %cst = arith.constant 2.000000e-01 : f32
    %60 = vector.broadcast %cst : f32 to vector<10x256xf32>
    %61 = arith.maximumf %59, %60 : vector<10x256xf32>
    %cst_6 = arith.constant 5.000000e+00 : f32
    %62 = vector.broadcast %cst_6 : f32 to vector<10x256xf32>
    %63 = arith.minimumf %61, %62 : vector<10x256xf32>
    %64 = vector.extract_strided_slice %63 {offsets = [0, 0], sizes = [10, 128], strides = [1, 1]} : vector<10x256xf32> to vector<10x128xf32>
    %c0_7 = arith.constant 0 : index
    %c0_8 = arith.constant 0 : index
    %c0_9 = arith.constant 0 : index
    %65 = vector.load %arg7[%c0_7, %c0_8, %c0_9] : memref<2x10x128xf32, #tpu.memory_space<vmem>>, vector<1x10x128xf32>
    %66 = vector.shape_cast %65 : vector<1x10x128xf32> to vector<10x128xf32>
    %67 = vector.shape_cast %64 : vector<10x128xf32> to vector<1x10x128xf32>
    tpu.vector_store %arg7[%c0_7, %c0_8, %c0_9], %67 {strides = array<i32>} : memref<2x10x128xf32, #tpu.memory_space<vmem>>, vector<1x10x128xf32>,
    %68 = vector.extract_strided_slice %63 {offsets = [0, 128], sizes = [10, 128], strides = [1, 1]} : vector<10x256xf32> to vector<10x128xf32>
    %c1 = arith.constant 1 : index
    %c0_10 = arith.constant 0 : index
    %c0_11 = arith.constant 0 : index
    %69 = vector.load %arg7[%c1, %c0_10, %c0_11] : memref<2x10x128xf32, #tpu.memory_space<vmem>>, vector<1x10x128xf32>
    %70 = vector.shape_cast %69 : vector<1x10x128xf32> to vector<10x128xf32>
    %71 = vector.shape_cast %68 : vector<10x128xf32> to vector<1x10x128xf32>
    tpu.vector_store %arg7[%c1, %c0_10, %c0_11], %71 {strides = array<i32>} : memref<2x10x128xf32, #tpu.memory_space<vmem>>, vector<1x10x128xf32>,
    %c0_12 = arith.constant 0 : index
    %c0_13 = arith.constant 0 : index
    %c0_14 = arith.constant 0 : index
    %72 = vector.load %arg5[%c0_12, %c0_13, %c0_14] : memref<1x10x256xf32, #tpu.memory_space<vmem>>, vector<1x10x256xf32>
    %73 = vector.shape_cast %72 : vector<1x10x256xf32> to vector<10x256xf32>
    %74 = arith.fptosi %73 : vector<10x256xf32> to vector<10x256xi32>
    %c128_i32 = arith.constant 128 : i32
    %75 = arith.muli %arg1, %c128_i32 : i32
    %76 = tpu.iota {dimensions = array<i32: 1>} : vector<10x128xi32>
    %77 = vector.broadcast %75 : i32 to vector<10x128xi32>
    %78 = arith.addi %77, %76 : vector<10x128xi32>
    %79 = tpu.iota {dimensions = array<i32: 1>} : vector<10x256xi32>
    %c196_i32 = arith.constant 196 : i32
    %80 = vector.broadcast %c196_i32 : i32 to vector<10x256xi32>
    %81 = arith.cmpi slt, %79, %80 : vector<10x256xi32>
    %82 = arith.cmpi ne, %74, %79 : vector<10x256xi32>
    %83 = arith.andi %81, %82 : vector<10x256xi1>
    %c1_i32 = arith.constant 1 : i32
    %c0_i32 = arith.constant 0 : i32
    %84 = vector.broadcast %c1_i32 : i32 to vector<10x256xi32>
    %85 = vector.broadcast %c0_i32 : i32 to vector<10x256xi32>
    %86 = arith.select %83, %84, %85 : vector<10x256xi1>, vector<10x256xi32>
    %87 = vector.shape_cast %86 : vector<10x256xi32> to vector<1x10x256xi32>
    %cst_15 = arith.constant dense<0> : vector<1xi32>
    %88 = vector.multi_reduction <add>, %87, %cst_15 [1, 2] : vector<1x10x256xi32> to vector<1xi32>
    %89 = vector.shape_cast %88 : vector<1xi32> to vector<1x1x1xi32>
    %90 = vector.extract %89[0, 0, 0] : i32 from vector<1x1x1xi32>
    %c0_i32_16 = arith.constant 0 : i32
    %91 = arith.cmpi eq, %90, %c0_i32_16 : i32
    %92 = arith.extui %91 : i1 to i32
    %c0_i32_17 = arith.constant 0 : i32
    %93 = arith.cmpi ne, %92, %c0_i32_17 : i32
    scf.if %93 {
      %97 = arith.index_cast %arg1 : i32 to index
      %c0_19 = arith.constant 0 : index
      %c0_20 = arith.constant 0 : index
      %98 = vector.load %arg7[%97, %c0_19, %c0_20] : memref<2x10x128xf32, #tpu.memory_space<vmem>>, vector<1x10x128xf32>
      %99 = vector.shape_cast %98 : vector<1x10x128xf32> to vector<10x128xf32>
      %c196_i32_21 = arith.constant 196 : i32
      %100 = vector.broadcast %c196_i32_21 : i32 to vector<10x128xi32>
      %101 = arith.cmpi slt, %78, %100 : vector<10x128xi32>
      %cst_22 = arith.constant 0.000000e+00 : f32
      %102 = vector.broadcast %cst_22 : f32 to vector<10x128xf32>
      %103 = arith.select %101, %99, %102 : vector<10x128xi1>, vector<10x128xf32>
      %c0_23 = arith.constant 0 : index
      %c0_24 = arith.constant 0 : index
      %c0_25 = arith.constant 0 : index
      %104 = vector.load %arg6[%c0_23, %c0_24, %c0_25] : memref<1x10x128xf32, #tpu.memory_space<vmem>>, vector<1x10x128xf32>
      %105 = vector.shape_cast %104 : vector<1x10x128xf32> to vector<10x128xf32>
      %106 = vector.shape_cast %103 : vector<10x128xf32> to vector<1x10x128xf32>
      tpu.vector_store %arg6[%c0_23, %c0_24, %c0_25], %106 {strides = array<i32>} : memref<1x10x128xf32, #tpu.memory_space<vmem>>, vector<1x10x128xf32>,
    } else {
    }
    %true = arith.constant true
    %94 = arith.xori %91, %true : i1
    %95 = arith.extui %94 : i1 to i32
    %c0_i32_18 = arith.constant 0 : i32
    %96 = arith.cmpi ne, %95, %c0_i32_18 : i32
    scf.if %96 {
      %97 = vector.extract_strided_slice %74 {offsets = [0, 0], sizes = [10, 128], strides = [1, 1]} : vector<10x256xi32> to vector<10x128xi32>
      %c0_19 = arith.constant 0 : index
      %c0_20 = arith.constant 0 : index
      %c0_21 = arith.constant 0 : index
      %98 = vector.load %arg8[%c0_19, %c0_20, %c0_21] : memref<2x10x128xi32, #tpu.memory_space<vmem>>, vector<1x10x128xi32>
      %99 = vector.shape_cast %98 : vector<1x10x128xi32> to vector<10x128xi32>
      %100 = vector.shape_cast %97 : vector<10x128xi32> to vector<1x10x128xi32>
      tpu.vector_store %arg8[%c0_19, %c0_20, %c0_21], %100 {strides = array<i32>} : memref<2x10x128xi32, #tpu.memory_space<vmem>>, vector<1x10x128xi32>,
      %101 = vector.extract_strided_slice %74 {offsets = [0, 128], sizes = [10, 128], strides = [1, 1]} : vector<10x256xi32> to vector<10x128xi32>
      %c1_22 = arith.constant 1 : index
      %c0_23 = arith.constant 0 : index
      %c0_24 = arith.constant 0 : index
      %102 = vector.load %arg8[%c1_22, %c0_23, %c0_24] : memref<2x10x128xi32, #tpu.memory_space<vmem>>, vector<1x10x128xi32>
      %103 = vector.shape_cast %102 : vector<1x10x128xi32> to vector<10x128xi32>
      %104 = vector.shape_cast %101 : vector<10x128xi32> to vector<1x10x128xi32>
      tpu.vector_store %arg8[%c1_22, %c0_23, %c0_24], %104 {strides = array<i32>} : memref<2x10x128xi32, #tpu.memory_space<vmem>>, vector<1x10x128xi32>,
      %cst_25 = arith.constant 0.000000e+00 : f32
      %105 = vector.broadcast %cst_25 : f32 to vector<10x128xf32>
      %c0_i32_26 = arith.constant 0 : i32
      %106 = arith.index_cast %c0_i32_26 : i32 to index
      %c0_27 = arith.constant 0 : index
      %c0_28 = arith.constant 0 : index
      %107 = vector.load %arg8[%106, %c0_27, %c0_28] : memref<2x10x128xi32, #tpu.memory_space<vmem>>, vector<1x10x128xi32>
      %108 = vector.shape_cast %107 : vector<1x10x128xi32> to vector<10x128xi32>
      %109 = arith.index_cast %c0_i32_26 : i32 to index
      %c0_29 = arith.constant 0 : index
      %c0_30 = arith.constant 0 : index
      %110 = vector.load %arg7[%109, %c0_29, %c0_30] : memref<2x10x128xf32, #tpu.memory_space<vmem>>, vector<1x10x128xf32>
      %111 = vector.shape_cast %110 : vector<1x10x128xf32> to vector<10x128xf32>
      %112 = vector.extract_strided_slice %108 {offsets = [0, 0], sizes = [10, 1], strides = [1, 1]} : vector<10x128xi32> to vector<10x1xi32>
      %113 = vector.broadcast %112 : vector<10x1xi32> to vector<10x128xi32>
      %114 = arith.cmpi eq, %113, %78 : vector<10x128xi32>
      %115 = vector.extract_strided_slice %111 {offsets = [0, 0], sizes = [10, 1], strides = [1, 1]} : vector<10x128xf32> to vector<10x1xf32>
      %116 = vector.shape_cast %115 : vector<10x1xf32> to vector<10x1xf32>
      %117 = vector.broadcast %116 : vector<10x1xf32> to vector<10x128xf32>
      %118 = arith.select %114, %117, %105 : vector<10x128xi1>, vector<10x128xf32>
      %119 = vector.extract_strided_slice %108 {offsets = [0, 1], sizes = [10, 1], strides = [1, 1]} : vector<10x128xi32> to vector<10x1xi32>
      %120 = vector.broadcast %119 : vector<10x1xi32> to vector<10x128xi32>
      %121 = arith.cmpi eq, %120, %78 : vector<10x128xi32>
      %122 = vector.extract_strided_slice %111 {offsets = [0, 1], sizes = [10, 1], strides = [1, 1]} : vector<10x128xf32> to vector<10x1xf32>
      %123 = vector.shape_cast %122 : vector<10x1xf32> to vector<10x1xf32>
      %124 = vector.broadcast %123 : vector<10x1xf32> to vector<10x128xf32>
      %125 = arith.select %121, %124, %105 : vector<10x128xi1>, vector<10x128xf32>
      %126 = vector.extract_strided_slice %108 {offsets = [0, 2], sizes = [10, 1], strides = [1, 1]} : vector<10x128xi32> to vector<10x1xi32>
      %127 = vector.broadcast %126 : vector<10x1xi32> to vector<10x128xi32>
      %128 = arith.cmpi eq, %127, %78 : vector<10x128xi32>
      %129 = vector.extract_strided_slice %111 {offsets = [0, 2], sizes = [10, 1], strides = [1, 1]} : vector<10x128xf32> to vector<10x1xf32>
      %130 = vector.shape_cast %129 : vector<10x1xf32> to vector<10x1xf32>
      %131 = vector.broadcast %130 : vector<10x1xf32> to vector<10x128xf32>
      %132 = arith.select %128, %131, %105 : vector<10x128xi1>, vector<10x128xf32>
      %133 = vector.extract_strided_slice %108 {offsets = [0, 3], sizes = [10, 1], strides = [1, 1]} : vector<10x128xi32> to vector<10x1xi32>
      %134 = vector.broadcast %133 : vector<10x1xi32> to vector<10x128xi32>
      %135 = arith.cmpi eq, %134, %78 : vector<10x128xi32>
      %136 = vector.extract_strided_slice %111 {offsets = [0, 3], sizes = [10, 1], strides = [1, 1]} : vector<10x128xf32> to vector<10x1xf32>
      %137 = vector.shape_cast %136 : vector<10x1xf32> to vector<10x1xf32>
      %138 = vector.broadcast %137 : vector<10x1xf32> to vector<10x128xf32>
      %139 = arith.select %135, %138, %105 : vector<10x128xi1>, vector<10x128xf32>
      %140 = vector.extract_strided_slice %108 {offsets = [0, 4], sizes = [10, 1], strides = [1, 1]} : vector<10x128xi32> to vector<10x1xi32>
      %141 = vector.broadcast %140 : vector<10x1xi32> to vector<10x128xi32>
      %142 = arith.cmpi eq, %141, %78 : vector<10x128xi32>
      %143 = vector.extract_strided_slice %111 {offsets = [0, 4], sizes = [10, 1], strides = [1, 1]} : vector<10x128xf32> to vector<10x1xf32>
      %144 = vector.shape_cast %143 : vector<10x1xf32> to vector<10x1xf32>
      %145 = vector.broadcast %144 : vector<10x1xf32> to vector<10x128xf32>
      %146 = arith.select %142, %145, %118 : vector<10x128xi1>, vector<10x128xf32>
      %147 = vector.extract_strided_slice %108 {offsets = [0, 5], sizes = [10, 1], strides = [1, 1]} : vector<10x128xi32> to vector<10x1xi32>
      %148 = vector.broadcast %147 : vector<10x1xi32> to vector<10x128xi32>
      %149 = arith.cmpi eq, %148, %78 : vector<10x128xi32>
      %150 = vector.extract_strided_slice %111 {offsets = [0, 5], sizes = [10, 1], strides = [1, 1]} : vector<10x128xf32> to vector<10x1xf32>
      %151 = vector.shape_cast %150 : vector<10x1xf32> to vector<10x1xf32>
      %152 = vector.broadcast %151 : vector<10x1xf32> to vector<10x128xf32>
      %153 = arith.select %149, %152, %125 : vector<10x128xi1>, vector<10x128xf32>
      %154 = vector.extract_strided_slice %108 {offsets = [0, 6], sizes = [10, 1], strides = [1, 1]} : vector<10x128xi32> to vector<10x1xi32>
      %155 = vector.broadcast %154 : vector<10x1xi32> to vector<10x128xi32>
      %156 = arith.cmpi eq, %155, %78 : vector<10x128xi32>
      %157 = vector.extract_strided_slice %111 {offsets = [0, 6], sizes = [10, 1], strides = [1, 1]} : vector<10x128xf32> to vector<10x1xf32>
      %158 = vector.shape_cast %157 : vector<10x1xf32> to vector<10x1xf32>
      %159 = vector.broadcast %158 : vector<10x1xf32> to vector<10x128xf32>
      %160 = arith.select %156, %159, %132 : vector<10x128xi1>, vector<10x128xf32>
      %161 = vector.extract_strided_slice %108 {offsets = [0, 7], sizes = [10, 1], strides = [1, 1]} : vector<10x128xi32> to vector<10x1xi32>
      %162 = vector.broadcast %161 : vector<10x1xi32> to vector<10x128xi32>
      %163 = arith.cmpi eq, %162, %78 : vector<10x128xi32>
      %164 = vector.extract_strided_slice %111 {offsets = [0, 7], sizes = [10, 1], strides = [1, 1]} : vector<10x128xf32> to vector<10x1xf32>
      %165 = vector.shape_cast %164 : vector<10x1xf32> to vector<10x1xf32>
      %166 = vector.broadcast %165 : vector<10x1xf32> to vector<10x128xf32>
      %167 = arith.select %163, %166, %139 : vector<10x128xi1>, vector<10x128xf32>
      %168 = vector.extract_strided_slice %108 {offsets = [0, 8], sizes = [10, 1], strides = [1, 1]} : vector<10x128xi32> to vector<10x1xi32>
      %169 = vector.broadcast %168 : vector<10x1xi32> to vector<10x128xi32>
      %170 = arith.cmpi eq, %169, %78 : vector<10x128xi32>
      %171 = vector.extract_strided_slice %111 {offsets = [0, 8], sizes = [10, 1], strides = [1, 1]} : vector<10x128xf32> to vector<10x1xf32>
      %172 = vector.shape_cast %171 : vector<10x1xf32> to vector<10x1xf32>
      %173 = vector.broadcast %172 : vector<10x1xf32> to vector<10x128xf32>
      %174 = arith.select %170, %173, %146 : vector<10x128xi1>, vector<10x128xf32>
      %175 = vector.extract_strided_slice %108 {offsets = [0, 9], sizes = [10, 1], strides = [1, 1]} : vector<10x128xi32> to vector<10x1xi32>
      %176 = vector.broadcast %175 : vector<10x1xi32> to vector<10x128xi32>
      %177 = arith.cmpi eq, %176, %78 : vector<10x128xi32>
      %178 = vector.extract_strided_slice %111 {offsets = [0, 9], sizes = [10, 1], strides = [1, 1]} : vector<10x128xf32> to vector<10x1xf32>
      %179 = vector.shape_cast %178 : vector<10x1xf32> to vector<10x1xf32>
      %180 = vector.broadcast %179 : vector<10x1xf32> to vector<10x128xf32>
      %181 = arith.select %177, %180, %153 : vector<10x128xi1>, vector<10x128xf32>
      %182 = vector.extract_strided_slice %108 {offsets = [0, 10], sizes = [10, 1], strides = [1, 1]} : vector<10x128xi32> to vector<10x1xi32>
      %183 = vector.broadcast %182 : vector<10x1xi32> to vector<10x128xi32>
      %184 = arith.cmpi eq, %183, %78 : vector<10x128xi32>
      %185 = vector.extract_strided_slice %111 {offsets = [0, 10], sizes = [10, 1], strides = [1, 1]} : vector<10x128xf32> to vector<10x1xf32>
      %186 = vector.shape_cast %185 : vector<10x1xf32> to vector<10x1xf32>
      %187 = vector.broadcast %186 : vector<10x1xf32> to vector<10x128xf32>
      %188 = arith.select %184, %187, %160 : vector<10x128xi1>, vector<10x128xf32>
      %189 = vector.extract_strided_slice %108 {offsets = [0, 11], sizes = [10, 1], strides = [1, 1]} : vector<10x128xi32> to vector<10x1xi32>
      %190 = vector.broadcast %189 : vector<10x1xi32> to vector<10x128xi32>
      %191 = arith.cmpi eq, %190, %78 : vector<10x128xi32>
      %192 = vector.extract_strided_slice %111 {offsets = [0, 11], sizes = [10, 1], strides = [1, 1]} : vector<10x128xf32> to vector<10x1xf32>
      %193 = vector.shape_cast %192 : vector<10x1xf32> to vector<10x1xf32>
      %194 = vector.broadcast %193 : vector<10x1xf32> to vector<10x128xf32>
      %195 = arith.select %191, %194, %167 : vector<10x128xi1>, vector<10x128xf32>
      %196 = vector.extract_strided_slice %108 {offsets = [0, 12], sizes = [10, 1], strides = [1, 1]} : vector<10x128xi32> to vector<10x1xi32>
      %197 = vector.broadcast %196 : vector<10x1xi32> to vector<10x128xi32>
      %198 = arith.cmpi eq, %197, %78 : vector<10x128xi32>
      %199 = vector.extract_strided_slice %111 {offsets = [0, 12], sizes = [10, 1], strides = [1, 1]} : vector<10x128xf32> to vector<10x1xf32>
      %200 = vector.shape_cast %199 : vector<10x1xf32> to vector<10x1xf32>
      %201 = vector.broadcast %200 : vector<10x1xf32> to vector<10x128xf32>
      %202 = arith.select %198, %201, %174 : vector<10x128xi1>, vector<10x128xf32>
      %203 = vector.extract_strided_slice %108 {offsets = [0, 13], sizes = [10, 1], strides = [1, 1]} : vector<10x128xi32> to vector<10x1xi32>
      %204 = vector.broadcast %203 : vector<10x1xi32> to vector<10x128xi32>
      %205 = arith.cmpi eq, %204, %78 : vector<10x128xi32>
      %206 = vector.extract_strided_slice %111 {offsets = [0, 13], sizes = [10, 1], strides = [1, 1]} : vector<10x128xf32> to vector<10x1xf32>
      %207 = vector.shape_cast %206 : vector<10x1xf32> to vector<10x1xf32>
      %208 = vector.broadcast %207 : vector<10x1xf32> to vector<10x128xf32>
      %209 = arith.select %205, %208, %181 : vector<10x128xi1>, vector<10x128xf32>
      %210 = vector.extract_strided_slice %108 {offsets = [0, 14], sizes = [10, 1], strides = [1, 1]} : vector<10x128xi32> to vector<10x1xi32>
      %211 = vector.broadcast %210 : vector<10x1xi32> to vector<10x128xi32>
      %212 = arith.cmpi eq, %211, %78 : vector<10x128xi32>
      %213 = vector.extract_strided_slice %111 {offsets = [0, 14], sizes = [10, 1], strides = [1, 1]} : vector<10x128xf32> to vector<10x1xf32>
      %214 = vector.shape_cast %213 : vector<10x1xf32> to vector<10x1xf32>
      %215 = vector.broadcast %214 : vector<10x1xf32> to vector<10x128xf32>
      %216 = arith.select %212, %215, %188 : vector<10x128xi1>, vector<10x128xf32>
      %217 = vector.extract_strided_slice %108 {offsets = [0, 15], sizes = [10, 1], strides = [1, 1]} : vector<10x128xi32> to vector<10x1xi32>
      %218 = vector.broadcast %217 : vector<10x1xi32> to vector<10x128xi32>
      %219 = arith.cmpi eq, %218, %78 : vector<10x128xi32>
      %220 = vector.extract_strided_slice %111 {offsets = [0, 15], sizes = [10, 1], strides = [1, 1]} : vector<10x128xf32> to vector<10x1xf32>
      %221 = vector.shape_cast %220 : vector<10x1xf32> to vector<10x1xf32>
      %222 = vector.broadcast %221 : vector<10x1xf32> to vector<10x128xf32>
      %223 = arith.select %219, %222, %195 : vector<10x128xi1>, vector<10x128xf32>
      %224 = vector.extract_strided_slice %108 {offsets = [0, 16], sizes = [10, 1], strides = [1, 1]} : vector<10x128xi32> to vector<10x1xi32>
      %225 = vector.broadcast %224 : vector<10x1xi32> to vector<10x128xi32>
      %226 = arith.cmpi eq, %225, %78 : vector<10x128xi32>
      %227 = vector.extract_strided_slice %111 {offsets = [0, 16], sizes = [10, 1], strides = [1, 1]} : vector<10x128xf32> to vector<10x1xf32>
      %228 = vector.shape_cast %227 : vector<10x1xf32> to vector<10x1xf32>
      %229 = vector.broadcast %228 : vector<10x1xf32> to vector<10x128xf32>
      %230 = arith.select %226, %229, %202 : vector<10x128xi1>, vector<10x128xf32>
      %231 = vector.extract_strided_slice %108 {offsets = [0, 17], sizes = [10, 1], strides = [1, 1]} : vector<10x128xi32> to vector<10x1xi32>
      %232 = vector.broadcast %231 : vector<10x1xi32> to vector<10x128xi32>
      %233 = arith.cmpi eq, %232, %78 : vector<10x128xi32>
      %234 = vector.extract_strided_slice %111 {offsets = [0, 17], sizes = [10, 1], strides = [1, 1]} : vector<10x128xf32> to vector<10x1xf32>
      %235 = vector.shape_cast %234 : vector<10x1xf32> to vector<10x1xf32>
      %236 = vector.broadcast %235 : vector<10x1xf32> to vector<10x128xf32>
      %237 = arith.select %233, %236, %209 : vector<10x128xi1>, vector<10x128xf32>
      %238 = vector.extract_strided_slice %108 {offsets = [0, 18], sizes = [10, 1], strides = [1, 1]} : vector<10x128xi32> to vector<10x1xi32>
      %239 = vector.broadcast %238 : vector<10x1xi32> to vector<10x128xi32>
      %240 = arith.cmpi eq, %239, %78 : vector<10x128xi32>
      %241 = vector.extract_strided_slice %111 {offsets = [0, 18], sizes = [10, 1], strides = [1, 1]} : vector<10x128xf32> to vector<10x1xf32>
      %242 = vector.shape_cast %241 : vector<10x1xf32> to vector<10x1xf32>
      %243 = vector.broadcast %242 : vector<10x1xf32> to vector<10x128xf32>
      %244 = arith.select %240, %243, %216 : vector<10x128xi1>, vector<10x128xf32>
      %245 = vector.extract_strided_slice %108 {offsets = [0, 19], sizes = [10, 1], strides = [1, 1]} : vector<10x128xi32> to vector<10x1xi32>
      %246 = vector.broadcast %245 : vector<10x1xi32> to vector<10x128xi32>
      %247 = arith.cmpi eq, %246, %78 : vector<10x128xi32>
      %248 = vector.extract_strided_slice %111 {offsets = [0, 19], sizes = [10, 1], strides = [1, 1]} : vector<10x128xf32> to vector<10x1xf32>
      %249 = vector.shape_cast %248 : vector<10x1xf32> to vector<10x1xf32>
      %250 = vector.broadcast %249 : vector<10x1xf32> to vector<10x128xf32>
      %251 = arith.select %247, %250, %223 : vector<10x128xi1>, vector<10x128xf32>
      %252 = vector.extract_strided_slice %108 {offsets = [0, 20], sizes = [10, 1], strides = [1, 1]} : vector<10x128xi32> to vector<10x1xi32>
      %253 = vector.broadcast %252 : vector<10x1xi32> to vector<10x128xi32>
      %254 = arith.cmpi eq, %253, %78 : vector<10x128xi32>
      %255 = vector.extract_strided_slice %111 {offsets = [0, 20], sizes = [10, 1], strides = [1, 1]} : vector<10x128xf32> to vector<10x1xf32>
      %256 = vector.shape_cast %255 : vector<10x1xf32> to vector<10x1xf32>
      %257 = vector.broadcast %256 : vector<10x1xf32> to vector<10x128xf32>
      %258 = arith.select %254, %257, %230 : vector<10x128xi1>, vector<10x128xf32>
      %259 = vector.extract_strided_slice %108 {offsets = [0, 21], sizes = [10, 1], strides = [1, 1]} : vector<10x128xi32> to vector<10x1xi32>
      %260 = vector.broadcast %259 : vector<10x1xi32> to vector<10x128xi32>
      %261 = arith.cmpi eq, %260, %78 : vector<10x128xi32>
      %262 = vector.extract_strided_slice %111 {offsets = [0, 21], sizes = [10, 1], strides = [1, 1]} : vector<10x128xf32> to vector<10x1xf32>
      %263 = vector.shape_cast %262 : vector<10x1xf32> to vector<10x1xf32>
      %264 = vector.broadcast %263 : vector<10x1xf32> to vector<10x128xf32>
      %265 = arith.select %261, %264, %237 : vector<10x128xi1>, vector<10x128xf32>
      %266 = vector.extract_strided_slice %108 {offsets = [0, 22], sizes = [10, 1], strides = [1, 1]} : vector<10x128xi32> to vector<10x1xi32>
      %267 = vector.broadcast %266 : vector<10x1xi32> to vector<10x128xi32>
      %268 = arith.cmpi eq, %267, %78 : vector<10x128xi32>
      %269 = vector.extract_strided_slice %111 {offsets = [0, 22], sizes = [10, 1], strides = [1, 1]} : vector<10x128xf32> to vector<10x1xf32>
      %270 = vector.shape_cast %269 : vector<10x1xf32> to vector<10x1xf32>
      %271 = vector.broadcast %270 : vector<10x1xf32> to vector<10x128xf32>
      %272 = arith.select %268, %271, %244 : vector<10x128xi1>, vector<10x128xf32>
      %273 = vector.extract_strided_slice %108 {offsets = [0, 23], sizes = [10, 1], strides = [1, 1]} : vector<10x128xi32> to vector<10x1xi32>
      %274 = vector.broadcast %273 : vector<10x1xi32> to vector<10x128xi32>
      %275 = arith.cmpi eq, %274, %78 : vector<10x128xi32>
      %276 = vector.extract_strided_slice %111 {offsets = [0, 23], sizes = [10, 1], strides = [1, 1]} : vector<10x128xf32> to vector<10x1xf32>
      %277 = vector.shape_cast %276 : vector<10x1xf32> to vector<10x1xf32>
      %278 = vector.broadcast %277 : vector<10x1xf32> to vector<10x128xf32>
      %279 = arith.select %275, %278, %251 : vector<10x128xi1>, vector<10x128xf32>
      %280 = vector.extract_strided_slice %108 {offsets = [0, 24], sizes = [10, 1], strides = [1, 1]} : vector<10x128xi32> to vector<10x1xi32>
      %281 = vector.broadcast %280 : vector<10x1xi32> to vector<10x128xi32>
      %282 = arith.cmpi eq, %281, %78 : vector<10x128xi32>
      %283 = vector.extract_strided_slice %111 {offsets = [0, 24], sizes = [10, 1], strides = [1, 1]} : vector<10x128xf32> to vector<10x1xf32>
      %284 = vector.shape_cast %283 : vector<10x1xf32> to vector<10x1xf32>
      %285 = vector.broadcast %284 : vector<10x1xf32> to vector<10x128xf32>
      %286 = arith.select %282, %285, %258 : vector<10x128xi1>, vector<10x128xf32>
      %287 = vector.extract_strided_slice %108 {offsets = [0, 25], sizes = [10, 1], strides = [1, 1]} : vector<10x128xi32> to vector<10x1xi32>
      %288 = vector.broadcast %287 : vector<10x1xi32> to vector<10x128xi32>
      %289 = arith.cmpi eq, %288, %78 : vector<10x128xi32>
      %290 = vector.extract_strided_slice %111 {offsets = [0, 25], sizes = [10, 1], strides = [1, 1]} : vector<10x128xf32> to vector<10x1xf32>
      %291 = vector.shape_cast %290 : vector<10x1xf32> to vector<10x1xf32>
      %292 = vector.broadcast %291 : vector<10x1xf32> to vector<10x128xf32>
      %293 = arith.select %289, %292, %265 : vector<10x128xi1>, vector<10x128xf32>
      %294 = vector.extract_strided_slice %108 {offsets = [0, 26], sizes = [10, 1], strides = [1, 1]} : vector<10x128xi32> to vector<10x1xi32>
      %295 = vector.broadcast %294 : vector<10x1xi32> to vector<10x128xi32>
      %296 = arith.cmpi eq, %295, %78 : vector<10x128xi32>
      %297 = vector.extract_strided_slice %111 {offsets = [0, 26], sizes = [10, 1], strides = [1, 1]} : vector<10x128xf32> to vector<10x1xf32>
      %298 = vector.shape_cast %297 : vector<10x1xf32> to vector<10x1xf32>
      %299 = vector.broadcast %298 : vector<10x1xf32> to vector<10x128xf32>
      %300 = arith.select %296, %299, %272 : vector<10x128xi1>, vector<10x128xf32>
      %301 = vector.extract_strided_slice %108 {offsets = [0, 27], sizes = [10, 1], strides = [1, 1]} : vector<10x128xi32> to vector<10x1xi32>
      %302 = vector.broadcast %301 : vector<10x1xi32> to vector<10x128xi32>
      %303 = arith.cmpi eq, %302, %78 : vector<10x128xi32>
      %304 = vector.extract_strided_slice %111 {offsets = [0, 27], sizes = [10, 1], strides = [1, 1]} : vector<10x128xf32> to vector<10x1xf32>
      %305 = vector.shape_cast %304 : vector<10x1xf32> to vector<10x1xf32>
      %306 = vector.broadcast %305 : vector<10x1xf32> to vector<10x128xf32>
      %307 = arith.select %303, %306, %279 : vector<10x128xi1>, vector<10x128xf32>
      %308 = vector.extract_strided_slice %108 {offsets = [0, 28], sizes = [10, 1], strides = [1, 1]} : vector<10x128xi32> to vector<10x1xi32>
      %309 = vector.broadcast %308 : vector<10x1xi32> to vector<10x128xi32>
      %310 = arith.cmpi eq, %309, %78 : vector<10x128xi32>
      %311 = vector.extract_strided_slice %111 {offsets = [0, 28], sizes = [10, 1], strides = [1, 1]} : vector<10x128xf32> to vector<10x1xf32>
      %312 = vector.shape_cast %311 : vector<10x1xf32> to vector<10x1xf32>
      %313 = vector.broadcast %312 : vector<10x1xf32> to vector<10x128xf32>
      %314 = arith.select %310, %313, %286 : vector<10x128xi1>, vector<10x128xf32>
      %315 = vector.extract_strided_slice %108 {offsets = [0, 29], sizes = [10, 1], strides = [1, 1]} : vector<10x128xi32> to vector<10x1xi32>
      %316 = vector.broadcast %315 : vector<10x1xi32> to vector<10x128xi32>
      %317 = arith.cmpi eq, %316, %78 : vector<10x128xi32>
      %318 = vector.extract_strided_slice %111 {offsets = [0, 29], sizes = [10, 1], strides = [1, 1]} : vector<10x128xf32> to vector<10x1xf32>
      %319 = vector.shape_cast %318 : vector<10x1xf32> to vector<10x1xf32>
      %320 = vector.broadcast %319 : vector<10x1xf32> to vector<10x128xf32>
      %321 = arith.select %317, %320, %293 : vector<10x128xi1>, vector<10x128xf32>
      %322 = vector.extract_strided_slice %108 {offsets = [0, 30], sizes = [10, 1], strides = [1, 1]} : vector<10x128xi32> to vector<10x1xi32>
      %323 = vector.broadcast %322 : vector<10x1xi32> to vector<10x128xi32>
      %324 = arith.cmpi eq, %323, %78 : vector<10x128xi32>
      %325 = vector.extract_strided_slice %111 {offsets = [0, 30], sizes = [10, 1], strides = [1, 1]} : vector<10x128xf32> to vector<10x1xf32>
      %326 = vector.shape_cast %325 : vector<10x1xf32> to vector<10x1xf32>
      %327 = vector.broadcast %326 : vector<10x1xf32> to vector<10x128xf32>
      %328 = arith.select %324, %327, %300 : vector<10x128xi1>, vector<10x128xf32>
      %329 = vector.extract_strided_slice %108 {offsets = [0, 31], sizes = [10, 1], strides = [1, 1]} : vector<10x128xi32> to vector<10x1xi32>
      %330 = vector.broadcast %329 : vector<10x1xi32> to vector<10x128xi32>
      %331 = arith.cmpi eq, %330, %78 : vector<10x128xi32>
      %332 = vector.extract_strided_slice %111 {offsets = [0, 31], sizes = [10, 1], strides = [1, 1]} : vector<10x128xf32> to vector<10x1xf32>
      %333 = vector.shape_cast %332 : vector<10x1xf32> to vector<10x1xf32>
      %334 = vector.broadcast %333 : vector<10x1xf32> to vector<10x128xf32>
      %335 = arith.select %331, %334, %307 : vector<10x128xi1>, vector<10x128xf32>
      %336 = vector.extract_strided_slice %108 {offsets = [0, 32], sizes = [10, 1], strides = [1, 1]} : vector<10x128xi32> to vector<10x1xi32>
      %337 = vector.broadcast %336 : vector<10x1xi32> to vector<10x128xi32>
      %338 = arith.cmpi eq, %337, %78 : vector<10x128xi32>
      %339 = vector.extract_strided_slice %111 {offsets = [0, 32], sizes = [10, 1], strides = [1, 1]} : vector<10x128xf32> to vector<10x1xf32>
      %340 = vector.shape_cast %339 : vector<10x1xf32> to vector<10x1xf32>
      %341 = vector.broadcast %340 : vector<10x1xf32> to vector<10x128xf32>
      %342 = arith.select %338, %341, %314 : vector<10x128xi1>, vector<10x128xf32>
      %343 = vector.extract_strided_slice %108 {offsets = [0, 33], sizes = [10, 1], strides = [1, 1]} : vector<10x128xi32> to vector<10x1xi32>
      %344 = vector.broadcast %343 : vector<10x1xi32> to vector<10x128xi32>
      %345 = arith.cmpi eq, %344, %78 : vector<10x128xi32>
      %346 = vector.extract_strided_slice %111 {offsets = [0, 33], sizes = [10, 1], strides = [1, 1]} : vector<10x128xf32> to vector<10x1xf32>
      %347 = vector.shape_cast %346 : vector<10x1xf32> to vector<10x1xf32>
      %348 = vector.broadcast %347 : vector<10x1xf32> to vector<10x128xf32>
      %349 = arith.select %345, %348, %321 : vector<10x128xi1>, vector<10x128xf32>
      %350 = vector.extract_strided_slice %108 {offsets = [0, 34], sizes = [10, 1], strides = [1, 1]} : vector<10x128xi32> to vector<10x1xi32>
      %351 = vector.broadcast %350 : vector<10x1xi32> to vector<10x128xi32>
      %352 = arith.cmpi eq, %351, %78 : vector<10x128xi32>
      %353 = vector.extract_strided_slice %111 {offsets = [0, 34], sizes = [10, 1], strides = [1, 1]} : vector<10x128xf32> to vector<10x1xf32>
      %354 = vector.shape_cast %353 : vector<10x1xf32> to vector<10x1xf32>
      %355 = vector.broadcast %354 : vector<10x1xf32> to vector<10x128xf32>
      %356 = arith.select %352, %355, %328 : vector<10x128xi1>, vector<10x128xf32>
      %357 = vector.extract_strided_slice %108 {offsets = [0, 35], sizes = [10, 1], strides = [1, 1]} : vector<10x128xi32> to vector<10x1xi32>
      %358 = vector.broadcast %357 : vector<10x1xi32> to vector<10x128xi32>
      %359 = arith.cmpi eq, %358, %78 : vector<10x128xi32>
      %360 = vector.extract_strided_slice %111 {offsets = [0, 35], sizes = [10, 1], strides = [1, 1]} : vector<10x128xf32> to vector<10x1xf32>
      %361 = vector.shape_cast %360 : vector<10x1xf32> to vector<10x1xf32>
      %362 = vector.broadcast %361 : vector<10x1xf32> to vector<10x128xf32>
      %363 = arith.select %359, %362, %335 : vector<10x128xi1>, vector<10x128xf32>
      %364 = vector.extract_strided_slice %108 {offsets = [0, 36], sizes = [10, 1], strides = [1, 1]} : vector<10x128xi32> to vector<10x1xi32>
      %365 = vector.broadcast %364 : vector<10x1xi32> to vector<10x128xi32>
      %366 = arith.cmpi eq, %365, %78 : vector<10x128xi32>
      %367 = vector.extract_strided_slice %111 {offsets = [0, 36], sizes = [10, 1], strides = [1, 1]} : vector<10x128xf32> to vector<10x1xf32>
      %368 = vector.shape_cast %367 : vector<10x1xf32> to vector<10x1xf32>
      %369 = vector.broadcast %368 : vector<10x1xf32> to vector<10x128xf32>
      %370 = arith.select %366, %369, %342 : vector<10x128xi1>, vector<10x128xf32>
      %371 = vector.extract_strided_slice %108 {offsets = [0, 37], sizes = [10, 1], strides = [1, 1]} : vector<10x128xi32> to vector<10x1xi32>
      %372 = vector.broadcast %371 : vector<10x1xi32> to vector<10x128xi32>
      %373 = arith.cmpi eq, %372, %78 : vector<10x128xi32>
      %374 = vector.extract_strided_slice %111 {offsets = [0, 37], sizes = [10, 1], strides = [1, 1]} : vector<10x128xf32> to vector<10x1xf32>
      %375 = vector.shape_cast %374 : vector<10x1xf32> to vector<10x1xf32>
      %376 = vector.broadcast %375 : vector<10x1xf32> to vector<10x128xf32>
      %377 = arith.select %373, %376, %349 : vector<10x128xi1>, vector<10x128xf32>
      %378 = vector.extract_strided_slice %108 {offsets = [0, 38], sizes = [10, 1], strides = [1, 1]} : vector<10x128xi32> to vector<10x1xi32>
      %379 = vector.broadcast %378 : vector<10x1xi32> to vector<10x128xi32>
      %380 = arith.cmpi eq, %379, %78 : vector<10x128xi32>
      %381 = vector.extract_strided_slice %111 {offsets = [0, 38], sizes = [10, 1], strides = [1, 1]} : vector<10x128xf32> to vector<10x1xf32>
      %382 = vector.shape_cast %381 : vector<10x1xf32> to vector<10x1xf32>
      %383 = vector.broadcast %382 : vector<10x1xf32> to vector<10x128xf32>
      %384 = arith.select %380, %383, %356 : vector<10x128xi1>, vector<10x128xf32>
      %385 = vector.extract_strided_slice %108 {offsets = [0, 39], sizes = [10, 1], strides = [1, 1]} : vector<10x128xi32> to vector<10x1xi32>
      %386 = vector.broadcast %385 : vector<10x1xi32> to vector<10x128xi32>
      %387 = arith.cmpi eq, %386, %78 : vector<10x128xi32>
      %388 = vector.extract_strided_slice %111 {offsets = [0, 39], sizes = [10, 1], strides = [1, 1]} : vector<10x128xf32> to vector<10x1xf32>
      %389 = vector.shape_cast %388 : vector<10x1xf32> to vector<10x1xf32>
      %390 = vector.broadcast %389 : vector<10x1xf32> to vector<10x128xf32>
      %391 = arith.select %387, %390, %363 : vector<10x128xi1>, vector<10x128xf32>
      %392 = vector.extract_strided_slice %108 {offsets = [0, 40], sizes = [10, 1], strides = [1, 1]} : vector<10x128xi32> to vector<10x1xi32>
      %393 = vector.broadcast %392 : vector<10x1xi32> to vector<10x128xi32>
      %394 = arith.cmpi eq, %393, %78 : vector<10x128xi32>
      %395 = vector.extract_strided_slice %111 {offsets = [0, 40], sizes = [10, 1], strides = [1, 1]} : vector<10x128xf32> to vector<10x1xf32>
      %396 = vector.shape_cast %395 : vector<10x1xf32> to vector<10x1xf32>
      %397 = vector.broadcast %396 : vector<10x1xf32> to vector<10x128xf32>
      %398 = arith.select %394, %397, %370 : vector<10x128xi1>, vector<10x128xf32>
      %399 = vector.extract_strided_slice %108 {offsets = [0, 41], sizes = [10, 1], strides = [1, 1]} : vector<10x128xi32> to vector<10x1xi32>
      %400 = vector.broadcast %399 : vector<10x1xi32> to vector<10x128xi32>
      %401 = arith.cmpi eq, %400, %78 : vector<10x128xi32>
      %402 = vector.extract_strided_slice %111 {offsets = [0, 41], sizes = [10, 1], strides = [1, 1]} : vector<10x128xf32> to vector<10x1xf32>
      %403 = vector.shape_cast %402 : vector<10x1xf32> to vector<10x1xf32>
      %404 = vector.broadcast %403 : vector<10x1xf32> to vector<10x128xf32>
      %405 = arith.select %401, %404, %377 : vector<10x128xi1>, vector<10x128xf32>
      %406 = vector.extract_strided_slice %108 {offsets = [0, 42], sizes = [10, 1], strides = [1, 1]} : vector<10x128xi32> to vector<10x1xi32>
      %407 = vector.broadcast %406 : vector<10x1xi32> to vector<10x128xi32>
      %408 = arith.cmpi eq, %407, %78 : vector<10x128xi32>
      %409 = vector.extract_strided_slice %111 {offsets = [0, 42], sizes = [10, 1], strides = [1, 1]} : vector<10x128xf32> to vector<10x1xf32>
      %410 = vector.shape_cast %409 : vector<10x1xf32> to vector<10x1xf32>
      %411 = vector.broadcast %410 : vector<10x1xf32> to vector<10x128xf32>
      %412 = arith.select %408, %411, %384 : vector<10x128xi1>, vector<10x128xf32>
      %413 = vector.extract_strided_slice %108 {offsets = [0, 43], sizes = [10, 1], strides = [1, 1]} : vector<10x128xi32> to vector<10x1xi32>
      %414 = vector.broadcast %413 : vector<10x1xi32> to vector<10x128xi32>
      %415 = arith.cmpi eq, %414, %78 : vector<10x128xi32>
      %416 = vector.extract_strided_slice %111 {offsets = [0, 43], sizes = [10, 1], strides = [1, 1]} : vector<10x128xf32> to vector<10x1xf32>
      %417 = vector.shape_cast %416 : vector<10x1xf32> to vector<10x1xf32>
      %418 = vector.broadcast %417 : vector<10x1xf32> to vector<10x128xf32>
      %419 = arith.select %415, %418, %391 : vector<10x128xi1>, vector<10x128xf32>
      %420 = vector.extract_strided_slice %108 {offsets = [0, 44], sizes = [10, 1], strides = [1, 1]} : vector<10x128xi32> to vector<10x1xi32>
      %421 = vector.broadcast %420 : vector<10x1xi32> to vector<10x128xi32>
      %422 = arith.cmpi eq, %421, %78 : vector<10x128xi32>
      %423 = vector.extract_strided_slice %111 {offsets = [0, 44], sizes = [10, 1], strides = [1, 1]} : vector<10x128xf32> to vector<10x1xf32>
      %424 = vector.shape_cast %423 : vector<10x1xf32> to vector<10x1xf32>
      %425 = vector.broadcast %424 : vector<10x1xf32> to vector<10x128xf32>
      %426 = arith.select %422, %425, %398 : vector<10x128xi1>, vector<10x128xf32>
      %427 = vector.extract_strided_slice %108 {offsets = [0, 45], sizes = [10, 1], strides = [1, 1]} : vector<10x128xi32> to vector<10x1xi32>
      %428 = vector.broadcast %427 : vector<10x1xi32> to vector<10x128xi32>
      %429 = arith.cmpi eq, %428, %78 : vector<10x128xi32>
      %430 = vector.extract_strided_slice %111 {offsets = [0, 45], sizes = [10, 1], strides = [1, 1]} : vector<10x128xf32> to vector<10x1xf32>
      %431 = vector.shape_cast %430 : vector<10x1xf32> to vector<10x1xf32>
      %432 = vector.broadcast %431 : vector<10x1xf32> to vector<10x128xf32>
      %433 = arith.select %429, %432, %405 : vector<10x128xi1>, vector<10x128xf32>
      %434 = vector.extract_strided_slice %108 {offsets = [0, 46], sizes = [10, 1], strides = [1, 1]} : vector<10x128xi32> to vector<10x1xi32>
      %435 = vector.broadcast %434 : vector<10x1xi32> to vector<10x128xi32>
      %436 = arith.cmpi eq, %435, %78 : vector<10x128xi32>
      %437 = vector.extract_strided_slice %111 {offsets = [0, 46], sizes = [10, 1], strides = [1, 1]} : vector<10x128xf32> to vector<10x1xf32>
      %438 = vector.shape_cast %437 : vector<10x1xf32> to vector<10x1xf32>
      %439 = vector.broadcast %438 : vector<10x1xf32> to vector<10x128xf32>
      %440 = arith.select %436, %439, %412 : vector<10x128xi1>, vector<10x128xf32>
      %441 = vector.extract_strided_slice %108 {offsets = [0, 47], sizes = [10, 1], strides = [1, 1]} : vector<10x128xi32> to vector<10x1xi32>
      %442 = vector.broadcast %441 : vector<10x1xi32> to vector<10x128xi32>
      %443 = arith.cmpi eq, %442, %78 : vector<10x128xi32>
      %444 = vector.extract_strided_slice %111 {offsets = [0, 47], sizes = [10, 1], strides = [1, 1]} : vector<10x128xf32> to vector<10x1xf32>
      %445 = vector.shape_cast %444 : vector<10x1xf32> to vector<10x1xf32>
      %446 = vector.broadcast %445 : vector<10x1xf32> to vector<10x128xf32>
      %447 = arith.select %443, %446, %419 : vector<10x128xi1>, vector<10x128xf32>
      %448 = vector.extract_strided_slice %108 {offsets = [0, 48], sizes = [10, 1], strides = [1, 1]} : vector<10x128xi32> to vector<10x1xi32>
      %449 = vector.broadcast %448 : vector<10x1xi32> to vector<10x128xi32>
      %450 = arith.cmpi eq, %449, %78 : vector<10x128xi32>
      %451 = vector.extract_strided_slice %111 {offsets = [0, 48], sizes = [10, 1], strides = [1, 1]} : vector<10x128xf32> to vector<10x1xf32>
      %452 = vector.shape_cast %451 : vector<10x1xf32> to vector<10x1xf32>
      %453 = vector.broadcast %452 : vector<10x1xf32> to vector<10x128xf32>
      %454 = arith.select %450, %453, %426 : vector<10x128xi1>, vector<10x128xf32>
      %455 = vector.extract_strided_slice %108 {offsets = [0, 49], sizes = [10, 1], strides = [1, 1]} : vector<10x128xi32> to vector<10x1xi32>
      %456 = vector.broadcast %455 : vector<10x1xi32> to vector<10x128xi32>
      %457 = arith.cmpi eq, %456, %78 : vector<10x128xi32>
      %458 = vector.extract_strided_slice %111 {offsets = [0, 49], sizes = [10, 1], strides = [1, 1]} : vector<10x128xf32> to vector<10x1xf32>
      %459 = vector.shape_cast %458 : vector<10x1xf32> to vector<10x1xf32>
      %460 = vector.broadcast %459 : vector<10x1xf32> to vector<10x128xf32>
      %461 = arith.select %457, %460, %433 : vector<10x128xi1>, vector<10x128xf32>
      %462 = vector.extract_strided_slice %108 {offsets = [0, 50], sizes = [10, 1], strides = [1, 1]} : vector<10x128xi32> to vector<10x1xi32>
      %463 = vector.broadcast %462 : vector<10x1xi32> to vector<10x128xi32>
      %464 = arith.cmpi eq, %463, %78 : vector<10x128xi32>
      %465 = vector.extract_strided_slice %111 {offsets = [0, 50], sizes = [10, 1], strides = [1, 1]} : vector<10x128xf32> to vector<10x1xf32>
      %466 = vector.shape_cast %465 : vector<10x1xf32> to vector<10x1xf32>
      %467 = vector.broadcast %466 : vector<10x1xf32> to vector<10x128xf32>
      %468 = arith.select %464, %467, %440 : vector<10x128xi1>, vector<10x128xf32>
      %469 = vector.extract_strided_slice %108 {offsets = [0, 51], sizes = [10, 1], strides = [1, 1]} : vector<10x128xi32> to vector<10x1xi32>
      %470 = vector.broadcast %469 : vector<10x1xi32> to vector<10x128xi32>
      %471 = arith.cmpi eq, %470, %78 : vector<10x128xi32>
      %472 = vector.extract_strided_slice %111 {offsets = [0, 51], sizes = [10, 1], strides = [1, 1]} : vector<10x128xf32> to vector<10x1xf32>
      %473 = vector.shape_cast %472 : vector<10x1xf32> to vector<10x1xf32>
      %474 = vector.broadcast %473 : vector<10x1xf32> to vector<10x128xf32>
      %475 = arith.select %471, %474, %447 : vector<10x128xi1>, vector<10x128xf32>
      %476 = vector.extract_strided_slice %108 {offsets = [0, 52], sizes = [10, 1], strides = [1, 1]} : vector<10x128xi32> to vector<10x1xi32>
      %477 = vector.broadcast %476 : vector<10x1xi32> to vector<10x128xi32>
      %478 = arith.cmpi eq, %477, %78 : vector<10x128xi32>
      %479 = vector.extract_strided_slice %111 {offsets = [0, 52], sizes = [10, 1], strides = [1, 1]} : vector<10x128xf32> to vector<10x1xf32>
      %480 = vector.shape_cast %479 : vector<10x1xf32> to vector<10x1xf32>
      %481 = vector.broadcast %480 : vector<10x1xf32> to vector<10x128xf32>
      %482 = arith.select %478, %481, %454 : vector<10x128xi1>, vector<10x128xf32>
      %483 = vector.extract_strided_slice %108 {offsets = [0, 53], sizes = [10, 1], strides = [1, 1]} : vector<10x128xi32> to vector<10x1xi32>
      %484 = vector.broadcast %483 : vector<10x1xi32> to vector<10x128xi32>
      %485 = arith.cmpi eq, %484, %78 : vector<10x128xi32>
      %486 = vector.extract_strided_slice %111 {offsets = [0, 53], sizes = [10, 1], strides = [1, 1]} : vector<10x128xf32> to vector<10x1xf32>
      %487 = vector.shape_cast %486 : vector<10x1xf32> to vector<10x1xf32>
      %488 = vector.broadcast %487 : vector<10x1xf32> to vector<10x128xf32>
      %489 = arith.select %485, %488, %461 : vector<10x128xi1>, vector<10x128xf32>
      %490 = vector.extract_strided_slice %108 {offsets = [0, 54], sizes = [10, 1], strides = [1, 1]} : vector<10x128xi32> to vector<10x1xi32>
      %491 = vector.broadcast %490 : vector<10x1xi32> to vector<10x128xi32>
      %492 = arith.cmpi eq, %491, %78 : vector<10x128xi32>
      %493 = vector.extract_strided_slice %111 {offsets = [0, 54], sizes = [10, 1], strides = [1, 1]} : vector<10x128xf32> to vector<10x1xf32>
      %494 = vector.shape_cast %493 : vector<10x1xf32> to vector<10x1xf32>
      %495 = vector.broadcast %494 : vector<10x1xf32> to vector<10x128xf32>
      %496 = arith.select %492, %495, %468 : vector<10x128xi1>, vector<10x128xf32>
      %497 = vector.extract_strided_slice %108 {offsets = [0, 55], sizes = [10, 1], strides = [1, 1]} : vector<10x128xi32> to vector<10x1xi32>
      %498 = vector.broadcast %497 : vector<10x1xi32> to vector<10x128xi32>
      %499 = arith.cmpi eq, %498, %78 : vector<10x128xi32>
      %500 = vector.extract_strided_slice %111 {offsets = [0, 55], sizes = [10, 1], strides = [1, 1]} : vector<10x128xf32> to vector<10x1xf32>
      %501 = vector.shape_cast %500 : vector<10x1xf32> to vector<10x1xf32>
      %502 = vector.broadcast %501 : vector<10x1xf32> to vector<10x128xf32>
      %503 = arith.select %499, %502, %475 : vector<10x128xi1>, vector<10x128xf32>
      %504 = vector.extract_strided_slice %108 {offsets = [0, 56], sizes = [10, 1], strides = [1, 1]} : vector<10x128xi32> to vector<10x1xi32>
      %505 = vector.broadcast %504 : vector<10x1xi32> to vector<10x128xi32>
      %506 = arith.cmpi eq, %505, %78 : vector<10x128xi32>
      %507 = vector.extract_strided_slice %111 {offsets = [0, 56], sizes = [10, 1], strides = [1, 1]} : vector<10x128xf32> to vector<10x1xf32>
      %508 = vector.shape_cast %507 : vector<10x1xf32> to vector<10x1xf32>
      %509 = vector.broadcast %508 : vector<10x1xf32> to vector<10x128xf32>
      %510 = arith.select %506, %509, %482 : vector<10x128xi1>, vector<10x128xf32>
      %511 = vector.extract_strided_slice %108 {offsets = [0, 57], sizes = [10, 1], strides = [1, 1]} : vector<10x128xi32> to vector<10x1xi32>
      %512 = vector.broadcast %511 : vector<10x1xi32> to vector<10x128xi32>
      %513 = arith.cmpi eq, %512, %78 : vector<10x128xi32>
      %514 = vector.extract_strided_slice %111 {offsets = [0, 57], sizes = [10, 1], strides = [1, 1]} : vector<10x128xf32> to vector<10x1xf32>
      %515 = vector.shape_cast %514 : vector<10x1xf32> to vector<10x1xf32>
      %516 = vector.broadcast %515 : vector<10x1xf32> to vector<10x128xf32>
      %517 = arith.select %513, %516, %489 : vector<10x128xi1>, vector<10x128xf32>
      %518 = vector.extract_strided_slice %108 {offsets = [0, 58], sizes = [10, 1], strides = [1, 1]} : vector<10x128xi32> to vector<10x1xi32>
      %519 = vector.broadcast %518 : vector<10x1xi32> to vector<10x128xi32>
      %520 = arith.cmpi eq, %519, %78 : vector<10x128xi32>
      %521 = vector.extract_strided_slice %111 {offsets = [0, 58], sizes = [10, 1], strides = [1, 1]} : vector<10x128xf32> to vector<10x1xf32>
      %522 = vector.shape_cast %521 : vector<10x1xf32> to vector<10x1xf32>
      %523 = vector.broadcast %522 : vector<10x1xf32> to vector<10x128xf32>
      %524 = arith.select %520, %523, %496 : vector<10x128xi1>, vector<10x128xf32>
      %525 = vector.extract_strided_slice %108 {offsets = [0, 59], sizes = [10, 1], strides = [1, 1]} : vector<10x128xi32> to vector<10x1xi32>
      %526 = vector.broadcast %525 : vector<10x1xi32> to vector<10x128xi32>
      %527 = arith.cmpi eq, %526, %78 : vector<10x128xi32>
      %528 = vector.extract_strided_slice %111 {offsets = [0, 59], sizes = [10, 1], strides = [1, 1]} : vector<10x128xf32> to vector<10x1xf32>
      %529 = vector.shape_cast %528 : vector<10x1xf32> to vector<10x1xf32>
      %530 = vector.broadcast %529 : vector<10x1xf32> to vector<10x128xf32>
      %531 = arith.select %527, %530, %503 : vector<10x128xi1>, vector<10x128xf32>
      %532 = vector.extract_strided_slice %108 {offsets = [0, 60], sizes = [10, 1], strides = [1, 1]} : vector<10x128xi32> to vector<10x1xi32>
      %533 = vector.broadcast %532 : vector<10x1xi32> to vector<10x128xi32>
      %534 = arith.cmpi eq, %533, %78 : vector<10x128xi32>
      %535 = vector.extract_strided_slice %111 {offsets = [0, 60], sizes = [10, 1], strides = [1, 1]} : vector<10x128xf32> to vector<10x1xf32>
      %536 = vector.shape_cast %535 : vector<10x1xf32> to vector<10x1xf32>
      %537 = vector.broadcast %536 : vector<10x1xf32> to vector<10x128xf32>
      %538 = arith.select %534, %537, %510 : vector<10x128xi1>, vector<10x128xf32>
      %539 = vector.extract_strided_slice %108 {offsets = [0, 61], sizes = [10, 1], strides = [1, 1]} : vector<10x128xi32> to vector<10x1xi32>
      %540 = vector.broadcast %539 : vector<10x1xi32> to vector<10x128xi32>
      %541 = arith.cmpi eq, %540, %78 : vector<10x128xi32>
      %542 = vector.extract_strided_slice %111 {offsets = [0, 61], sizes = [10, 1], strides = [1, 1]} : vector<10x128xf32> to vector<10x1xf32>
      %543 = vector.shape_cast %542 : vector<10x1xf32> to vector<10x1xf32>
      %544 = vector.broadcast %543 : vector<10x1xf32> to vector<10x128xf32>
      %545 = arith.select %541, %544, %517 : vector<10x128xi1>, vector<10x128xf32>
      %546 = vector.extract_strided_slice %108 {offsets = [0, 62], sizes = [10, 1], strides = [1, 1]} : vector<10x128xi32> to vector<10x1xi32>
      %547 = vector.broadcast %546 : vector<10x1xi32> to vector<10x128xi32>
      %548 = arith.cmpi eq, %547, %78 : vector<10x128xi32>
      %549 = vector.extract_strided_slice %111 {offsets = [0, 62], sizes = [10, 1], strides = [1, 1]} : vector<10x128xf32> to vector<10x1xf32>
      %550 = vector.shape_cast %549 : vector<10x1xf32> to vector<10x1xf32>
      %551 = vector.broadcast %550 : vector<10x1xf32> to vector<10x128xf32>
      %552 = arith.select %548, %551, %524 : vector<10x128xi1>, vector<10x128xf32>
      %553 = vector.extract_strided_slice %108 {offsets = [0, 63], sizes = [10, 1], strides = [1, 1]} : vector<10x128xi32> to vector<10x1xi32>
      %554 = vector.broadcast %553 : vector<10x1xi32> to vector<10x128xi32>
      %555 = arith.cmpi eq, %554, %78 : vector<10x128xi32>
      %556 = vector.extract_strided_slice %111 {offsets = [0, 63], sizes = [10, 1], strides = [1, 1]} : vector<10x128xf32> to vector<10x1xf32>
      %557 = vector.shape_cast %556 : vector<10x1xf32> to vector<10x1xf32>
      %558 = vector.broadcast %557 : vector<10x1xf32> to vector<10x128xf32>
      %559 = arith.select %555, %558, %531 : vector<10x128xi1>, vector<10x128xf32>
      %560 = vector.extract_strided_slice %108 {offsets = [0, 64], sizes = [10, 1], strides = [1, 1]} : vector<10x128xi32> to vector<10x1xi32>
      %561 = vector.broadcast %560 : vector<10x1xi32> to vector<10x128xi32>
      %562 = arith.cmpi eq, %561, %78 : vector<10x128xi32>
      %563 = vector.extract_strided_slice %111 {offsets = [0, 64], sizes = [10, 1], strides = [1, 1]} : vector<10x128xf32> to vector<10x1xf32>
      %564 = vector.shape_cast %563 : vector<10x1xf32> to vector<10x1xf32>
      %565 = vector.broadcast %564 : vector<10x1xf32> to vector<10x128xf32>
      %566 = arith.select %562, %565, %538 : vector<10x128xi1>, vector<10x128xf32>
      %567 = vector.extract_strided_slice %108 {offsets = [0, 65], sizes = [10, 1], strides = [1, 1]} : vector<10x128xi32> to vector<10x1xi32>
      %568 = vector.broadcast %567 : vector<10x1xi32> to vector<10x128xi32>
      %569 = arith.cmpi eq, %568, %78 : vector<10x128xi32>
      %570 = vector.extract_strided_slice %111 {offsets = [0, 65], sizes = [10, 1], strides = [1, 1]} : vector<10x128xf32> to vector<10x1xf32>
      %571 = vector.shape_cast %570 : vector<10x1xf32> to vector<10x1xf32>
      %572 = vector.broadcast %571 : vector<10x1xf32> to vector<10x128xf32>
      %573 = arith.select %569, %572, %545 : vector<10x128xi1>, vector<10x128xf32>
      %574 = vector.extract_strided_slice %108 {offsets = [0, 66], sizes = [10, 1], strides = [1, 1]} : vector<10x128xi32> to vector<10x1xi32>
      %575 = vector.broadcast %574 : vector<10x1xi32> to vector<10x128xi32>
      %576 = arith.cmpi eq, %575, %78 : vector<10x128xi32>
      %577 = vector.extract_strided_slice %111 {offsets = [0, 66], sizes = [10, 1], strides = [1, 1]} : vector<10x128xf32> to vector<10x1xf32>
      %578 = vector.shape_cast %577 : vector<10x1xf32> to vector<10x1xf32>
      %579 = vector.broadcast %578 : vector<10x1xf32> to vector<10x128xf32>
      %580 = arith.select %576, %579, %552 : vector<10x128xi1>, vector<10x128xf32>
      %581 = vector.extract_strided_slice %108 {offsets = [0, 67], sizes = [10, 1], strides = [1, 1]} : vector<10x128xi32> to vector<10x1xi32>
      %582 = vector.broadcast %581 : vector<10x1xi32> to vector<10x128xi32>
      %583 = arith.cmpi eq, %582, %78 : vector<10x128xi32>
      %584 = vector.extract_strided_slice %111 {offsets = [0, 67], sizes = [10, 1], strides = [1, 1]} : vector<10x128xf32> to vector<10x1xf32>
      %585 = vector.shape_cast %584 : vector<10x1xf32> to vector<10x1xf32>
      %586 = vector.broadcast %585 : vector<10x1xf32> to vector<10x128xf32>
      %587 = arith.select %583, %586, %559 : vector<10x128xi1>, vector<10x128xf32>
      %588 = vector.extract_strided_slice %108 {offsets = [0, 68], sizes = [10, 1], strides = [1, 1]} : vector<10x128xi32> to vector<10x1xi32>
      %589 = vector.broadcast %588 : vector<10x1xi32> to vector<10x128xi32>
      %590 = arith.cmpi eq, %589, %78 : vector<10x128xi32>
      %591 = vector.extract_strided_slice %111 {offsets = [0, 68], sizes = [10, 1], strides = [1, 1]} : vector<10x128xf32> to vector<10x1xf32>
      %592 = vector.shape_cast %591 : vector<10x1xf32> to vector<10x1xf32>
      %593 = vector.broadcast %592 : vector<10x1xf32> to vector<10x128xf32>
      %594 = arith.select %590, %593, %566 : vector<10x128xi1>, vector<10x128xf32>
      %595 = vector.extract_strided_slice %108 {offsets = [0, 69], sizes = [10, 1], strides = [1, 1]} : vector<10x128xi32> to vector<10x1xi32>
      %596 = vector.broadcast %595 : vector<10x1xi32> to vector<10x128xi32>
      %597 = arith.cmpi eq, %596, %78 : vector<10x128xi32>
      %598 = vector.extract_strided_slice %111 {offsets = [0, 69], sizes = [10, 1], strides = [1, 1]} : vector<10x128xf32> to vector<10x1xf32>
      %599 = vector.shape_cast %598 : vector<10x1xf32> to vector<10x1xf32>
      %600 = vector.broadcast %599 : vector<10x1xf32> to vector<10x128xf32>
      %601 = arith.select %597, %600, %573 : vector<10x128xi1>, vector<10x128xf32>
      %602 = vector.extract_strided_slice %108 {offsets = [0, 70], sizes = [10, 1], strides = [1, 1]} : vector<10x128xi32> to vector<10x1xi32>
      %603 = vector.broadcast %602 : vector<10x1xi32> to vector<10x128xi32>
      %604 = arith.cmpi eq, %603, %78 : vector<10x128xi32>
      %605 = vector.extract_strided_slice %111 {offsets = [0, 70], sizes = [10, 1], strides = [1, 1]} : vector<10x128xf32> to vector<10x1xf32>
      %606 = vector.shape_cast %605 : vector<10x1xf32> to vector<10x1xf32>
      %607 = vector.broadcast %606 : vector<10x1xf32> to vector<10x128xf32>
      %608 = arith.select %604, %607, %580 : vector<10x128xi1>, vector<10x128xf32>
      %609 = vector.extract_strided_slice %108 {offsets = [0, 71], sizes = [10, 1], strides = [1, 1]} : vector<10x128xi32> to vector<10x1xi32>
      %610 = vector.broadcast %609 : vector<10x1xi32> to vector<10x128xi32>
      %611 = arith.cmpi eq, %610, %78 : vector<10x128xi32>
      %612 = vector.extract_strided_slice %111 {offsets = [0, 71], sizes = [10, 1], strides = [1, 1]} : vector<10x128xf32> to vector<10x1xf32>
      %613 = vector.shape_cast %612 : vector<10x1xf32> to vector<10x1xf32>
      %614 = vector.broadcast %613 : vector<10x1xf32> to vector<10x128xf32>
      %615 = arith.select %611, %614, %587 : vector<10x128xi1>, vector<10x128xf32>
      %616 = vector.extract_strided_slice %108 {offsets = [0, 72], sizes = [10, 1], strides = [1, 1]} : vector<10x128xi32> to vector<10x1xi32>
      %617 = vector.broadcast %616 : vector<10x1xi32> to vector<10x128xi32>
      %618 = arith.cmpi eq, %617, %78 : vector<10x128xi32>
      %619 = vector.extract_strided_slice %111 {offsets = [0, 72], sizes = [10, 1], strides = [1, 1]} : vector<10x128xf32> to vector<10x1xf32>
      %620 = vector.shape_cast %619 : vector<10x1xf32> to vector<10x1xf32>
      %621 = vector.broadcast %620 : vector<10x1xf32> to vector<10x128xf32>
      %622 = arith.select %618, %621, %594 : vector<10x128xi1>, vector<10x128xf32>
      %623 = vector.extract_strided_slice %108 {offsets = [0, 73], sizes = [10, 1], strides = [1, 1]} : vector<10x128xi32> to vector<10x1xi32>
      %624 = vector.broadcast %623 : vector<10x1xi32> to vector<10x128xi32>
      %625 = arith.cmpi eq, %624, %78 : vector<10x128xi32>
      %626 = vector.extract_strided_slice %111 {offsets = [0, 73], sizes = [10, 1], strides = [1, 1]} : vector<10x128xf32> to vector<10x1xf32>
      %627 = vector.shape_cast %626 : vector<10x1xf32> to vector<10x1xf32>
      %628 = vector.broadcast %627 : vector<10x1xf32> to vector<10x128xf32>
      %629 = arith.select %625, %628, %601 : vector<10x128xi1>, vector<10x128xf32>
      %630 = vector.extract_strided_slice %108 {offsets = [0, 74], sizes = [10, 1], strides = [1, 1]} : vector<10x128xi32> to vector<10x1xi32>
      %631 = vector.broadcast %630 : vector<10x1xi32> to vector<10x128xi32>
      %632 = arith.cmpi eq, %631, %78 : vector<10x128xi32>
      %633 = vector.extract_strided_slice %111 {offsets = [0, 74], sizes = [10, 1], strides = [1, 1]} : vector<10x128xf32> to vector<10x1xf32>
      %634 = vector.shape_cast %633 : vector<10x1xf32> to vector<10x1xf32>
      %635 = vector.broadcast %634 : vector<10x1xf32> to vector<10x128xf32>
      %636 = arith.select %632, %635, %608 : vector<10x128xi1>, vector<10x128xf32>
      %637 = vector.extract_strided_slice %108 {offsets = [0, 75], sizes = [10, 1], strides = [1, 1]} : vector<10x128xi32> to vector<10x1xi32>
      %638 = vector.broadcast %637 : vector<10x1xi32> to vector<10x128xi32>
      %639 = arith.cmpi eq, %638, %78 : vector<10x128xi32>
      %640 = vector.extract_strided_slice %111 {offsets = [0, 75], sizes = [10, 1], strides = [1, 1]} : vector<10x128xf32> to vector<10x1xf32>
      %641 = vector.shape_cast %640 : vector<10x1xf32> to vector<10x1xf32>
      %642 = vector.broadcast %641 : vector<10x1xf32> to vector<10x128xf32>
      %643 = arith.select %639, %642, %615 : vector<10x128xi1>, vector<10x128xf32>
      %644 = vector.extract_strided_slice %108 {offsets = [0, 76], sizes = [10, 1], strides = [1, 1]} : vector<10x128xi32> to vector<10x1xi32>
      %645 = vector.broadcast %644 : vector<10x1xi32> to vector<10x128xi32>
      %646 = arith.cmpi eq, %645, %78 : vector<10x128xi32>
      %647 = vector.extract_strided_slice %111 {offsets = [0, 76], sizes = [10, 1], strides = [1, 1]} : vector<10x128xf32> to vector<10x1xf32>
      %648 = vector.shape_cast %647 : vector<10x1xf32> to vector<10x1xf32>
      %649 = vector.broadcast %648 : vector<10x1xf32> to vector<10x128xf32>
      %650 = arith.select %646, %649, %622 : vector<10x128xi1>, vector<10x128xf32>
      %651 = vector.extract_strided_slice %108 {offsets = [0, 77], sizes = [10, 1], strides = [1, 1]} : vector<10x128xi32> to vector<10x1xi32>
      %652 = vector.broadcast %651 : vector<10x1xi32> to vector<10x128xi32>
      %653 = arith.cmpi eq, %652, %78 : vector<10x128xi32>
      %654 = vector.extract_strided_slice %111 {offsets = [0, 77], sizes = [10, 1], strides = [1, 1]} : vector<10x128xf32> to vector<10x1xf32>
      %655 = vector.shape_cast %654 : vector<10x1xf32> to vector<10x1xf32>
      %656 = vector.broadcast %655 : vector<10x1xf32> to vector<10x128xf32>
      %657 = arith.select %653, %656, %629 : vector<10x128xi1>, vector<10x128xf32>
      %658 = vector.extract_strided_slice %108 {offsets = [0, 78], sizes = [10, 1], strides = [1, 1]} : vector<10x128xi32> to vector<10x1xi32>
      %659 = vector.broadcast %658 : vector<10x1xi32> to vector<10x128xi32>
      %660 = arith.cmpi eq, %659, %78 : vector<10x128xi32>
      %661 = vector.extract_strided_slice %111 {offsets = [0, 78], sizes = [10, 1], strides = [1, 1]} : vector<10x128xf32> to vector<10x1xf32>
      %662 = vector.shape_cast %661 : vector<10x1xf32> to vector<10x1xf32>
      %663 = vector.broadcast %662 : vector<10x1xf32> to vector<10x128xf32>
      %664 = arith.select %660, %663, %636 : vector<10x128xi1>, vector<10x128xf32>
      %665 = vector.extract_strided_slice %108 {offsets = [0, 79], sizes = [10, 1], strides = [1, 1]} : vector<10x128xi32> to vector<10x1xi32>
      %666 = vector.broadcast %665 : vector<10x1xi32> to vector<10x128xi32>
      %667 = arith.cmpi eq, %666, %78 : vector<10x128xi32>
      %668 = vector.extract_strided_slice %111 {offsets = [0, 79], sizes = [10, 1], strides = [1, 1]} : vector<10x128xf32> to vector<10x1xf32>
      %669 = vector.shape_cast %668 : vector<10x1xf32> to vector<10x1xf32>
      %670 = vector.broadcast %669 : vector<10x1xf32> to vector<10x128xf32>
      %671 = arith.select %667, %670, %643 : vector<10x128xi1>, vector<10x128xf32>
      %672 = vector.extract_strided_slice %108 {offsets = [0, 80], sizes = [10, 1], strides = [1, 1]} : vector<10x128xi32> to vector<10x1xi32>
      %673 = vector.broadcast %672 : vector<10x1xi32> to vector<10x128xi32>
      %674 = arith.cmpi eq, %673, %78 : vector<10x128xi32>
      %675 = vector.extract_strided_slice %111 {offsets = [0, 80], sizes = [10, 1], strides = [1, 1]} : vector<10x128xf32> to vector<10x1xf32>
      %676 = vector.shape_cast %675 : vector<10x1xf32> to vector<10x1xf32>
      %677 = vector.broadcast %676 : vector<10x1xf32> to vector<10x128xf32>
      %678 = arith.select %674, %677, %650 : vector<10x128xi1>, vector<10x128xf32>
      %679 = vector.extract_strided_slice %108 {offsets = [0, 81], sizes = [10, 1], strides = [1, 1]} : vector<10x128xi32> to vector<10x1xi32>
      %680 = vector.broadcast %679 : vector<10x1xi32> to vector<10x128xi32>
      %681 = arith.cmpi eq, %680, %78 : vector<10x128xi32>
      %682 = vector.extract_strided_slice %111 {offsets = [0, 81], sizes = [10, 1], strides = [1, 1]} : vector<10x128xf32> to vector<10x1xf32>
      %683 = vector.shape_cast %682 : vector<10x1xf32> to vector<10x1xf32>
      %684 = vector.broadcast %683 : vector<10x1xf32> to vector<10x128xf32>
      %685 = arith.select %681, %684, %657 : vector<10x128xi1>, vector<10x128xf32>
      %686 = vector.extract_strided_slice %108 {offsets = [0, 82], sizes = [10, 1], strides = [1, 1]} : vector<10x128xi32> to vector<10x1xi32>
      %687 = vector.broadcast %686 : vector<10x1xi32> to vector<10x128xi32>
      %688 = arith.cmpi eq, %687, %78 : vector<10x128xi32>
      %689 = vector.extract_strided_slice %111 {offsets = [0, 82], sizes = [10, 1], strides = [1, 1]} : vector<10x128xf32> to vector<10x1xf32>
      %690 = vector.shape_cast %689 : vector<10x1xf32> to vector<10x1xf32>
      %691 = vector.broadcast %690 : vector<10x1xf32> to vector<10x128xf32>
      %692 = arith.select %688, %691, %664 : vector<10x128xi1>, vector<10x128xf32>
      %693 = vector.extract_strided_slice %108 {offsets = [0, 83], sizes = [10, 1], strides = [1, 1]} : vector<10x128xi32> to vector<10x1xi32>
      %694 = vector.broadcast %693 : vector<10x1xi32> to vector<10x128xi32>
      %695 = arith.cmpi eq, %694, %78 : vector<10x128xi32>
      %696 = vector.extract_strided_slice %111 {offsets = [0, 83], sizes = [10, 1], strides = [1, 1]} : vector<10x128xf32> to vector<10x1xf32>
      %697 = vector.shape_cast %696 : vector<10x1xf32> to vector<10x1xf32>
      %698 = vector.broadcast %697 : vector<10x1xf32> to vector<10x128xf32>
      %699 = arith.select %695, %698, %671 : vector<10x128xi1>, vector<10x128xf32>
      %700 = vector.extract_strided_slice %108 {offsets = [0, 84], sizes = [10, 1], strides = [1, 1]} : vector<10x128xi32> to vector<10x1xi32>
      %701 = vector.broadcast %700 : vector<10x1xi32> to vector<10x128xi32>
      %702 = arith.cmpi eq, %701, %78 : vector<10x128xi32>
      %703 = vector.extract_strided_slice %111 {offsets = [0, 84], sizes = [10, 1], strides = [1, 1]} : vector<10x128xf32> to vector<10x1xf32>
      %704 = vector.shape_cast %703 : vector<10x1xf32> to vector<10x1xf32>
      %705 = vector.broadcast %704 : vector<10x1xf32> to vector<10x128xf32>
      %706 = arith.select %702, %705, %678 : vector<10x128xi1>, vector<10x128xf32>
      %707 = vector.extract_strided_slice %108 {offsets = [0, 85], sizes = [10, 1], strides = [1, 1]} : vector<10x128xi32> to vector<10x1xi32>
      %708 = vector.broadcast %707 : vector<10x1xi32> to vector<10x128xi32>
      %709 = arith.cmpi eq, %708, %78 : vector<10x128xi32>
      %710 = vector.extract_strided_slice %111 {offsets = [0, 85], sizes = [10, 1], strides = [1, 1]} : vector<10x128xf32> to vector<10x1xf32>
      %711 = vector.shape_cast %710 : vector<10x1xf32> to vector<10x1xf32>
      %712 = vector.broadcast %711 : vector<10x1xf32> to vector<10x128xf32>
      %713 = arith.select %709, %712, %685 : vector<10x128xi1>, vector<10x128xf32>
      %714 = vector.extract_strided_slice %108 {offsets = [0, 86], sizes = [10, 1], strides = [1, 1]} : vector<10x128xi32> to vector<10x1xi32>
      %715 = vector.broadcast %714 : vector<10x1xi32> to vector<10x128xi32>
      %716 = arith.cmpi eq, %715, %78 : vector<10x128xi32>
      %717 = vector.extract_strided_slice %111 {offsets = [0, 86], sizes = [10, 1], strides = [1, 1]} : vector<10x128xf32> to vector<10x1xf32>
      %718 = vector.shape_cast %717 : vector<10x1xf32> to vector<10x1xf32>
      %719 = vector.broadcast %718 : vector<10x1xf32> to vector<10x128xf32>
      %720 = arith.select %716, %719, %692 : vector<10x128xi1>, vector<10x128xf32>
      %721 = vector.extract_strided_slice %108 {offsets = [0, 87], sizes = [10, 1], strides = [1, 1]} : vector<10x128xi32> to vector<10x1xi32>
      %722 = vector.broadcast %721 : vector<10x1xi32> to vector<10x128xi32>
      %723 = arith.cmpi eq, %722, %78 : vector<10x128xi32>
      %724 = vector.extract_strided_slice %111 {offsets = [0, 87], sizes = [10, 1], strides = [1, 1]} : vector<10x128xf32> to vector<10x1xf32>
      %725 = vector.shape_cast %724 : vector<10x1xf32> to vector<10x1xf32>
      %726 = vector.broadcast %725 : vector<10x1xf32> to vector<10x128xf32>
      %727 = arith.select %723, %726, %699 : vector<10x128xi1>, vector<10x128xf32>
      %728 = vector.extract_strided_slice %108 {offsets = [0, 88], sizes = [10, 1], strides = [1, 1]} : vector<10x128xi32> to vector<10x1xi32>
      %729 = vector.broadcast %728 : vector<10x1xi32> to vector<10x128xi32>
      %730 = arith.cmpi eq, %729, %78 : vector<10x128xi32>
      %731 = vector.extract_strided_slice %111 {offsets = [0, 88], sizes = [10, 1], strides = [1, 1]} : vector<10x128xf32> to vector<10x1xf32>
      %732 = vector.shape_cast %731 : vector<10x1xf32> to vector<10x1xf32>
      %733 = vector.broadcast %732 : vector<10x1xf32> to vector<10x128xf32>
      %734 = arith.select %730, %733, %706 : vector<10x128xi1>, vector<10x128xf32>
      %735 = vector.extract_strided_slice %108 {offsets = [0, 89], sizes = [10, 1], strides = [1, 1]} : vector<10x128xi32> to vector<10x1xi32>
      %736 = vector.broadcast %735 : vector<10x1xi32> to vector<10x128xi32>
      %737 = arith.cmpi eq, %736, %78 : vector<10x128xi32>
      %738 = vector.extract_strided_slice %111 {offsets = [0, 89], sizes = [10, 1], strides = [1, 1]} : vector<10x128xf32> to vector<10x1xf32>
      %739 = vector.shape_cast %738 : vector<10x1xf32> to vector<10x1xf32>
      %740 = vector.broadcast %739 : vector<10x1xf32> to vector<10x128xf32>
      %741 = arith.select %737, %740, %713 : vector<10x128xi1>, vector<10x128xf32>
      %742 = vector.extract_strided_slice %108 {offsets = [0, 90], sizes = [10, 1], strides = [1, 1]} : vector<10x128xi32> to vector<10x1xi32>
      %743 = vector.broadcast %742 : vector<10x1xi32> to vector<10x128xi32>
      %744 = arith.cmpi eq, %743, %78 : vector<10x128xi32>
      %745 = vector.extract_strided_slice %111 {offsets = [0, 90], sizes = [10, 1], strides = [1, 1]} : vector<10x128xf32> to vector<10x1xf32>
      %746 = vector.shape_cast %745 : vector<10x1xf32> to vector<10x1xf32>
      %747 = vector.broadcast %746 : vector<10x1xf32> to vector<10x128xf32>
      %748 = arith.select %744, %747, %720 : vector<10x128xi1>, vector<10x128xf32>
      %749 = vector.extract_strided_slice %108 {offsets = [0, 91], sizes = [10, 1], strides = [1, 1]} : vector<10x128xi32> to vector<10x1xi32>
      %750 = vector.broadcast %749 : vector<10x1xi32> to vector<10x128xi32>
      %751 = arith.cmpi eq, %750, %78 : vector<10x128xi32>
      %752 = vector.extract_strided_slice %111 {offsets = [0, 91], sizes = [10, 1], strides = [1, 1]} : vector<10x128xf32> to vector<10x1xf32>
      %753 = vector.shape_cast %752 : vector<10x1xf32> to vector<10x1xf32>
      %754 = vector.broadcast %753 : vector<10x1xf32> to vector<10x128xf32>
      %755 = arith.select %751, %754, %727 : vector<10x128xi1>, vector<10x128xf32>
      %756 = vector.extract_strided_slice %108 {offsets = [0, 92], sizes = [10, 1], strides = [1, 1]} : vector<10x128xi32> to vector<10x1xi32>
      %757 = vector.broadcast %756 : vector<10x1xi32> to vector<10x128xi32>
      %758 = arith.cmpi eq, %757, %78 : vector<10x128xi32>
      %759 = vector.extract_strided_slice %111 {offsets = [0, 92], sizes = [10, 1], strides = [1, 1]} : vector<10x128xf32> to vector<10x1xf32>
      %760 = vector.shape_cast %759 : vector<10x1xf32> to vector<10x1xf32>
      %761 = vector.broadcast %760 : vector<10x1xf32> to vector<10x128xf32>
      %762 = arith.select %758, %761, %734 : vector<10x128xi1>, vector<10x128xf32>
      %763 = vector.extract_strided_slice %108 {offsets = [0, 93], sizes = [10, 1], strides = [1, 1]} : vector<10x128xi32> to vector<10x1xi32>
      %764 = vector.broadcast %763 : vector<10x1xi32> to vector<10x128xi32>
      %765 = arith.cmpi eq, %764, %78 : vector<10x128xi32>
      %766 = vector.extract_strided_slice %111 {offsets = [0, 93], sizes = [10, 1], strides = [1, 1]} : vector<10x128xf32> to vector<10x1xf32>
      %767 = vector.shape_cast %766 : vector<10x1xf32> to vector<10x1xf32>
      %768 = vector.broadcast %767 : vector<10x1xf32> to vector<10x128xf32>
      %769 = arith.select %765, %768, %741 : vector<10x128xi1>, vector<10x128xf32>
      %770 = vector.extract_strided_slice %108 {offsets = [0, 94], sizes = [10, 1], strides = [1, 1]} : vector<10x128xi32> to vector<10x1xi32>
      %771 = vector.broadcast %770 : vector<10x1xi32> to vector<10x128xi32>
      %772 = arith.cmpi eq, %771, %78 : vector<10x128xi32>
      %773 = vector.extract_strided_slice %111 {offsets = [0, 94], sizes = [10, 1], strides = [1, 1]} : vector<10x128xf32> to vector<10x1xf32>
      %774 = vector.shape_cast %773 : vector<10x1xf32> to vector<10x1xf32>
      %775 = vector.broadcast %774 : vector<10x1xf32> to vector<10x128xf32>
      %776 = arith.select %772, %775, %748 : vector<10x128xi1>, vector<10x128xf32>
      %777 = vector.extract_strided_slice %108 {offsets = [0, 95], sizes = [10, 1], strides = [1, 1]} : vector<10x128xi32> to vector<10x1xi32>
      %778 = vector.broadcast %777 : vector<10x1xi32> to vector<10x128xi32>
      %779 = arith.cmpi eq, %778, %78 : vector<10x128xi32>
      %780 = vector.extract_strided_slice %111 {offsets = [0, 95], sizes = [10, 1], strides = [1, 1]} : vector<10x128xf32> to vector<10x1xf32>
      %781 = vector.shape_cast %780 : vector<10x1xf32> to vector<10x1xf32>
      %782 = vector.broadcast %781 : vector<10x1xf32> to vector<10x128xf32>
      %783 = arith.select %779, %782, %755 : vector<10x128xi1>, vector<10x128xf32>
      %784 = vector.extract_strided_slice %108 {offsets = [0, 96], sizes = [10, 1], strides = [1, 1]} : vector<10x128xi32> to vector<10x1xi32>
      %785 = vector.broadcast %784 : vector<10x1xi32> to vector<10x128xi32>
      %786 = arith.cmpi eq, %785, %78 : vector<10x128xi32>
      %787 = vector.extract_strided_slice %111 {offsets = [0, 96], sizes = [10, 1], strides = [1, 1]} : vector<10x128xf32> to vector<10x1xf32>
      %788 = vector.shape_cast %787 : vector<10x1xf32> to vector<10x1xf32>
      %789 = vector.broadcast %788 : vector<10x1xf32> to vector<10x128xf32>
      %790 = arith.select %786, %789, %762 : vector<10x128xi1>, vector<10x128xf32>
      %791 = vector.extract_strided_slice %108 {offsets = [0, 97], sizes = [10, 1], strides = [1, 1]} : vector<10x128xi32> to vector<10x1xi32>
      %792 = vector.broadcast %791 : vector<10x1xi32> to vector<10x128xi32>
      %793 = arith.cmpi eq, %792, %78 : vector<10x128xi32>
      %794 = vector.extract_strided_slice %111 {offsets = [0, 97], sizes = [10, 1], strides = [1, 1]} : vector<10x128xf32> to vector<10x1xf32>
      %795 = vector.shape_cast %794 : vector<10x1xf32> to vector<10x1xf32>
      %796 = vector.broadcast %795 : vector<10x1xf32> to vector<10x128xf32>
      %797 = arith.select %793, %796, %769 : vector<10x128xi1>, vector<10x128xf32>
      %798 = vector.extract_strided_slice %108 {offsets = [0, 98], sizes = [10, 1], strides = [1, 1]} : vector<10x128xi32> to vector<10x1xi32>
      %799 = vector.broadcast %798 : vector<10x1xi32> to vector<10x128xi32>
      %800 = arith.cmpi eq, %799, %78 : vector<10x128xi32>
      %801 = vector.extract_strided_slice %111 {offsets = [0, 98], sizes = [10, 1], strides = [1, 1]} : vector<10x128xf32> to vector<10x1xf32>
      %802 = vector.shape_cast %801 : vector<10x1xf32> to vector<10x1xf32>
      %803 = vector.broadcast %802 : vector<10x1xf32> to vector<10x128xf32>
      %804 = arith.select %800, %803, %776 : vector<10x128xi1>, vector<10x128xf32>
      %805 = vector.extract_strided_slice %108 {offsets = [0, 99], sizes = [10, 1], strides = [1, 1]} : vector<10x128xi32> to vector<10x1xi32>
      %806 = vector.broadcast %805 : vector<10x1xi32> to vector<10x128xi32>
      %807 = arith.cmpi eq, %806, %78 : vector<10x128xi32>
      %808 = vector.extract_strided_slice %111 {offsets = [0, 99], sizes = [10, 1], strides = [1, 1]} : vector<10x128xf32> to vector<10x1xf32>
      %809 = vector.shape_cast %808 : vector<10x1xf32> to vector<10x1xf32>
      %810 = vector.broadcast %809 : vector<10x1xf32> to vector<10x128xf32>
      %811 = arith.select %807, %810, %783 : vector<10x128xi1>, vector<10x128xf32>
      %812 = vector.extract_strided_slice %108 {offsets = [0, 100], sizes = [10, 1], strides = [1, 1]} : vector<10x128xi32> to vector<10x1xi32>
      %813 = vector.broadcast %812 : vector<10x1xi32> to vector<10x128xi32>
      %814 = arith.cmpi eq, %813, %78 : vector<10x128xi32>
      %815 = vector.extract_strided_slice %111 {offsets = [0, 100], sizes = [10, 1], strides = [1, 1]} : vector<10x128xf32> to vector<10x1xf32>
      %816 = vector.shape_cast %815 : vector<10x1xf32> to vector<10x1xf32>
      %817 = vector.broadcast %816 : vector<10x1xf32> to vector<10x128xf32>
      %818 = arith.select %814, %817, %790 : vector<10x128xi1>, vector<10x128xf32>
      %819 = vector.extract_strided_slice %108 {offsets = [0, 101], sizes = [10, 1], strides = [1, 1]} : vector<10x128xi32> to vector<10x1xi32>
      %820 = vector.broadcast %819 : vector<10x1xi32> to vector<10x128xi32>
      %821 = arith.cmpi eq, %820, %78 : vector<10x128xi32>
      %822 = vector.extract_strided_slice %111 {offsets = [0, 101], sizes = [10, 1], strides = [1, 1]} : vector<10x128xf32> to vector<10x1xf32>
      %823 = vector.shape_cast %822 : vector<10x1xf32> to vector<10x1xf32>
      %824 = vector.broadcast %823 : vector<10x1xf32> to vector<10x128xf32>
      %825 = arith.select %821, %824, %797 : vector<10x128xi1>, vector<10x128xf32>
      %826 = vector.extract_strided_slice %108 {offsets = [0, 102], sizes = [10, 1], strides = [1, 1]} : vector<10x128xi32> to vector<10x1xi32>
      %827 = vector.broadcast %826 : vector<10x1xi32> to vector<10x128xi32>
      %828 = arith.cmpi eq, %827, %78 : vector<10x128xi32>
      %829 = vector.extract_strided_slice %111 {offsets = [0, 102], sizes = [10, 1], strides = [1, 1]} : vector<10x128xf32> to vector<10x1xf32>
      %830 = vector.shape_cast %829 : vector<10x1xf32> to vector<10x1xf32>
      %831 = vector.broadcast %830 : vector<10x1xf32> to vector<10x128xf32>
      %832 = arith.select %828, %831, %804 : vector<10x128xi1>, vector<10x128xf32>
      %833 = vector.extract_strided_slice %108 {offsets = [0, 103], sizes = [10, 1], strides = [1, 1]} : vector<10x128xi32> to vector<10x1xi32>
      %834 = vector.broadcast %833 : vector<10x1xi32> to vector<10x128xi32>
      %835 = arith.cmpi eq, %834, %78 : vector<10x128xi32>
      %836 = vector.extract_strided_slice %111 {offsets = [0, 103], sizes = [10, 1], strides = [1, 1]} : vector<10x128xf32> to vector<10x1xf32>
      %837 = vector.shape_cast %836 : vector<10x1xf32> to vector<10x1xf32>
      %838 = vector.broadcast %837 : vector<10x1xf32> to vector<10x128xf32>
      %839 = arith.select %835, %838, %811 : vector<10x128xi1>, vector<10x128xf32>
      %840 = vector.extract_strided_slice %108 {offsets = [0, 104], sizes = [10, 1], strides = [1, 1]} : vector<10x128xi32> to vector<10x1xi32>
      %841 = vector.broadcast %840 : vector<10x1xi32> to vector<10x128xi32>
      %842 = arith.cmpi eq, %841, %78 : vector<10x128xi32>
      %843 = vector.extract_strided_slice %111 {offsets = [0, 104], sizes = [10, 1], strides = [1, 1]} : vector<10x128xf32> to vector<10x1xf32>
      %844 = vector.shape_cast %843 : vector<10x1xf32> to vector<10x1xf32>
      %845 = vector.broadcast %844 : vector<10x1xf32> to vector<10x128xf32>
      %846 = arith.select %842, %845, %818 : vector<10x128xi1>, vector<10x128xf32>
      %847 = vector.extract_strided_slice %108 {offsets = [0, 105], sizes = [10, 1], strides = [1, 1]} : vector<10x128xi32> to vector<10x1xi32>
      %848 = vector.broadcast %847 : vector<10x1xi32> to vector<10x128xi32>
      %849 = arith.cmpi eq, %848, %78 : vector<10x128xi32>
      %850 = vector.extract_strided_slice %111 {offsets = [0, 105], sizes = [10, 1], strides = [1, 1]} : vector<10x128xf32> to vector<10x1xf32>
      %851 = vector.shape_cast %850 : vector<10x1xf32> to vector<10x1xf32>
      %852 = vector.broadcast %851 : vector<10x1xf32> to vector<10x128xf32>
      %853 = arith.select %849, %852, %825 : vector<10x128xi1>, vector<10x128xf32>
      %854 = vector.extract_strided_slice %108 {offsets = [0, 106], sizes = [10, 1], strides = [1, 1]} : vector<10x128xi32> to vector<10x1xi32>
      %855 = vector.broadcast %854 : vector<10x1xi32> to vector<10x128xi32>
      %856 = arith.cmpi eq, %855, %78 : vector<10x128xi32>
      %857 = vector.extract_strided_slice %111 {offsets = [0, 106], sizes = [10, 1], strides = [1, 1]} : vector<10x128xf32> to vector<10x1xf32>
      %858 = vector.shape_cast %857 : vector<10x1xf32> to vector<10x1xf32>
      %859 = vector.broadcast %858 : vector<10x1xf32> to vector<10x128xf32>
      %860 = arith.select %856, %859, %832 : vector<10x128xi1>, vector<10x128xf32>
      %861 = vector.extract_strided_slice %108 {offsets = [0, 107], sizes = [10, 1], strides = [1, 1]} : vector<10x128xi32> to vector<10x1xi32>
      %862 = vector.broadcast %861 : vector<10x1xi32> to vector<10x128xi32>
      %863 = arith.cmpi eq, %862, %78 : vector<10x128xi32>
      %864 = vector.extract_strided_slice %111 {offsets = [0, 107], sizes = [10, 1], strides = [1, 1]} : vector<10x128xf32> to vector<10x1xf32>
      %865 = vector.shape_cast %864 : vector<10x1xf32> to vector<10x1xf32>
      %866 = vector.broadcast %865 : vector<10x1xf32> to vector<10x128xf32>
      %867 = arith.select %863, %866, %839 : vector<10x128xi1>, vector<10x128xf32>
      %868 = vector.extract_strided_slice %108 {offsets = [0, 108], sizes = [10, 1], strides = [1, 1]} : vector<10x128xi32> to vector<10x1xi32>
      %869 = vector.broadcast %868 : vector<10x1xi32> to vector<10x128xi32>
      %870 = arith.cmpi eq, %869, %78 : vector<10x128xi32>
      %871 = vector.extract_strided_slice %111 {offsets = [0, 108], sizes = [10, 1], strides = [1, 1]} : vector<10x128xf32> to vector<10x1xf32>
      %872 = vector.shape_cast %871 : vector<10x1xf32> to vector<10x1xf32>
      %873 = vector.broadcast %872 : vector<10x1xf32> to vector<10x128xf32>
      %874 = arith.select %870, %873, %846 : vector<10x128xi1>, vector<10x128xf32>
      %875 = vector.extract_strided_slice %108 {offsets = [0, 109], sizes = [10, 1], strides = [1, 1]} : vector<10x128xi32> to vector<10x1xi32>
      %876 = vector.broadcast %875 : vector<10x1xi32> to vector<10x128xi32>
      %877 = arith.cmpi eq, %876, %78 : vector<10x128xi32>
      %878 = vector.extract_strided_slice %111 {offsets = [0, 109], sizes = [10, 1], strides = [1, 1]} : vector<10x128xf32> to vector<10x1xf32>
      %879 = vector.shape_cast %878 : vector<10x1xf32> to vector<10x1xf32>
      %880 = vector.broadcast %879 : vector<10x1xf32> to vector<10x128xf32>
      %881 = arith.select %877, %880, %853 : vector<10x128xi1>, vector<10x128xf32>
      %882 = vector.extract_strided_slice %108 {offsets = [0, 110], sizes = [10, 1], strides = [1, 1]} : vector<10x128xi32> to vector<10x1xi32>
      %883 = vector.broadcast %882 : vector<10x1xi32> to vector<10x128xi32>
      %884 = arith.cmpi eq, %883, %78 : vector<10x128xi32>
      %885 = vector.extract_strided_slice %111 {offsets = [0, 110], sizes = [10, 1], strides = [1, 1]} : vector<10x128xf32> to vector<10x1xf32>
      %886 = vector.shape_cast %885 : vector<10x1xf32> to vector<10x1xf32>
      %887 = vector.broadcast %886 : vector<10x1xf32> to vector<10x128xf32>
      %888 = arith.select %884, %887, %860 : vector<10x128xi1>, vector<10x128xf32>
      %889 = vector.extract_strided_slice %108 {offsets = [0, 111], sizes = [10, 1], strides = [1, 1]} : vector<10x128xi32> to vector<10x1xi32>
      %890 = vector.broadcast %889 : vector<10x1xi32> to vector<10x128xi32>
      %891 = arith.cmpi eq, %890, %78 : vector<10x128xi32>
      %892 = vector.extract_strided_slice %111 {offsets = [0, 111], sizes = [10, 1], strides = [1, 1]} : vector<10x128xf32> to vector<10x1xf32>
      %893 = vector.shape_cast %892 : vector<10x1xf32> to vector<10x1xf32>
      %894 = vector.broadcast %893 : vector<10x1xf32> to vector<10x128xf32>
      %895 = arith.select %891, %894, %867 : vector<10x128xi1>, vector<10x128xf32>
      %896 = vector.extract_strided_slice %108 {offsets = [0, 112], sizes = [10, 1], strides = [1, 1]} : vector<10x128xi32> to vector<10x1xi32>
      %897 = vector.broadcast %896 : vector<10x1xi32> to vector<10x128xi32>
      %898 = arith.cmpi eq, %897, %78 : vector<10x128xi32>
      %899 = vector.extract_strided_slice %111 {offsets = [0, 112], sizes = [10, 1], strides = [1, 1]} : vector<10x128xf32> to vector<10x1xf32>
      %900 = vector.shape_cast %899 : vector<10x1xf32> to vector<10x1xf32>
      %901 = vector.broadcast %900 : vector<10x1xf32> to vector<10x128xf32>
      %902 = arith.select %898, %901, %874 : vector<10x128xi1>, vector<10x128xf32>
      %903 = vector.extract_strided_slice %108 {offsets = [0, 113], sizes = [10, 1], strides = [1, 1]} : vector<10x128xi32> to vector<10x1xi32>
      %904 = vector.broadcast %903 : vector<10x1xi32> to vector<10x128xi32>
      %905 = arith.cmpi eq, %904, %78 : vector<10x128xi32>
      %906 = vector.extract_strided_slice %111 {offsets = [0, 113], sizes = [10, 1], strides = [1, 1]} : vector<10x128xf32> to vector<10x1xf32>
      %907 = vector.shape_cast %906 : vector<10x1xf32> to vector<10x1xf32>
      %908 = vector.broadcast %907 : vector<10x1xf32> to vector<10x128xf32>
      %909 = arith.select %905, %908, %881 : vector<10x128xi1>, vector<10x128xf32>
      %910 = vector.extract_strided_slice %108 {offsets = [0, 114], sizes = [10, 1], strides = [1, 1]} : vector<10x128xi32> to vector<10x1xi32>
      %911 = vector.broadcast %910 : vector<10x1xi32> to vector<10x128xi32>
      %912 = arith.cmpi eq, %911, %78 : vector<10x128xi32>
      %913 = vector.extract_strided_slice %111 {offsets = [0, 114], sizes = [10, 1], strides = [1, 1]} : vector<10x128xf32> to vector<10x1xf32>
      %914 = vector.shape_cast %913 : vector<10x1xf32> to vector<10x1xf32>
      %915 = vector.broadcast %914 : vector<10x1xf32> to vector<10x128xf32>
      %916 = arith.select %912, %915, %888 : vector<10x128xi1>, vector<10x128xf32>
      %917 = vector.extract_strided_slice %108 {offsets = [0, 115], sizes = [10, 1], strides = [1, 1]} : vector<10x128xi32> to vector<10x1xi32>
      %918 = vector.broadcast %917 : vector<10x1xi32> to vector<10x128xi32>
      %919 = arith.cmpi eq, %918, %78 : vector<10x128xi32>
      %920 = vector.extract_strided_slice %111 {offsets = [0, 115], sizes = [10, 1], strides = [1, 1]} : vector<10x128xf32> to vector<10x1xf32>
      %921 = vector.shape_cast %920 : vector<10x1xf32> to vector<10x1xf32>
      %922 = vector.broadcast %921 : vector<10x1xf32> to vector<10x128xf32>
      %923 = arith.select %919, %922, %895 : vector<10x128xi1>, vector<10x128xf32>
      %924 = vector.extract_strided_slice %108 {offsets = [0, 116], sizes = [10, 1], strides = [1, 1]} : vector<10x128xi32> to vector<10x1xi32>
      %925 = vector.broadcast %924 : vector<10x1xi32> to vector<10x128xi32>
      %926 = arith.cmpi eq, %925, %78 : vector<10x128xi32>
      %927 = vector.extract_strided_slice %111 {offsets = [0, 116], sizes = [10, 1], strides = [1, 1]} : vector<10x128xf32> to vector<10x1xf32>
      %928 = vector.shape_cast %927 : vector<10x1xf32> to vector<10x1xf32>
      %929 = vector.broadcast %928 : vector<10x1xf32> to vector<10x128xf32>
      %930 = arith.select %926, %929, %902 : vector<10x128xi1>, vector<10x128xf32>
      %931 = vector.extract_strided_slice %108 {offsets = [0, 117], sizes = [10, 1], strides = [1, 1]} : vector<10x128xi32> to vector<10x1xi32>
      %932 = vector.broadcast %931 : vector<10x1xi32> to vector<10x128xi32>
      %933 = arith.cmpi eq, %932, %78 : vector<10x128xi32>
      %934 = vector.extract_strided_slice %111 {offsets = [0, 117], sizes = [10, 1], strides = [1, 1]} : vector<10x128xf32> to vector<10x1xf32>
      %935 = vector.shape_cast %934 : vector<10x1xf32> to vector<10x1xf32>
      %936 = vector.broadcast %935 : vector<10x1xf32> to vector<10x128xf32>
      %937 = arith.select %933, %936, %909 : vector<10x128xi1>, vector<10x128xf32>
      %938 = vector.extract_strided_slice %108 {offsets = [0, 118], sizes = [10, 1], strides = [1, 1]} : vector<10x128xi32> to vector<10x1xi32>
      %939 = vector.broadcast %938 : vector<10x1xi32> to vector<10x128xi32>
      %940 = arith.cmpi eq, %939, %78 : vector<10x128xi32>
      %941 = vector.extract_strided_slice %111 {offsets = [0, 118], sizes = [10, 1], strides = [1, 1]} : vector<10x128xf32> to vector<10x1xf32>
      %942 = vector.shape_cast %941 : vector<10x1xf32> to vector<10x1xf32>
      %943 = vector.broadcast %942 : vector<10x1xf32> to vector<10x128xf32>
      %944 = arith.select %940, %943, %916 : vector<10x128xi1>, vector<10x128xf32>
      %945 = vector.extract_strided_slice %108 {offsets = [0, 119], sizes = [10, 1], strides = [1, 1]} : vector<10x128xi32> to vector<10x1xi32>
      %946 = vector.broadcast %945 : vector<10x1xi32> to vector<10x128xi32>
      %947 = arith.cmpi eq, %946, %78 : vector<10x128xi32>
      %948 = vector.extract_strided_slice %111 {offsets = [0, 119], sizes = [10, 1], strides = [1, 1]} : vector<10x128xf32> to vector<10x1xf32>
      %949 = vector.shape_cast %948 : vector<10x1xf32> to vector<10x1xf32>
      %950 = vector.broadcast %949 : vector<10x1xf32> to vector<10x128xf32>
      %951 = arith.select %947, %950, %923 : vector<10x128xi1>, vector<10x128xf32>
      %952 = vector.extract_strided_slice %108 {offsets = [0, 120], sizes = [10, 1], strides = [1, 1]} : vector<10x128xi32> to vector<10x1xi32>
      %953 = vector.broadcast %952 : vector<10x1xi32> to vector<10x128xi32>
      %954 = arith.cmpi eq, %953, %78 : vector<10x128xi32>
      %955 = vector.extract_strided_slice %111 {offsets = [0, 120], sizes = [10, 1], strides = [1, 1]} : vector<10x128xf32> to vector<10x1xf32>
      %956 = vector.shape_cast %955 : vector<10x1xf32> to vector<10x1xf32>
      %957 = vector.broadcast %956 : vector<10x1xf32> to vector<10x128xf32>
      %958 = arith.select %954, %957, %930 : vector<10x128xi1>, vector<10x128xf32>
      %959 = vector.extract_strided_slice %108 {offsets = [0, 121], sizes = [10, 1], strides = [1, 1]} : vector<10x128xi32> to vector<10x1xi32>
      %960 = vector.broadcast %959 : vector<10x1xi32> to vector<10x128xi32>
      %961 = arith.cmpi eq, %960, %78 : vector<10x128xi32>
      %962 = vector.extract_strided_slice %111 {offsets = [0, 121], sizes = [10, 1], strides = [1, 1]} : vector<10x128xf32> to vector<10x1xf32>
      %963 = vector.shape_cast %962 : vector<10x1xf32> to vector<10x1xf32>
      %964 = vector.broadcast %963 : vector<10x1xf32> to vector<10x128xf32>
      %965 = arith.select %961, %964, %937 : vector<10x128xi1>, vector<10x128xf32>
      %966 = vector.extract_strided_slice %108 {offsets = [0, 122], sizes = [10, 1], strides = [1, 1]} : vector<10x128xi32> to vector<10x1xi32>
      %967 = vector.broadcast %966 : vector<10x1xi32> to vector<10x128xi32>
      %968 = arith.cmpi eq, %967, %78 : vector<10x128xi32>
      %969 = vector.extract_strided_slice %111 {offsets = [0, 122], sizes = [10, 1], strides = [1, 1]} : vector<10x128xf32> to vector<10x1xf32>
      %970 = vector.shape_cast %969 : vector<10x1xf32> to vector<10x1xf32>
      %971 = vector.broadcast %970 : vector<10x1xf32> to vector<10x128xf32>
      %972 = arith.select %968, %971, %944 : vector<10x128xi1>, vector<10x128xf32>
      %973 = vector.extract_strided_slice %108 {offsets = [0, 123], sizes = [10, 1], strides = [1, 1]} : vector<10x128xi32> to vector<10x1xi32>
      %974 = vector.broadcast %973 : vector<10x1xi32> to vector<10x128xi32>
      %975 = arith.cmpi eq, %974, %78 : vector<10x128xi32>
      %976 = vector.extract_strided_slice %111 {offsets = [0, 123], sizes = [10, 1], strides = [1, 1]} : vector<10x128xf32> to vector<10x1xf32>
      %977 = vector.shape_cast %976 : vector<10x1xf32> to vector<10x1xf32>
      %978 = vector.broadcast %977 : vector<10x1xf32> to vector<10x128xf32>
      %979 = arith.select %975, %978, %951 : vector<10x128xi1>, vector<10x128xf32>
      %980 = vector.extract_strided_slice %108 {offsets = [0, 124], sizes = [10, 1], strides = [1, 1]} : vector<10x128xi32> to vector<10x1xi32>
      %981 = vector.broadcast %980 : vector<10x1xi32> to vector<10x128xi32>
      %982 = arith.cmpi eq, %981, %78 : vector<10x128xi32>
      %983 = vector.extract_strided_slice %111 {offsets = [0, 124], sizes = [10, 1], strides = [1, 1]} : vector<10x128xf32> to vector<10x1xf32>
      %984 = vector.shape_cast %983 : vector<10x1xf32> to vector<10x1xf32>
      %985 = vector.broadcast %984 : vector<10x1xf32> to vector<10x128xf32>
      %986 = arith.select %982, %985, %958 : vector<10x128xi1>, vector<10x128xf32>
      %987 = vector.extract_strided_slice %108 {offsets = [0, 125], sizes = [10, 1], strides = [1, 1]} : vector<10x128xi32> to vector<10x1xi32>
      %988 = vector.broadcast %987 : vector<10x1xi32> to vector<10x128xi32>
      %989 = arith.cmpi eq, %988, %78 : vector<10x128xi32>
      %990 = vector.extract_strided_slice %111 {offsets = [0, 125], sizes = [10, 1], strides = [1, 1]} : vector<10x128xf32> to vector<10x1xf32>
      %991 = vector.shape_cast %990 : vector<10x1xf32> to vector<10x1xf32>
      %992 = vector.broadcast %991 : vector<10x1xf32> to vector<10x128xf32>
      %993 = arith.select %989, %992, %965 : vector<10x128xi1>, vector<10x128xf32>
      %994 = vector.extract_strided_slice %108 {offsets = [0, 126], sizes = [10, 1], strides = [1, 1]} : vector<10x128xi32> to vector<10x1xi32>
      %995 = vector.broadcast %994 : vector<10x1xi32> to vector<10x128xi32>
      %996 = arith.cmpi eq, %995, %78 : vector<10x128xi32>
      %997 = vector.extract_strided_slice %111 {offsets = [0, 126], sizes = [10, 1], strides = [1, 1]} : vector<10x128xf32> to vector<10x1xf32>
      %998 = vector.shape_cast %997 : vector<10x1xf32> to vector<10x1xf32>
      %999 = vector.broadcast %998 : vector<10x1xf32> to vector<10x128xf32>
      %1000 = arith.select %996, %999, %972 : vector<10x128xi1>, vector<10x128xf32>
      %1001 = vector.extract_strided_slice %108 {offsets = [0, 127], sizes = [10, 1], strides = [1, 1]} : vector<10x128xi32> to vector<10x1xi32>
      %1002 = vector.broadcast %1001 : vector<10x1xi32> to vector<10x128xi32>
      %1003 = arith.cmpi eq, %1002, %78 : vector<10x128xi32>
      %1004 = vector.extract_strided_slice %111 {offsets = [0, 127], sizes = [10, 1], strides = [1, 1]} : vector<10x128xf32> to vector<10x1xf32>
      %1005 = vector.shape_cast %1004 : vector<10x1xf32> to vector<10x1xf32>
      %1006 = vector.broadcast %1005 : vector<10x1xf32> to vector<10x128xf32>
      %1007 = arith.select %1003, %1006, %979 : vector<10x128xi1>, vector<10x128xf32>
      %c1_i32_31 = arith.constant 1 : i32
      %c1_32 = arith.constant 1 : index
      %c0_33 = arith.constant 0 : index
      %c0_34 = arith.constant 0 : index
      %1008 = vector.load %arg8[%c1_32, %c0_33, %c0_34] : memref<2x10x128xi32, #tpu.memory_space<vmem>>, vector<1x10x128xi32>
      %1009 = vector.shape_cast %1008 : vector<1x10x128xi32> to vector<10x128xi32>
      %c1_35 = arith.constant 1 : index
      %c0_36 = arith.constant 0 : index
      %c0_37 = arith.constant 0 : index
      %1010 = vector.load %arg7[%c1_35, %c0_36, %c0_37] : memref<2x10x128xf32, #tpu.memory_space<vmem>>, vector<1x10x128xf32>
      %1011 = vector.shape_cast %1010 : vector<1x10x128xf32> to vector<10x128xf32>
      %1012 = vector.extract_strided_slice %1009 {offsets = [0, 0], sizes = [10, 1], strides = [1, 1]} : vector<10x128xi32> to vector<10x1xi32>
      %1013 = vector.broadcast %1012 : vector<10x1xi32> to vector<10x128xi32>
      %1014 = arith.cmpi eq, %1013, %78 : vector<10x128xi32>
      %1015 = vector.extract_strided_slice %1011 {offsets = [0, 0], sizes = [10, 1], strides = [1, 1]} : vector<10x128xf32> to vector<10x1xf32>
      %1016 = vector.shape_cast %1015 : vector<10x1xf32> to vector<10x1xf32>
      %1017 = vector.broadcast %1016 : vector<10x1xf32> to vector<10x128xf32>
      %1018 = arith.select %1014, %1017, %986 : vector<10x128xi1>, vector<10x128xf32>
      %1019 = vector.extract_strided_slice %1009 {offsets = [0, 1], sizes = [10, 1], strides = [1, 1]} : vector<10x128xi32> to vector<10x1xi32>
      %1020 = vector.broadcast %1019 : vector<10x1xi32> to vector<10x128xi32>
      %1021 = arith.cmpi eq, %1020, %78 : vector<10x128xi32>
      %1022 = vector.extract_strided_slice %1011 {offsets = [0, 1], sizes = [10, 1], strides = [1, 1]} : vector<10x128xf32> to vector<10x1xf32>
      %1023 = vector.shape_cast %1022 : vector<10x1xf32> to vector<10x1xf32>
      %1024 = vector.broadcast %1023 : vector<10x1xf32> to vector<10x128xf32>
      %1025 = arith.select %1021, %1024, %993 : vector<10x128xi1>, vector<10x128xf32>
      %1026 = vector.extract_strided_slice %1009 {offsets = [0, 2], sizes = [10, 1], strides = [1, 1]} : vector<10x128xi32> to vector<10x1xi32>
      %1027 = vector.broadcast %1026 : vector<10x1xi32> to vector<10x128xi32>
      %1028 = arith.cmpi eq, %1027, %78 : vector<10x128xi32>
      %1029 = vector.extract_strided_slice %1011 {offsets = [0, 2], sizes = [10, 1], strides = [1, 1]} : vector<10x128xf32> to vector<10x1xf32>
      %1030 = vector.shape_cast %1029 : vector<10x1xf32> to vector<10x1xf32>
      %1031 = vector.broadcast %1030 : vector<10x1xf32> to vector<10x128xf32>
      %1032 = arith.select %1028, %1031, %1000 : vector<10x128xi1>, vector<10x128xf32>
      %1033 = vector.extract_strided_slice %1009 {offsets = [0, 3], sizes = [10, 1], strides = [1, 1]} : vector<10x128xi32> to vector<10x1xi32>
      %1034 = vector.broadcast %1033 : vector<10x1xi32> to vector<10x128xi32>
      %1035 = arith.cmpi eq, %1034, %78 : vector<10x128xi32>
      %1036 = vector.extract_strided_slice %1011 {offsets = [0, 3], sizes = [10, 1], strides = [1, 1]} : vector<10x128xf32> to vector<10x1xf32>
      %1037 = vector.shape_cast %1036 : vector<10x1xf32> to vector<10x1xf32>
      %1038 = vector.broadcast %1037 : vector<10x1xf32> to vector<10x128xf32>
      %1039 = arith.select %1035, %1038, %1007 : vector<10x128xi1>, vector<10x128xf32>
      %1040 = vector.extract_strided_slice %1009 {offsets = [0, 4], sizes = [10, 1], strides = [1, 1]} : vector<10x128xi32> to vector<10x1xi32>
      %1041 = vector.broadcast %1040 : vector<10x1xi32> to vector<10x128xi32>
      %1042 = arith.cmpi eq, %1041, %78 : vector<10x128xi32>
      %1043 = vector.extract_strided_slice %1011 {offsets = [0, 4], sizes = [10, 1], strides = [1, 1]} : vector<10x128xf32> to vector<10x1xf32>
      %1044 = vector.shape_cast %1043 : vector<10x1xf32> to vector<10x1xf32>
      %1045 = vector.broadcast %1044 : vector<10x1xf32> to vector<10x128xf32>
      %1046 = arith.select %1042, %1045, %1018 : vector<10x128xi1>, vector<10x128xf32>
      %1047 = vector.extract_strided_slice %1009 {offsets = [0, 5], sizes = [10, 1], strides = [1, 1]} : vector<10x128xi32> to vector<10x1xi32>
      %1048 = vector.broadcast %1047 : vector<10x1xi32> to vector<10x128xi32>
      %1049 = arith.cmpi eq, %1048, %78 : vector<10x128xi32>
      %1050 = vector.extract_strided_slice %1011 {offsets = [0, 5], sizes = [10, 1], strides = [1, 1]} : vector<10x128xf32> to vector<10x1xf32>
      %1051 = vector.shape_cast %1050 : vector<10x1xf32> to vector<10x1xf32>
      %1052 = vector.broadcast %1051 : vector<10x1xf32> to vector<10x128xf32>
      %1053 = arith.select %1049, %1052, %1025 : vector<10x128xi1>, vector<10x128xf32>
      %1054 = vector.extract_strided_slice %1009 {offsets = [0, 6], sizes = [10, 1], strides = [1, 1]} : vector<10x128xi32> to vector<10x1xi32>
      %1055 = vector.broadcast %1054 : vector<10x1xi32> to vector<10x128xi32>
      %1056 = arith.cmpi eq, %1055, %78 : vector<10x128xi32>
      %1057 = vector.extract_strided_slice %1011 {offsets = [0, 6], sizes = [10, 1], strides = [1, 1]} : vector<10x128xf32> to vector<10x1xf32>
      %1058 = vector.shape_cast %1057 : vector<10x1xf32> to vector<10x1xf32>
      %1059 = vector.broadcast %1058 : vector<10x1xf32> to vector<10x128xf32>
      %1060 = arith.select %1056, %1059, %1032 : vector<10x128xi1>, vector<10x128xf32>
      %1061 = vector.extract_strided_slice %1009 {offsets = [0, 7], sizes = [10, 1], strides = [1, 1]} : vector<10x128xi32> to vector<10x1xi32>
      %1062 = vector.broadcast %1061 : vector<10x1xi32> to vector<10x128xi32>
      %1063 = arith.cmpi eq, %1062, %78 : vector<10x128xi32>
      %1064 = vector.extract_strided_slice %1011 {offsets = [0, 7], sizes = [10, 1], strides = [1, 1]} : vector<10x128xf32> to vector<10x1xf32>
      %1065 = vector.shape_cast %1064 : vector<10x1xf32> to vector<10x1xf32>
      %1066 = vector.broadcast %1065 : vector<10x1xf32> to vector<10x128xf32>
      %1067 = arith.select %1063, %1066, %1039 : vector<10x128xi1>, vector<10x128xf32>
      %1068 = vector.extract_strided_slice %1009 {offsets = [0, 8], sizes = [10, 1], strides = [1, 1]} : vector<10x128xi32> to vector<10x1xi32>
      %1069 = vector.broadcast %1068 : vector<10x1xi32> to vector<10x128xi32>
      %1070 = arith.cmpi eq, %1069, %78 : vector<10x128xi32>
      %1071 = vector.extract_strided_slice %1011 {offsets = [0, 8], sizes = [10, 1], strides = [1, 1]} : vector<10x128xf32> to vector<10x1xf32>
      %1072 = vector.shape_cast %1071 : vector<10x1xf32> to vector<10x1xf32>
      %1073 = vector.broadcast %1072 : vector<10x1xf32> to vector<10x128xf32>
      %1074 = arith.select %1070, %1073, %1046 : vector<10x128xi1>, vector<10x128xf32>
      %1075 = vector.extract_strided_slice %1009 {offsets = [0, 9], sizes = [10, 1], strides = [1, 1]} : vector<10x128xi32> to vector<10x1xi32>
      %1076 = vector.broadcast %1075 : vector<10x1xi32> to vector<10x128xi32>
      %1077 = arith.cmpi eq, %1076, %78 : vector<10x128xi32>
      %1078 = vector.extract_strided_slice %1011 {offsets = [0, 9], sizes = [10, 1], strides = [1, 1]} : vector<10x128xf32> to vector<10x1xf32>
      %1079 = vector.shape_cast %1078 : vector<10x1xf32> to vector<10x1xf32>
      %1080 = vector.broadcast %1079 : vector<10x1xf32> to vector<10x128xf32>
      %1081 = arith.select %1077, %1080, %1053 : vector<10x128xi1>, vector<10x128xf32>
      %1082 = vector.extract_strided_slice %1009 {offsets = [0, 10], sizes = [10, 1], strides = [1, 1]} : vector<10x128xi32> to vector<10x1xi32>
      %1083 = vector.broadcast %1082 : vector<10x1xi32> to vector<10x128xi32>
      %1084 = arith.cmpi eq, %1083, %78 : vector<10x128xi32>
      %1085 = vector.extract_strided_slice %1011 {offsets = [0, 10], sizes = [10, 1], strides = [1, 1]} : vector<10x128xf32> to vector<10x1xf32>
      %1086 = vector.shape_cast %1085 : vector<10x1xf32> to vector<10x1xf32>
      %1087 = vector.broadcast %1086 : vector<10x1xf32> to vector<10x128xf32>
      %1088 = arith.select %1084, %1087, %1060 : vector<10x128xi1>, vector<10x128xf32>
      %1089 = vector.extract_strided_slice %1009 {offsets = [0, 11], sizes = [10, 1], strides = [1, 1]} : vector<10x128xi32> to vector<10x1xi32>
      %1090 = vector.broadcast %1089 : vector<10x1xi32> to vector<10x128xi32>
      %1091 = arith.cmpi eq, %1090, %78 : vector<10x128xi32>
      %1092 = vector.extract_strided_slice %1011 {offsets = [0, 11], sizes = [10, 1], strides = [1, 1]} : vector<10x128xf32> to vector<10x1xf32>
      %1093 = vector.shape_cast %1092 : vector<10x1xf32> to vector<10x1xf32>
      %1094 = vector.broadcast %1093 : vector<10x1xf32> to vector<10x128xf32>
      %1095 = arith.select %1091, %1094, %1067 : vector<10x128xi1>, vector<10x128xf32>
      %1096 = vector.extract_strided_slice %1009 {offsets = [0, 12], sizes = [10, 1], strides = [1, 1]} : vector<10x128xi32> to vector<10x1xi32>
      %1097 = vector.broadcast %1096 : vector<10x1xi32> to vector<10x128xi32>
      %1098 = arith.cmpi eq, %1097, %78 : vector<10x128xi32>
      %1099 = vector.extract_strided_slice %1011 {offsets = [0, 12], sizes = [10, 1], strides = [1, 1]} : vector<10x128xf32> to vector<10x1xf32>
      %1100 = vector.shape_cast %1099 : vector<10x1xf32> to vector<10x1xf32>
      %1101 = vector.broadcast %1100 : vector<10x1xf32> to vector<10x128xf32>
      %1102 = arith.select %1098, %1101, %1074 : vector<10x128xi1>, vector<10x128xf32>
      %1103 = vector.extract_strided_slice %1009 {offsets = [0, 13], sizes = [10, 1], strides = [1, 1]} : vector<10x128xi32> to vector<10x1xi32>
      %1104 = vector.broadcast %1103 : vector<10x1xi32> to vector<10x128xi32>
      %1105 = arith.cmpi eq, %1104, %78 : vector<10x128xi32>
      %1106 = vector.extract_strided_slice %1011 {offsets = [0, 13], sizes = [10, 1], strides = [1, 1]} : vector<10x128xf32> to vector<10x1xf32>
      %1107 = vector.shape_cast %1106 : vector<10x1xf32> to vector<10x1xf32>
      %1108 = vector.broadcast %1107 : vector<10x1xf32> to vector<10x128xf32>
      %1109 = arith.select %1105, %1108, %1081 : vector<10x128xi1>, vector<10x128xf32>
      %1110 = vector.extract_strided_slice %1009 {offsets = [0, 14], sizes = [10, 1], strides = [1, 1]} : vector<10x128xi32> to vector<10x1xi32>
      %1111 = vector.broadcast %1110 : vector<10x1xi32> to vector<10x128xi32>
      %1112 = arith.cmpi eq, %1111, %78 : vector<10x128xi32>
      %1113 = vector.extract_strided_slice %1011 {offsets = [0, 14], sizes = [10, 1], strides = [1, 1]} : vector<10x128xf32> to vector<10x1xf32>
      %1114 = vector.shape_cast %1113 : vector<10x1xf32> to vector<10x1xf32>
      %1115 = vector.broadcast %1114 : vector<10x1xf32> to vector<10x128xf32>
      %1116 = arith.select %1112, %1115, %1088 : vector<10x128xi1>, vector<10x128xf32>
      %1117 = vector.extract_strided_slice %1009 {offsets = [0, 15], sizes = [10, 1], strides = [1, 1]} : vector<10x128xi32> to vector<10x1xi32>
      %1118 = vector.broadcast %1117 : vector<10x1xi32> to vector<10x128xi32>
      %1119 = arith.cmpi eq, %1118, %78 : vector<10x128xi32>
      %1120 = vector.extract_strided_slice %1011 {offsets = [0, 15], sizes = [10, 1], strides = [1, 1]} : vector<10x128xf32> to vector<10x1xf32>
      %1121 = vector.shape_cast %1120 : vector<10x1xf32> to vector<10x1xf32>
      %1122 = vector.broadcast %1121 : vector<10x1xf32> to vector<10x128xf32>
      %1123 = arith.select %1119, %1122, %1095 : vector<10x128xi1>, vector<10x128xf32>
      %1124 = vector.extract_strided_slice %1009 {offsets = [0, 16], sizes = [10, 1], strides = [1, 1]} : vector<10x128xi32> to vector<10x1xi32>
      %1125 = vector.broadcast %1124 : vector<10x1xi32> to vector<10x128xi32>
      %1126 = arith.cmpi eq, %1125, %78 : vector<10x128xi32>
      %1127 = vector.extract_strided_slice %1011 {offsets = [0, 16], sizes = [10, 1], strides = [1, 1]} : vector<10x128xf32> to vector<10x1xf32>
      %1128 = vector.shape_cast %1127 : vector<10x1xf32> to vector<10x1xf32>
      %1129 = vector.broadcast %1128 : vector<10x1xf32> to vector<10x128xf32>
      %1130 = arith.select %1126, %1129, %1102 : vector<10x128xi1>, vector<10x128xf32>
      %1131 = vector.extract_strided_slice %1009 {offsets = [0, 17], sizes = [10, 1], strides = [1, 1]} : vector<10x128xi32> to vector<10x1xi32>
      %1132 = vector.broadcast %1131 : vector<10x1xi32> to vector<10x128xi32>
      %1133 = arith.cmpi eq, %1132, %78 : vector<10x128xi32>
      %1134 = vector.extract_strided_slice %1011 {offsets = [0, 17], sizes = [10, 1], strides = [1, 1]} : vector<10x128xf32> to vector<10x1xf32>
      %1135 = vector.shape_cast %1134 : vector<10x1xf32> to vector<10x1xf32>
      %1136 = vector.broadcast %1135 : vector<10x1xf32> to vector<10x128xf32>
      %1137 = arith.select %1133, %1136, %1109 : vector<10x128xi1>, vector<10x128xf32>
      %1138 = vector.extract_strided_slice %1009 {offsets = [0, 18], sizes = [10, 1], strides = [1, 1]} : vector<10x128xi32> to vector<10x1xi32>
      %1139 = vector.broadcast %1138 : vector<10x1xi32> to vector<10x128xi32>
      %1140 = arith.cmpi eq, %1139, %78 : vector<10x128xi32>
      %1141 = vector.extract_strided_slice %1011 {offsets = [0, 18], sizes = [10, 1], strides = [1, 1]} : vector<10x128xf32> to vector<10x1xf32>
      %1142 = vector.shape_cast %1141 : vector<10x1xf32> to vector<10x1xf32>
      %1143 = vector.broadcast %1142 : vector<10x1xf32> to vector<10x128xf32>
      %1144 = arith.select %1140, %1143, %1116 : vector<10x128xi1>, vector<10x128xf32>
      %1145 = vector.extract_strided_slice %1009 {offsets = [0, 19], sizes = [10, 1], strides = [1, 1]} : vector<10x128xi32> to vector<10x1xi32>
      %1146 = vector.broadcast %1145 : vector<10x1xi32> to vector<10x128xi32>
      %1147 = arith.cmpi eq, %1146, %78 : vector<10x128xi32>
      %1148 = vector.extract_strided_slice %1011 {offsets = [0, 19], sizes = [10, 1], strides = [1, 1]} : vector<10x128xf32> to vector<10x1xf32>
      %1149 = vector.shape_cast %1148 : vector<10x1xf32> to vector<10x1xf32>
      %1150 = vector.broadcast %1149 : vector<10x1xf32> to vector<10x128xf32>
      %1151 = arith.select %1147, %1150, %1123 : vector<10x128xi1>, vector<10x128xf32>
      %1152 = vector.extract_strided_slice %1009 {offsets = [0, 20], sizes = [10, 1], strides = [1, 1]} : vector<10x128xi32> to vector<10x1xi32>
      %1153 = vector.broadcast %1152 : vector<10x1xi32> to vector<10x128xi32>
      %1154 = arith.cmpi eq, %1153, %78 : vector<10x128xi32>
      %1155 = vector.extract_strided_slice %1011 {offsets = [0, 20], sizes = [10, 1], strides = [1, 1]} : vector<10x128xf32> to vector<10x1xf32>
      %1156 = vector.shape_cast %1155 : vector<10x1xf32> to vector<10x1xf32>
      %1157 = vector.broadcast %1156 : vector<10x1xf32> to vector<10x128xf32>
      %1158 = arith.select %1154, %1157, %1130 : vector<10x128xi1>, vector<10x128xf32>
      %1159 = vector.extract_strided_slice %1009 {offsets = [0, 21], sizes = [10, 1], strides = [1, 1]} : vector<10x128xi32> to vector<10x1xi32>
      %1160 = vector.broadcast %1159 : vector<10x1xi32> to vector<10x128xi32>
      %1161 = arith.cmpi eq, %1160, %78 : vector<10x128xi32>
      %1162 = vector.extract_strided_slice %1011 {offsets = [0, 21], sizes = [10, 1], strides = [1, 1]} : vector<10x128xf32> to vector<10x1xf32>
      %1163 = vector.shape_cast %1162 : vector<10x1xf32> to vector<10x1xf32>
      %1164 = vector.broadcast %1163 : vector<10x1xf32> to vector<10x128xf32>
      %1165 = arith.select %1161, %1164, %1137 : vector<10x128xi1>, vector<10x128xf32>
      %1166 = vector.extract_strided_slice %1009 {offsets = [0, 22], sizes = [10, 1], strides = [1, 1]} : vector<10x128xi32> to vector<10x1xi32>
      %1167 = vector.broadcast %1166 : vector<10x1xi32> to vector<10x128xi32>
      %1168 = arith.cmpi eq, %1167, %78 : vector<10x128xi32>
      %1169 = vector.extract_strided_slice %1011 {offsets = [0, 22], sizes = [10, 1], strides = [1, 1]} : vector<10x128xf32> to vector<10x1xf32>
      %1170 = vector.shape_cast %1169 : vector<10x1xf32> to vector<10x1xf32>
      %1171 = vector.broadcast %1170 : vector<10x1xf32> to vector<10x128xf32>
      %1172 = arith.select %1168, %1171, %1144 : vector<10x128xi1>, vector<10x128xf32>
      %1173 = vector.extract_strided_slice %1009 {offsets = [0, 23], sizes = [10, 1], strides = [1, 1]} : vector<10x128xi32> to vector<10x1xi32>
      %1174 = vector.broadcast %1173 : vector<10x1xi32> to vector<10x128xi32>
      %1175 = arith.cmpi eq, %1174, %78 : vector<10x128xi32>
      %1176 = vector.extract_strided_slice %1011 {offsets = [0, 23], sizes = [10, 1], strides = [1, 1]} : vector<10x128xf32> to vector<10x1xf32>
      %1177 = vector.shape_cast %1176 : vector<10x1xf32> to vector<10x1xf32>
      %1178 = vector.broadcast %1177 : vector<10x1xf32> to vector<10x128xf32>
      %1179 = arith.select %1175, %1178, %1151 : vector<10x128xi1>, vector<10x128xf32>
      %1180 = vector.extract_strided_slice %1009 {offsets = [0, 24], sizes = [10, 1], strides = [1, 1]} : vector<10x128xi32> to vector<10x1xi32>
      %1181 = vector.broadcast %1180 : vector<10x1xi32> to vector<10x128xi32>
      %1182 = arith.cmpi eq, %1181, %78 : vector<10x128xi32>
      %1183 = vector.extract_strided_slice %1011 {offsets = [0, 24], sizes = [10, 1], strides = [1, 1]} : vector<10x128xf32> to vector<10x1xf32>
      %1184 = vector.shape_cast %1183 : vector<10x1xf32> to vector<10x1xf32>
      %1185 = vector.broadcast %1184 : vector<10x1xf32> to vector<10x128xf32>
      %1186 = arith.select %1182, %1185, %1158 : vector<10x128xi1>, vector<10x128xf32>
      %1187 = vector.extract_strided_slice %1009 {offsets = [0, 25], sizes = [10, 1], strides = [1, 1]} : vector<10x128xi32> to vector<10x1xi32>
      %1188 = vector.broadcast %1187 : vector<10x1xi32> to vector<10x128xi32>
      %1189 = arith.cmpi eq, %1188, %78 : vector<10x128xi32>
      %1190 = vector.extract_strided_slice %1011 {offsets = [0, 25], sizes = [10, 1], strides = [1, 1]} : vector<10x128xf32> to vector<10x1xf32>
      %1191 = vector.shape_cast %1190 : vector<10x1xf32> to vector<10x1xf32>
      %1192 = vector.broadcast %1191 : vector<10x1xf32> to vector<10x128xf32>
      %1193 = arith.select %1189, %1192, %1165 : vector<10x128xi1>, vector<10x128xf32>
      %1194 = vector.extract_strided_slice %1009 {offsets = [0, 26], sizes = [10, 1], strides = [1, 1]} : vector<10x128xi32> to vector<10x1xi32>
      %1195 = vector.broadcast %1194 : vector<10x1xi32> to vector<10x128xi32>
      %1196 = arith.cmpi eq, %1195, %78 : vector<10x128xi32>
      %1197 = vector.extract_strided_slice %1011 {offsets = [0, 26], sizes = [10, 1], strides = [1, 1]} : vector<10x128xf32> to vector<10x1xf32>
      %1198 = vector.shape_cast %1197 : vector<10x1xf32> to vector<10x1xf32>
      %1199 = vector.broadcast %1198 : vector<10x1xf32> to vector<10x128xf32>
      %1200 = arith.select %1196, %1199, %1172 : vector<10x128xi1>, vector<10x128xf32>
      %1201 = vector.extract_strided_slice %1009 {offsets = [0, 27], sizes = [10, 1], strides = [1, 1]} : vector<10x128xi32> to vector<10x1xi32>
      %1202 = vector.broadcast %1201 : vector<10x1xi32> to vector<10x128xi32>
      %1203 = arith.cmpi eq, %1202, %78 : vector<10x128xi32>
      %1204 = vector.extract_strided_slice %1011 {offsets = [0, 27], sizes = [10, 1], strides = [1, 1]} : vector<10x128xf32> to vector<10x1xf32>
      %1205 = vector.shape_cast %1204 : vector<10x1xf32> to vector<10x1xf32>
      %1206 = vector.broadcast %1205 : vector<10x1xf32> to vector<10x128xf32>
      %1207 = arith.select %1203, %1206, %1179 : vector<10x128xi1>, vector<10x128xf32>
      %1208 = vector.extract_strided_slice %1009 {offsets = [0, 28], sizes = [10, 1], strides = [1, 1]} : vector<10x128xi32> to vector<10x1xi32>
      %1209 = vector.broadcast %1208 : vector<10x1xi32> to vector<10x128xi32>
      %1210 = arith.cmpi eq, %1209, %78 : vector<10x128xi32>
      %1211 = vector.extract_strided_slice %1011 {offsets = [0, 28], sizes = [10, 1], strides = [1, 1]} : vector<10x128xf32> to vector<10x1xf32>
      %1212 = vector.shape_cast %1211 : vector<10x1xf32> to vector<10x1xf32>
      %1213 = vector.broadcast %1212 : vector<10x1xf32> to vector<10x128xf32>
      %1214 = arith.select %1210, %1213, %1186 : vector<10x128xi1>, vector<10x128xf32>
      %1215 = vector.extract_strided_slice %1009 {offsets = [0, 29], sizes = [10, 1], strides = [1, 1]} : vector<10x128xi32> to vector<10x1xi32>
      %1216 = vector.broadcast %1215 : vector<10x1xi32> to vector<10x128xi32>
      %1217 = arith.cmpi eq, %1216, %78 : vector<10x128xi32>
      %1218 = vector.extract_strided_slice %1011 {offsets = [0, 29], sizes = [10, 1], strides = [1, 1]} : vector<10x128xf32> to vector<10x1xf32>
      %1219 = vector.shape_cast %1218 : vector<10x1xf32> to vector<10x1xf32>
      %1220 = vector.broadcast %1219 : vector<10x1xf32> to vector<10x128xf32>
      %1221 = arith.select %1217, %1220, %1193 : vector<10x128xi1>, vector<10x128xf32>
      %1222 = vector.extract_strided_slice %1009 {offsets = [0, 30], sizes = [10, 1], strides = [1, 1]} : vector<10x128xi32> to vector<10x1xi32>
      %1223 = vector.broadcast %1222 : vector<10x1xi32> to vector<10x128xi32>
      %1224 = arith.cmpi eq, %1223, %78 : vector<10x128xi32>
      %1225 = vector.extract_strided_slice %1011 {offsets = [0, 30], sizes = [10, 1], strides = [1, 1]} : vector<10x128xf32> to vector<10x1xf32>
      %1226 = vector.shape_cast %1225 : vector<10x1xf32> to vector<10x1xf32>
      %1227 = vector.broadcast %1226 : vector<10x1xf32> to vector<10x128xf32>
      %1228 = arith.select %1224, %1227, %1200 : vector<10x128xi1>, vector<10x128xf32>
      %1229 = vector.extract_strided_slice %1009 {offsets = [0, 31], sizes = [10, 1], strides = [1, 1]} : vector<10x128xi32> to vector<10x1xi32>
      %1230 = vector.broadcast %1229 : vector<10x1xi32> to vector<10x128xi32>
      %1231 = arith.cmpi eq, %1230, %78 : vector<10x128xi32>
      %1232 = vector.extract_strided_slice %1011 {offsets = [0, 31], sizes = [10, 1], strides = [1, 1]} : vector<10x128xf32> to vector<10x1xf32>
      %1233 = vector.shape_cast %1232 : vector<10x1xf32> to vector<10x1xf32>
      %1234 = vector.broadcast %1233 : vector<10x1xf32> to vector<10x128xf32>
      %1235 = arith.select %1231, %1234, %1207 : vector<10x128xi1>, vector<10x128xf32>
      %1236 = vector.extract_strided_slice %1009 {offsets = [0, 32], sizes = [10, 1], strides = [1, 1]} : vector<10x128xi32> to vector<10x1xi32>
      %1237 = vector.broadcast %1236 : vector<10x1xi32> to vector<10x128xi32>
      %1238 = arith.cmpi eq, %1237, %78 : vector<10x128xi32>
      %1239 = vector.extract_strided_slice %1011 {offsets = [0, 32], sizes = [10, 1], strides = [1, 1]} : vector<10x128xf32> to vector<10x1xf32>
      %1240 = vector.shape_cast %1239 : vector<10x1xf32> to vector<10x1xf32>
      %1241 = vector.broadcast %1240 : vector<10x1xf32> to vector<10x128xf32>
      %1242 = arith.select %1238, %1241, %1214 : vector<10x128xi1>, vector<10x128xf32>
      %1243 = vector.extract_strided_slice %1009 {offsets = [0, 33], sizes = [10, 1], strides = [1, 1]} : vector<10x128xi32> to vector<10x1xi32>
      %1244 = vector.broadcast %1243 : vector<10x1xi32> to vector<10x128xi32>
      %1245 = arith.cmpi eq, %1244, %78 : vector<10x128xi32>
      %1246 = vector.extract_strided_slice %1011 {offsets = [0, 33], sizes = [10, 1], strides = [1, 1]} : vector<10x128xf32> to vector<10x1xf32>
      %1247 = vector.shape_cast %1246 : vector<10x1xf32> to vector<10x1xf32>
      %1248 = vector.broadcast %1247 : vector<10x1xf32> to vector<10x128xf32>
      %1249 = arith.select %1245, %1248, %1221 : vector<10x128xi1>, vector<10x128xf32>
      %1250 = vector.extract_strided_slice %1009 {offsets = [0, 34], sizes = [10, 1], strides = [1, 1]} : vector<10x128xi32> to vector<10x1xi32>
      %1251 = vector.broadcast %1250 : vector<10x1xi32> to vector<10x128xi32>
      %1252 = arith.cmpi eq, %1251, %78 : vector<10x128xi32>
      %1253 = vector.extract_strided_slice %1011 {offsets = [0, 34], sizes = [10, 1], strides = [1, 1]} : vector<10x128xf32> to vector<10x1xf32>
      %1254 = vector.shape_cast %1253 : vector<10x1xf32> to vector<10x1xf32>
      %1255 = vector.broadcast %1254 : vector<10x1xf32> to vector<10x128xf32>
      %1256 = arith.select %1252, %1255, %1228 : vector<10x128xi1>, vector<10x128xf32>
      %1257 = vector.extract_strided_slice %1009 {offsets = [0, 35], sizes = [10, 1], strides = [1, 1]} : vector<10x128xi32> to vector<10x1xi32>
      %1258 = vector.broadcast %1257 : vector<10x1xi32> to vector<10x128xi32>
      %1259 = arith.cmpi eq, %1258, %78 : vector<10x128xi32>
      %1260 = vector.extract_strided_slice %1011 {offsets = [0, 35], sizes = [10, 1], strides = [1, 1]} : vector<10x128xf32> to vector<10x1xf32>
      %1261 = vector.shape_cast %1260 : vector<10x1xf32> to vector<10x1xf32>
      %1262 = vector.broadcast %1261 : vector<10x1xf32> to vector<10x128xf32>
      %1263 = arith.select %1259, %1262, %1235 : vector<10x128xi1>, vector<10x128xf32>
      %1264 = vector.extract_strided_slice %1009 {offsets = [0, 36], sizes = [10, 1], strides = [1, 1]} : vector<10x128xi32> to vector<10x1xi32>
      %1265 = vector.broadcast %1264 : vector<10x1xi32> to vector<10x128xi32>
      %1266 = arith.cmpi eq, %1265, %78 : vector<10x128xi32>
      %1267 = vector.extract_strided_slice %1011 {offsets = [0, 36], sizes = [10, 1], strides = [1, 1]} : vector<10x128xf32> to vector<10x1xf32>
      %1268 = vector.shape_cast %1267 : vector<10x1xf32> to vector<10x1xf32>
      %1269 = vector.broadcast %1268 : vector<10x1xf32> to vector<10x128xf32>
      %1270 = arith.select %1266, %1269, %1242 : vector<10x128xi1>, vector<10x128xf32>
      %1271 = vector.extract_strided_slice %1009 {offsets = [0, 37], sizes = [10, 1], strides = [1, 1]} : vector<10x128xi32> to vector<10x1xi32>
      %1272 = vector.broadcast %1271 : vector<10x1xi32> to vector<10x128xi32>
      %1273 = arith.cmpi eq, %1272, %78 : vector<10x128xi32>
      %1274 = vector.extract_strided_slice %1011 {offsets = [0, 37], sizes = [10, 1], strides = [1, 1]} : vector<10x128xf32> to vector<10x1xf32>
      %1275 = vector.shape_cast %1274 : vector<10x1xf32> to vector<10x1xf32>
      %1276 = vector.broadcast %1275 : vector<10x1xf32> to vector<10x128xf32>
      %1277 = arith.select %1273, %1276, %1249 : vector<10x128xi1>, vector<10x128xf32>
      %1278 = vector.extract_strided_slice %1009 {offsets = [0, 38], sizes = [10, 1], strides = [1, 1]} : vector<10x128xi32> to vector<10x1xi32>
      %1279 = vector.broadcast %1278 : vector<10x1xi32> to vector<10x128xi32>
      %1280 = arith.cmpi eq, %1279, %78 : vector<10x128xi32>
      %1281 = vector.extract_strided_slice %1011 {offsets = [0, 38], sizes = [10, 1], strides = [1, 1]} : vector<10x128xf32> to vector<10x1xf32>
      %1282 = vector.shape_cast %1281 : vector<10x1xf32> to vector<10x1xf32>
      %1283 = vector.broadcast %1282 : vector<10x1xf32> to vector<10x128xf32>
      %1284 = arith.select %1280, %1283, %1256 : vector<10x128xi1>, vector<10x128xf32>
      %1285 = vector.extract_strided_slice %1009 {offsets = [0, 39], sizes = [10, 1], strides = [1, 1]} : vector<10x128xi32> to vector<10x1xi32>
      %1286 = vector.broadcast %1285 : vector<10x1xi32> to vector<10x128xi32>
      %1287 = arith.cmpi eq, %1286, %78 : vector<10x128xi32>
      %1288 = vector.extract_strided_slice %1011 {offsets = [0, 39], sizes = [10, 1], strides = [1, 1]} : vector<10x128xf32> to vector<10x1xf32>
      %1289 = vector.shape_cast %1288 : vector<10x1xf32> to vector<10x1xf32>
      %1290 = vector.broadcast %1289 : vector<10x1xf32> to vector<10x128xf32>
      %1291 = arith.select %1287, %1290, %1263 : vector<10x128xi1>, vector<10x128xf32>
      %1292 = vector.extract_strided_slice %1009 {offsets = [0, 40], sizes = [10, 1], strides = [1, 1]} : vector<10x128xi32> to vector<10x1xi32>
      %1293 = vector.broadcast %1292 : vector<10x1xi32> to vector<10x128xi32>
      %1294 = arith.cmpi eq, %1293, %78 : vector<10x128xi32>
      %1295 = vector.extract_strided_slice %1011 {offsets = [0, 40], sizes = [10, 1], strides = [1, 1]} : vector<10x128xf32> to vector<10x1xf32>
      %1296 = vector.shape_cast %1295 : vector<10x1xf32> to vector<10x1xf32>
      %1297 = vector.broadcast %1296 : vector<10x1xf32> to vector<10x128xf32>
      %1298 = arith.select %1294, %1297, %1270 : vector<10x128xi1>, vector<10x128xf32>
      %1299 = vector.extract_strided_slice %1009 {offsets = [0, 41], sizes = [10, 1], strides = [1, 1]} : vector<10x128xi32> to vector<10x1xi32>
      %1300 = vector.broadcast %1299 : vector<10x1xi32> to vector<10x128xi32>
      %1301 = arith.cmpi eq, %1300, %78 : vector<10x128xi32>
      %1302 = vector.extract_strided_slice %1011 {offsets = [0, 41], sizes = [10, 1], strides = [1, 1]} : vector<10x128xf32> to vector<10x1xf32>
      %1303 = vector.shape_cast %1302 : vector<10x1xf32> to vector<10x1xf32>
      %1304 = vector.broadcast %1303 : vector<10x1xf32> to vector<10x128xf32>
      %1305 = arith.select %1301, %1304, %1277 : vector<10x128xi1>, vector<10x128xf32>
      %1306 = vector.extract_strided_slice %1009 {offsets = [0, 42], sizes = [10, 1], strides = [1, 1]} : vector<10x128xi32> to vector<10x1xi32>
      %1307 = vector.broadcast %1306 : vector<10x1xi32> to vector<10x128xi32>
      %1308 = arith.cmpi eq, %1307, %78 : vector<10x128xi32>
      %1309 = vector.extract_strided_slice %1011 {offsets = [0, 42], sizes = [10, 1], strides = [1, 1]} : vector<10x128xf32> to vector<10x1xf32>
      %1310 = vector.shape_cast %1309 : vector<10x1xf32> to vector<10x1xf32>
      %1311 = vector.broadcast %1310 : vector<10x1xf32> to vector<10x128xf32>
      %1312 = arith.select %1308, %1311, %1284 : vector<10x128xi1>, vector<10x128xf32>
      %1313 = vector.extract_strided_slice %1009 {offsets = [0, 43], sizes = [10, 1], strides = [1, 1]} : vector<10x128xi32> to vector<10x1xi32>
      %1314 = vector.broadcast %1313 : vector<10x1xi32> to vector<10x128xi32>
      %1315 = arith.cmpi eq, %1314, %78 : vector<10x128xi32>
      %1316 = vector.extract_strided_slice %1011 {offsets = [0, 43], sizes = [10, 1], strides = [1, 1]} : vector<10x128xf32> to vector<10x1xf32>
      %1317 = vector.shape_cast %1316 : vector<10x1xf32> to vector<10x1xf32>
      %1318 = vector.broadcast %1317 : vector<10x1xf32> to vector<10x128xf32>
      %1319 = arith.select %1315, %1318, %1291 : vector<10x128xi1>, vector<10x128xf32>
      %1320 = vector.extract_strided_slice %1009 {offsets = [0, 44], sizes = [10, 1], strides = [1, 1]} : vector<10x128xi32> to vector<10x1xi32>
      %1321 = vector.broadcast %1320 : vector<10x1xi32> to vector<10x128xi32>
      %1322 = arith.cmpi eq, %1321, %78 : vector<10x128xi32>
      %1323 = vector.extract_strided_slice %1011 {offsets = [0, 44], sizes = [10, 1], strides = [1, 1]} : vector<10x128xf32> to vector<10x1xf32>
      %1324 = vector.shape_cast %1323 : vector<10x1xf32> to vector<10x1xf32>
      %1325 = vector.broadcast %1324 : vector<10x1xf32> to vector<10x128xf32>
      %1326 = arith.select %1322, %1325, %1298 : vector<10x128xi1>, vector<10x128xf32>
      %1327 = vector.extract_strided_slice %1009 {offsets = [0, 45], sizes = [10, 1], strides = [1, 1]} : vector<10x128xi32> to vector<10x1xi32>
      %1328 = vector.broadcast %1327 : vector<10x1xi32> to vector<10x128xi32>
      %1329 = arith.cmpi eq, %1328, %78 : vector<10x128xi32>
      %1330 = vector.extract_strided_slice %1011 {offsets = [0, 45], sizes = [10, 1], strides = [1, 1]} : vector<10x128xf32> to vector<10x1xf32>
      %1331 = vector.shape_cast %1330 : vector<10x1xf32> to vector<10x1xf32>
      %1332 = vector.broadcast %1331 : vector<10x1xf32> to vector<10x128xf32>
      %1333 = arith.select %1329, %1332, %1305 : vector<10x128xi1>, vector<10x128xf32>
      %1334 = vector.extract_strided_slice %1009 {offsets = [0, 46], sizes = [10, 1], strides = [1, 1]} : vector<10x128xi32> to vector<10x1xi32>
      %1335 = vector.broadcast %1334 : vector<10x1xi32> to vector<10x128xi32>
      %1336 = arith.cmpi eq, %1335, %78 : vector<10x128xi32>
      %1337 = vector.extract_strided_slice %1011 {offsets = [0, 46], sizes = [10, 1], strides = [1, 1]} : vector<10x128xf32> to vector<10x1xf32>
      %1338 = vector.shape_cast %1337 : vector<10x1xf32> to vector<10x1xf32>
      %1339 = vector.broadcast %1338 : vector<10x1xf32> to vector<10x128xf32>
      %1340 = arith.select %1336, %1339, %1312 : vector<10x128xi1>, vector<10x128xf32>
      %1341 = vector.extract_strided_slice %1009 {offsets = [0, 47], sizes = [10, 1], strides = [1, 1]} : vector<10x128xi32> to vector<10x1xi32>
      %1342 = vector.broadcast %1341 : vector<10x1xi32> to vector<10x128xi32>
      %1343 = arith.cmpi eq, %1342, %78 : vector<10x128xi32>
      %1344 = vector.extract_strided_slice %1011 {offsets = [0, 47], sizes = [10, 1], strides = [1, 1]} : vector<10x128xf32> to vector<10x1xf32>
      %1345 = vector.shape_cast %1344 : vector<10x1xf32> to vector<10x1xf32>
      %1346 = vector.broadcast %1345 : vector<10x1xf32> to vector<10x128xf32>
      %1347 = arith.select %1343, %1346, %1319 : vector<10x128xi1>, vector<10x128xf32>
      %1348 = vector.extract_strided_slice %1009 {offsets = [0, 48], sizes = [10, 1], strides = [1, 1]} : vector<10x128xi32> to vector<10x1xi32>
      %1349 = vector.broadcast %1348 : vector<10x1xi32> to vector<10x128xi32>
      %1350 = arith.cmpi eq, %1349, %78 : vector<10x128xi32>
      %1351 = vector.extract_strided_slice %1011 {offsets = [0, 48], sizes = [10, 1], strides = [1, 1]} : vector<10x128xf32> to vector<10x1xf32>
      %1352 = vector.shape_cast %1351 : vector<10x1xf32> to vector<10x1xf32>
      %1353 = vector.broadcast %1352 : vector<10x1xf32> to vector<10x128xf32>
      %1354 = arith.select %1350, %1353, %1326 : vector<10x128xi1>, vector<10x128xf32>
      %1355 = vector.extract_strided_slice %1009 {offsets = [0, 49], sizes = [10, 1], strides = [1, 1]} : vector<10x128xi32> to vector<10x1xi32>
      %1356 = vector.broadcast %1355 : vector<10x1xi32> to vector<10x128xi32>
      %1357 = arith.cmpi eq, %1356, %78 : vector<10x128xi32>
      %1358 = vector.extract_strided_slice %1011 {offsets = [0, 49], sizes = [10, 1], strides = [1, 1]} : vector<10x128xf32> to vector<10x1xf32>
      %1359 = vector.shape_cast %1358 : vector<10x1xf32> to vector<10x1xf32>
      %1360 = vector.broadcast %1359 : vector<10x1xf32> to vector<10x128xf32>
      %1361 = arith.select %1357, %1360, %1333 : vector<10x128xi1>, vector<10x128xf32>
      %1362 = vector.extract_strided_slice %1009 {offsets = [0, 50], sizes = [10, 1], strides = [1, 1]} : vector<10x128xi32> to vector<10x1xi32>
      %1363 = vector.broadcast %1362 : vector<10x1xi32> to vector<10x128xi32>
      %1364 = arith.cmpi eq, %1363, %78 : vector<10x128xi32>
      %1365 = vector.extract_strided_slice %1011 {offsets = [0, 50], sizes = [10, 1], strides = [1, 1]} : vector<10x128xf32> to vector<10x1xf32>
      %1366 = vector.shape_cast %1365 : vector<10x1xf32> to vector<10x1xf32>
      %1367 = vector.broadcast %1366 : vector<10x1xf32> to vector<10x128xf32>
      %1368 = arith.select %1364, %1367, %1340 : vector<10x128xi1>, vector<10x128xf32>
      %1369 = vector.extract_strided_slice %1009 {offsets = [0, 51], sizes = [10, 1], strides = [1, 1]} : vector<10x128xi32> to vector<10x1xi32>
      %1370 = vector.broadcast %1369 : vector<10x1xi32> to vector<10x128xi32>
      %1371 = arith.cmpi eq, %1370, %78 : vector<10x128xi32>
      %1372 = vector.extract_strided_slice %1011 {offsets = [0, 51], sizes = [10, 1], strides = [1, 1]} : vector<10x128xf32> to vector<10x1xf32>
      %1373 = vector.shape_cast %1372 : vector<10x1xf32> to vector<10x1xf32>
      %1374 = vector.broadcast %1373 : vector<10x1xf32> to vector<10x128xf32>
      %1375 = arith.select %1371, %1374, %1347 : vector<10x128xi1>, vector<10x128xf32>
      %1376 = vector.extract_strided_slice %1009 {offsets = [0, 52], sizes = [10, 1], strides = [1, 1]} : vector<10x128xi32> to vector<10x1xi32>
      %1377 = vector.broadcast %1376 : vector<10x1xi32> to vector<10x128xi32>
      %1378 = arith.cmpi eq, %1377, %78 : vector<10x128xi32>
      %1379 = vector.extract_strided_slice %1011 {offsets = [0, 52], sizes = [10, 1], strides = [1, 1]} : vector<10x128xf32> to vector<10x1xf32>
      %1380 = vector.shape_cast %1379 : vector<10x1xf32> to vector<10x1xf32>
      %1381 = vector.broadcast %1380 : vector<10x1xf32> to vector<10x128xf32>
      %1382 = arith.select %1378, %1381, %1354 : vector<10x128xi1>, vector<10x128xf32>
      %1383 = vector.extract_strided_slice %1009 {offsets = [0, 53], sizes = [10, 1], strides = [1, 1]} : vector<10x128xi32> to vector<10x1xi32>
      %1384 = vector.broadcast %1383 : vector<10x1xi32> to vector<10x128xi32>
      %1385 = arith.cmpi eq, %1384, %78 : vector<10x128xi32>
      %1386 = vector.extract_strided_slice %1011 {offsets = [0, 53], sizes = [10, 1], strides = [1, 1]} : vector<10x128xf32> to vector<10x1xf32>
      %1387 = vector.shape_cast %1386 : vector<10x1xf32> to vector<10x1xf32>
      %1388 = vector.broadcast %1387 : vector<10x1xf32> to vector<10x128xf32>
      %1389 = arith.select %1385, %1388, %1361 : vector<10x128xi1>, vector<10x128xf32>
      %1390 = vector.extract_strided_slice %1009 {offsets = [0, 54], sizes = [10, 1], strides = [1, 1]} : vector<10x128xi32> to vector<10x1xi32>
      %1391 = vector.broadcast %1390 : vector<10x1xi32> to vector<10x128xi32>
      %1392 = arith.cmpi eq, %1391, %78 : vector<10x128xi32>
      %1393 = vector.extract_strided_slice %1011 {offsets = [0, 54], sizes = [10, 1], strides = [1, 1]} : vector<10x128xf32> to vector<10x1xf32>
      %1394 = vector.shape_cast %1393 : vector<10x1xf32> to vector<10x1xf32>
      %1395 = vector.broadcast %1394 : vector<10x1xf32> to vector<10x128xf32>
      %1396 = arith.select %1392, %1395, %1368 : vector<10x128xi1>, vector<10x128xf32>
      %1397 = vector.extract_strided_slice %1009 {offsets = [0, 55], sizes = [10, 1], strides = [1, 1]} : vector<10x128xi32> to vector<10x1xi32>
      %1398 = vector.broadcast %1397 : vector<10x1xi32> to vector<10x128xi32>
      %1399 = arith.cmpi eq, %1398, %78 : vector<10x128xi32>
      %1400 = vector.extract_strided_slice %1011 {offsets = [0, 55], sizes = [10, 1], strides = [1, 1]} : vector<10x128xf32> to vector<10x1xf32>
      %1401 = vector.shape_cast %1400 : vector<10x1xf32> to vector<10x1xf32>
      %1402 = vector.broadcast %1401 : vector<10x1xf32> to vector<10x128xf32>
      %1403 = arith.select %1399, %1402, %1375 : vector<10x128xi1>, vector<10x128xf32>
      %1404 = vector.extract_strided_slice %1009 {offsets = [0, 56], sizes = [10, 1], strides = [1, 1]} : vector<10x128xi32> to vector<10x1xi32>
      %1405 = vector.broadcast %1404 : vector<10x1xi32> to vector<10x128xi32>
      %1406 = arith.cmpi eq, %1405, %78 : vector<10x128xi32>
      %1407 = vector.extract_strided_slice %1011 {offsets = [0, 56], sizes = [10, 1], strides = [1, 1]} : vector<10x128xf32> to vector<10x1xf32>
      %1408 = vector.shape_cast %1407 : vector<10x1xf32> to vector<10x1xf32>
      %1409 = vector.broadcast %1408 : vector<10x1xf32> to vector<10x128xf32>
      %1410 = arith.select %1406, %1409, %1382 : vector<10x128xi1>, vector<10x128xf32>
      %1411 = vector.extract_strided_slice %1009 {offsets = [0, 57], sizes = [10, 1], strides = [1, 1]} : vector<10x128xi32> to vector<10x1xi32>
      %1412 = vector.broadcast %1411 : vector<10x1xi32> to vector<10x128xi32>
      %1413 = arith.cmpi eq, %1412, %78 : vector<10x128xi32>
      %1414 = vector.extract_strided_slice %1011 {offsets = [0, 57], sizes = [10, 1], strides = [1, 1]} : vector<10x128xf32> to vector<10x1xf32>
      %1415 = vector.shape_cast %1414 : vector<10x1xf32> to vector<10x1xf32>
      %1416 = vector.broadcast %1415 : vector<10x1xf32> to vector<10x128xf32>
      %1417 = arith.select %1413, %1416, %1389 : vector<10x128xi1>, vector<10x128xf32>
      %1418 = vector.extract_strided_slice %1009 {offsets = [0, 58], sizes = [10, 1], strides = [1, 1]} : vector<10x128xi32> to vector<10x1xi32>
      %1419 = vector.broadcast %1418 : vector<10x1xi32> to vector<10x128xi32>
      %1420 = arith.cmpi eq, %1419, %78 : vector<10x128xi32>
      %1421 = vector.extract_strided_slice %1011 {offsets = [0, 58], sizes = [10, 1], strides = [1, 1]} : vector<10x128xf32> to vector<10x1xf32>
      %1422 = vector.shape_cast %1421 : vector<10x1xf32> to vector<10x1xf32>
      %1423 = vector.broadcast %1422 : vector<10x1xf32> to vector<10x128xf32>
      %1424 = arith.select %1420, %1423, %1396 : vector<10x128xi1>, vector<10x128xf32>
      %1425 = vector.extract_strided_slice %1009 {offsets = [0, 59], sizes = [10, 1], strides = [1, 1]} : vector<10x128xi32> to vector<10x1xi32>
      %1426 = vector.broadcast %1425 : vector<10x1xi32> to vector<10x128xi32>
      %1427 = arith.cmpi eq, %1426, %78 : vector<10x128xi32>
      %1428 = vector.extract_strided_slice %1011 {offsets = [0, 59], sizes = [10, 1], strides = [1, 1]} : vector<10x128xf32> to vector<10x1xf32>
      %1429 = vector.shape_cast %1428 : vector<10x1xf32> to vector<10x1xf32>
      %1430 = vector.broadcast %1429 : vector<10x1xf32> to vector<10x128xf32>
      %1431 = arith.select %1427, %1430, %1403 : vector<10x128xi1>, vector<10x128xf32>
      %1432 = vector.extract_strided_slice %1009 {offsets = [0, 60], sizes = [10, 1], strides = [1, 1]} : vector<10x128xi32> to vector<10x1xi32>
      %1433 = vector.broadcast %1432 : vector<10x1xi32> to vector<10x128xi32>
      %1434 = arith.cmpi eq, %1433, %78 : vector<10x128xi32>
      %1435 = vector.extract_strided_slice %1011 {offsets = [0, 60], sizes = [10, 1], strides = [1, 1]} : vector<10x128xf32> to vector<10x1xf32>
      %1436 = vector.shape_cast %1435 : vector<10x1xf32> to vector<10x1xf32>
      %1437 = vector.broadcast %1436 : vector<10x1xf32> to vector<10x128xf32>
      %1438 = arith.select %1434, %1437, %1410 : vector<10x128xi1>, vector<10x128xf32>
      %1439 = vector.extract_strided_slice %1009 {offsets = [0, 61], sizes = [10, 1], strides = [1, 1]} : vector<10x128xi32> to vector<10x1xi32>
      %1440 = vector.broadcast %1439 : vector<10x1xi32> to vector<10x128xi32>
      %1441 = arith.cmpi eq, %1440, %78 : vector<10x128xi32>
      %1442 = vector.extract_strided_slice %1011 {offsets = [0, 61], sizes = [10, 1], strides = [1, 1]} : vector<10x128xf32> to vector<10x1xf32>
      %1443 = vector.shape_cast %1442 : vector<10x1xf32> to vector<10x1xf32>
      %1444 = vector.broadcast %1443 : vector<10x1xf32> to vector<10x128xf32>
      %1445 = arith.select %1441, %1444, %1417 : vector<10x128xi1>, vector<10x128xf32>
      %1446 = vector.extract_strided_slice %1009 {offsets = [0, 62], sizes = [10, 1], strides = [1, 1]} : vector<10x128xi32> to vector<10x1xi32>
      %1447 = vector.broadcast %1446 : vector<10x1xi32> to vector<10x128xi32>
      %1448 = arith.cmpi eq, %1447, %78 : vector<10x128xi32>
      %1449 = vector.extract_strided_slice %1011 {offsets = [0, 62], sizes = [10, 1], strides = [1, 1]} : vector<10x128xf32> to vector<10x1xf32>
      %1450 = vector.shape_cast %1449 : vector<10x1xf32> to vector<10x1xf32>
      %1451 = vector.broadcast %1450 : vector<10x1xf32> to vector<10x128xf32>
      %1452 = arith.select %1448, %1451, %1424 : vector<10x128xi1>, vector<10x128xf32>
      %1453 = vector.extract_strided_slice %1009 {offsets = [0, 63], sizes = [10, 1], strides = [1, 1]} : vector<10x128xi32> to vector<10x1xi32>
      %1454 = vector.broadcast %1453 : vector<10x1xi32> to vector<10x128xi32>
      %1455 = arith.cmpi eq, %1454, %78 : vector<10x128xi32>
      %1456 = vector.extract_strided_slice %1011 {offsets = [0, 63], sizes = [10, 1], strides = [1, 1]} : vector<10x128xf32> to vector<10x1xf32>
      %1457 = vector.shape_cast %1456 : vector<10x1xf32> to vector<10x1xf32>
      %1458 = vector.broadcast %1457 : vector<10x1xf32> to vector<10x128xf32>
      %1459 = arith.select %1455, %1458, %1431 : vector<10x128xi1>, vector<10x128xf32>
      %1460 = vector.extract_strided_slice %1009 {offsets = [0, 64], sizes = [10, 1], strides = [1, 1]} : vector<10x128xi32> to vector<10x1xi32>
      %1461 = vector.broadcast %1460 : vector<10x1xi32> to vector<10x128xi32>
      %1462 = arith.cmpi eq, %1461, %78 : vector<10x128xi32>
      %1463 = vector.extract_strided_slice %1011 {offsets = [0, 64], sizes = [10, 1], strides = [1, 1]} : vector<10x128xf32> to vector<10x1xf32>
      %1464 = vector.shape_cast %1463 : vector<10x1xf32> to vector<10x1xf32>
      %1465 = vector.broadcast %1464 : vector<10x1xf32> to vector<10x128xf32>
      %1466 = arith.select %1462, %1465, %1438 : vector<10x128xi1>, vector<10x128xf32>
      %1467 = vector.extract_strided_slice %1009 {offsets = [0, 65], sizes = [10, 1], strides = [1, 1]} : vector<10x128xi32> to vector<10x1xi32>
      %1468 = vector.broadcast %1467 : vector<10x1xi32> to vector<10x128xi32>
      %1469 = arith.cmpi eq, %1468, %78 : vector<10x128xi32>
      %1470 = vector.extract_strided_slice %1011 {offsets = [0, 65], sizes = [10, 1], strides = [1, 1]} : vector<10x128xf32> to vector<10x1xf32>
      %1471 = vector.shape_cast %1470 : vector<10x1xf32> to vector<10x1xf32>
      %1472 = vector.broadcast %1471 : vector<10x1xf32> to vector<10x128xf32>
      %1473 = arith.select %1469, %1472, %1445 : vector<10x128xi1>, vector<10x128xf32>
      %1474 = vector.extract_strided_slice %1009 {offsets = [0, 66], sizes = [10, 1], strides = [1, 1]} : vector<10x128xi32> to vector<10x1xi32>
      %1475 = vector.broadcast %1474 : vector<10x1xi32> to vector<10x128xi32>
      %1476 = arith.cmpi eq, %1475, %78 : vector<10x128xi32>
      %1477 = vector.extract_strided_slice %1011 {offsets = [0, 66], sizes = [10, 1], strides = [1, 1]} : vector<10x128xf32> to vector<10x1xf32>
      %1478 = vector.shape_cast %1477 : vector<10x1xf32> to vector<10x1xf32>
      %1479 = vector.broadcast %1478 : vector<10x1xf32> to vector<10x128xf32>
      %1480 = arith.select %1476, %1479, %1452 : vector<10x128xi1>, vector<10x128xf32>
      %1481 = vector.extract_strided_slice %1009 {offsets = [0, 67], sizes = [10, 1], strides = [1, 1]} : vector<10x128xi32> to vector<10x1xi32>
      %1482 = vector.broadcast %1481 : vector<10x1xi32> to vector<10x128xi32>
      %1483 = arith.cmpi eq, %1482, %78 : vector<10x128xi32>
      %1484 = vector.extract_strided_slice %1011 {offsets = [0, 67], sizes = [10, 1], strides = [1, 1]} : vector<10x128xf32> to vector<10x1xf32>
      %1485 = vector.shape_cast %1484 : vector<10x1xf32> to vector<10x1xf32>
      %1486 = vector.broadcast %1485 : vector<10x1xf32> to vector<10x128xf32>
      %1487 = arith.select %1483, %1486, %1459 : vector<10x128xi1>, vector<10x128xf32>
      %1488 = arith.addf %1466, %1473 : vector<10x128xf32>
      %1489 = arith.addf %1480, %1487 : vector<10x128xf32>
      %1490 = arith.addf %1488, %1489 : vector<10x128xf32>
      %c0_38 = arith.constant 0 : index
      %c0_39 = arith.constant 0 : index
      %c0_40 = arith.constant 0 : index
      %1491 = vector.load %arg6[%c0_38, %c0_39, %c0_40] : memref<1x10x128xf32, #tpu.memory_space<vmem>>, vector<1x10x128xf32>
      %1492 = vector.shape_cast %1491 : vector<1x10x128xf32> to vector<10x128xf32>
      %1493 = vector.shape_cast %1490 : vector<10x128xf32> to vector<1x10x128xf32>
      tpu.vector_store %arg6[%c0_38, %c0_39, %c0_40], %1493 {strides = array<i32>} : memref<1x10x128xf32, #tpu.memory_space<vmem>>, vector<1x10x128xf32>,
    } else {
    }
    return
  }
  func.func @transform_0(%arg0: i32, %arg1: i32) -> (i32, i32, i32) {
    %c0_i32 = arith.constant 0 : i32
    %c0_i32_0 = arith.constant 0 : i32
    %c0_i32_1 = arith.constant 0 : i32
    return %arg0, %c0_i32, %c0_i32_0 : i32, i32, i32
  }
  func.func @transform_1(%arg0: i32, %arg1: i32) -> (i32, i32) {
    %c0_i32 = arith.constant 0 : i32
    %c0_i32_0 = arith.constant 0 : i32
    %c0_i32_1 = arith.constant 0 : i32
    return %c0_i32, %c0_i32_0 : i32, i32
  }
  func.func @transform_2(%arg0: i32, %arg1: i32) -> (i32, i32) {
    %c0_i32 = arith.constant 0 : i32
    %c0_i32_0 = arith.constant 0 : i32
    %c0_i32_1 = arith.constant 0 : i32
    return %c0_i32, %c0_i32_0 : i32, i32
  }
  func.func @transform_3(%arg0: i32, %arg1: i32) -> (i32, i32, i32) {
    %c0_i32 = arith.constant 0 : i32
    %c0_i32_0 = arith.constant 0 : i32
    %c0_i32_1 = arith.constant 0 : i32
    return %arg0, %c0_i32, %c0_i32_0 : i32, i32, i32
  }
  func.func @transform_4(%arg0: i32, %arg1: i32) -> (i32, i32, i32) {
    %c0_i32 = arith.constant 0 : i32
    %c0_i32_0 = arith.constant 0 : i32
    return %arg0, %c0_i32, %arg1 : i32, i32, i32
  }
}

</mosaic_0001>

<bundles_post_ra>
// kernel: model_forward.1
= control target key start
LH: loop header
LB: loop body
LE: loop exit
PB: predicated region body
PF: predicated region fallthrough
CT: control target
= control target key end

     0   :  { %s5037_s15 = smov 0   ;;  %s5039_s16 = smov 0   ;;  %s9647_s0 = inlined_call_operand.vmem [shape: f32[2,9,256], index: 0, kind: input, shape index: {}]   ;;  %s9648_s1 = inlined_call_operand.vmem [shape: f32[10,9], index: 1, kind: input, shape index: {}]   ;;  %s9649_s2 = inlined_call_operand.vmem [shape: f32[10,1], index: 2, kind: input, shape index: {}]   ;;  %s9650_s3 = inlined_call_operand.vmem [shape: f32[2,10,256], index: 3, kind: input, shape index: {}]   ;;  %s9651_s4 = inlined_call_operand.vmem [shape: f32[2,10,256], index: 4, kind: output, shape index: {}]  }
   0x1   :  { %s5041_s17 = smov 0   ;;  %s5043_s18 = smov 0  }
   0x2   :  { %s5045_s19 = smov 0   ;;  %s5047_s20 = smov 0  }
   0x3   :  { %s5049_s21 = smov 0  }
   0x4 LB: > { %s23_s22 = sadd.s32 1, %s4865_s19  ;;  %s26_s23 = sadd.s32 1, %s4869_s20  ;;  %s4873_s21 = sphi %s5049_s21, %s14_s21   ;;  %s4869_s20 = sphi %s5047_s20, %s11540_s20   ;;  %s4865_s19 = sphi %s5045_s19, %s11539_s19   ;;  %s4861_s18 = sphi %s5043_s18, %s11538_s18   ;;  %s4857_s17 = sphi %s5041_s17, %s11537_s17   ;;  %s4853_s16 = sphi %s5039_s16, %s11536_s16   ;;  %s4849_s15 = sphi %s5037_s15, %s11535_s15  }
   0x5   : > { %p24_p0 = scmp.ge.s32.totalorder %s23_s22, 2  ;;  %s4223_s24 = sadd.s32 4294967295, %s4873_s21  }
   0x6   : > { %p139_p1 = scmp.ne.s32.totalorder %s4853_s16, %s4849_s15  ;;  %p140_p2 = scmp.eq.s32.totalorder %s4223_s24, 3 }
   0x7   : > { %s11542_s22 = smov (%p24_p0, %s23_s22), 0  ;;  %s11544_s23 = smov (!%p24_p0, %s26_s23), %s4869_s20 }
   0x8   : > { %s125_s25 = ssub.s32 %s4865_s19, %s11542_s22  ;;  %p28_p3 = scmp.ge.s32.totalorder %s11544_s23, 2 }
   0x9   : > { %p4227_p4 = scmp.ge.s32.totalorder %s4873_s21, 1  ;;  %p5083_p5 = por %p140_p2, %p139_p1 }
   0xa   : > { %p186_p6 = scmp.lt.s32.totalorder %s4873_s21, 5  ;;  %s11546_s23 = smov (%p28_p3, %s11544_s23), 0 }
   0xb   : > { %s124_s27 = ssub.s32 %s4869_s20, %s11546_s23  ;;  %s129_s29 = sadd.s32 1, %s4853_s16 }
   0xc   : > { %p187_p7 = pnand %p4227_p4, %p186_p6  ;;  %s126_s28 = sor.u32 %s125_s25, %s124_s27 }
   0xd   : > { %p127_p8 = scmp.eq.s32.totalorder %s126_s28, 0  ;;  %v232_v0 = vld [vmem:[%s9649_s2] sm:$0xff] (!%p187_p7)  ;;  %v254_v1 = vlaneseq (!%p187_p7)  ;;  %v4875_v2 = vmov (!%p187_p7), 0   ;;  %p216_p9 = scmp.lt.s32.totalorder (!%p187_p7), %s4861_s18, 1  ;;  %v233_v10 = vld [vmem:[%s9649_s2 + $0x8] sm:$0x3] (!%p187_p7) }
   0xe   : > { %190 = sbr.rel (%p187_p7) target bundleno = 2621 (0xa3d), region = 36  ;;  %4449 = vset.pattern.permute.xlu1 (!%p187_p7), %v4875_v2  ;;  %s4235_s7 = sshll.u32 (!%p187_p7), %s4857_s17, 7  ;;  %4450 = vset.pattern.permute.xlu0 (!%p187_p7), %v4875_v2  ;;  %v5106_v6 = vld [vmem:[%s9648_s1] sm:$0xff] (!%p187_p7)  ;;  %vm503_vm1 = vcmask (!%p187_p7), 1041408   ;;  %v4876_v30 = vmov (!%p187_p7), 1   ;;  %v4877_v44 = vmov (!%p187_p7), 2  }
   0xf   : > { %s5094_s30 = scalar_select %p127_p8, %s4853_s16, %s129_s29  }
  0x10   : > { %236 = vperm.xlu1 (!%p187_p7), %4449, %v232_v0   ;;  %v5101_v3 = vshrl.u32 (!%p187_p7), %v254_v1, 7  ;;  %v485_v4 = vand.u32 (!%p187_p7), 127, %v254_v1  ;;  %v486_v5 = vstv (!%p187_p7), %s4235_s7  ;;  %v231_v37 = vld [vmem:[%s9648_s1 + $0x8] sm:$0x3] (!%p187_p7)  ;;  %v4878_v50 = vmov (!%p187_p7), 3   ;;  %s213_s7 = sand.u32 (!%p187_p7), 1, %s4849_s15  }
  0x11   : > { %v4879_v54 = vmov (!%p187_p7), 4   ;;  %v4880_v58 = vmov (!%p187_p7), 5   ;;  %v4881_v0 = vmov (!%p187_p7), 6   ;;  %v4882_v1 = vmov (!%p187_p7), 7   ;;  %s5205_s8 = sshll.u32 (!%p187_p7), %s213_s7, 4 }
  0x12   : > { %v5109_v7 = vadd.s32 (!%p187_p7), %v486_v5, %v485_v4  ;;  %v488_v8 = vadd.s32 (!%p187_p7), 128, %v485_v4  ;;  %v256_v9 = vsub.s32 (!%p187_p7), 0, %v5101_v3  ;;  %v280_v26 = vsub.s32 (!%p187_p7), 1, %v5101_v3  ;;  %s5250_s9 = scalar_lea.vmem (!%p187_p7), [#allocation4], %s5205_s8 }
  0x13   : > { %v304_v41 = vsub.s32 (!%p187_p7), 2, %v5101_v3  ;;  %v328_v49 = vsub.s32 (!%p187_p7), 3, %v5101_v3  ;;  %v352_v53 = vsub.s32 (!%p187_p7), 4, %v5101_v3  ;;  %v376_v57 = vsub.s32 (!%p187_p7), 5, %v5101_v3 }
  0x14   : > { %246 = vperm.xlu1 (!%p187_p7), %4449, %v5106_v6   ;;  %vm490_vm0 = vcmp.lt.s32.totalorder (!%p187_p7), %v488_v8, 196  ;;  %v400_v61 = vsub.s32 (!%p187_p7), 6, %v5101_v3 }
  0x15   : > { %s217_s10 = scalar_select %p216_p9, %s4861_s18, 1 }
  0x17   : > { %s4244_s11 = sshll.u32 %s217_s10, 5 }
  0x18   : > { %s225_s25 = scalar_lea.vmem %s9650_s3, %s4244_s11  ;;  %s5122_s29 = scalar_lea.vmem %s9647_s0, %s4244_s11  ;;  %241 = vperm.xlu1 %4449, %v233_v10  }
  0x19   : > { %v475_v11 = vld [vmem:[%s225_s25] sm:$0xff]  ;;  %v476_v12 = vld [vmem:[%s225_s25 + $0x8] sm:$0xff]  ;;  %v477_v13 = vld [vmem:[%s225_s25 + $0x10] sm:$0x3] }
  0x1a   : > { %v478_v14 = vld [vmem:[%s225_s25 + $0x18] sm:$0x3]  ;;  %v4246_v15 = vtrunc.f32 %v475_v11  ;;  %v4248_v16 = vtrunc.f32 %v476_v12  ;;  %v4250_v17 = vtrunc.f32 %v477_v13  ;;  %v5125_v18 = vld [vmem:[%s5122_s29] sm:$0xff]  ;;  %v5128_v19 = vld [vmem:[%s5122_s29 + $0x8] sm:$0xff] }
  0x1b   : > { %v4252_v20 = vtrunc.f32 %v478_v14  ;;  %v5131_v21 = vrot.slane %v5125_v18, %v256_v9  ;;  %v5134_v22 = vrot.slane %v5128_v19, %v256_v9  ;;  %v5153_v33 = vrot.slane %v5125_v18, %v280_v26 }
  0x1c   : > { %v5136_v23 = vcvt.f32.s32 %v4246_v15  ;;  %v5138_v24 = vcvt.f32.s32 %v4248_v16  ;;  %v5140_v25 = vcvt.f32.s32 %v4250_v17  ;;  %4451 = vset.pattern.permute.xlu1 %v4876_v30  ;;  %v5156_v34 = vrot.slane %v5128_v19, %v280_v26 }
  0x1d   : > { %v5143_v27 = vcvt.f32.s32 %v4252_v20  ;;  %271 = vperm.xlu1 %4451, %v5106_v6   ;;  %v5165_v46 = vrot.slane %v5125_v18, %v304_v41  ;;  %v5168_v47 = vrot.slane %v5128_v19, %v304_v41  ;;  %v5173_v51 = vrot.slane %v5125_v18, %v328_v49 }
  0x1e   : > { %vm491_vm2 = vcmp.ne.s32.totalorder %v5136_v23, %v485_v4  ;;  %vm492_vm3 = vcmp.ne.s32.totalorder %v5138_v24, %v488_v8  ;;  %vm493_vm4 = vcmp.ne.s32.totalorder %v5140_v25, %v485_v4  ;;  %v5176_v52 = vrot.slane %v5128_v19, %v328_v49 }
  0x1f   : > { %vm494_vm5 = vcmp.ne.s32.totalorder %v5143_v27, %v488_v8  ;;  %vm496_vm6 = vmand %vm490_vm0, %vm492_vm3  ;;  %v499_v28 = vsel %vm491_vm2, 1, %v4875_v2  ;;  %v501_v29 = vsel %vm493_vm4, 1, %v4875_v2  ;;  %v5182_v55 = vrot.slane %v5125_v18, %v352_v53 }
  0x20   : > { %vm498_vm7 = vmand %vm490_vm0, %vm494_vm5  ;;  %v500_v31 = vsel %vm496_vm6, 1, %v4875_v2  ;;  %v504_v32 = vsel %vm503_vm1, %v501_v29, 0  ;;  %v5185_v56 = vrot.slane %v5128_v19, %v352_v53  ;;  %v5190_v59 = vrot.slane %v5125_v18, %v376_v57 }
  0x21   : > { %v502_v35 = vsel %vm498_vm7, 1, %v4875_v2  ;;  %v506_v36 = vadd.s32 %v500_v31, %v499_v28  ;;  %275 = vperm.xlu1 %4451, %v231_v37   ;;  %v5193_v60 = vrot.slane %v5128_v19, %v376_v57  ;;  %v5197_v62 = vrot.slane %v5125_v18, %v400_v61 }
  0x22   : > { %v505_v38 = vsel %vm503_vm1, %v502_v35, 0  ;;  %v5200_v63 = vrot.slane %v5128_v19, %v400_v61  ;;  %v424_v2 = vsub.s32 7, %v5101_v3  ;;  %v4883_v8 = vmov 8  }
  0x23   : > { %v507_v39 = vadd.s32 %v505_v38, %v504_v32 }
  0x24   : > { %v5208_v4 = vrot.slane %v5125_v18, %v424_v2  ;;  %v5211_v5 = vrot.slane %v5128_v19, %v424_v2 }
  0x25   : > { %v508_v40 = vadd.s32 %v507_v39, %v506_v36  ;;  %4452 = vset.pattern.permute.xlu1 %v4877_v44 }
  0x26   : > { %295 = vperm.xlu1 %4452, %v5106_v6  }
  0x27   : > { %v510_v42 = vshrl.u32 %v508_v40, 16  ;;  %v509_v43 = vand.u32 65535, %v508_v40 }
  0x29   : > { %v512_v45 = vcvt.s32.f32 %v510_v42  ;;  %v511_v48 = vcvt.s32.f32 %v509_v43 }
  0x2a   : > { %299 = vperm.xlu1 %4452, %v231_v37  }
  0x2b   : > { %515 = vadd.xlane.f32.xlu0 %v512_v45 }
  0x2e   : > { %4453 = vset.pattern.permute.xlu1 %v4878_v50 }
  0x2f   : > { %513 = vadd.xlane.f32.xlu0 %v511_v48  ;;  %319 = vperm.xlu1 %4453, %v5106_v6  }
  0x33   : > { %323 = vperm.xlu1 %4453, %v231_v37  }
  0x37   : > { %4454 = vset.pattern.permute.xlu1 %v4879_v54 }
  0x38   : > { %343 = vperm.xlu1 %4454, %v5106_v6  }
  0x3c   : > { %347 = vperm.xlu1 %4454, %v231_v37  }
  0x40   : > { %4455 = vset.pattern.permute.xlu1 %v4880_v58 }
  0x41   : > { %367 = vperm.xlu1 %4455, %v5106_v6  }
  0x45   : > { %251 = vperm.xlu0 %4450, %v231_v37   ;;  %371 = vperm.xlu1 %4455, %v231_v37  }
  0x49   : > { %4456 = vset.pattern.permute.xlu0 %v4881_v0  ;;  %4457 = vset.pattern.permute.xlu1 %v4881_v0 }
  0x4a   : > { %391 = vperm.xlu0 %4456, %v5106_v6   ;;  %395 = vperm.xlu1 %4457, %v231_v37  }
  0x4e   : > { %4459 = vset.pattern.permute.xlu0 %v4882_v1  ;;  %4458 = vset.pattern.permute.xlu1 %v4882_v1 }
  0x4f   : > { %419 = vperm.xlu0 %4459, %v231_v37   ;;  %415 = vperm.xlu1 %4458, %v5106_v6  }
  0x53   : > { %4461 = vset.pattern.permute.xlu0 %v4883_v8  ;;  %4460 = vset.pattern.permute.xlu1 %v4883_v8 }
  0x54   : > { %439 = vperm.xlu1 %4460, %v5106_v6  }
  0x58   : > { %443 = vperm.xlu1 %4460, %v231_v37  }
  0x8f   : > { %v237_v9 = vpop.permute.xlu1 %236 }
  0x93   : > { %v247_v3 = vpop.permute.xlu1 %246 }
  0x94   : > { %v262_v10 = vmul.f32 %v5131_v21, %v247_v3  ;;  %v263_v11 = vmul.f32 %v5134_v22, %v247_v3 }
  0x96   : > { %v266_v13 = vadd.f32 %v262_v10, %v237_v9  ;;  %v267_v14 = vadd.f32 %v263_v11, %v237_v9 }
  0x97   : > { %v242_v12 = vpop.permute.xlu1 %241 }
  0x9c   : > { %v272_v15 = vpop.permute.xlu1 %271 }
  0x9d   : > { %v286_v16 = vmul.f32 %v5153_v33, %v272_v15  ;;  %v287_v17 = vmul.f32 %v5156_v34, %v272_v15 }
  0x9f   : > { %v290_v18 = vadd.f32 %v286_v16, %v266_v13  ;;  %v291_v19 = vadd.f32 %v287_v17, %v267_v14 }
  0xa0   : > { %v276_v20 = vpop.permute.xlu1 %275 }
  0xa1   : > { %v288_v10 = vmul.f32 %v5153_v33, %v276_v20  ;;  %v289_v11 = vmul.f32 %v5156_v34, %v276_v20 }
  0xa5   : > { %v296_v26 = vpop.permute.xlu1 %295 }
  0xa6   : > { %v310_v6 = vmul.f32 %v5165_v46, %v296_v26  ;;  %v311_v28 = vmul.f32 %v5168_v47, %v296_v26 }
  0xa8   : > { %v314_v29 = vadd.f32 %v310_v6, %v290_v18  ;;  %v315_v30 = vadd.f32 %v311_v28, %v291_v19 }
  0xa9   : > { %v300_v31 = vpop.permute.xlu1 %299 }
  0xaa   : > { %v312_v18 = vmul.f32 %v5165_v46, %v300_v31  ;;  %v313_v19 = vmul.f32 %v5168_v47, %v300_v31 }
  0xae   : > { %v320_v32 = vpop.permute.xlu1 %319 }
  0xaf   : > { %v334_v35 = vmul.f32 %v5173_v51, %v320_v32  ;;  %v335_v36 = vmul.f32 %v5176_v52, %v320_v32 }
  0xb1   : > { %v338_v37 = vadd.f32 %v334_v35, %v314_v29  ;;  %v339_v38 = vadd.f32 %v335_v36, %v315_v30 }
  0xb2   : > { %v324_v39 = vpop.permute.xlu1 %323 }
  0xb3   : > { %v337_v6 = vmul.f32 %v5176_v52, %v324_v39 }
  0xb7   : > { %v344_v42 = vpop.permute.xlu1 %343 }
  0xb8   : > { %v516_v40 = vpop.xlane.xlu0 %515  ;;  %v358_v44 = vmul.f32 %v5182_v55, %v344_v42  ;;  %v359_v45 = vmul.f32 %v5185_v56, %v344_v42 }
  0xb9   : > { %v518_v41 = vcvt.f32.s32 %v516_v40 }
  0xba   : > { %v362_v50 = vadd.f32 %v358_v44, %v338_v37  ;;  %v363_v53 = vadd.f32 %v359_v45, %v339_v38 }
  0xbb   : > { %v519_v48 = vshll.u32 %v518_v41, 16  ;;  %v348_v57 = vpop.permute.xlu1 %347 }
  0xbc   : > { %v514_v43 = vpop.xlane.xlu0 %513  ;;  %v360_v30 = vmul.f32 %v5182_v55, %v348_v57  ;;  %v361_v46 = vmul.f32 %v5185_v56, %v348_v57 }
  0xbd   : > { %v517_v49 = vcvt.f32.s32 %v514_v43 }
  0xbf   : > { %v520_v54 = vadd.s32 %v519_v48, %v517_v49 }
  0xc0   : > { %v368_v1 = vpop.permute.xlu1 %367 }
  0xc1   : > { %v521_v58 = vrot.slane %v520_v54, 4  ;;  %v382_v9 = vmul.f32 %v5190_v59, %v368_v1  ;;  %v383_v3 = vmul.f32 %v5193_v60, %v368_v1 }
  0xc3   : > { %v522_v61 = vadd.s32 %v521_v58, %v520_v54  ;;  %v386_v16 = vadd.f32 %v382_v9, %v362_v50  ;;  %v387_v17 = vadd.f32 %v383_v3, %v363_v53 }
  0xc4   : > { %v252_v0 = vpop.permute.xlu0 %251 }
  0xc5   : > { %v264_v2 = vmul.f32 %v5131_v21, %v252_v0  ;;  %v265_v8 = vmul.f32 %v5134_v22, %v252_v0  ;;  %v523_v13 = vrot.slane %v522_v61, 2  ;;  %v372_v21 = vpop.permute.xlu1 %371  ;;  %v336_v22 = vmul.f32 %v5173_v51, %v324_v39  ;;  %v4234_v0 = vld [vmem:[%s5122_s29 + $0x18] ss:$0 sm:$0xff] }
  0xc6   : > { %v384_v52 = vmul.f32 %v5190_v59, %v372_v21  ;;  %v385_v38 = vmul.f32 %v5193_v60, %v372_v21 }
  0xc7   : > { %v268_v14 = vadd.f32 %v264_v2, %v242_v12  ;;  %v269_v15 = vadd.f32 %v265_v8, %v242_v12  ;;  %v524_v26 = vadd.s32 %v523_v13, %v522_v61  ;;  %v4233_v61 = vld [vmem:[%s5122_s29 + $0x10] ss:$0 sm:$0xff] }
  0xc9   : > { %v292_v28 = vadd.f32 %v288_v10, %v268_v14  ;;  %v293_v29 = vadd.f32 %v289_v11, %v269_v15  ;;  %v392_v33 = vpop.permute.xlu0 %391  ;;  %v525_v12 = vrot.slane %v524_v26, 1  ;;  %v396_v39 = vpop.permute.xlu1 %395 }
  0xca   : > { %v406_v34 = vmul.f32 %v5197_v62, %v392_v33  ;;  %v407_v20 = vmul.f32 %v5200_v63, %v392_v33  ;;  %v408_v55 = vmul.f32 %v5197_v62, %v396_v39  ;;  %v409_v56 = vmul.f32 %v5200_v63, %v396_v39 }
  0xcb   : > { %v316_v32 = vadd.f32 %v312_v18, %v292_v28  ;;  %v317_v47 = vadd.f32 %v313_v19, %v293_v29  ;;  %v526_v36 = vadd.s32 %v525_v12, %v524_v26 }
  0xcc   : > { %v410_v31 = vadd.f32 %v406_v34, %v386_v16  ;;  %v411_v35 = vadd.f32 %v407_v20, %v387_v17 }
  0xcd   : > { %v340_v51 = vadd.f32 %v336_v22, %v316_v32  ;;  %v341_v37 = vadd.f32 %v337_v6, %v317_v47  ;;  %4254 = vpush %v526_v36 }
  0xce   : > { %v420_v40 = vpop.permute.xlu0 %419  ;;  %v416_v59 = vpop.permute.xlu1 %415 }
  0xcf   : > { %v364_v41 = vadd.f32 %v360_v30, %v340_v51  ;;  %v365_v42 = vadd.f32 %v361_v46, %v341_v37  ;;  %v432_v45 = vmul.f32 %v5208_v4, %v420_v40  ;;  %v433_v48 = vmul.f32 %v5211_v5, %v420_v40 }
  0xd0   : > { %v430_v50 = vmul.f32 %v5208_v4, %v416_v59  ;;  %v431_v53 = vmul.f32 %v5211_v5, %v416_v59 }
  0xd1   : > { %v388_v43 = vadd.f32 %v384_v52, %v364_v41  ;;  %v389_v44 = vadd.f32 %v385_v38, %v365_v42 }
  0xd2   : > { %v434_v58 = vadd.f32 %v430_v50, %v410_v31  ;;  %v435_v62 = vadd.f32 %v431_v53, %v411_v35 }
  0xd3   : > { %v412_v49 = vadd.f32 %v408_v55, %v388_v43  ;;  %v413_v60 = vadd.f32 %v409_v56, %v389_v44  ;;  %v440_v63 = vpop.permute.xlu1 %439 }
  0xd4   : > { %v454_v1 = vmul.f32 %v4233_v61, %v440_v63  ;;  %v455_v2 = vmul.f32 %v4234_v0, %v440_v63 }
  0xd5   : > { %v436_v54 = vadd.f32 %v432_v45, %v412_v49  ;;  %v437_v57 = vadd.f32 %v433_v48, %v413_v60 }
  0xd6   : > { %v458_v8 = vadd.f32 %v454_v1, %v434_v58  ;;  %v459_v9 = vadd.f32 %v455_v2, %v435_v62 }
  0xd7   : > { %v444_v3 = vpop.permute.xlu1 %443 }
  0xd8   : > { %v456_v10 = vmul.f32 %v4233_v61, %v444_v3  ;;  %v457_v11 = vmul.f32 %v4234_v0, %v444_v3  ;;  %v462_v13 = vmax.f32 %v458_v8, 0.2  ;;  %v463_v14 = vmax.f32 %v459_v9, 0.2 }
  0xda   : > { %v460_v4 = vadd.f32 %v456_v10, %v436_v54  ;;  %v461_v15 = vadd.f32 %v457_v11, %v437_v57  ;;  %v466_v5 = vmin.f32 %v462_v13, 5.0  ;;  %v467_v16 = vmin.f32 %v463_v14, 5.0 }
  0xdc   : > { %v464_v17 = vmax.f32 %v460_v4, 0.2  ;;  %v465_v18 = vmax.f32 %v461_v15, 0.2  ;;  %470 = vst [vmem:[#allocation2] sm:$0xff] %v466_v5  ;;  %473 = vst [vmem:[#allocation2 + $0x10] sm:$0xff] %v467_v16 }
  0xde   : > { %v468_v19 = vmin.f32 %v464_v17, 5.0  ;;  %v469_v21 = vmin.f32 %v465_v18, 5.0 }
  0xe0   : > { %471 = vst [vmem:[#allocation2 + $0x8] sm:$0x3] %v468_v19  ;;  %474 = vst [vmem:[#allocation2 + $0x18] sm:$0x3] %v469_v21 }
  0xfe   : > { %s4255_s15 = spop %4254 }
  0xff   : > { %p4236_p10 = scmp.ne.s32.totalorder %s4255_s15, 0 }
 0x100   : > { %s4237_s10 = sshll.u32 (!%p4236_p10), %s4857_s17, 4  ;;  %vm536_vm8 = vcmp.lt.s32.totalorder (!%p4236_p10), %v5109_v7, 196 }
 0x101   : > { %531 = sbr.rel (%p4236_p10) target bundleno = 264 (0x108), region = 40  ;;  %s533_s11 = scalar_lea.vmem (!%p4236_p10), [#allocation2], %s4237_s10 }
 0x102   : > { %v534_v26 = vld [vmem:[%s533_s11] sm:$0xff] (!%p4236_p10)  ;;  %v535_v22 = vld [vmem:[%s533_s11 + $0x8] sm:$0x3] (!%p4236_p10) }
 0x103   : > { %v537_v6 = vsel (!%p4236_p10), %vm536_vm8, %v534_v26, 0.0  ;;  %v538_v28 = vsel (!%p4236_p10), %vm536_vm8, %v535_v22, 0.0 }
 0x104   : > { %539 = vst [vmem:[%s5250_s9] sm:$0xff] (!%p4236_p10), %v537_v6  ;;  %540 = vst [vmem:[%s5250_s9 + $0x8] sm:$0x3] (!%p4236_p10), %v538_v28 }
 0x108 PF: > { %p4238_p11 = scmp.eq.s32.totalorder %s4255_s15, 0 }
 0x10a   : > { %544 = sbr.rel (%p4238_p11) target bundleno = 2613 (0xa35), region = 44 }
 0x111   : > { %v5256_v29 = vld [vmem:[#allocation2] sm:$0xff]  ;;  %546 = vst [vmem:[#allocation3 + $0x8] sm:$0x3] %v5140_v25  ;;  %545 = vst [vmem:[#allocation3] sm:$0xff] %v5136_v23  ;;  %v9735_v33 = vmov 0   ;;  %v9683_v34 = vmov 64  }
 0x112   : > { %549 = vst [vmem:[#allocation3 + $0x18] sm:$0x3] %v5143_v27  ;;  %548 = vst [vmem:[#allocation3 + $0x10] sm:$0xff] %v5138_v24  ;;  %4462 = vset.pattern.permute.xlu1 %v9735_v33  ;;  %4527 = vset.pattern.permute.xlu0 %v9683_v34  ;;  %v5265_v20 = vld [vmem:[#allocation2 + $0x8] sm:$0x3]  ;;  %v9732_v25 = vmov 1  }
 0x113   : > { %564 = vperm.xlu1 %4462, %v5256_v29   ;;  %v9681_v24 = vmov 65   ;;  %v9730_v27 = vmov 2   ;;  %v9678_v30 = vmov 66   ;;  %v9676_v46 = vmov 67  }
 0x114   : > { %v9728_v32 = vmov 3   ;;  %v9675_v47 = vmov 68   ;;  %v9674_v31 = vmov 69   ;;  %v9726_v35 = vmov 4  }
 0x115   : > { %v9673_v36 = vmov 70   ;;  %v9671_v51 = vmov 71   ;;  %v9722_v37 = vmov 5   ;;  %v9670_v52 = vmov 72  }
 0x116   : > { %v9719_v38 = vmov 6   ;;  %v9668_v39 = vmov 73   ;;  %v9717_v40 = vmov 7   ;;  %v9667_v41 = vmov 74  }
 0x117   : > { %569 = vperm.xlu1 %4462, %v5265_v20   ;;  %v9666_v42 = vmov 75   ;;  %v9714_v55 = vmov 8   ;;  %v9665_v56 = vmov 76   ;;  %v9664_v43 = vmov 77  }
 0x118   : > { %v5268_v12 = vld [vmem:[#allocation3 + $0x8] sm:$0x3]  ;;  %v9710_v44 = vmov 9   ;;  %v9662_v45 = vmov 78   ;;  %v9708_v48 = vmov 10   ;;  %v9661_v59 = vmov 79  }
 0x119   : > { %1712 = vperm.xlu0 %4527, %v5268_v12   ;;  %v9659_v49 = vmov 80   ;;  %v9706_v60 = vmov 11   ;;  %v9658_v50 = vmov 81   ;;  %v9703_v54 = vmov 12  }
 0x11a   : > { %v9657_v58 = vmov 82   ;;  %v9656_v0 = vmov 83   ;;  %v9701_v2 = vmov 13   ;;  %v9655_v9 = vmov 84  }
 0x11b   : > { %4463 = vset.pattern.permute.xlu1 %v9732_v25  ;;  %v9699_v11 = vmov 14   ;;  %v9653_v14 = vmov 85   ;;  %v9652_v17 = vmov 86   ;;  %v9694_v19 = vmov 15  }
 0x11c   : > { %578 = vperm.xlu1 %4463, %v5268_v12   ;;  %v9654_v26 = vmov 87  }
 0x11d   : > { %4528 = vset.pattern.permute.xlu0 %v9681_v24 }
 0x11e   : > { %1727 = vperm.xlu0 %4528, %v5136_v23  }
 0x120   : > { %583 = vperm.xlu1 %4463, %v5256_v29  }
 0x122   : > { %1739 = vperm.xlu0 %4528, %v5265_v20  }
 0x124   : > { %4464 = vset.pattern.permute.xlu1 %v9730_v27 }
 0x125   : > { %593 = vperm.xlu1 %4464, %v5136_v23  }
 0x126   : > { %4531 = vset.pattern.permute.xlu0 %v9678_v30 }
 0x127   : > { %1748 = vperm.xlu0 %4531, %v5268_v12  }
 0x129   : > { %601 = vperm.xlu1 %4464, %v5256_v29  }
 0x12b   : > { %4532 = vset.pattern.permute.xlu0 %v9676_v46  ;;  %v9686_v46 = vmov 19  }
 0x12c   : > { %1763 = vperm.xlu0 %4532, %v5136_v23  }
 0x12d   : > { %605 = vperm.xlu1 %4464, %v5265_v20  }
 0x130   : > { %1775 = vperm.xlu0 %4532, %v5265_v20  }
 0x131   : > { %4465 = vset.pattern.permute.xlu1 %v9728_v32  ;;  %v9738_v32 = vmov 23  }
 0x132   : > { %614 = vperm.xlu1 %4465, %v5268_v12  }
 0x134   : > { %4535 = vset.pattern.permute.xlu0 %v9675_v47  ;;  %v9685_v47 = vmov 93  }
 0x135   : > { %1784 = vperm.xlu0 %4535, %v5268_v12  }
 0x136   : > { %619 = vperm.xlu1 %4465, %v5256_v29  }
 0x139   : > { %4536 = vset.pattern.permute.xlu0 %v9674_v31 }
 0x13a   : > { %1799 = vperm.xlu0 %4536, %v5136_v23   ;;  %4466 = vset.pattern.permute.xlu1 %v9726_v35  ;;  %v9737_v35 = vmov 99  }
 0x13b   : > { %629 = vperm.xlu1 %4466, %v5136_v23  }
 0x13e   : > { %1811 = vperm.xlu0 %4536, %v5265_v20  }
 0x13f   : > { %637 = vperm.xlu1 %4466, %v5256_v29  }
 0x142   : > { %4539 = vset.pattern.permute.xlu0 %v9673_v36 }
 0x143   : > { %1820 = vperm.xlu0 %4539, %v5268_v12   ;;  %641 = vperm.xlu1 %4466, %v5265_v20  }
 0x147   : > { %4540 = vset.pattern.permute.xlu0 %v9671_v51  ;;  %4467 = vset.pattern.permute.xlu1 %v9722_v37 }
 0x148   : > { %1835 = vperm.xlu0 %4540, %v5136_v23   ;;  %650 = vperm.xlu1 %4467, %v5268_v12  }
 0x14c   : > { %1847 = vperm.xlu0 %4540, %v5265_v20   ;;  %655 = vperm.xlu1 %4467, %v5256_v29  }
 0x150   : > { %4543 = vset.pattern.permute.xlu0 %v9670_v52  ;;  %4468 = vset.pattern.permute.xlu1 %v9719_v38 }
 0x151   : > { %1856 = vperm.xlu0 %4543, %v5268_v12   ;;  %665 = vperm.xlu1 %4468, %v5136_v23  }
 0x155   : > { %4544 = vset.pattern.permute.xlu0 %v9668_v39  ;;  %673 = vperm.xlu1 %4468, %v5256_v29  }
 0x156   : > { %1871 = vperm.xlu0 %4544, %v5136_v23  }
 0x159   : > { %677 = vperm.xlu1 %4468, %v5265_v20  }
 0x15a   : > { %1883 = vperm.xlu0 %4544, %v5265_v20  }
 0x15d   : > { %4469 = vset.pattern.permute.xlu1 %v9717_v40 }
 0x15e   : > { %4547 = vset.pattern.permute.xlu0 %v9667_v41  ;;  %686 = vperm.xlu1 %4469, %v5268_v12   ;;  %v9688_v41 = vmov 18  }
 0x15f   : > { %1892 = vperm.xlu0 %4547, %v5268_v12  }
 0x162   : > { %691 = vperm.xlu1 %4469, %v5256_v29  }
 0x163   : > { %4548 = vset.pattern.permute.xlu0 %v9666_v42  ;;  %v9672_v42 = vmov 91  }
 0x164   : > { %1907 = vperm.xlu0 %4548, %v5136_v23  }
 0x166   : > { %4470 = vset.pattern.permute.xlu1 %v9714_v55  ;;  %v9724_v55 = vmov 22  }
 0x167   : > { %701 = vperm.xlu1 %4470, %v5136_v23  }
 0x168   : > { %1919 = vperm.xlu0 %4548, %v5265_v20  }
 0x16b   : > { %709 = vperm.xlu1 %4470, %v5256_v29  }
 0x16c   : > { %4551 = vset.pattern.permute.xlu0 %v9665_v56 }
 0x16d   : > { %1928 = vperm.xlu0 %4551, %v5268_v12  }
 0x16f   : > { %713 = vperm.xlu1 %4470, %v5265_v20  }
 0x171   : > { %4552 = vset.pattern.permute.xlu0 %v9664_v43 }
 0x172   : > { %1943 = vperm.xlu0 %4552, %v5136_v23  }
 0x173   : > { %4471 = vset.pattern.permute.xlu1 %v9710_v44  ;;  %v9721_v44 = vmov 97  }
 0x174   : > { %722 = vperm.xlu1 %4471, %v5268_v12  }
 0x176   : > { %1955 = vperm.xlu0 %4552, %v5265_v20  }
 0x178   : > { %727 = vperm.xlu1 %4471, %v5256_v29  }
 0x17a   : > { %4555 = vset.pattern.permute.xlu0 %v9662_v45 }
 0x17b   : > { %1964 = vperm.xlu0 %4555, %v5268_v12  }
 0x17c   : > { %4472 = vset.pattern.permute.xlu1 %v9708_v48 }
 0x17d   : > { %737 = vperm.xlu1 %4472, %v5136_v23  }
 0x17f   : > { %4556 = vset.pattern.permute.xlu0 %v9661_v59 }
 0x180   : > { %1979 = vperm.xlu0 %4556, %v5136_v23  }
 0x181   : > { %745 = vperm.xlu1 %4472, %v5256_v29  }
 0x184   : > { %1991 = vperm.xlu0 %4556, %v5265_v20  }
 0x185   : > { %749 = vperm.xlu1 %4472, %v5265_v20  }
 0x188   : > { %4559 = vset.pattern.permute.xlu0 %v9659_v49 }
 0x189   : > { %2000 = vperm.xlu0 %4559, %v5268_v12   ;;  %4473 = vset.pattern.permute.xlu1 %v9706_v60 }
 0x18a   : > { %758 = vperm.xlu1 %4473, %v5268_v12  }
 0x18d   : > { %4560 = vset.pattern.permute.xlu0 %v9658_v50 }
 0x18e   : > { %2015 = vperm.xlu0 %4560, %v5136_v23   ;;  %763 = vperm.xlu1 %4473, %v5256_v29  }
 0x192   : > { %v5351_v53 = vpop.permute.xlu1 %564  ;;  %2027 = vperm.xlu0 %4560, %v5265_v20   ;;  %4474 = vset.pattern.permute.xlu1 %v9703_v54 }
 0x193   : > { %10022 = vst [vmem:[#allocation5_spill] sm:$0xff] %v5351_v53  ;;  %773 = vperm.xlu1 %4474, %v5136_v23  }
 0x196   : > { %v5356_v57 = vpop.permute.xlu1 %569  ;;  %4563 = vset.pattern.permute.xlu0 %v9657_v58  ;;  %v9663_v58 = vmov 89  }
 0x197   : > { %10023 = vst [vmem:[#allocation6_spill] sm:$0xff] %v5356_v57  ;;  %2036 = vperm.xlu0 %4563, %v5268_v12   ;;  %781 = vperm.xlu1 %4474, %v5256_v29  }
 0x198   : > { %v5361_v62 = vpop.permute.xlu0 %1712 }
 0x199   : > { %10024 = vst [vmem:[#allocation7_spill] sm:$0xff] %v5361_v62 }
 0x19b   : > { %v5363_v61 = vpop.permute.xlu1 %578  ;;  %4564 = vset.pattern.permute.xlu0 %v9656_v0  ;;  %785 = vperm.xlu1 %4474, %v5265_v20  }
 0x19c   : > { %10025 = vst [vmem:[#allocation8_spill] sm:$0xff] %v5363_v61  ;;  %2051 = vperm.xlu0 %4564, %v5136_v23   ;;  %v10262_v61 = vmov 18  }
 0x19d   : > { %v5368_v63 = vpop.permute.xlu0 %1727 }
 0x19e   : > { %10026 = vst [vmem:[#allocation9_spill] sm:$0xff] %v5368_v63  ;;  %v9807_v63 = vmov 33  }
 0x19f   : > { %v5370_v1 = vpop.permute.xlu1 %583  ;;  %4475 = vset.pattern.permute.xlu1 %v9701_v2  ;;  %v9712_v2 = vmov 21  }
 0x1a0   : > { %10027 = vst [vmem:[#allocation10_spill] sm:$0xff] %v5370_v1  ;;  %2063 = vperm.xlu0 %4564, %v5265_v20   ;;  %794 = vperm.xlu1 %4475, %v5268_v12   ;;  %v9901_v1 = vmov 57  }
 0x1a1   : > { %v5375_v8 = vpop.permute.xlu0 %1739 }
 0x1a2   : > { %10028 = vst [vmem:[#allocation11_spill] sm:$0xff] %v5375_v8 }
 0x1a4   : > { %4567 = vset.pattern.permute.xlu0 %v9655_v9  ;;  %799 = vperm.xlu1 %4475, %v5256_v29   ;;  %v5379_v3 = vpop.permute.xlu1 %593 }
 0x1a5   : > { %10029 = vst [vmem:[#allocation12_spill] sm:$0xff] %v5379_v3  ;;  %2072 = vperm.xlu0 %4567, %v5268_v12   ;;  %v9834_v3 = vmov 123  }
 0x1a6   : > { %v5382_v10 = vpop.permute.xlu0 %1748 }
 0x1a7   : > { %10030 = vst [vmem:[#allocation13_spill] sm:$0xff] %v5382_v10 }
 0x1a8   : > { %4476 = vset.pattern.permute.xlu1 %v9699_v11  ;;  %v5385_v13 = vpop.permute.xlu1 %601 }
 0x1a9   : > { %10031 = vst [vmem:[#allocation14_spill] sm:$0xff] %v5385_v13  ;;  %4568 = vset.pattern.permute.xlu0 %v9653_v14  ;;  %809 = vperm.xlu1 %4476, %v5136_v23  }
 0x1aa   : > { %2087 = vperm.xlu0 %4568, %v5136_v23  }
 0x1ab   : > { %v5390_v4 = vpop.permute.xlu0 %1763 }
 0x1ac   : > { %10032 = vst [vmem:[#allocation15_spill] sm:$0xff] %v5390_v4  ;;  %v5392_v15 = vpop.permute.xlu1 %605  ;;  %v9797_v4 = vmov 113  }
 0x1ad   : > { %817 = vperm.xlu1 %4476, %v5256_v29  }
 0x1ae   : > { %2099 = vperm.xlu0 %4568, %v5265_v20  }
 0x1af   : > { %v5396_v5 = vpop.permute.xlu0 %1775 }
 0x1b0   : > { %10033 = vst [vmem:[#allocation16_spill] sm:$0xff] %v5396_v5 }
 0x1b1   : > { %821 = vperm.xlu1 %4476, %v5265_v20   ;;  %v5399_v16 = vpop.permute.xlu1 %614 }
 0x1b2   : > { %4571 = vset.pattern.permute.xlu0 %v9652_v17  ;;  %v9692_v17 = vmov 16   ;;  %vm617_vm1 = vcmp.eq.s32.totalorder %v5399_v16, %v5109_v7 }
 0x1b3   : > { %2108 = vperm.xlu0 %4571, %v5268_v12  }
 0x1b4   : > { %v5403_v18 = vpop.permute.xlu0 %1784 }
 0x1b5   : > { %10034 = vst [vmem:[#allocation17_spill] sm:$0xff] %v5403_v18  ;;  %4477 = vset.pattern.permute.xlu1 %v9694_v19  ;;  %v5406_v21 = vpop.permute.xlu1 %619  ;;  %v9705_v19 = vmov 95  }
 0x1b6   : > { %830 = vperm.xlu1 %4477, %v5268_v12  }
 0x1b7   : > { %4572 = vset.pattern.permute.xlu0 %v9654_v26  ;;  %v9660_v26 = vmov 88  }
 0x1b8   : > { %2123 = vperm.xlu0 %4572, %v5136_v23  }
 0x1b9   : > { %v5411_v22 = vpop.permute.xlu0 %1799 }
 0x1ba   : > { %10035 = vst [vmem:[#allocation18_spill] sm:$0xff] %v5411_v22  ;;  %835 = vperm.xlu1 %4477, %v5256_v29   ;;  %v5414_v6 = vpop.permute.xlu1 %629 }
 0x1bb   : > { %10036 = vst [vmem:[#allocation19_spill] sm:$0xff] %v5414_v6 }
 0x1bc   : > { %2135 = vperm.xlu0 %4572, %v5265_v20  }
 0x1bd   : > { %v5417_v28 = vpop.permute.xlu0 %1811 }
 0x1be   : > { %10037 = vst [vmem:[#allocation20_spill] sm:$0xff] %v5417_v28  ;;  %4478 = vset.pattern.permute.xlu1 %v9692_v17  ;;  %v5420_v14 = vpop.permute.xlu1 %637 }
 0x1bf   : > { %10038 = vst [vmem:[#allocation21_spill] sm:$0xff] %v5420_v14  ;;  %845 = vperm.xlu1 %4478, %v5136_v23  }
 0x1c0   : > { %4575 = vset.pattern.permute.xlu0 %v9660_v26  ;;  %v9690_v26 = vmov 17  }
 0x1c1   : > { %2144 = vperm.xlu0 %4575, %v5268_v12  }
 0x1c2   : > { %v5425_v9 = vpop.permute.xlu1 %641  ;;  %v5427_v0 = vpop.permute.xlu0 %1820 }
 0x1c3   : > { %10039 = vst [vmem:[#allocation22_spill] sm:$0xff] %v5425_v9  ;;  %10040 = vst [vmem:[#allocation23_spill] sm:$0xff] %v5427_v0  ;;  %853 = vperm.xlu1 %4478, %v5256_v29   ;;  %v10268_v9 = vmov 19  }
 0x1c5   : > { %4576 = vset.pattern.permute.xlu0 %v9663_v58  ;;  %v9669_v58 = vmov 90  }
 0x1c6   : > { %2159 = vperm.xlu0 %4576, %v5136_v23  }
 0x1c7   : > { %857 = vperm.xlu1 %4478, %v5265_v20   ;;  %v5433_v50 = vpop.permute.xlu1 %650  ;;  %v5435_v49 = vpop.permute.xlu0 %1835 }
 0x1c8   : > { %10041 = vst [vmem:[#allocation24_spill] sm:$0xff] %v5433_v50  ;;  %10042 = vst [vmem:[#allocation25_spill] sm:$0xff] %v5435_v49  ;;  %v9918_v50 = vmov 62  }
 0x1ca   : > { %2171 = vperm.xlu0 %4576, %v5265_v20  }
 0x1cb   : > { %4479 = vset.pattern.permute.xlu1 %v9690_v26  ;;  %v5439_v59 = vpop.permute.xlu1 %655  ;;  %v5441_v45 = vpop.permute.xlu0 %1847 }
 0x1cc   : > { %10043 = vst [vmem:[#allocation26_spill] sm:$0xff] %v5439_v59  ;;  %10044 = vst [vmem:[#allocation27_spill] sm:$0xff] %v5441_v45  ;;  %866 = vperm.xlu1 %4479, %v5268_v12   ;;  %v9898_v59 = vmov 56  }
 0x1ce   : > { %4579 = vset.pattern.permute.xlu0 %v9669_v58 }
 0x1cf   : > { %2180 = vperm.xlu0 %4579, %v5268_v12  }
 0x1d0   : > { %871 = vperm.xlu1 %4479, %v5256_v29   ;;  %v5447_v43 = vpop.permute.xlu1 %665  ;;  %v5449_v56 = vpop.permute.xlu0 %1856 }
 0x1d1   : > { %10045 = vst [vmem:[#allocation28_spill] sm:$0xff] %v5447_v43  ;;  %10046 = vst [vmem:[#allocation29_spill] sm:$0xff] %v5449_v56  ;;  %v9788_v56 = vmov 111  }
 0x1d3   : > { %4580 = vset.pattern.permute.xlu0 %v9672_v42  ;;  %v9680_v42 = vmov 92  }
 0x1d4   : > { %2195 = vperm.xlu0 %4580, %v5136_v23   ;;  %4480 = vset.pattern.permute.xlu1 %v9688_v41  ;;  %v5454_v39 = vpop.permute.xlu1 %673 }
 0x1d5   : > { %10047 = vst [vmem:[#allocation30_spill] sm:$0xff] %v5454_v39  ;;  %881 = vperm.xlu1 %4480, %v5136_v23   ;;  %v5457_v58 = vpop.permute.xlu0 %1871 }
 0x1d6   : > { %10048 = vst [vmem:[#allocation31_spill] sm:$0xff] %v5457_v58 }
 0x1d8   : > { %2207 = vperm.xlu0 %4580, %v5265_v20   ;;  %v5460_v52 = vpop.permute.xlu1 %677 }
 0x1d9   : > { %889 = vperm.xlu1 %4480, %v5256_v29   ;;  %v5463_v51 = vpop.permute.xlu0 %1883 }
 0x1da   : > { %10049 = vst [vmem:[#allocation32_spill] sm:$0xff] %v5463_v51  ;;  %v9746_v51 = vmov 102  }
 0x1dc   : > { %4583 = vset.pattern.permute.xlu0 %v9680_v42 }
 0x1dd   : > { %2216 = vperm.xlu0 %4583, %v5268_v12   ;;  %893 = vperm.xlu1 %4480, %v5265_v20   ;;  %v5468_v36 = vpop.permute.xlu1 %686 }
 0x1de   : > { %v5470_v31 = vpop.permute.xlu0 %1892  ;;  %vm689_vm3 = vcmp.eq.s32.totalorder %v5468_v36, %v5109_v7 }
 0x1df   : > { %10050 = vst [vmem:[#allocation33_spill] sm:$0xff] %v5470_v31  ;;  %v9779_v31 = vmov 109  }
 0x1e1   : > { %4584 = vset.pattern.permute.xlu0 %v9685_v47  ;;  %4481 = vset.pattern.permute.xlu1 %v9686_v46  ;;  %v5474_v30 = vpop.permute.xlu1 %691  ;;  %v9696_v47 = vmov 94   ;;  %v9697_v46 = vmov 20  }
 0x1e2   : > { %2231 = vperm.xlu0 %4584, %v5136_v23   ;;  %902 = vperm.xlu1 %4481, %v5268_v12  }
 0x1e3   : > { %v5478_v42 = vpop.permute.xlu0 %1907 }
 0x1e4   : > { %10051 = vst [vmem:[#allocation34_spill] sm:$0xff] %v5478_v42  ;;  %v9774_v42 = vmov 108  }
 0x1e6   : > { %2243 = vperm.xlu0 %4584, %v5265_v20   ;;  %907 = vperm.xlu1 %4481, %v5256_v29   ;;  %v5482_v24 = vpop.permute.xlu1 %701 }
 0x1e7   : > { %10052 = vst [vmem:[#allocation35_spill] sm:$0xff] %v5482_v24  ;;  %v5484_v34 = vpop.permute.xlu0 %1919 }
 0x1e8   : > { %10053 = vst [vmem:[#allocation36_spill] sm:$0xff] %v5484_v34 }
 0x1ea   : > { %4587 = vset.pattern.permute.xlu0 %v9696_v47  ;;  %4482 = vset.pattern.permute.xlu1 %v9697_v46  ;;  %v5488_v41 = vpop.permute.xlu1 %709 }
 0x1eb   : > { %10054 = vst [vmem:[#allocation37_spill] sm:$0xff] %v5488_v41  ;;  %2252 = vperm.xlu0 %4587, %v5268_v12   ;;  %917 = vperm.xlu1 %4482, %v5136_v23   ;;  %v5901_v41 = vld [vmem:[#allocation3 + $0x10] sm:$0xff] }
 0x1ec   : > { %v5492_v26 = vpop.permute.xlu0 %1928 }
 0x1ed   : > { %10055 = vst [vmem:[#allocation38_spill] sm:$0xff] %v5492_v26 }
 0x1ee   : > { %v5494_v17 = vpop.permute.xlu1 %713 }
 0x1ef   : > { %10056 = vst [vmem:[#allocation39_spill] sm:$0xff] %v5494_v17  ;;  %4588 = vset.pattern.permute.xlu0 %v9705_v19  ;;  %925 = vperm.xlu1 %4482, %v5256_v29   ;;  %v9716_v19 = vmov 96   ;;  %v10266_v17 = vmov 64  }
 0x1f0   : > { %2267 = vperm.xlu0 %4588, %v5136_v23  }
 0x1f1   : > { %v5499_v47 = vpop.permute.xlu0 %1943 }
 0x1f2   : > { %10057 = vst [vmem:[#allocation40_spill] sm:$0xff] %v5499_v47  ;;  %v9770_v47 = vmov 107  }
 0x1f3   : > { %929 = vperm.xlu1 %4482, %v5265_v20   ;;  %v5502_v46 = vpop.permute.xlu1 %722 }
 0x1f4   : > { %10058 = vst [vmem:[#allocation41_spill] sm:$0xff] %v5502_v46  ;;  %2279 = vperm.xlu0 %4588, %v5265_v20  }
 0x1f5   : > { %v5505_v11 = vpop.permute.xlu0 %1955 }
 0x1f6   : > { %10059 = vst [vmem:[#allocation42_spill] sm:$0xff] %v5505_v11  ;;  %v9743_v11 = vmov 101  }
 0x1f7   : > { %4483 = vset.pattern.permute.xlu1 %v9712_v2  ;;  %v5508_v54 = vpop.permute.xlu1 %727 }
 0x1f8   : > { %10060 = vst [vmem:[#allocation43_spill] sm:$0xff] %v5508_v54  ;;  %4591 = vset.pattern.permute.xlu0 %v9716_v19  ;;  %938 = vperm.xlu1 %4483, %v5268_v12  }
 0x1f9   : > { %2288 = vperm.xlu0 %4591, %v5268_v12  }
 0x1fa   : > { %v5513_v60 = vpop.permute.xlu0 %1964 }
 0x1fb   : > { %10061 = vst [vmem:[#allocation44_spill] sm:$0xff] %v5513_v60 }
 0x1fc   : > { %943 = vperm.xlu1 %4483, %v5256_v29   ;;  %v5516_v48 = vpop.permute.xlu1 %737 }
 0x1fd   : > { %10062 = vst [vmem:[#allocation45_spill] sm:$0xff] %v5516_v48  ;;  %4592 = vset.pattern.permute.xlu0 %v9721_v44  ;;  %v9734_v44 = vmov 98   ;;  %v9826_v48 = vmov 121  }
 0x1fe   : > { %2303 = vperm.xlu0 %4592, %v5136_v23  }
 0x1ff   : > { %v5520_v2 = vpop.permute.xlu0 %1979 }
 0x200   : > { %10063 = vst [vmem:[#allocation46_spill] sm:$0xff] %v5520_v2  ;;  %4484 = vset.pattern.permute.xlu1 %v9724_v55  ;;  %v5523_v19 = vpop.permute.xlu1 %745  ;;  %v9759_v2 = vmov 105  }
 0x201   : > { %10064 = vst [vmem:[#allocation47_spill] sm:$0xff] %v5523_v19  ;;  %953 = vperm.xlu1 %4484, %v5136_v23  }
 0x202   : > { %2315 = vperm.xlu0 %4592, %v5265_v20  }
 0x203   : > { %v5527_v40 = vpop.permute.xlu0 %1991 }
 0x204   : > { %10065 = vst [vmem:[#allocation48_spill] sm:$0xff] %v5527_v40  ;;  %v5529_v38 = vpop.permute.xlu1 %749 }
 0x205   : > { %961 = vperm.xlu1 %4484, %v5256_v29  }
 0x206   : > { %4595 = vset.pattern.permute.xlu0 %v9734_v44 }
 0x207   : > { %2324 = vperm.xlu0 %4595, %v5268_v12  }
 0x208   : > { %v5534_v37 = vpop.permute.xlu0 %2000 }
 0x209   : > { %10066 = vst [vmem:[#allocation49_spill] sm:$0xff] %v5534_v37  ;;  %965 = vperm.xlu1 %4484, %v5265_v20   ;;  %v5537_v55 = vpop.permute.xlu1 %758 }
 0x20a   : > { %vm761_vm6 = vcmp.eq.s32.totalorder %v5537_v55, %v5109_v7 }
 0x20b   : > { %4596 = vset.pattern.permute.xlu0 %v9737_v35  ;;  %v9740_v35 = vmov 100  }
 0x20c   : > { %2339 = vperm.xlu0 %4596, %v5136_v23  }
 0x20d   : > { %4485 = vset.pattern.permute.xlu1 %v9738_v32  ;;  %v5542_v27 = vpop.permute.xlu1 %763  ;;  %v5544_v25 = vpop.permute.xlu0 %2015  ;;  %v9741_v32 = vmov 24  }
 0x20e   : > { %10067 = vst [vmem:[#allocation50_spill] sm:$0xff] %v5544_v25  ;;  %974 = vperm.xlu1 %4485, %v5268_v12  }
 0x210   : > { %2351 = vperm.xlu0 %4596, %v5265_v20  }
 0x211   : > { %v5548_v44 = vpop.permute.xlu0 %2027 }
 0x212   : > { %10068 = vst [vmem:[#allocation51_spill] sm:$0xff] %v5548_v44  ;;  %979 = vperm.xlu1 %4485, %v5256_v29   ;;  %v5551_v33 = vpop.permute.xlu1 %773 }
 0x213   : > { %10069 = vst [vmem:[#allocation52_spill] sm:$0xff] %v5551_v33  ;;  %v9855_v33 = vmov 43  }
 0x214   : > { %4599 = vset.pattern.permute.xlu0 %v9740_v35 }
 0x215   : > { %2360 = vperm.xlu0 %4599, %v5268_v12  }
 0x216   : > { %4486 = vset.pattern.permute.xlu1 %v9741_v32  ;;  %v5556_v40 = vpop.permute.xlu1 %781  ;;  %v5558_v34 = vpop.permute.xlu0 %2036 }
 0x217   : > { %10070 = vst [vmem:[#allocation53_spill] sm:$0xff] %v5556_v40  ;;  %10071 = vst [vmem:[#allocation54_spill] sm:$0xff] %v5558_v34  ;;  %989 = vperm.xlu1 %4486, %v5136_v23   ;;  %v9750_v34 = vmov 103  }
 0x219   : > { %4600 = vset.pattern.permute.xlu0 %v9743_v11  ;;  %v9747_v11 = vmov 25  }
 0x21a   : > { %2375 = vperm.xlu0 %4600, %v5136_v23   ;;  %v5563_v44 = vpop.permute.xlu1 %785 }
 0x21b   : > { %10072 = vst [vmem:[#allocation55_spill] sm:$0xff] %v5563_v44  ;;  %997 = vperm.xlu1 %4486, %v5256_v29   ;;  %v5566_v35 = vpop.permute.xlu0 %2051 }
 0x21c   : > { %10073 = vst [vmem:[#allocation56_spill] sm:$0xff] %v5566_v35 }
 0x21e   : > { %2387 = vperm.xlu0 %4600, %v5265_v20  }
 0x21f   : > { %1001 = vperm.xlu1 %4486, %v5265_v20   ;;  %v5570_v32 = vpop.permute.xlu1 %794  ;;  %v5572_v45 = vpop.permute.xlu0 %2063 }
 0x220   : > { %10074 = vst [vmem:[#allocation57_spill] sm:$0xff] %v5570_v32  ;;  %10075 = vst [vmem:[#allocation58_spill] sm:$0xff] %v5572_v45  ;;  %v9909_v32 = vmov 59  }
 0x222   : > { %4603 = vset.pattern.permute.xlu0 %v9746_v51 }
 0x223   : > { %2396 = vperm.xlu0 %4603, %v5268_v12   ;;  %4487 = vset.pattern.permute.xlu1 %v9747_v11  ;;  %v5577_v5 = vpop.permute.xlu1 %799  ;;  %v9754_v11 = vmov 26  }
 0x224   : > { %10076 = vst [vmem:[#allocation59_spill] sm:$0xff] %v5577_v5  ;;  %1010 = vperm.xlu1 %4487, %v5268_v12   ;;  %v5580_v35 = vpop.permute.xlu0 %2072 }
 0x225   : > { %10077 = vst [vmem:[#allocation60_spill] sm:$0xff] %v5580_v35 }
 0x227   : > { %4604 = vset.pattern.permute.xlu0 %v9750_v34  ;;  %v9756_v34 = vmov 104  }
 0x228   : > { %2411 = vperm.xlu0 %4604, %v5136_v23   ;;  %1015 = vperm.xlu1 %4487, %v5256_v29   ;;  %v5585_v45 = vpop.permute.xlu1 %809 }
 0x229   : > { %10078 = vst [vmem:[#allocation61_spill] sm:$0xff] %v5585_v45  ;;  %v5587_v51 = vpop.permute.xlu0 %2087  ;;  %v9820_v45 = vmov 119  }
 0x22a   : > { %10079 = vst [vmem:[#allocation62_spill] sm:$0xff] %v5587_v51 }
 0x22c   : > { %2423 = vperm.xlu0 %4604, %v5265_v20   ;;  %4488 = vset.pattern.permute.xlu1 %v9754_v11  ;;  %v5591_v28 = vpop.permute.xlu1 %817 }
 0x22d   : > { %10080 = vst [vmem:[#allocation63_spill] sm:$0xff] %v5591_v28  ;;  %1025 = vperm.xlu1 %4488, %v5136_v23   ;;  %v5594_v35 = vpop.permute.xlu0 %2099  ;;  %v9814_v28 = vmov 117  }
 0x22e   : > { %10081 = vst [vmem:[#allocation64_spill] sm:$0xff] %v5594_v35 }
 0x230   : > { %4607 = vset.pattern.permute.xlu0 %v9756_v34  ;;  %v5597_v25 = vpop.permute.xlu1 %821  ;;  %v9762_v34 = vmov 27  }
 0x231   : > { %2432 = vperm.xlu0 %4607, %v5268_v12   ;;  %1033 = vperm.xlu1 %4488, %v5256_v29  }
 0x232   : > { %v5601_v51 = vpop.permute.xlu0 %2108 }
 0x233   : > { %10082 = vst [vmem:[#allocation65_spill] sm:$0xff] %v5601_v51 }
 0x235   : > { %4608 = vset.pattern.permute.xlu0 %v9759_v2  ;;  %1037 = vperm.xlu1 %4488, %v5265_v20   ;;  %v5605_v11 = vpop.permute.xlu1 %830  ;;  %v9765_v2 = vmov 106  }
 0x236   : > { %2447 = vperm.xlu0 %4608, %v5136_v23  }
 0x237   : > { %v5608_v35 = vpop.permute.xlu0 %2123 }
 0x238   : > { %10083 = vst [vmem:[#allocation66_spill] sm:$0xff] %v5608_v35 }
 0x239   : > { %4489 = vset.pattern.permute.xlu1 %v9762_v34  ;;  %v5611_v37 = vpop.permute.xlu1 %835  ;;  %v9767_v34 = vmov 28  }
 0x23a   : > { %2459 = vperm.xlu0 %4608, %v5265_v20   ;;  %1046 = vperm.xlu1 %4489, %v5268_v12  }
 0x23b   : > { %v5615_v51 = vpop.permute.xlu0 %2135 }
 0x23c   : > { %10084 = vst [vmem:[#allocation67_spill] sm:$0xff] %v5615_v51 }
 0x23e   : > { %4611 = vset.pattern.permute.xlu0 %v9765_v2  ;;  %1051 = vperm.xlu1 %4489, %v5256_v29   ;;  %v5619_v60 = vpop.permute.xlu1 %845 }
 0x23f   : > { %10085 = vst [vmem:[#allocation68_spill] sm:$0xff] %v5619_v60  ;;  %2468 = vperm.xlu0 %4611, %v5268_v12  }
 0x240   : > { %v5622_v35 = vpop.permute.xlu0 %2144 }
 0x241   : > { %10086 = vst [vmem:[#allocation69_spill] sm:$0xff] %v5622_v35 }
 0x242   : > { %4490 = vset.pattern.permute.xlu1 %v9767_v34  ;;  %v5625_v8 = vpop.permute.xlu1 %853 }
 0x243   : > { %10087 = vst [vmem:[#allocation70_spill] sm:$0xff] %v5625_v8  ;;  %4612 = vset.pattern.permute.xlu0 %v9770_v47  ;;  %1061 = vperm.xlu1 %4490, %v5136_v23   ;;  %v9851_v8 = vmov 42  }
 0x244   : > { %2483 = vperm.xlu0 %4612, %v5136_v23  }
 0x245   : > { %v5630_v2 = vpop.permute.xlu0 %2159 }
 0x246   : > { %10088 = vst [vmem:[#allocation71_spill] sm:$0xff] %v5630_v2  ;;  %v5632_v51 = vpop.permute.xlu1 %857  ;;  %v9776_v2 = vmov 29  }
 0x247   : > { %10089 = vst [vmem:[#allocation72_spill] sm:$0xff] %v5632_v51  ;;  %1069 = vperm.xlu1 %4490, %v5256_v29  }
 0x248   : > { %2495 = vperm.xlu0 %4612, %v5265_v20  }
 0x249   : > { %v5636_v35 = vpop.permute.xlu0 %2171 }
 0x24a   : > { %10090 = vst [vmem:[#allocation73_spill] sm:$0xff] %v5636_v35 }
 0x24b   : > { %1073 = vperm.xlu1 %4490, %v5265_v20   ;;  %v5639_v34 = vpop.permute.xlu1 %866 }
 0x24c   : > { %10091 = vst [vmem:[#allocation74_spill] sm:$0xff] %v5639_v34  ;;  %4615 = vset.pattern.permute.xlu0 %v9774_v42  ;;  %v9886_v34 = vmov 52  }
 0x24d   : > { %2504 = vperm.xlu0 %4615, %v5268_v12  }
 0x24e   : > { %v5643_v47 = vpop.permute.xlu0 %2180 }
 0x24f   : > { %10092 = vst [vmem:[#allocation75_spill] sm:$0xff] %v5643_v47  ;;  %4491 = vset.pattern.permute.xlu1 %v9776_v2  ;;  %v5646_v26 = vpop.permute.xlu1 %871  ;;  %v9783_v2 = vmov 30  }
 0x250   : > { %10093 = vst [vmem:[#allocation76_spill] sm:$0xff] %v5646_v26  ;;  %1082 = vperm.xlu1 %4491, %v5268_v12   ;;  %v9892_v26 = vmov 54  }
 0x251   : > { %4616 = vset.pattern.permute.xlu0 %v9779_v31  ;;  %v9785_v31 = vmov 110  }
 0x252   : > { %2519 = vperm.xlu0 %4616, %v5136_v23  }
 0x253   : > { %v5651_v35 = vpop.permute.xlu0 %2195 }
 0x254   : > { %10094 = vst [vmem:[#allocation77_spill] sm:$0xff] %v5651_v35  ;;  %1087 = vperm.xlu1 %4491, %v5256_v29   ;;  %v5654_v42 = vpop.permute.xlu1 %881 }
 0x255   : > { %10095 = vst [vmem:[#allocation78_spill] sm:$0xff] %v5654_v42 }
 0x256   : > { %2531 = vperm.xlu0 %4616, %v5265_v20  }
 0x257   : > { %v5657_v47 = vpop.permute.xlu0 %2207 }
 0x258   : > { %10096 = vst [vmem:[#allocation79_spill] sm:$0xff] %v5657_v47  ;;  %4492 = vset.pattern.permute.xlu1 %v9783_v2  ;;  %v5660_v58 = vpop.permute.xlu1 %889 }
 0x259   : > { %10097 = vst [vmem:[#allocation80_spill] sm:$0xff] %v5660_v58  ;;  %1097 = vperm.xlu1 %4492, %v5136_v23  }
 0x25a   : > { %4619 = vset.pattern.permute.xlu0 %v9785_v31  ;;  %v9792_v31 = vmov 31  }
 0x25b   : > { %2540 = vperm.xlu0 %4619, %v5268_v12  }
 0x25c   : > { %v5665_v35 = vpop.permute.xlu1 %893  ;;  %v5667_v49 = vpop.permute.xlu0 %2216 }
 0x25d   : > { %10098 = vst [vmem:[#allocation81_spill] sm:$0xff] %v5667_v49  ;;  %1105 = vperm.xlu1 %4492, %v5256_v29  }
 0x25f   : > { %4620 = vset.pattern.permute.xlu0 %v9788_v56  ;;  %v9794_v56 = vmov 112  }
 0x260   : > { %2555 = vperm.xlu0 %4620, %v5136_v23  }
 0x261   : > { %1109 = vperm.xlu1 %4492, %v5265_v20   ;;  %v5673_v2 = vpop.permute.xlu1 %902  ;;  %v5675_v47 = vpop.permute.xlu0 %2231 }
 0x262   : > { %10099 = vst [vmem:[#allocation82_spill] sm:$0xff] %v5675_v47 }
 0x264   : > { %2567 = vperm.xlu0 %4620, %v5265_v20  }
 0x265   : > { %4493 = vset.pattern.permute.xlu1 %v9792_v31  ;;  %v5679_v0 = vpop.permute.xlu1 %907  ;;  %v5681_v49 = vpop.permute.xlu0 %2243  ;;  %v9798_v31 = vmov 32  }
 0x266   : > { %10100 = vst [vmem:[#allocation83_spill] sm:$0xff] %v5681_v49  ;;  %1118 = vperm.xlu1 %4493, %v5268_v12  }
 0x268   : > { %4623 = vset.pattern.permute.xlu0 %v9794_v56 }
 0x269   : > { %2576 = vperm.xlu0 %4623, %v5268_v12  }
 0x26a   : > { %1123 = vperm.xlu1 %4493, %v5256_v29   ;;  %v5687_v22 = vpop.permute.xlu1 %917  ;;  %v5689_v47 = vpop.permute.xlu0 %2252 }
 0x26b   : > { %10101 = vst [vmem:[#allocation84_spill] sm:$0xff] %v5687_v22  ;;  %10102 = vst [vmem:[#allocation85_spill] sm:$0xff] %v5689_v47 }
 0x26d   : > { %4624 = vset.pattern.permute.xlu0 %v9797_v4  ;;  %v9804_v4 = vmov 114  }
 0x26e   : > { %2591 = vperm.xlu0 %4624, %v5136_v23   ;;  %4494 = vset.pattern.permute.xlu1 %v9798_v31  ;;  %v5694_v49 = vpop.permute.xlu1 %925 }
 0x26f   : > { %10103 = vst [vmem:[#allocation86_spill] sm:$0xff] %v5694_v49  ;;  %1133 = vperm.xlu1 %4494, %v5136_v23   ;;  %v5697_v56 = vpop.permute.xlu0 %2267 }
 0x270   : > { %10104 = vst [vmem:[#allocation87_spill] sm:$0xff] %v5697_v56  ;;  %v9806_v56 = vmov 115  }
 0x272   : > { %2603 = vperm.xlu0 %4624, %v5265_v20   ;;  %v5700_v18 = vpop.permute.xlu1 %929 }
 0x273   : > { %10105 = vst [vmem:[#allocation88_spill] sm:$0xff] %v5700_v18  ;;  %1141 = vperm.xlu1 %4494, %v5256_v29   ;;  %v5703_v47 = vpop.permute.xlu0 %2279 }
 0x274   : > { %10106 = vst [vmem:[#allocation89_spill] sm:$0xff] %v5703_v47 }
 0x276   : > { %4627 = vset.pattern.permute.xlu0 %v9804_v4 }
 0x277   : > { %2612 = vperm.xlu0 %4627, %v5268_v12   ;;  %1145 = vperm.xlu1 %4494, %v5265_v20   ;;  %v5708_v31 = vpop.permute.xlu1 %938 }
 0x278   : > { %10107 = vst [vmem:[#allocation90_spill] sm:$0xff] %v5708_v31  ;;  %v5710_v10 = vpop.permute.xlu0 %2288  ;;  %v9880_v31 = vmov 50  }
 0x279   : > { %10108 = vst [vmem:[#allocation91_spill] sm:$0xff] %v5710_v10 }
 0x27b   : > { %4628 = vset.pattern.permute.xlu0 %v9806_v56  ;;  %4495 = vset.pattern.permute.xlu1 %v9807_v63  ;;  %v5714_v62 = vpop.permute.xlu1 %943  ;;  %v9810_v56 = vmov 116   ;;  %v9811_v63 = vmov 34  }
 0x27c   : > { %10109 = vst [vmem:[#allocation92_spill] sm:$0xff] %v5714_v62  ;;  %2627 = vperm.xlu0 %4628, %v5136_v23   ;;  %1154 = vperm.xlu1 %4495, %v5268_v12  }
 0x27d   : > { %v5718_v4 = vpop.permute.xlu0 %2303 }
 0x27e   : > { %10110 = vst [vmem:[#allocation93_spill] sm:$0xff] %v5718_v4 }
 0x280   : > { %2639 = vperm.xlu0 %4628, %v5265_v20   ;;  %1159 = vperm.xlu1 %4495, %v5256_v29   ;;  %v5722_v47 = vpop.permute.xlu1 %953 }
 0x281   : > { %10111 = vst [vmem:[#allocation94_spill] sm:$0xff] %v5722_v47  ;;  %v5724_v10 = vpop.permute.xlu0 %2315 }
 0x282   : > { %10112 = vst [vmem:[#allocation95_spill] sm:$0xff] %v5724_v10 }
 0x284   : > { %4631 = vset.pattern.permute.xlu0 %v9810_v56  ;;  %4496 = vset.pattern.permute.xlu1 %v9811_v63  ;;  %v5728_v58 = vpop.permute.xlu1 %961 }
 0x285   : > { %10113 = vst [vmem:[#allocation96_spill] sm:$0xff] %v5728_v58  ;;  %2648 = vperm.xlu0 %4631, %v5268_v12   ;;  %1169 = vperm.xlu1 %4496, %v5136_v23  }
 0x286   : > { %v5732_v4 = vpop.permute.xlu0 %2324 }
 0x287   : > { %10114 = vst [vmem:[#allocation97_spill] sm:$0xff] %v5732_v4  ;;  %v9816_v4 = vmov 35  }
 0x288   : > { %v5734_v42 = vpop.permute.xlu1 %965 }
 0x289   : > { %4632 = vset.pattern.permute.xlu0 %v9814_v28  ;;  %1177 = vperm.xlu1 %4496, %v5256_v29   ;;  %v9818_v28 = vmov 118  }
 0x28a   : > { %2663 = vperm.xlu0 %4632, %v5136_v23  }
 0x28b   : > { %v5739_v56 = vpop.permute.xlu0 %2339 }
 0x28c   : > { %10115 = vst [vmem:[#allocation98_spill] sm:$0xff] %v5739_v56 }
 0x28d   : > { %1181 = vperm.xlu1 %4496, %v5265_v20   ;;  %v5742_v63 = vpop.permute.xlu1 %974 }
 0x28e   : > { %10116 = vst [vmem:[#allocation99_spill] sm:$0xff] %v5742_v63  ;;  %2675 = vperm.xlu0 %4632, %v5265_v20   ;;  %v10527_v63 = vmov 53  }
 0x28f   : > { %v5745_v10 = vpop.permute.xlu0 %2351 }
 0x290   : > { %10117 = vst [vmem:[#allocation100_spill] sm:$0xff] %v5745_v10  ;;  %v9822_v10 = vmov 36  }
 0x291   : > { %4497 = vset.pattern.permute.xlu1 %v9816_v4  ;;  %v5748_v58 = vpop.permute.xlu1 %979 }
 0x292   : > { %10118 = vst [vmem:[#allocation101_spill] sm:$0xff] %v5748_v58  ;;  %4635 = vset.pattern.permute.xlu0 %v9818_v28  ;;  %1190 = vperm.xlu1 %4497, %v5268_v12  }
 0x293   : > { %2684 = vperm.xlu0 %4635, %v5268_v12  }
 0x294   : > { %v5753_v56 = vpop.permute.xlu0 %2360 }
 0x295   : > { %10119 = vst [vmem:[#allocation102_spill] sm:$0xff] %v5753_v56 }
 0x296   : > { %1195 = vperm.xlu1 %4497, %v5256_v29   ;;  %v5756_v47 = vpop.permute.xlu1 %989 }
 0x297   : > { %10120 = vst [vmem:[#allocation103_spill] sm:$0xff] %v5756_v47  ;;  %4636 = vset.pattern.permute.xlu0 %v9820_v45  ;;  %v9824_v45 = vmov 120   ;;  %v9844_v47 = vmov 126  }
 0x298   : > { %2699 = vperm.xlu0 %4636, %v5136_v23  }
 0x299   : > { %v5760_v4 = vpop.permute.xlu0 %2375 }
 0x29a   : > { %10121 = vst [vmem:[#allocation104_spill] sm:$0xff] %v5760_v4  ;;  %4498 = vset.pattern.permute.xlu1 %v9822_v10  ;;  %v5763_v28 = vpop.permute.xlu1 %997 }
 0x29b   : > { %10122 = vst [vmem:[#allocation105_spill] sm:$0xff] %v5763_v28  ;;  %1205 = vperm.xlu1 %4498, %v5136_v23   ;;  %v9842_v28 = vmov 40  }
 0x29c   : > { %2711 = vperm.xlu0 %4636, %v5265_v20  }
 0x29d   : > { %v5767_v56 = vpop.permute.xlu0 %2387 }
 0x29e   : > { %10123 = vst [vmem:[#allocation106_spill] sm:$0xff] %v5767_v56  ;;  %v5769_v19 = vpop.permute.xlu1 %1001  ;;  %v9827_v56 = vmov 37  }
 0x29f   : > { %10124 = vst [vmem:[#allocation107_spill] sm:$0xff] %v5769_v19  ;;  %1213 = vperm.xlu1 %4498, %v5256_v29   ;;  %v9912_v19 = vmov 60  }
 0x2a0   : > { %4639 = vset.pattern.permute.xlu0 %v9824_v45 }
 0x2a1   : > { %2720 = vperm.xlu0 %4639, %v5268_v12  }
 0x2a2   : > { %v5774_v4 = vpop.permute.xlu0 %2396 }
 0x2a3   : > { %10125 = vst [vmem:[#allocation108_spill] sm:$0xff] %v5774_v4  ;;  %1217 = vperm.xlu1 %4498, %v5265_v20   ;;  %v5777_v10 = vpop.permute.xlu1 %1010 }
 0x2a4   : > { %10126 = vst [vmem:[#allocation109_spill] sm:$0xff] %v5777_v10  ;;  %v9872_v10 = vmov 48  }
 0x2a5   : > { %4640 = vset.pattern.permute.xlu0 %v9826_v48  ;;  %v9830_v48 = vmov 122  }
 0x2a6   : > { %2735 = vperm.xlu0 %4640, %v5136_v23  }
 0x2a7   : > { %4499 = vset.pattern.permute.xlu1 %v9827_v56  ;;  %v5782_v39 = vpop.permute.xlu1 %1015  ;;  %v5784_v43 = vpop.permute.xlu0 %2411  ;;  %v9831_v56 = vmov 38  }
 0x2a8   : > { %10127 = vst [vmem:[#allocation110_spill] sm:$0xff] %v5782_v39  ;;  %10128 = vst [vmem:[#allocation111_spill] sm:$0xff] %v5784_v43  ;;  %1226 = vperm.xlu1 %4499, %v5268_v12  }
 0x2aa   : > { %2747 = vperm.xlu0 %4640, %v5265_v20  }
 0x2ab   : > { %v5788_v45 = vpop.permute.xlu0 %2423 }
 0x2ac   : > { %10129 = vst [vmem:[#allocation112_spill] sm:$0xff] %v5788_v45  ;;  %1231 = vperm.xlu1 %4499, %v5256_v29   ;;  %v5791_v4 = vpop.permute.xlu1 %1025  ;;  %v5805_v45 = vld [vmem:[#allocation2] sm:$0xff] }
 0x2ad   : > { %10130 = vst [vmem:[#allocation113_spill] sm:$0xff] %v5791_v4 }
 0x2ae   : > { %4643 = vset.pattern.permute.xlu0 %v9830_v48 }
 0x2af   : > { %2756 = vperm.xlu0 %4643, %v5268_v12  }
 0x2b0   : > { %4500 = vset.pattern.permute.xlu1 %v9831_v56  ;;  %v5796_v13 = vpop.permute.xlu1 %1033  ;;  %v5798_v43 = vpop.permute.xlu0 %2432 }
 0x2b1   : > { %10131 = vst [vmem:[#allocation114_spill] sm:$0xff] %v5796_v13  ;;  %10132 = vst [vmem:[#allocation115_spill] sm:$0xff] %v5798_v43  ;;  %1241 = vperm.xlu1 %4500, %v5136_v23   ;;  %v9836_v43 = vmov 124  }
 0x2b3   : > { %4644 = vset.pattern.permute.xlu0 %v9834_v3  ;;  %v9837_v3 = vmov 39  }
 0x2b4   : > { %2771 = vperm.xlu0 %4644, %v5136_v23   ;;  %v5803_v29 = vpop.permute.xlu1 %1037  ;;  %v5817_v23 = vld [vmem:[#allocation3 + $0x8] sm:$0x3] }
 0x2b5   : > { %1249 = vperm.xlu1 %4500, %v5805_v45   ;;  %v5808_v12 = vpop.permute.xlu0 %2447 }
 0x2b6   : > { %10133 = vst [vmem:[#allocation116_spill] sm:$0xff] %v5808_v12 }
 0x2b8   : > { %2783 = vperm.xlu0 %4644, %v5265_v20  }
 0x2b9   : > { %1253 = vperm.xlu1 %4500, %v5265_v20   ;;  %v5812_v48 = vpop.permute.xlu1 %1046  ;;  %v5814_v56 = vpop.permute.xlu0 %2459  ;;  %v9840_v20 = vmov 125  }
 0x2ba   : > { %10134 = vst [vmem:[#allocation117_spill] sm:$0xff] %v5812_v48  ;;  %10135 = vst [vmem:[#allocation118_spill] sm:$0xff] %v5814_v56  ;;  %v5827_v56 = vld [vmem:[#allocation3] sm:$0xff]  ;;  %v10463_v48 = vmov 45  }
 0x2bc   : > { %4647 = vset.pattern.permute.xlu0 %v9836_v43 }
 0x2bd   : > { %2792 = vperm.xlu0 %4647, %v5817_v23   ;;  %4501 = vset.pattern.permute.xlu1 %v9837_v3  ;;  %v5821_v13 = vpop.permute.xlu1 %1051  ;;  %v5835_v3 = vld [vmem:[#allocation2 + $0x8] sm:$0x3] }
 0x2be   : > { %10136 = vst [vmem:[#allocation119_spill] sm:$0xff] %v5821_v13  ;;  %1262 = vperm.xlu1 %4501, %v5817_v23   ;;  %v5824_v12 = vpop.permute.xlu0 %2468  ;;  %v10474_v13 = vmov 46  }
 0x2bf   : > { %10137 = vst [vmem:[#allocation120_spill] sm:$0xff] %v5824_v12 }
 0x2c1   : > { %4648 = vset.pattern.permute.xlu0 %v9840_v20  ;;  %v10615_v16 = vld [vmem:[#allocation117_spill] sm:$0xff] }
 0x2c2   : > { %2807 = vperm.xlu0 %4648, %v5827_v56   ;;  %1267 = vperm.xlu1 %4501, %v5805_v45   ;;  %v5831_v43 = vpop.permute.xlu1 %1061 }
 0x2c3   : > { %10138 = vst [vmem:[#allocation121_spill] sm:$0xff] %v5831_v43  ;;  %v5833_v4 = vpop.permute.xlu0 %2483  ;;  %v9846_v43 = vmov 127  }
 0x2c4   : > { %10139 = vst [vmem:[#allocation122_spill] sm:$0xff] %v5833_v4 }
 0x2c6   : > { %2819 = vperm.xlu0 %4648, %v5835_v3   ;;  %4502 = vset.pattern.permute.xlu1 %v9842_v28  ;;  %v5839_v12 = vpop.permute.xlu1 %1069 }
 0x2c7   : > { %10140 = vst [vmem:[#allocation123_spill] sm:$0xff] %v5839_v12  ;;  %1277 = vperm.xlu1 %4502, %v5827_v56   ;;  %v5842_v20 = vpop.permute.xlu0 %2495 }
 0x2c8   : > { %10141 = vst [vmem:[#allocation124_spill] sm:$0xff] %v5842_v20 }
 0x2ca   : > { %4651 = vset.pattern.permute.xlu0 %v9844_v47  ;;  %v5845_v49 = vpop.permute.xlu1 %1073  ;;  %v9848_v47 = vmov 41  }
 0x2cb   : > { %10142 = vst [vmem:[#allocation125_spill] sm:$0xff] %v5845_v49  ;;  %2828 = vperm.xlu0 %4651, %v5817_v23   ;;  %1285 = vperm.xlu1 %4502, %v5805_v45  }
 0x2cc   : > { %v5849_v4 = vpop.permute.xlu0 %2504 }
 0x2cd   : > { %10143 = vst [vmem:[#allocation126_spill] sm:$0xff] %v5849_v4 }
 0x2cf   : > { %4652 = vset.pattern.permute.xlu0 %v9846_v43  ;;  %1289 = vperm.xlu1 %4502, %v5835_v3   ;;  %v5853_v28 = vpop.permute.xlu1 %1082  ;;  %v10148_v43 = vmov 0  }
 0x2d0   : > { %10144 = vst [vmem:[#allocation127_spill] sm:$0xff] %v5853_v28  ;;  %2843 = vperm.xlu0 %4652, %v5827_v56  }
 0x2d1   : > { %v5856_v20 = vpop.permute.xlu0 %2519 }
 0x2d2   : > { %10145 = vst [vmem:[#allocation128_spill] sm:$0xff] %v5856_v20 }
 0x2d3   : > { %4503 = vset.pattern.permute.xlu1 %v9848_v47  ;;  %v5859_v12 = vpop.permute.xlu1 %1087 }
 0x2d4   : > { %10146 = vst [vmem:[#allocation129_spill] sm:$0xff] %v5859_v12  ;;  %2855 = vperm.xlu0 %4652, %v5835_v3   ;;  %1298 = vperm.xlu1 %4503, %v5817_v23  }
 0x2d5   : > { %v5863_v4 = vpop.permute.xlu0 %2531 }
 0x2d6   : > { %10147 = vst [vmem:[#allocation130_spill] sm:$0xff] %v5863_v4  ;;  %v5877_v4 = vld [vmem:[#allocation3 + $0x18] sm:$0x3] }
 0x2d8   : > { %4654 = vset.pattern.permute.xlu0 %v10148_v43  ;;  %1303 = vperm.xlu1 %4503, %v5805_v45   ;;  %v5867_v22 = vpop.permute.xlu1 %1097 }
 0x2d9   : > { %10149 = vst [vmem:[#allocation131_spill] sm:$0xff] %v5867_v22  ;;  %555 = vperm.xlu0 %4654, %v5827_v56   ;;  %v10154_v22 = vmov 1  }
 0x2da   : > { %v5870_v20 = vpop.permute.xlu0 %2540 }
 0x2db   : > { %10150 = vst [vmem:[#allocation132_spill] sm:$0xff] %v5870_v20 }
 0x2dc   : > { %4504 = vset.pattern.permute.xlu1 %v9851_v8  ;;  %v5873_v47 = vpop.permute.xlu1 %1105 }
 0x2dd   : > { %10151 = vst [vmem:[#allocation133_spill] sm:$0xff] %v5873_v47  ;;  %558 = vperm.xlu0 %4654, %v5817_v23   ;;  %1313 = vperm.xlu1 %4504, %v5827_v56  }
 0x2df   : > { %v5879_v60 = vpop.permute.xlu0 %2555 }
 0x2e0   : > { %10152 = vst [vmem:[#allocation134_spill] sm:$0xff] %v5879_v60  ;;  %v5881_v40 = vpop.permute.xlu1 %1109 }
 0x2e1   : > { %2868 = vperm.xlu0 %4654, %v5877_v4   ;;  %1321 = vperm.xlu1 %4504, %v5805_v45  }
 0x2e3   : > { %v5885_v20 = vpop.permute.xlu0 %2567 }
 0x2e4   : > { %10153 = vst [vmem:[#allocation135_spill] sm:$0xff] %v5885_v20 }
 0x2e5   : > { %4656 = vset.pattern.permute.xlu0 %v10154_v22  ;;  %1325 = vperm.xlu1 %4504, %v5835_v3   ;;  %v5889_v8 = vpop.permute.xlu1 %1118 }
 0x2e6   : > { %10155 = vst [vmem:[#allocation136_spill] sm:$0xff] %v5889_v8  ;;  %575 = vperm.xlu0 %4656, %v5827_v56  }
 0x2e8   : > { %v5892_v47 = vpop.permute.xlu0 %2576 }
 0x2e9   : > { %10156 = vst [vmem:[#allocation137_spill] sm:$0xff] %v5892_v47  ;;  %4505 = vset.pattern.permute.xlu1 %v9855_v33  ;;  %v5895_v60 = vpop.permute.xlu1 %1123  ;;  %v5907_v47 = vld [vmem:[#allocation2 + $0x18] sm:$0x3]  ;;  %v9858_v33 = vmov 44  }
 0x2ea   : > { %10157 = vst [vmem:[#allocation138_spill] sm:$0xff] %v5895_v60  ;;  %587 = vperm.xlu0 %4656, %v5835_v3   ;;  %1334 = vperm.xlu1 %4505, %v5817_v23   ;;  %v10431_v60 = vmov 90  }
 0x2ed   : > { %v5899_v20 = vpop.permute.xlu0 %2591 }
 0x2ee   : > { %10158 = vst [vmem:[#allocation139_spill] sm:$0xff] %v5899_v20  ;;  %2885 = vperm.xlu0 %4656, %v5901_v41   ;;  %1339 = vperm.xlu1 %4505, %v5805_v45   ;;  %v5905_v24 = vpop.permute.xlu1 %1133  ;;  %v10162_v20 = vmov 2  }
 0x2ef   : > { %10159 = vst [vmem:[#allocation140_spill] sm:$0xff] %v5905_v24  ;;  %v9862_v24 = vmov 45  }
 0x2f1   : > { %v5909_v14 = vpop.permute.xlu0 %2603 }
 0x2f2   : > { %10160 = vst [vmem:[#allocation141_spill] sm:$0xff] %v5909_v14  ;;  %2897 = vperm.xlu0 %4656, %v5907_v47   ;;  %4506 = vset.pattern.permute.xlu1 %v9858_v33  ;;  %v5913_v6 = vpop.permute.xlu1 %1141 }
 0x2f3   : > { %10161 = vst [vmem:[#allocation142_spill] sm:$0xff] %v5913_v6  ;;  %1349 = vperm.xlu1 %4506, %v5827_v56   ;;  %v10167_v6 = vmov 3  }
 0x2f6   : > { %4658 = vset.pattern.permute.xlu0 %v10162_v20  ;;  %v5917_v53 = vpop.permute.xlu1 %1145  ;;  %v5919_v22 = vpop.permute.xlu0 %2612 }
 0x2f7   : > { %10163 = vst [vmem:[#allocation143_spill] sm:$0xff] %v5917_v53  ;;  %10164 = vst [vmem:[#allocation144_spill] sm:$0xff] %v5919_v22  ;;  %596 = vperm.xlu0 %4658, %v5817_v23   ;;  %1357 = vperm.xlu1 %4506, %v5805_v45   ;;  %v9904_v53 = vmov 58  }
 0x2fb   : > { %2906 = vperm.xlu0 %4658, %v5877_v4   ;;  %1361 = vperm.xlu1 %4506, %v5835_v3   ;;  %v5925_v14 = vpop.permute.xlu1 %1154  ;;  %v5927_v33 = vpop.permute.xlu0 %2627 }
 0x2fc   : > { %10165 = vst [vmem:[#allocation145_spill] sm:$0xff] %v5925_v14  ;;  %10166 = vst [vmem:[#allocation146_spill] sm:$0xff] %v5927_v33 }
 0x2ff   : > { %4660 = vset.pattern.permute.xlu0 %v10167_v6  ;;  %4507 = vset.pattern.permute.xlu1 %v9862_v24  ;;  %v5931_v20 = vpop.permute.xlu1 %1159  ;;  %v5933_v22 = vpop.permute.xlu0 %2639  ;;  %v9865_v6 = vmov 46  }
 0x300   : > { %10168 = vst [vmem:[#allocation147_spill] sm:$0xff] %v5931_v20  ;;  %10169 = vst [vmem:[#allocation148_spill] sm:$0xff] %v5933_v22  ;;  %611 = vperm.xlu0 %4660, %v5827_v56   ;;  %1370 = vperm.xlu1 %4507, %v5817_v23  }
 0x304   : > { %623 = vperm.xlu0 %4660, %v5835_v3   ;;  %1375 = vperm.xlu1 %4507, %v5805_v45   ;;  %v5939_v43 = vpop.permute.xlu1 %1169  ;;  %v5941_v33 = vpop.permute.xlu0 %2648 }
 0x305   : > { %10170 = vst [vmem:[#allocation149_spill] sm:$0xff] %v5939_v43  ;;  %10171 = vst [vmem:[#allocation150_spill] sm:$0xff] %v5941_v33  ;;  %v10175_v33 = vmov 4  }
 0x308   : > { %2921 = vperm.xlu0 %4660, %v5901_v41   ;;  %4508 = vset.pattern.permute.xlu1 %v9865_v6  ;;  %v5945_v24 = vpop.permute.xlu1 %1177 }
 0x309   : > { %10172 = vst [vmem:[#allocation151_spill] sm:$0xff] %v5945_v24  ;;  %1385 = vperm.xlu1 %4508, %v5827_v56   ;;  %v5948_v22 = vpop.permute.xlu0 %2663 }
 0x30a   : > { %10173 = vst [vmem:[#allocation152_spill] sm:$0xff] %v5948_v22  ;;  %v9869_v22 = vmov 47  }
 0x30c   : > { %2933 = vperm.xlu0 %4660, %v5907_v47   ;;  %v5951_v14 = vpop.permute.xlu1 %1181 }
 0x30d   : > { %1393 = vperm.xlu1 %4508, %v5805_v45   ;;  %v5954_v43 = vpop.permute.xlu0 %2675 }
 0x30e   : > { %10174 = vst [vmem:[#allocation153_spill] sm:$0xff] %v5954_v43 }
 0x310   : > { %4662 = vset.pattern.permute.xlu0 %v10175_v33  ;;  %v10180_v33 = vmov 5  }
 0x311   : > { %632 = vperm.xlu0 %4662, %v5817_v23   ;;  %1397 = vperm.xlu1 %4508, %v5835_v3   ;;  %v5959_v6 = vpop.permute.xlu1 %1190 }
 0x312   : > { %10176 = vst [vmem:[#allocation154_spill] sm:$0xff] %v5959_v6  ;;  %v5961_v24 = vpop.permute.xlu0 %2684 }
 0x313   : > { %10177 = vst [vmem:[#allocation155_spill] sm:$0xff] %v5961_v24 }
 0x315   : > { %2942 = vperm.xlu0 %4662, %v5877_v4   ;;  %4509 = vset.pattern.permute.xlu1 %v9869_v22  ;;  %v5965_v28 = vpop.permute.xlu1 %1195 }
 0x316   : > { %10178 = vst [vmem:[#allocation156_spill] sm:$0xff] %v5965_v28  ;;  %1406 = vperm.xlu1 %4509, %v5817_v23   ;;  %v10380_v28 = vmov 82  }
 0x317   : > { %v5968_v43 = vpop.permute.xlu0 %2699 }
 0x318   : > { %10179 = vst [vmem:[#allocation157_spill] sm:$0xff] %v5968_v43 }
 0x319   : > { %4664 = vset.pattern.permute.xlu0 %v10180_v33 }
 0x31a   : > { %647 = vperm.xlu0 %4664, %v5827_v56   ;;  %1411 = vperm.xlu1 %4509, %v5805_v45   ;;  %v5973_v20 = vpop.permute.xlu1 %1205 }
 0x31b   : > { %10181 = vst [vmem:[#allocation158_spill] sm:$0xff] %v5973_v20  ;;  %v5975_v24 = vpop.permute.xlu0 %2711 }
 0x31c   : > { %10182 = vst [vmem:[#allocation159_spill] sm:$0xff] %v5975_v24 }
 0x31e   : > { %659 = vperm.xlu0 %4664, %v5835_v3   ;;  %4510 = vset.pattern.permute.xlu1 %v9872_v10  ;;  %v5979_v22 = vpop.permute.xlu1 %1213 }
 0x31f   : > { %10183 = vst [vmem:[#allocation160_spill] sm:$0xff] %v5979_v22  ;;  %1421 = vperm.xlu1 %4510, %v5827_v56   ;;  %v10189_v22 = vmov 6  }
 0x320   : > { %v5982_v43 = vpop.permute.xlu0 %2720 }
 0x321   : > { %10184 = vst [vmem:[#allocation161_spill] sm:$0xff] %v5982_v43  ;;  %v9876_v43 = vmov 49  }
 0x322   : > { %2957 = vperm.xlu0 %4664, %v5901_v41   ;;  %v5985_v33 = vpop.permute.xlu1 %1217 }
 0x323   : > { %10185 = vst [vmem:[#allocation162_spill] sm:$0xff] %v5985_v33  ;;  %1429 = vperm.xlu1 %4510, %v5805_v45  }
 0x325   : > { %v5988_v20 = vpop.permute.xlu0 %2735 }
 0x326   : > { %10186 = vst [vmem:[#allocation163_spill] sm:$0xff] %v5988_v20  ;;  %2969 = vperm.xlu0 %4664, %v5907_v47  }
 0x327   : > { %1433 = vperm.xlu1 %4510, %v5835_v3   ;;  %v5992_v24 = vpop.permute.xlu1 %1226 }
 0x328   : > { %10187 = vst [vmem:[#allocation164_spill] sm:$0xff] %v5992_v24 }
 0x329   : > { %v5994_v10 = vpop.permute.xlu0 %2747 }
 0x32a   : > { %10188 = vst [vmem:[#allocation165_spill] sm:$0xff] %v5994_v10  ;;  %4666 = vset.pattern.permute.xlu0 %v10189_v22  ;;  %v10193_v10 = vmov 7  }
 0x32b   : > { %668 = vperm.xlu0 %4666, %v5817_v23   ;;  %4511 = vset.pattern.permute.xlu1 %v9876_v43  ;;  %v5999_v12 = vpop.permute.xlu1 %1231 }
 0x32c   : > { %10190 = vst [vmem:[#allocation166_spill] sm:$0xff] %v5999_v12  ;;  %1442 = vperm.xlu1 %4511, %v5817_v23  }
 0x32e   : > { %v6002_v20 = vpop.permute.xlu0 %2756 }
 0x32f   : > { %10191 = vst [vmem:[#allocation167_spill] sm:$0xff] %v6002_v20  ;;  %2978 = vperm.xlu0 %4666, %v5877_v4  }
 0x330   : > { %1447 = vperm.xlu1 %4511, %v5805_v45   ;;  %v6006_v24 = vpop.permute.xlu1 %1241 }
 0x331   : > { %10192 = vst [vmem:[#allocation168_spill] sm:$0xff] %v6006_v24 }
 0x333   : > { %4668 = vset.pattern.permute.xlu0 %v10193_v10  ;;  %v6009_v22 = vpop.permute.xlu0 %2771  ;;  %v10201_v10 = vmov 8  }
 0x334   : > { %10194 = vst [vmem:[#allocation169_spill] sm:$0xff] %v6009_v22  ;;  %683 = vperm.xlu0 %4668, %v5827_v56   ;;  %4512 = vset.pattern.permute.xlu1 %v9880_v31  ;;  %v6013_v43 = vpop.permute.xlu1 %1249  ;;  %v9883_v31 = vmov 51  }
 0x335   : > { %10195 = vst [vmem:[#allocation170_spill] sm:$0xff] %v6013_v43  ;;  %1457 = vperm.xlu1 %4512, %v5827_v56  }
 0x337   : > { %v6016_v20 = vpop.permute.xlu0 %2783 }
 0x338   : > { %10196 = vst [vmem:[#allocation171_spill] sm:$0xff] %v6016_v20  ;;  %695 = vperm.xlu0 %4668, %v5835_v3   ;;  %v6019_v12 = vpop.permute.xlu1 %1253 }
 0x339   : > { %1465 = vperm.xlu1 %4512, %v5805_v45  }
 0x33c   : > { %2993 = vperm.xlu0 %4668, %v5901_v41   ;;  %v6023_v22 = vpop.permute.xlu0 %2792 }
 0x33d   : > { %10197 = vst [vmem:[#allocation172_spill] sm:$0xff] %v6023_v22  ;;  %1469 = vperm.xlu1 %4512, %v5835_v3   ;;  %v6026_v24 = vpop.permute.xlu1 %1262 }
 0x33e   : > { %10198 = vst [vmem:[#allocation173_spill] sm:$0xff] %v6026_v24  ;;  %v10340_v24 = vmov 29  }
 0x340   : > { %3005 = vperm.xlu0 %4668, %v5907_v47  }
 0x341   : > { %4513 = vset.pattern.permute.xlu1 %v9883_v31  ;;  %v6030_v20 = vpop.permute.xlu1 %1267  ;;  %v6032_v43 = vpop.permute.xlu0 %2807 }
 0x342   : > { %10199 = vst [vmem:[#allocation174_spill] sm:$0xff] %v6030_v20  ;;  %10200 = vst [vmem:[#allocation175_spill] sm:$0xff] %v6032_v43  ;;  %1478 = vperm.xlu1 %4513, %v5817_v23  }
 0x344   : > { %4670 = vset.pattern.permute.xlu0 %v10201_v10  ;;  %v10206_v10 = vmov 9  }
 0x345   : > { %704 = vperm.xlu0 %4670, %v5817_v23   ;;  %v6037_v22 = vpop.permute.xlu0 %2819 }
 0x346   : > { %10202 = vst [vmem:[#allocation176_spill] sm:$0xff] %v6037_v22  ;;  %1483 = vperm.xlu1 %4513, %v5805_v45   ;;  %v6040_v39 = vpop.permute.xlu1 %1277 }
 0x347   : > { %10203 = vst [vmem:[#allocation177_spill] sm:$0xff] %v6040_v39 }
 0x349   : > { %3014 = vperm.xlu0 %4670, %v5877_v4  }
 0x34a   : > { %4514 = vset.pattern.permute.xlu1 %v9886_v34  ;;  %v6044_v31 = vpop.permute.xlu1 %1285  ;;  %v6046_v43 = vpop.permute.xlu0 %2828 }
 0x34b   : > { %10204 = vst [vmem:[#allocation178_spill] sm:$0xff] %v6044_v31  ;;  %10205 = vst [vmem:[#allocation179_spill] sm:$0xff] %v6046_v43  ;;  %1493 = vperm.xlu1 %4514, %v5827_v56   ;;  %v9890_v43 = vmov 53  }
 0x34d   : > { %4672 = vset.pattern.permute.xlu0 %v10206_v10 }
 0x34e   : > { %719 = vperm.xlu0 %4672, %v5827_v56   ;;  %v6051_v22 = vpop.permute.xlu1 %1289 }
 0x34f   : > { %10207 = vst [vmem:[#allocation180_spill] sm:$0xff] %v6051_v22  ;;  %1501 = vperm.xlu1 %4514, %v5805_v45   ;;  %v6054_v39 = vpop.permute.xlu0 %2843 }
 0x350   : > { %10208 = vst [vmem:[#allocation181_spill] sm:$0xff] %v6054_v39 }
 0x352   : > { %731 = vperm.xlu0 %4672, %v5835_v3  }
 0x353   : > { %1505 = vperm.xlu1 %4514, %v5835_v3   ;;  %v6058_v34 = vpop.permute.xlu1 %1298  ;;  %v6060_v31 = vpop.permute.xlu0 %2855 }
 0x354   : > { %10209 = vst [vmem:[#allocation182_spill] sm:$0xff] %v6058_v34  ;;  %10210 = vst [vmem:[#allocation183_spill] sm:$0xff] %v6060_v31  ;;  %v10215_v31 = vmov 10  }
 0x356   : > { %3029 = vperm.xlu0 %4672, %v5901_v41  }
 0x357   : > { %4515 = vset.pattern.permute.xlu1 %v9890_v43  ;;  %v6064_v10 = vpop.permute.xlu1 %1303 }
 0x358   : > { %10211 = vst [vmem:[#allocation184_spill] sm:$0xff] %v6064_v10  ;;  %v6066_v62 = vpop.permute.xlu0 %555  ;;  %1514 = vperm.xlu1 %4515, %v5817_v23  }
 0x359   : > { %10212 = vst [vmem:[#allocation185_spill] sm:$0xff] %v6066_v62 }
 0x35a   : > { %3041 = vperm.xlu0 %4672, %v5907_v47  }
 0x35c   : > { %v6070_v39 = vpop.permute.xlu0 %558  ;;  %1519 = vperm.xlu1 %4515, %v5805_v45   ;;  %v6073_v34 = vpop.permute.xlu1 %1313 }
 0x35d   : > { %10213 = vst [vmem:[#allocation186_spill] sm:$0xff] %v6070_v39  ;;  %10214 = vst [vmem:[#allocation187_spill] sm:$0xff] %v6073_v34  ;;  %v10219_v34 = vmov 11  }
 0x35e   : > { %4674 = vset.pattern.permute.xlu0 %v10215_v31 }
 0x35f   : > { %740 = vperm.xlu0 %4674, %v5817_v23  }
 0x360   : > { %4516 = vset.pattern.permute.xlu1 %v9892_v26  ;;  %v6078_v43 = vpop.permute.xlu1 %1321  ;;  %v6080_v62 = vpop.permute.xlu0 %2868 }
 0x361   : > { %10216 = vst [vmem:[#allocation188_spill] sm:$0xff] %v6078_v43  ;;  %10217 = vst [vmem:[#allocation189_spill] sm:$0xff] %v6080_v62  ;;  %1529 = vperm.xlu1 %4516, %v5827_v56   ;;  %v9895_v62 = vmov 55  }
 0x363   : > { %3050 = vperm.xlu0 %4674, %v5877_v4  }
 0x364   : > { %v6084_v10 = vpop.permute.xlu1 %1325 }
 0x365   : > { %v6086_v5 = vpop.permute.xlu0 %575  ;;  %1537 = vperm.xlu1 %4516, %v5805_v45  }
 0x366   : > { %10218 = vst [vmem:[#allocation190_spill] sm:$0xff] %v6086_v5  ;;  %v9916_v5 = vmov 61  }
 0x367   : > { %4676 = vset.pattern.permute.xlu0 %v10219_v34 }
 0x368   : > { %755 = vperm.xlu0 %4676, %v5827_v56  }
 0x369   : > { %v6091_v31 = vpop.permute.xlu0 %587  ;;  %1541 = vperm.xlu1 %4516, %v5835_v3   ;;  %v6094_v26 = vpop.permute.xlu1 %1334 }
 0x36a   : > { %10220 = vst [vmem:[#allocation191_spill] sm:$0xff] %v6091_v31  ;;  %10221 = vst [vmem:[#allocation192_spill] sm:$0xff] %v6094_v26 }
 0x36c   : > { %767 = vperm.xlu0 %4676, %v5835_v3  }
 0x36d   : > { %4517 = vset.pattern.permute.xlu1 %v9895_v62  ;;  %v6098_v43 = vpop.permute.xlu1 %1339  ;;  %v6100_v54 = vpop.permute.xlu0 %2885 }
 0x36e   : > { %10222 = vst [vmem:[#allocation193_spill] sm:$0xff] %v6098_v43  ;;  %10223 = vst [vmem:[#allocation194_spill] sm:$0xff] %v6100_v54  ;;  %1550 = vperm.xlu1 %4517, %v5817_v23   ;;  %v10227_v54 = vmov 12  }
 0x370   : > { %3065 = vperm.xlu0 %4676, %v5901_v41  }
 0x371   : > { %v6104_v34 = vpop.permute.xlu0 %2897 }
 0x372   : > { %10224 = vst [vmem:[#allocation195_spill] sm:$0xff] %v6104_v34  ;;  %1555 = vperm.xlu1 %4517, %v5805_v45   ;;  %v6107_v31 = vpop.permute.xlu1 %1349 }
 0x373   : > { %10225 = vst [vmem:[#allocation196_spill] sm:$0xff] %v6107_v31 }
 0x374   : > { %3077 = vperm.xlu0 %4676, %v5907_v47  }
 0x376   : > { %v6110_v22 = vpop.permute.xlu0 %596  ;;  %4518 = vset.pattern.permute.xlu1 %v9898_v59  ;;  %v6113_v62 = vpop.permute.xlu1 %1357 }
 0x377   : > { %10226 = vst [vmem:[#allocation197_spill] sm:$0xff] %v6113_v62  ;;  %1565 = vperm.xlu1 %4518, %v5827_v56   ;;  %v10231_v62 = vmov 13   ;;  %vm599_vm9 = vcmp.eq.s32.totalorder %v6110_v22, %v5109_v7 }
 0x378   : > { %4678 = vset.pattern.permute.xlu0 %v10227_v54 }
 0x379   : > { %776 = vperm.xlu0 %4678, %v5817_v23  }
 0x37a   : > { %v6118_v34 = vpop.permute.xlu1 %1361  ;;  %v6120_v33 = vpop.permute.xlu0 %2906 }
 0x37b   : > { %10228 = vst [vmem:[#allocation198_spill] sm:$0xff] %v6118_v34  ;;  %10229 = vst [vmem:[#allocation199_spill] sm:$0xff] %v6120_v33  ;;  %1573 = vperm.xlu1 %4518, %v5805_v45  }
 0x37d   : > { %3086 = vperm.xlu0 %4678, %v5877_v4  }
 0x37f   : > { %v6124_v31 = vpop.permute.xlu0 %611  ;;  %1577 = vperm.xlu1 %4518, %v5835_v3   ;;  %v6127_v59 = vpop.permute.xlu1 %1370 }
 0x380   : > { %10230 = vst [vmem:[#allocation200_spill] sm:$0xff] %v6127_v59  ;;  %vm616_vm4 = vcmp.eq.s32.totalorder %v6124_v31, %v5109_v7 }
 0x381   : > { %4680 = vset.pattern.permute.xlu0 %v10231_v62 }
 0x382   : > { %791 = vperm.xlu0 %4680, %v5827_v56  }
 0x383   : > { %v6131_v54 = vpop.permute.xlu0 %623  ;;  %4519 = vset.pattern.permute.xlu1 %v9901_v1  ;;  %v6134_v33 = vpop.permute.xlu1 %1375 }
 0x384   : > { %10232 = vst [vmem:[#allocation201_spill] sm:$0xff] %v6134_v33  ;;  %1586 = vperm.xlu1 %4519, %v5817_v23  }
 0x386   : > { %803 = vperm.xlu0 %4680, %v5835_v3  }
 0x387   : > { %v6138_v34 = vpop.permute.xlu0 %2921 }
 0x388   : > { %10233 = vst [vmem:[#allocation202_spill] sm:$0xff] %v6138_v34  ;;  %1591 = vperm.xlu1 %4519, %v5805_v45   ;;  %v6141_v59 = vpop.permute.xlu1 %1385 }
 0x389   : > { %10234 = vst [vmem:[#allocation203_spill] sm:$0xff] %v6141_v59  ;;  %v10238_v59 = vmov 14  }
 0x38a   : > { %3101 = vperm.xlu0 %4680, %v5901_v41  }
 0x38b   : > { %v6144_v62 = vpop.permute.xlu0 %2933 }
 0x38c   : > { %10235 = vst [vmem:[#allocation204_spill] sm:$0xff] %v6144_v62  ;;  %4520 = vset.pattern.permute.xlu1 %v9904_v53  ;;  %v6147_v1 = vpop.permute.xlu1 %1393 }
 0x38d   : > { %10236 = vst [vmem:[#allocation205_spill] sm:$0xff] %v6147_v1  ;;  %1601 = vperm.xlu1 %4520, %v5827_v56  }
 0x38e   : > { %3113 = vperm.xlu0 %4680, %v5907_v47  }
 0x390   : > { %v6151_v33 = vpop.permute.xlu0 %632  ;;  %v6153_v34 = vpop.permute.xlu1 %1397 }
 0x391   : > { %10237 = vst [vmem:[#allocation206_spill] sm:$0xff] %v6151_v33  ;;  %1609 = vperm.xlu1 %4520, %v5805_v45  }
 0x392   : > { %4682 = vset.pattern.permute.xlu0 %v10238_v59  ;;  %v10243_v59 = vmov 15  }
 0x393   : > { %812 = vperm.xlu0 %4682, %v5817_v23  }
 0x394   : > { %v6158_v62 = vpop.permute.xlu0 %2942 }
 0x395   : > { %10239 = vst [vmem:[#allocation207_spill] sm:$0xff] %v6158_v62  ;;  %1613 = vperm.xlu1 %4520, %v5835_v3   ;;  %v6161_v53 = vpop.permute.xlu1 %1406 }
 0x396   : > { %10240 = vst [vmem:[#allocation208_spill] sm:$0xff] %v6161_v53  ;;  %v10289_v53 = vmov 22  }
 0x397   : > { %3122 = vperm.xlu0 %4682, %v5877_v4  }
 0x399   : > { %v6164_v1 = vpop.permute.xlu0 %647  ;;  %4521 = vset.pattern.permute.xlu1 %v9909_v32  ;;  %v6167_v49 = vpop.permute.xlu1 %1411 }
 0x39a   : > { %10241 = vst [vmem:[#allocation209_spill] sm:$0xff] %v6164_v1  ;;  %10242 = vst [vmem:[#allocation210_spill] sm:$0xff] %v6167_v49  ;;  %1622 = vperm.xlu1 %4521, %v5817_v23  }
 0x39b   : > { %4684 = vset.pattern.permute.xlu0 %v10243_v59 }
 0x39c   : > { %827 = vperm.xlu0 %4684, %v5827_v56  }
 0x39d   : > { %v6172_v62 = vpop.permute.xlu0 %659 }
 0x39e   : > { %10244 = vst [vmem:[#allocation211_spill] sm:$0xff] %v6172_v62  ;;  %1627 = vperm.xlu1 %4521, %v5805_v45   ;;  %v6175_v46 = vpop.permute.xlu1 %1421 }
 0x39f   : > { %10245 = vst [vmem:[#allocation212_spill] sm:$0xff] %v6175_v46 }
 0x3a0   : > { %839 = vperm.xlu0 %4684, %v5835_v3  }
 0x3a1   : > { %v6178_v1 = vpop.permute.xlu0 %2957 }
 0x3a2   : > { %10246 = vst [vmem:[#allocation213_spill] sm:$0xff] %v6178_v1  ;;  %4522 = vset.pattern.permute.xlu1 %v9912_v19  ;;  %v6181_v32 = vpop.permute.xlu1 %1429  ;;  %v10251_v19 = vmov 16  }
 0x3a3   : > { %10247 = vst [vmem:[#allocation214_spill] sm:$0xff] %v6181_v32  ;;  %1637 = vperm.xlu1 %4522, %v5827_v56  }
 0x3a4   : > { %3137 = vperm.xlu0 %4684, %v5901_v41  }
 0x3a5   : > { %v6185_v59 = vpop.permute.xlu0 %2969 }
 0x3a6   : > { %10248 = vst [vmem:[#allocation215_spill] sm:$0xff] %v6185_v59  ;;  %v6187_v62 = vpop.permute.xlu1 %1433 }
 0x3a7   : > { %10249 = vst [vmem:[#allocation216_spill] sm:$0xff] %v6187_v62  ;;  %1645 = vperm.xlu1 %4522, %v5805_v45  }
 0x3a8   : > { %3149 = vperm.xlu0 %4684, %v5907_v47  }
 0x3aa   : > { %v6191_v46 = vpop.permute.xlu0 %668 }
 0x3ab   : > { %1649 = vperm.xlu1 %4522, %v5835_v3   ;;  %v6194_v1 = vpop.permute.xlu1 %1442  ;;  %vm671_vm10 = vcmp.eq.s32.totalorder %v6191_v46, %v5109_v7 }
 0x3ac   : > { %10250 = vst [vmem:[#allocation217_spill] sm:$0xff] %v6194_v1  ;;  %4686 = vset.pattern.permute.xlu0 %v10251_v19  ;;  %v10255_v19 = vmov 17  }
 0x3ad   : > { %848 = vperm.xlu0 %4686, %v5817_v23  }
 0x3ae   : > { %v6198_v32 = vpop.permute.xlu0 %2978 }
 0x3af   : > { %10252 = vst [vmem:[#allocation218_spill] sm:$0xff] %v6198_v32  ;;  %4523 = vset.pattern.permute.xlu1 %v9916_v5  ;;  %v6201_v59 = vpop.permute.xlu1 %1447 }
 0x3b0   : > { %10253 = vst [vmem:[#allocation219_spill] sm:$0xff] %v6201_v59  ;;  %1658 = vperm.xlu1 %4523, %v5817_v23  }
 0x3b1   : > { %3158 = vperm.xlu0 %4686, %v5877_v4  }
 0x3b3   : > { %v6205_v62 = vpop.permute.xlu0 %683 }
 0x3b4   : > { %1663 = vperm.xlu1 %4523, %v5805_v45   ;;  %v6208_v1 = vpop.permute.xlu1 %1457  ;;  %vm688_vm7 = vcmp.eq.s32.totalorder %v6205_v62, %v5109_v7 }
 0x3b5   : > { %10254 = vst [vmem:[#allocation220_spill] sm:$0xff] %v6208_v1  ;;  %4688 = vset.pattern.permute.xlu0 %v10255_v19 }
 0x3b6   : > { %863 = vperm.xlu0 %4688, %v5827_v56  }
 0x3b7   : > { %v6212_v32 = vpop.permute.xlu0 %695 }
 0x3b8   : > { %4524 = vset.pattern.permute.xlu1 %v9918_v50  ;;  %v6215_v5 = vpop.permute.xlu1 %1465 }
 0x3b9   : > { %10256 = vst [vmem:[#allocation221_spill] sm:$0xff] %v6215_v5  ;;  %1673 = vperm.xlu1 %4524, %v5827_v56   ;;  %v9922_v5 = vmov 63  }
 0x3ba   : > { %875 = vperm.xlu0 %4688, %v5835_v3  }
 0x3bb   : > { %v6219_v59 = vpop.permute.xlu0 %2993 }
 0x3bc   : > { %10257 = vst [vmem:[#allocation222_spill] sm:$0xff] %v6219_v59  ;;  %v6221_v18 = vpop.permute.xlu1 %1469 }
 0x3bd   : > { %1681 = vperm.xlu1 %4524, %v5805_v45  }
 0x3be   : > { %3173 = vperm.xlu0 %4688, %v5901_v41  }
 0x3bf   : > { %v6225_v1 = vpop.permute.xlu0 %3005 }
 0x3c0   : > { %10258 = vst [vmem:[#allocation223_spill] sm:$0xff] %v6225_v1 }
 0x3c1   : > { %1685 = vperm.xlu1 %4524, %v5835_v3   ;;  %v6228_v19 = vpop.permute.xlu1 %1478 }
 0x3c2   : > { %10259 = vst [vmem:[#allocation224_spill] sm:$0xff] %v6228_v19  ;;  %3185 = vperm.xlu0 %4688, %v5907_v47  }
 0x3c4   : > { %v6231_v50 = vpop.permute.xlu0 %704 }
 0x3c5   : > { %10260 = vst [vmem:[#allocation225_spill] sm:$0xff] %v6231_v50  ;;  %4525 = vset.pattern.permute.xlu1 %v9922_v5  ;;  %v6234_v59 = vpop.permute.xlu1 %1483 }
 0x3c6   : > { %10261 = vst [vmem:[#allocation226_spill] sm:$0xff] %v6234_v59  ;;  %4690 = vset.pattern.permute.xlu0 %v10262_v61  ;;  %1694 = vperm.xlu1 %4525, %v5817_v23   ;;  %v10310_v59 = vmov 71  }
 0x3c7   : > { %884 = vperm.xlu0 %4690, %v5817_v23  }
 0x3c8   : > { %v6239_v1 = vpop.permute.xlu0 %3014 }
 0x3c9   : > { %10263 = vst [vmem:[#allocation227_spill] sm:$0xff] %v6239_v1 }
 0x3ca   : > { %1699 = vperm.xlu1 %4525, %v5805_v45   ;;  %v6242_v51 = vpop.permute.xlu1 %1493 }
 0x3cb   : > { %10264 = vst [vmem:[#allocation228_spill] sm:$0xff] %v6242_v51  ;;  %3194 = vperm.xlu0 %4690, %v5877_v4  }
 0x3cd   : > { %v6245_v44 = vpop.permute.xlu0 %719 }
 0x3ce   : > { %10265 = vst [vmem:[#allocation229_spill] sm:$0xff] %v6245_v44  ;;  %4526 = vset.pattern.permute.xlu1 %v10266_v17  ;;  %v6248_v5 = vpop.permute.xlu1 %1501 }
 0x3cf   : > { %10267 = vst [vmem:[#allocation230_spill] sm:$0xff] %v6248_v5  ;;  %4692 = vset.pattern.permute.xlu0 %v10268_v9  ;;  %1709 = vperm.xlu1 %4526, %v5827_v56   ;;  %v10274_v9 = vmov 65  }
 0x3d0   : > { %899 = vperm.xlu0 %4692, %v5827_v56  }
 0x3d1   : > { %v6253_v61 = vpop.permute.xlu0 %731 }
 0x3d2   : > { %10269 = vst [vmem:[#allocation231_spill] sm:$0xff] %v6253_v61  ;;  %v6255_v1 = vpop.permute.xlu1 %1505 }
 0x3d3   : > { %10270 = vst [vmem:[#allocation232_spill] sm:$0xff] %v6255_v1  ;;  %1717 = vperm.xlu1 %4526, %v5805_v45   ;;  %v10276_v1 = vmov 20  }
 0x3d4   : > { %911 = vperm.xlu0 %4692, %v5835_v3  }
 0x3d5   : > { %v6259_v51 = vpop.permute.xlu0 %3029 }
 0x3d6   : > { %10271 = vst [vmem:[#allocation233_spill] sm:$0xff] %v6259_v51 }
 0x3d7   : > { %1721 = vperm.xlu1 %4526, %v5835_v3   ;;  %v6262_v44 = vpop.permute.xlu1 %1514 }
 0x3d8   : > { %10272 = vst [vmem:[#allocation234_spill] sm:$0xff] %v6262_v44  ;;  %3209 = vperm.xlu0 %4692, %v5901_v41  }
 0x3d9   : > { %v6265_v5 = vpop.permute.xlu0 %3041 }
 0x3da   : > { %10273 = vst [vmem:[#allocation235_spill] sm:$0xff] %v6265_v5  ;;  %v10279_v5 = vmov 66  }
 0x3db   : > { %4529 = vset.pattern.permute.xlu1 %v10274_v9  ;;  %v6268_v57 = vpop.permute.xlu1 %1519 }
 0x3dc   : > { %10275 = vst [vmem:[#allocation236_spill] sm:$0xff] %v6268_v57  ;;  %3221 = vperm.xlu0 %4692, %v5907_v47   ;;  %1730 = vperm.xlu1 %4529, %v5817_v23  }
 0x3de   : > { %v6272_v61 = vpop.permute.xlu0 %740 }
 0x3df   : > { %vm743_vm11 = vcmp.eq.s32.totalorder %v6272_v61, %v5109_v7 }
 0x3e0   : > { %4694 = vset.pattern.permute.xlu0 %v10276_v1  ;;  %1735 = vperm.xlu1 %4529, %v5805_v45   ;;  %v6276_v51 = vpop.permute.xlu1 %1529  ;;  %v10281_v1 = vmov 21  }
 0x3e1   : > { %10277 = vst [vmem:[#allocation237_spill] sm:$0xff] %v6276_v51  ;;  %920 = vperm.xlu0 %4694, %v5817_v23  }
 0x3e2   : > { %v6279_v44 = vpop.permute.xlu0 %3050 }
 0x3e3   : > { %10278 = vst [vmem:[#allocation238_spill] sm:$0xff] %v6279_v44 }
 0x3e4   : > { %4530 = vset.pattern.permute.xlu1 %v10279_v5  ;;  %v6282_v50 = vpop.permute.xlu1 %1537  ;;  %v10284_v5 = vmov 67  }
 0x3e5   : > { %10280 = vst [vmem:[#allocation239_spill] sm:$0xff] %v6282_v50  ;;  %3230 = vperm.xlu0 %4694, %v5877_v4   ;;  %1745 = vperm.xlu1 %4530, %v5827_v56  }
 0x3e7   : > { %v6286_v57 = vpop.permute.xlu0 %755 }
 0x3e8   : > { %v6288_v9 = vpop.permute.xlu1 %1541 }
 0x3e9   : > { %4696 = vset.pattern.permute.xlu0 %v10281_v1  ;;  %1753 = vperm.xlu1 %4530, %v5805_v45  }
 0x3ea   : > { %935 = vperm.xlu0 %4696, %v5827_v56  }
 0x3eb   : > { %v6293_v51 = vpop.permute.xlu0 %767 }
 0x3ed   : > { %1757 = vperm.xlu1 %4530, %v5835_v3   ;;  %v6296_v44 = vpop.permute.xlu1 %1550 }
 0x3ee   : > { %10282 = vst [vmem:[#allocation240_spill] sm:$0xff] %v6296_v44  ;;  %947 = vperm.xlu0 %4696, %v5835_v3  }
 0x3ef   : > { %v6299_v50 = vpop.permute.xlu0 %3065 }
 0x3f0   : > { %10283 = vst [vmem:[#allocation241_spill] sm:$0xff] %v6299_v50  ;;  %v10290_v50 = vmov 68  }
 0x3f1   : > { %4533 = vset.pattern.permute.xlu1 %v10284_v5  ;;  %v6302_v19 = vpop.permute.xlu1 %1555 }
 0x3f2   : > { %10285 = vst [vmem:[#allocation242_spill] sm:$0xff] %v6302_v19  ;;  %3245 = vperm.xlu0 %4696, %v5901_v41   ;;  %1766 = vperm.xlu1 %4533, %v5817_v23  }
 0x3f3   : > { %v6306_v1 = vpop.permute.xlu0 %3077 }
 0x3f4   : > { %10286 = vst [vmem:[#allocation243_spill] sm:$0xff] %v6306_v1 }
 0x3f6   : > { %3257 = vperm.xlu0 %4696, %v5907_v47   ;;  %1771 = vperm.xlu1 %4533, %v5805_v45   ;;  %v6310_v33 = vpop.permute.xlu1 %1565 }
 0x3f7   : > { %10287 = vst [vmem:[#allocation244_spill] sm:$0xff] %v6310_v33 }
 0x3f8   : > { %v6312_v44 = vpop.permute.xlu0 %776 }
 0x3f9   : > { %10288 = vst [vmem:[#allocation245_spill] sm:$0xff] %v6312_v44  ;;  %v10295_v44 = vmov 23  }
 0x3fa   : > { %4698 = vset.pattern.permute.xlu0 %v10289_v53  ;;  %4534 = vset.pattern.permute.xlu1 %v10290_v50  ;;  %v6316_v39 = vpop.permute.xlu1 %1573  ;;  %v10298_v53 = vmov 69  }
 0x3fb   : > { %10291 = vst [vmem:[#allocation246_spill] sm:$0xff] %v6316_v39  ;;  %956 = vperm.xlu0 %4698, %v5817_v23   ;;  %1781 = vperm.xlu1 %4534, %v5827_v56  }
 0x3fc   : > { %v6320_v19 = vpop.permute.xlu0 %3086 }
 0x3fd   : > { %10292 = vst [vmem:[#allocation247_spill] sm:$0xff] %v6320_v19 }
 0x3fe   : > { %v6322_v1 = vpop.permute.xlu1 %1577 }
 0x3ff   : > { %10293 = vst [vmem:[#allocation248_spill] sm:$0xff] %v6322_v1  ;;  %3266 = vperm.xlu0 %4698, %v5877_v4   ;;  %1789 = vperm.xlu1 %4534, %v5805_v45  }
 0x401   : > { %v6326_v33 = vpop.permute.xlu0 %791 }
 0x402   : > { %10294 = vst [vmem:[#allocation249_spill] sm:$0xff] %v6326_v33  ;;  %v10305_v33 = vmov 24  }
 0x403   : > { %4700 = vset.pattern.permute.xlu0 %v10295_v44  ;;  %1793 = vperm.xlu1 %4534, %v5835_v3   ;;  %v6330_v50 = vpop.permute.xlu1 %1586 }
 0x404   : > { %10296 = vst [vmem:[#allocation250_spill] sm:$0xff] %v6330_v50  ;;  %971 = vperm.xlu0 %4700, %v5827_v56  }
 0x405   : > { %v6333_v39 = vpop.permute.xlu0 %803 }
 0x406   : > { %10297 = vst [vmem:[#allocation251_spill] sm:$0xff] %v6333_v39  ;;  %v10303_v39 = vmov 70  }
 0x407   : > { %4537 = vset.pattern.permute.xlu1 %v10298_v53  ;;  %v6336_v19 = vpop.permute.xlu1 %1591 }
 0x408   : > { %10299 = vst [vmem:[#allocation252_spill] sm:$0xff] %v6336_v19  ;;  %983 = vperm.xlu0 %4700, %v5835_v3   ;;  %1802 = vperm.xlu1 %4537, %v5817_v23  }
 0x409   : > { %v6340_v1 = vpop.permute.xlu0 %3101 }
 0x40a   : > { %10300 = vst [vmem:[#allocation253_spill] sm:$0xff] %v6340_v1 }
 0x40c   : > { %3281 = vperm.xlu0 %4700, %v5901_v41   ;;  %1807 = vperm.xlu1 %4537, %v5805_v45   ;;  %v6344_v44 = vpop.permute.xlu1 %1601 }
 0x40d   : > { %10301 = vst [vmem:[#allocation254_spill] sm:$0xff] %v6344_v44  ;;  %v6346_v50 = vpop.permute.xlu0 %3113 }
 0x40e   : > { %10302 = vst [vmem:[#allocation255_spill] sm:$0xff] %v6346_v50 }
 0x410   : > { %3293 = vperm.xlu0 %4700, %v5907_v47   ;;  %4538 = vset.pattern.permute.xlu1 %v10303_v39  ;;  %v6350_v53 = vpop.permute.xlu1 %1609 }
 0x411   : > { %10304 = vst [vmem:[#allocation256_spill] sm:$0xff] %v6350_v53  ;;  %1817 = vperm.xlu1 %4538, %v5827_v56   ;;  %v10309_v53 = vmov 25  }
 0x412   : > { %v6353_v19 = vpop.permute.xlu0 %812 }
 0x413   : > { %vm815_vm12 = vcmp.eq.s32.totalorder %v6353_v19, %v5109_v7  ;;  %v10607_v19 = vmov 117  }
 0x414   : > { %4702 = vset.pattern.permute.xlu0 %v10305_v33  ;;  %v6356_v1 = vpop.permute.xlu1 %1613 }
 0x415   : > { %10306 = vst [vmem:[#allocation257_spill] sm:$0xff] %v6356_v1  ;;  %992 = vperm.xlu0 %4702, %v5817_v23   ;;  %1825 = vperm.xlu1 %4538, %v5805_v45  }
 0x416   : > { %v6360_v44 = vpop.permute.xlu0 %3122 }
 0x417   : > { %10307 = vst [vmem:[#allocation258_spill] sm:$0xff] %v6360_v44 }
 0x419   : > { %3302 = vperm.xlu0 %4702, %v5877_v4   ;;  %1829 = vperm.xlu1 %4538, %v5835_v3   ;;  %v6364_v39 = vpop.permute.xlu1 %1622 }
 0x41a   : > { %10308 = vst [vmem:[#allocation259_spill] sm:$0xff] %v6364_v39 }
 0x41b   : > { %v6366_v50 = vpop.permute.xlu0 %827 }
 0x41d   : > { %4704 = vset.pattern.permute.xlu0 %v10309_v53  ;;  %4541 = vset.pattern.permute.xlu1 %v10310_v59  ;;  %v6370_v33 = vpop.permute.xlu1 %1627  ;;  %v10315_v53 = vmov 72  }
 0x41e   : > { %10311 = vst [vmem:[#allocation260_spill] sm:$0xff] %v6370_v33  ;;  %1007 = vperm.xlu0 %4704, %v5827_v56   ;;  %1838 = vperm.xlu1 %4541, %v5817_v23  }
 0x41f   : > { %v6374_v1 = vpop.permute.xlu0 %839 }
 0x420   : > { %10312 = vst [vmem:[#allocation261_spill] sm:$0xff] %v6374_v1  ;;  %v10495_v1 = vmov 49  }
 0x422   : > { %1019 = vperm.xlu0 %4704, %v5835_v3   ;;  %1843 = vperm.xlu1 %4541, %v5805_v45   ;;  %v6378_v44 = vpop.permute.xlu1 %1637 }
 0x423   : > { %10313 = vst [vmem:[#allocation262_spill] sm:$0xff] %v6378_v44  ;;  %v6380_v39 = vpop.permute.xlu0 %3137  ;;  %v10320_v44 = vmov 26  }
 0x424   : > { %10314 = vst [vmem:[#allocation263_spill] sm:$0xff] %v6380_v39 }
 0x426   : > { %3317 = vperm.xlu0 %4704, %v5901_v41   ;;  %4542 = vset.pattern.permute.xlu1 %v10315_v53  ;;  %v6384_v59 = vpop.permute.xlu1 %1645 }
 0x427   : > { %10316 = vst [vmem:[#allocation264_spill] sm:$0xff] %v6384_v59  ;;  %1853 = vperm.xlu1 %4542, %v5827_v56   ;;  %v6387_v33 = vpop.permute.xlu0 %3149 }
 0x428   : > { %10317 = vst [vmem:[#allocation265_spill] sm:$0xff] %v6387_v33  ;;  %v10323_v33 = vmov 73  }
 0x42a   : > { %3329 = vperm.xlu0 %4704, %v5907_v47   ;;  %v6390_v26 = vpop.permute.xlu1 %1649 }
 0x42b   : > { %10318 = vst [vmem:[#allocation266_spill] sm:$0xff] %v6390_v26  ;;  %1861 = vperm.xlu1 %4542, %v5805_v45  }
 0x42c   : > { %v6393_v49 = vpop.permute.xlu0 %848 }
 0x42d   : > { %10319 = vst [vmem:[#allocation267_spill] sm:$0xff] %v6393_v49  ;;  %v10326_v49 = vmov 27  }
 0x42e   : > { %4706 = vset.pattern.permute.xlu0 %v10320_v44 }
 0x42f   : > { %1028 = vperm.xlu0 %4706, %v5817_v23   ;;  %1865 = vperm.xlu1 %4542, %v5835_v3   ;;  %v6398_v53 = vpop.permute.xlu1 %1658 }
 0x430   : > { %10321 = vst [vmem:[#allocation268_spill] sm:$0xff] %v6398_v53  ;;  %v6400_v39 = vpop.permute.xlu0 %3158 }
 0x431   : > { %10322 = vst [vmem:[#allocation269_spill] sm:$0xff] %v6400_v39  ;;  %v10329_v39 = vmov 74  }
 0x433   : > { %3338 = vperm.xlu0 %4706, %v5877_v4   ;;  %4545 = vset.pattern.permute.xlu1 %v10323_v33  ;;  %v6404_v59 = vpop.permute.xlu1 %1663 }
 0x434   : > { %10324 = vst [vmem:[#allocation270_spill] sm:$0xff] %v6404_v59  ;;  %1874 = vperm.xlu1 %4545, %v5817_v23  }
 0x435   : > { %v6407_v26 = vpop.permute.xlu0 %863 }
 0x436   : > { %10325 = vst [vmem:[#allocation271_spill] sm:$0xff] %v6407_v26 }
 0x437   : > { %4708 = vset.pattern.permute.xlu0 %v10326_v49 }
 0x438   : > { %1043 = vperm.xlu0 %4708, %v5827_v56   ;;  %1879 = vperm.xlu1 %4545, %v5805_v45   ;;  %v6412_v44 = vpop.permute.xlu1 %1673 }
 0x439   : > { %10327 = vst [vmem:[#allocation272_spill] sm:$0xff] %v6412_v44  ;;  %v6414_v53 = vpop.permute.xlu0 %875 }
 0x43a   : > { %10328 = vst [vmem:[#allocation273_spill] sm:$0xff] %v6414_v53 }
 0x43c   : > { %1055 = vperm.xlu0 %4708, %v5835_v3   ;;  %4546 = vset.pattern.permute.xlu1 %v10329_v39  ;;  %v6418_v33 = vpop.permute.xlu1 %1681 }
 0x43d   : > { %10330 = vst [vmem:[#allocation274_spill] sm:$0xff] %v6418_v33  ;;  %1889 = vperm.xlu1 %4546, %v5827_v56   ;;  %v6421_v59 = vpop.permute.xlu0 %3173  ;;  %v10335_v33 = vmov 28  }
 0x43e   : > { %10331 = vst [vmem:[#allocation275_spill] sm:$0xff] %v6421_v59  ;;  %v10336_v59 = vmov 75  }
 0x440   : > { %3353 = vperm.xlu0 %4708, %v5901_v41   ;;  %v6424_v49 = vpop.permute.xlu1 %1685 }
 0x441   : > { %10332 = vst [vmem:[#allocation276_spill] sm:$0xff] %v6424_v49  ;;  %1897 = vperm.xlu1 %4546, %v5805_v45   ;;  %v6427_v26 = vpop.permute.xlu0 %3185 }
 0x442   : > { %10333 = vst [vmem:[#allocation277_spill] sm:$0xff] %v6427_v26 }
 0x444   : > { %3365 = vperm.xlu0 %4708, %v5907_v47  }
 0x445   : > { %1901 = vperm.xlu1 %4546, %v5835_v3   ;;  %v6431_v44 = vpop.permute.xlu1 %1694 }
 0x446   : > { %10334 = vst [vmem:[#allocation278_spill] sm:$0xff] %v6431_v44  ;;  %v6433_v39 = vpop.permute.xlu0 %884 }
 0x447   : > { %vm887_vm13 = vcmp.eq.s32.totalorder %v6433_v39, %v5109_v7 }
 0x448   : > { %4710 = vset.pattern.permute.xlu0 %v10335_v33  ;;  %v10341_v33 = vmov 76  }
 0x449   : > { %1064 = vperm.xlu0 %4710, %v5817_v23   ;;  %4549 = vset.pattern.permute.xlu1 %v10336_v59  ;;  %v6438_v53 = vpop.permute.xlu1 %1699 }
 0x44a   : > { %10337 = vst [vmem:[#allocation279_spill] sm:$0xff] %v6438_v53  ;;  %1910 = vperm.xlu1 %4549, %v5817_v23   ;;  %v6441_v49 = vpop.permute.xlu0 %3194 }
 0x44b   : > { %10338 = vst [vmem:[#allocation280_spill] sm:$0xff] %v6441_v49 }
 0x44d   : > { %3374 = vperm.xlu0 %4710, %v5877_v4  }
 0x44e   : > { %1915 = vperm.xlu1 %4549, %v5805_v45   ;;  %v6445_v26 = vpop.permute.xlu1 %1709 }
 0x44f   : > { %10339 = vst [vmem:[#allocation281_spill] sm:$0xff] %v6445_v26  ;;  %v6447_v44 = vpop.permute.xlu0 %899 }
 0x451   : > { %4712 = vset.pattern.permute.xlu0 %v10340_v24 }
 0x452   : > { %1079 = vperm.xlu0 %4712, %v5827_v56   ;;  %4550 = vset.pattern.permute.xlu1 %v10341_v33  ;;  %v6452_v59 = vpop.permute.xlu1 %1717 }
 0x453   : > { %10342 = vst [vmem:[#allocation282_spill] sm:$0xff] %v6452_v59  ;;  %v6454_v53 = vpop.permute.xlu0 %911  ;;  %1925 = vperm.xlu1 %4550, %v5827_v56   ;;  %v10348_v59 = vmov 77  }
 0x454   : > { %10343 = vst [vmem:[#allocation283_spill] sm:$0xff] %v6454_v53 }
 0x456   : > { %1091 = vperm.xlu0 %4712, %v5835_v3   ;;  %v6458_v49 = vpop.permute.xlu1 %1721 }
 0x457   : > { %10344 = vst [vmem:[#allocation284_spill] sm:$0xff] %v6458_v49  ;;  %1933 = vperm.xlu1 %4550, %v5805_v45   ;;  %v6461_v26 = vpop.permute.xlu0 %3209  ;;  %v10351_v49 = vmov 30  }
 0x458   : > { %10345 = vst [vmem:[#allocation285_spill] sm:$0xff] %v6461_v26 }
 0x45a   : > { %3389 = vperm.xlu0 %4712, %v5901_v41  }
 0x45b   : > { %1937 = vperm.xlu1 %4550, %v5835_v3   ;;  %v6465_v24 = vpop.permute.xlu1 %1730  ;;  %v6467_v33 = vpop.permute.xlu0 %3221 }
 0x45c   : > { %10346 = vst [vmem:[#allocation286_spill] sm:$0xff] %v6465_v24  ;;  %10347 = vst [vmem:[#allocation287_spill] sm:$0xff] %v6467_v33  ;;  %v10354_v33 = vmov 78  }
 0x45e   : > { %3401 = vperm.xlu0 %4712, %v5907_v47  }
 0x45f   : > { %4553 = vset.pattern.permute.xlu1 %v10348_v59  ;;  %v6471_v43 = vpop.permute.xlu1 %1735 }
 0x460   : > { %10349 = vst [vmem:[#allocation288_spill] sm:$0xff] %v6471_v43  ;;  %v6473_v6 = vpop.permute.xlu0 %920  ;;  %1946 = vperm.xlu1 %4553, %v5817_v23  }
 0x461   : > { %10350 = vst [vmem:[#allocation289_spill] sm:$0xff] %v6473_v6  ;;  %v10357_v6 = vmov 31  }
 0x462   : > { %4714 = vset.pattern.permute.xlu0 %v10351_v49 }
 0x463   : > { %1100 = vperm.xlu0 %4714, %v5817_v23  }
 0x464   : > { %1951 = vperm.xlu1 %4553, %v5805_v45   ;;  %v6479_v26 = vpop.permute.xlu1 %1745  ;;  %v6481_v24 = vpop.permute.xlu0 %3230 }
 0x465   : > { %10352 = vst [vmem:[#allocation290_spill] sm:$0xff] %v6479_v26  ;;  %10353 = vst [vmem:[#allocation291_spill] sm:$0xff] %v6481_v24 }
 0x467   : > { %3410 = vperm.xlu0 %4714, %v5877_v4  }
 0x468   : > { %4554 = vset.pattern.permute.xlu1 %v10354_v33  ;;  %v6485_v59 = vpop.permute.xlu1 %1753 }
 0x469   : > { %10355 = vst [vmem:[#allocation292_spill] sm:$0xff] %v6485_v59  ;;  %v6487_v43 = vpop.permute.xlu0 %935  ;;  %1961 = vperm.xlu1 %4554, %v5827_v56   ;;  %v10362_v59 = vmov 79  }
 0x46a   : > { %10356 = vst [vmem:[#allocation293_spill] sm:$0xff] %v6487_v43 }
 0x46b   : > { %4716 = vset.pattern.permute.xlu0 %v10357_v6 }
 0x46c   : > { %1115 = vperm.xlu0 %4716, %v5827_v56   ;;  %v6492_v49 = vpop.permute.xlu1 %1757 }
 0x46d   : > { %10358 = vst [vmem:[#allocation294_spill] sm:$0xff] %v6492_v49  ;;  %v6494_v5 = vpop.permute.xlu0 %947  ;;  %1969 = vperm.xlu1 %4554, %v5805_v45   ;;  %v6513_v49 = vld [vmem:[#allocation2] sm:$0xff] }
 0x46e   : > { %10359 = vst [vmem:[#allocation295_spill] sm:$0xff] %v6494_v5 }
 0x470   : > { %1127 = vperm.xlu0 %4716, %v5835_v3  }
 0x471   : > { %1973 = vperm.xlu1 %4554, %v5835_v3   ;;  %v6499_v33 = vpop.permute.xlu1 %1766  ;;  %v6501_v24 = vpop.permute.xlu0 %3245 }
 0x472   : > { %10360 = vst [vmem:[#allocation296_spill] sm:$0xff] %v6499_v33  ;;  %10361 = vst [vmem:[#allocation297_spill] sm:$0xff] %v6501_v24  ;;  %v10366_v24 = vmov 32   ;;  %v6519_v33 = vld [vmem:[#allocation3 + $0x8] sm:$0x3] }
 0x474   : > { %3425 = vperm.xlu0 %4716, %v5901_v41  }
 0x475   : > { %4557 = vset.pattern.permute.xlu1 %v10362_v59  ;;  %v6505_v26 = vpop.permute.xlu1 %1771  ;;  %v6507_v6 = vpop.permute.xlu0 %3257  ;;  %v10367_v59 = vmov 80  }
 0x476   : > { %10363 = vst [vmem:[#allocation298_spill] sm:$0xff] %v6505_v26  ;;  %10364 = vst [vmem:[#allocation299_spill] sm:$0xff] %v6507_v6  ;;  %1982 = vperm.xlu1 %4557, %v5817_v23  }
 0x478   : > { %3437 = vperm.xlu0 %4716, %v5907_v47  }
 0x47a   : > { %v6511_v45 = vpop.permute.xlu0 %956  ;;  %1987 = vperm.xlu1 %4557, %v6513_v49   ;;  %v6516_v3 = vpop.permute.xlu1 %1781 }
 0x47b   : > { %10365 = vst [vmem:[#allocation300_spill] sm:$0xff] %v6516_v3  ;;  %v10371_v3 = vmov 33   ;;  %vm959_vm14 = vcmp.eq.s32.totalorder %v6511_v45, %v5109_v7 }
 0x47c   : > { %4718 = vset.pattern.permute.xlu0 %v10366_v24  ;;  %v6535_v24 = vld [vmem:[#allocation3] sm:$0xff] }
 0x47d   : > { %1136 = vperm.xlu0 %4718, %v6519_v33  }
 0x47e   : > { %4558 = vset.pattern.permute.xlu1 %v10367_v59  ;;  %v6523_v6 = vpop.permute.xlu1 %1789  ;;  %v6525_v23 = vpop.permute.xlu0 %3266 }
 0x47f   : > { %10368 = vst [vmem:[#allocation301_spill] sm:$0xff] %v6523_v6  ;;  %10369 = vst [vmem:[#allocation302_spill] sm:$0xff] %v6525_v23  ;;  %1997 = vperm.xlu1 %4558, %v5827_v56   ;;  %v6540_v6 = vld [vmem:[#allocation2 + $0x8] sm:$0x3]  ;;  %v10374_v23 = vmov 81  }
 0x481   : > { %3446 = vperm.xlu0 %4718, %v5877_v4  }
 0x482   : > { %v6529_v26 = vpop.permute.xlu1 %1793 }
 0x483   : > { %10370 = vst [vmem:[#allocation303_spill] sm:$0xff] %v6529_v26  ;;  %v6531_v5 = vpop.permute.xlu0 %971  ;;  %2005 = vperm.xlu1 %4558, %v6513_v49  }
 0x485   : > { %4720 = vset.pattern.permute.xlu0 %v10371_v3 }
 0x486   : > { %1151 = vperm.xlu0 %4720, %v6535_v24  }
 0x487   : > { %v6538_v59 = vpop.permute.xlu0 %983  ;;  %2009 = vperm.xlu1 %4558, %v6540_v6   ;;  %v6543_v56 = vpop.permute.xlu1 %1802 }
 0x488   : > { %10372 = vst [vmem:[#allocation304_spill] sm:$0xff] %v6538_v59  ;;  %10373 = vst [vmem:[#allocation305_spill] sm:$0xff] %v6543_v56 }
 0x48a   : > { %1163 = vperm.xlu0 %4720, %v6540_v6  }
 0x48b   : > { %4561 = vset.pattern.permute.xlu1 %v10374_v23  ;;  %v6547_v26 = vpop.permute.xlu1 %1807  ;;  %v6549_v43 = vpop.permute.xlu0 %3281 }
 0x48c   : > { %10375 = vst [vmem:[#allocation306_spill] sm:$0xff] %v6547_v26  ;;  %10376 = vst [vmem:[#allocation307_spill] sm:$0xff] %v6549_v43  ;;  %2018 = vperm.xlu1 %4561, %v6519_v33   ;;  %v10382_v43 = vmov 34  }
 0x48e   : > { %3461 = vperm.xlu0 %4720, %v5901_v41  }
 0x48f   : > { %v6553_v3 = vpop.permute.xlu0 %3293 }
 0x490   : > { %10377 = vst [vmem:[#allocation308_spill] sm:$0xff] %v6553_v3  ;;  %2023 = vperm.xlu1 %4561, %v6513_v49   ;;  %v6556_v20 = vpop.permute.xlu1 %1817 }
 0x491   : > { %10378 = vst [vmem:[#allocation309_spill] sm:$0xff] %v6556_v20 }
 0x492   : > { %3473 = vperm.xlu0 %4720, %v5907_v47  }
 0x494   : > { %v6559_v56 = vpop.permute.xlu0 %992  ;;  %4562 = vset.pattern.permute.xlu1 %v10380_v28  ;;  %v6562_v23 = vpop.permute.xlu1 %1825 }
 0x495   : > { %10379 = vst [vmem:[#allocation310_spill] sm:$0xff] %v6559_v56  ;;  %10381 = vst [vmem:[#allocation311_spill] sm:$0xff] %v6562_v23  ;;  %2033 = vperm.xlu1 %4562, %v6535_v24   ;;  %v10387_v23 = vmov 35   ;;  %v10389_v56 = vmov 83  }
 0x496   : > { %4722 = vset.pattern.permute.xlu0 %v10382_v43 }
 0x497   : > { %1172 = vperm.xlu0 %4722, %v6519_v33  }
 0x498   : > { %v6567_v26 = vpop.permute.xlu1 %1829  ;;  %v6569_v3 = vpop.permute.xlu0 %3302 }
 0x499   : > { %10383 = vst [vmem:[#allocation312_spill] sm:$0xff] %v6567_v26  ;;  %10384 = vst [vmem:[#allocation313_spill] sm:$0xff] %v6569_v3  ;;  %2041 = vperm.xlu1 %4562, %v6513_v49  }
 0x49b   : > { %3482 = vperm.xlu0 %4722, %v5877_v4  }
 0x49d   : > { %v6573_v20 = vpop.permute.xlu0 %1007  ;;  %2045 = vperm.xlu1 %4562, %v6540_v6   ;;  %v6576_v28 = vpop.permute.xlu1 %1838 }
 0x49e   : > { %10385 = vst [vmem:[#allocation314_spill] sm:$0xff] %v6573_v20  ;;  %10386 = vst [vmem:[#allocation315_spill] sm:$0xff] %v6576_v28  ;;  %v10406_v20 = vmov 86  }
 0x49f   : > { %4724 = vset.pattern.permute.xlu0 %v10387_v23  ;;  %v10394_v23 = vmov 84  }
 0x4a0   : > { %1187 = vperm.xlu0 %4724, %v6535_v24  }
 0x4a1   : > { %v6580_v43 = vpop.permute.xlu0 %1019  ;;  %4565 = vset.pattern.permute.xlu1 %v10389_v56  ;;  %v6583_v26 = vpop.permute.xlu1 %1843 }
 0x4a2   : > { %10388 = vst [vmem:[#allocation316_spill] sm:$0xff] %v6580_v43  ;;  %10390 = vst [vmem:[#allocation317_spill] sm:$0xff] %v6583_v26  ;;  %2054 = vperm.xlu1 %4565, %v6519_v33  }
 0x4a4   : > { %1199 = vperm.xlu0 %4724, %v6540_v6  }
 0x4a5   : > { %v6587_v4 = vpop.permute.xlu0 %3317 }
 0x4a6   : > { %10391 = vst [vmem:[#allocation318_spill] sm:$0xff] %v6587_v4  ;;  %2059 = vperm.xlu1 %4565, %v6513_v49   ;;  %v6590_v3 = vpop.permute.xlu1 %1853  ;;  %v10397_v4 = vmov 36  }
 0x4a7   : > { %10392 = vst [vmem:[#allocation319_spill] sm:$0xff] %v6590_v3  ;;  %v10402_v3 = vmov 37  }
 0x4a8   : > { %3497 = vperm.xlu0 %4724, %v5901_v41  }
 0x4a9   : > { %v6593_v28 = vpop.permute.xlu0 %3329 }
 0x4aa   : > { %10393 = vst [vmem:[#allocation320_spill] sm:$0xff] %v6593_v28  ;;  %4566 = vset.pattern.permute.xlu1 %v10394_v23  ;;  %v6596_v43 = vpop.permute.xlu1 %1861  ;;  %v6612_v28 = vld [vmem:[#allocation3 + $0x18] sm:$0x3] }
 0x4ab   : > { %10395 = vst [vmem:[#allocation321_spill] sm:$0xff] %v6596_v43  ;;  %2069 = vperm.xlu1 %4566, %v6535_v24   ;;  %v10400_v43 = vmov 85  }
 0x4ac   : > { %3509 = vperm.xlu0 %4724, %v5907_v47  }
 0x4ae   : > { %v6600_v56 = vpop.permute.xlu0 %1028  ;;  %v6602_v26 = vpop.permute.xlu1 %1865 }
 0x4af   : > { %10396 = vst [vmem:[#allocation322_spill] sm:$0xff] %v6602_v26  ;;  %2077 = vperm.xlu1 %4566, %v6513_v49   ;;  %vm1031_vm15 = vcmp.eq.s32.totalorder %v6600_v56, %v5109_v7  ;;  %v10619_v56 = vld [vmem:[#allocation136_spill] sm:$0xff] }
 0x4b0   : > { %4726 = vset.pattern.permute.xlu0 %v10397_v4 }
 0x4b1   : > { %1208 = vperm.xlu0 %4726, %v6519_v33  }
 0x4b2   : > { %v6607_v41 = vpop.permute.xlu0 %3338 }
 0x4b3   : > { %10398 = vst [vmem:[#allocation323_spill] sm:$0xff] %v6607_v41  ;;  %2081 = vperm.xlu1 %4566, %v6540_v6   ;;  %v6610_v23 = vpop.permute.xlu1 %1874 }
 0x4b4   : > { %10399 = vst [vmem:[#allocation324_spill] sm:$0xff] %v6610_v23 }
 0x4b5   : > { %3518 = vperm.xlu0 %4726, %v6612_v28  }
 0x4b7   : > { %v6615_v47 = vpop.permute.xlu0 %1043  ;;  %4569 = vset.pattern.permute.xlu1 %v10400_v43  ;;  %v6618_v26 = vpop.permute.xlu1 %1879 }
 0x4b8   : > { %10401 = vst [vmem:[#allocation325_spill] sm:$0xff] %v6618_v26  ;;  %2090 = vperm.xlu1 %4569, %v6519_v33   ;;  %v6635_v26 = vld [vmem:[#allocation3 + $0x10] sm:$0xff] }
 0x4b9   : > { %4728 = vset.pattern.permute.xlu0 %v10402_v3 }
 0x4ba   : > { %1223 = vperm.xlu0 %4728, %v6535_v24  }
 0x4bb   : > { %v6623_v41 = vpop.permute.xlu0 %1055 }
 0x4bc   : > { %10403 = vst [vmem:[#allocation326_spill] sm:$0xff] %v6623_v41  ;;  %2095 = vperm.xlu1 %4569, %v6513_v49   ;;  %v6626_v23 = vpop.permute.xlu1 %1889 }
 0x4bd   : > { %10404 = vst [vmem:[#allocation327_spill] sm:$0xff] %v6626_v23  ;;  %v6643_v23 = vld [vmem:[#allocation2 + $0x18] sm:$0x3] }
 0x4be   : > { %1235 = vperm.xlu0 %4728, %v6540_v6  }
 0x4bf   : > { %v6629_v4 = vpop.permute.xlu0 %3353 }
 0x4c0   : > { %10405 = vst [vmem:[#allocation328_spill] sm:$0xff] %v6629_v4  ;;  %4570 = vset.pattern.permute.xlu1 %v10406_v20  ;;  %v6632_v43 = vpop.permute.xlu1 %1897 }
 0x4c1   : > { %10407 = vst [vmem:[#allocation329_spill] sm:$0xff] %v6632_v43  ;;  %2105 = vperm.xlu1 %4570, %v6535_v24   ;;  %v10412_v43 = vmov 38  }
 0x4c2   : > { %3533 = vperm.xlu0 %4728, %v6635_v26  }
 0x4c3   : > { %v6638_v3 = vpop.permute.xlu0 %3365 }
 0x4c4   : > { %10408 = vst [vmem:[#allocation330_spill] sm:$0xff] %v6638_v3  ;;  %v6640_v41 = vpop.permute.xlu1 %1901  ;;  %v10414_v3 = vmov 87  }
 0x4c5   : > { %10409 = vst [vmem:[#allocation331_spill] sm:$0xff] %v6640_v41  ;;  %2113 = vperm.xlu1 %4570, %v6513_v49  }
 0x4c6   : > { %3545 = vperm.xlu0 %4728, %v6643_v23  }
 0x4c8   : > { %v6646_v4 = vpop.permute.xlu0 %1064 }
 0x4c9   : > { %10410 = vst [vmem:[#allocation332_spill] sm:$0xff] %v6646_v4  ;;  %2117 = vperm.xlu1 %4570, %v6540_v6   ;;  %v6649_v20 = vpop.permute.xlu1 %1910 }
 0x4ca   : > { %10411 = vst [vmem:[#allocation333_spill] sm:$0xff] %v6649_v20  ;;  %4730 = vset.pattern.permute.xlu0 %v10412_v43  ;;  %v10418_v20 = vmov 39  }
 0x4cb   : > { %1244 = vperm.xlu0 %4730, %v6519_v33  }
 0x4cc   : > { %v6653_v59 = vpop.permute.xlu0 %3374 }
 0x4cd   : > { %10413 = vst [vmem:[#allocation334_spill] sm:$0xff] %v6653_v59  ;;  %4573 = vset.pattern.permute.xlu1 %v10414_v3  ;;  %v6656_v41 = vpop.permute.xlu1 %1915  ;;  %v10420_v59 = vmov 88  }
 0x4ce   : > { %10415 = vst [vmem:[#allocation335_spill] sm:$0xff] %v6656_v41  ;;  %2126 = vperm.xlu1 %4573, %v6519_v33  }
 0x4cf   : > { %3554 = vperm.xlu0 %4730, %v6612_v28  }
 0x4d1   : > { %v6660_v8 = vpop.permute.xlu0 %1079 }
 0x4d2   : > { %10416 = vst [vmem:[#allocation336_spill] sm:$0xff] %v6660_v8  ;;  %2131 = vperm.xlu1 %4573, %v6513_v49   ;;  %v6663_v4 = vpop.permute.xlu1 %1925 }
 0x4d3   : > { %10417 = vst [vmem:[#allocation337_spill] sm:$0xff] %v6663_v4  ;;  %4732 = vset.pattern.permute.xlu0 %v10418_v20 }
 0x4d4   : > { %1259 = vperm.xlu0 %4732, %v6535_v24  }
 0x4d5   : > { %v6667_v43 = vpop.permute.xlu0 %1091 }
 0x4d6   : > { %10419 = vst [vmem:[#allocation338_spill] sm:$0xff] %v6667_v43  ;;  %4574 = vset.pattern.permute.xlu1 %v10420_v59  ;;  %v6670_v3 = vpop.permute.xlu1 %1933 }
 0x4d7   : > { %10421 = vst [vmem:[#allocation339_spill] sm:$0xff] %v6670_v3  ;;  %2141 = vperm.xlu1 %4574, %v6535_v24   ;;  %v10426_v3 = vmov 89  }
 0x4d8   : > { %1271 = vperm.xlu0 %4732, %v6540_v6  }
 0x4d9   : > { %v6674_v41 = vpop.permute.xlu0 %3389 }
 0x4da   : > { %10422 = vst [vmem:[#allocation340_spill] sm:$0xff] %v6674_v41  ;;  %v6676_v8 = vpop.permute.xlu1 %1937  ;;  %v10428_v41 = vmov 40  }
 0x4db   : > { %10423 = vst [vmem:[#allocation341_spill] sm:$0xff] %v6676_v8  ;;  %2149 = vperm.xlu1 %4574, %v6513_v49  }
 0x4dc   : > { %3569 = vperm.xlu0 %4732, %v6635_v26  }
 0x4dd   : > { %v6680_v4 = vpop.permute.xlu0 %3401 }
 0x4de   : > { %10424 = vst [vmem:[#allocation342_spill] sm:$0xff] %v6680_v4 }
 0x4df   : > { %2153 = vperm.xlu1 %4574, %v6540_v6   ;;  %v6683_v20 = vpop.permute.xlu1 %1946 }
 0x4e0   : > { %10425 = vst [vmem:[#allocation343_spill] sm:$0xff] %v6683_v20  ;;  %3581 = vperm.xlu0 %4732, %v6643_v23  }
 0x4e2   : > { %v6686_v59 = vpop.permute.xlu0 %1100 }
 0x4e3   : > { %4577 = vset.pattern.permute.xlu1 %v10426_v3  ;;  %v6689_v43 = vpop.permute.xlu1 %1951  ;;  %vm1103_vm0 = vcmp.eq.s32.totalorder %v6686_v59, %v5109_v7 }
 0x4e4   : > { %10427 = vst [vmem:[#allocation344_spill] sm:$0xff] %v6689_v43  ;;  %4734 = vset.pattern.permute.xlu0 %v10428_v41  ;;  %2162 = vperm.xlu1 %4577, %v6519_v33   ;;  %v10433_v43 = vmov 41  }
 0x4e5   : > { %1280 = vperm.xlu0 %4734, %v6519_v33  }
 0x4e6   : > { %v6694_v8 = vpop.permute.xlu0 %3410 }
 0x4e7   : > { %10429 = vst [vmem:[#allocation345_spill] sm:$0xff] %v6694_v8 }
 0x4e8   : > { %2167 = vperm.xlu1 %4577, %v6513_v49   ;;  %v6697_v4 = vpop.permute.xlu1 %1961 }
 0x4e9   : > { %10430 = vst [vmem:[#allocation346_spill] sm:$0xff] %v6697_v4  ;;  %3590 = vperm.xlu0 %4734, %v6612_v28  }
 0x4eb   : > { %v6700_v20 = vpop.permute.xlu0 %1115 }
 0x4ec   : > { %4578 = vset.pattern.permute.xlu1 %v10431_v60  ;;  %v6703_v3 = vpop.permute.xlu1 %1969 }
 0x4ed   : > { %10432 = vst [vmem:[#allocation347_spill] sm:$0xff] %v6703_v3  ;;  %4736 = vset.pattern.permute.xlu0 %v10433_v43  ;;  %2177 = vperm.xlu1 %4578, %v6535_v24   ;;  %v10439_v43 = vmov 91  }
 0x4ee   : > { %1295 = vperm.xlu0 %4736, %v6535_v24  }
 0x4ef   : > { %v6708_v41 = vpop.permute.xlu0 %1127 }
 0x4f0   : > { %10434 = vst [vmem:[#allocation348_spill] sm:$0xff] %v6708_v41  ;;  %v6710_v8 = vpop.permute.xlu1 %1973  ;;  %v10442_v41 = vmov 42  }
 0x4f1   : > { %10435 = vst [vmem:[#allocation349_spill] sm:$0xff] %v6710_v8  ;;  %2185 = vperm.xlu1 %4578, %v6513_v49  }
 0x4f2   : > { %1307 = vperm.xlu0 %4736, %v6540_v6  }
 0x4f3   : > { %v6714_v4 = vpop.permute.xlu0 %3425 }
 0x4f4   : > { %10436 = vst [vmem:[#allocation350_spill] sm:$0xff] %v6714_v4 }
 0x4f5   : > { %2189 = vperm.xlu1 %4578, %v6540_v6   ;;  %v6717_v60 = vpop.permute.xlu1 %1982 }
 0x4f6   : > { %10437 = vst [vmem:[#allocation351_spill] sm:$0xff] %v6717_v60  ;;  %3605 = vperm.xlu0 %4736, %v6635_v26  }
 0x4f7   : > { %v6720_v3 = vpop.permute.xlu0 %3437 }
 0x4f8   : > { %10438 = vst [vmem:[#allocation352_spill] sm:$0xff] %v6720_v3  ;;  %v10445_v3 = vmov 92  }
 0x4f9   : > { %4581 = vset.pattern.permute.xlu1 %v10439_v43  ;;  %v6723_v53 = vpop.permute.xlu1 %1987 }
 0x4fa   : > { %10440 = vst [vmem:[#allocation353_spill] sm:$0xff] %v6723_v53  ;;  %3617 = vperm.xlu0 %4736, %v6643_v23   ;;  %2198 = vperm.xlu1 %4581, %v6519_v33  }
 0x4fc   : > { %v6727_v8 = vpop.permute.xlu0 %1136 }
 0x4fd   : > { %10441 = vst [vmem:[#allocation354_spill] sm:$0xff] %v6727_v8 }
 0x4fe   : > { %4738 = vset.pattern.permute.xlu0 %v10442_v41  ;;  %2203 = vperm.xlu1 %4581, %v6513_v49   ;;  %v6731_v4 = vpop.permute.xlu1 %1997  ;;  %v10449_v41 = vmov 43  }
 0x4ff   : > { %10443 = vst [vmem:[#allocation355_spill] sm:$0xff] %v6731_v4  ;;  %1316 = vperm.xlu0 %4738, %v6519_v33  }
 0x500   : > { %v6734_v60 = vpop.permute.xlu0 %3446 }
 0x501   : > { %10444 = vst [vmem:[#allocation356_spill] sm:$0xff] %v6734_v60 }
 0x502   : > { %4582 = vset.pattern.permute.xlu1 %v10445_v3  ;;  %v6737_v43 = vpop.permute.xlu1 %2005 }
 0x503   : > { %10446 = vst [vmem:[#allocation357_spill] sm:$0xff] %v6737_v43  ;;  %3626 = vperm.xlu0 %4738, %v6612_v28   ;;  %2213 = vperm.xlu1 %4582, %v6535_v24   ;;  %v10453_v43 = vmov 93  }
 0x505   : > { %v6741_v53 = vpop.permute.xlu0 %1151 }
 0x506   : > { %10447 = vst [vmem:[#allocation358_spill] sm:$0xff] %v6741_v53  ;;  %v6743_v8 = vpop.permute.xlu1 %2009 }
 0x507   : > { %10448 = vst [vmem:[#allocation359_spill] sm:$0xff] %v6743_v8  ;;  %4740 = vset.pattern.permute.xlu0 %v10449_v41  ;;  %2221 = vperm.xlu1 %4582, %v6513_v49  }
 0x508   : > { %1331 = vperm.xlu0 %4740, %v6535_v24  }
 0x509   : > { %v6748_v4 = vpop.permute.xlu0 %1163 }
 0x50a   : > { %10450 = vst [vmem:[#allocation360_spill] sm:$0xff] %v6748_v4  ;;  %v10457_v4 = vmov 44  }
 0x50b   : > { %2225 = vperm.xlu1 %4582, %v6540_v6   ;;  %v6751_v3 = vpop.permute.xlu1 %2018 }
 0x50c   : > { %10451 = vst [vmem:[#allocation361_spill] sm:$0xff] %v6751_v3  ;;  %1343 = vperm.xlu0 %4740, %v6540_v6  }
 0x50d   : > { %v6754_v60 = vpop.permute.xlu0 %3461 }
 0x50e   : > { %10452 = vst [vmem:[#allocation362_spill] sm:$0xff] %v6754_v60  ;;  %v10458_v60 = vmov 94  }
 0x50f   : > { %4585 = vset.pattern.permute.xlu1 %v10453_v43  ;;  %v6757_v53 = vpop.permute.xlu1 %2023 }
 0x510   : > { %10454 = vst [vmem:[#allocation363_spill] sm:$0xff] %v6757_v53  ;;  %3641 = vperm.xlu0 %4740, %v6635_v26   ;;  %2234 = vperm.xlu1 %4585, %v6519_v33  }
 0x511   : > { %v6761_v8 = vpop.permute.xlu0 %3473 }
 0x512   : > { %10455 = vst [vmem:[#allocation364_spill] sm:$0xff] %v6761_v8 }
 0x514   : > { %3653 = vperm.xlu0 %4740, %v6643_v23   ;;  %2239 = vperm.xlu1 %4585, %v6513_v49   ;;  %v6765_v41 = vpop.permute.xlu1 %2033 }
 0x515   : > { %10456 = vst [vmem:[#allocation365_spill] sm:$0xff] %v6765_v41 }
 0x516   : > { %v6767_v3 = vpop.permute.xlu0 %1172 }
 0x517   : > { %vm1175_vm2 = vcmp.eq.s32.totalorder %v6767_v3, %v5109_v7  ;;  %v10621_v3 = vld [vmem:[#allocation156_spill] sm:$0xff] }
 0x518   : > { %4742 = vset.pattern.permute.xlu0 %v10457_v4  ;;  %4586 = vset.pattern.permute.xlu1 %v10458_v60  ;;  %v6771_v43 = vpop.permute.xlu1 %2041  ;;  %v10466_v4 = vmov 95  }
 0x519   : > { %10459 = vst [vmem:[#allocation366_spill] sm:$0xff] %v6771_v43  ;;  %1352 = vperm.xlu0 %4742, %v6519_v33   ;;  %2249 = vperm.xlu1 %4586, %v6535_v24  }
 0x51a   : > { %v6775_v53 = vpop.permute.xlu0 %3482 }
 0x51b   : > { %10460 = vst [vmem:[#allocation367_spill] sm:$0xff] %v6775_v53 }
 0x51c   : > { %v6777_v8 = vpop.permute.xlu1 %2045 }
 0x51d   : > { %10461 = vst [vmem:[#allocation368_spill] sm:$0xff] %v6777_v8  ;;  %3662 = vperm.xlu0 %4742, %v6612_v28   ;;  %2257 = vperm.xlu1 %4586, %v6513_v49  }
 0x51f   : > { %v6781_v41 = vpop.permute.xlu0 %1187 }
 0x520   : > { %10462 = vst [vmem:[#allocation369_spill] sm:$0xff] %v6781_v41 }
 0x521   : > { %4744 = vset.pattern.permute.xlu0 %v10463_v48  ;;  %2261 = vperm.xlu1 %4586, %v6540_v6   ;;  %v6785_v60 = vpop.permute.xlu1 %2054 }
 0x522   : > { %10464 = vst [vmem:[#allocation370_spill] sm:$0xff] %v6785_v60  ;;  %1367 = vperm.xlu0 %4744, %v6535_v24  }
 0x523   : > { %v6788_v43 = vpop.permute.xlu0 %1199 }
 0x524   : > { %10465 = vst [vmem:[#allocation371_spill] sm:$0xff] %v6788_v43  ;;  %v10471_v43 = vmov 96  }
 0x525   : > { %4589 = vset.pattern.permute.xlu1 %v10466_v4  ;;  %v6791_v53 = vpop.permute.xlu1 %2059 }
 0x526   : > { %10467 = vst [vmem:[#allocation372_spill] sm:$0xff] %v6791_v53  ;;  %1379 = vperm.xlu0 %4744, %v6540_v6   ;;  %2270 = vperm.xlu1 %4589, %v6519_v33  }
 0x527   : > { %v6795_v8 = vpop.permute.xlu0 %3497 }
 0x528   : > { %10468 = vst [vmem:[#allocation373_spill] sm:$0xff] %v6795_v8 }
 0x52a   : > { %3677 = vperm.xlu0 %4744, %v6635_v26   ;;  %2275 = vperm.xlu1 %4589, %v6513_v49   ;;  %v6799_v48 = vpop.permute.xlu1 %2069 }
 0x52b   : > { %10469 = vst [vmem:[#allocation374_spill] sm:$0xff] %v6799_v48  ;;  %v6801_v60 = vpop.permute.xlu0 %3509 }
 0x52c   : > { %10470 = vst [vmem:[#allocation375_spill] sm:$0xff] %v6801_v60 }
 0x52e   : > { %3689 = vperm.xlu0 %4744, %v6643_v23   ;;  %4590 = vset.pattern.permute.xlu1 %v10471_v43  ;;  %v6805_v4 = vpop.permute.xlu1 %2077 }
 0x52f   : > { %10472 = vst [vmem:[#allocation376_spill] sm:$0xff] %v6805_v4  ;;  %2285 = vperm.xlu1 %4590, %v6535_v24   ;;  %v10479_v4 = vmov 47  }
 0x530   : > { %v6808_v53 = vpop.permute.xlu0 %1208 }
 0x531   : > { %10473 = vst [vmem:[#allocation377_spill] sm:$0xff] %v6808_v53  ;;  %v10480_v53 = vmov 97  }
 0x532   : > { %4746 = vset.pattern.permute.xlu0 %v10474_v13  ;;  %v6811_v8 = vpop.permute.xlu1 %2081 }
 0x533   : > { %10475 = vst [vmem:[#allocation378_spill] sm:$0xff] %v6811_v8  ;;  %1388 = vperm.xlu0 %4746, %v6519_v33   ;;  %2293 = vperm.xlu1 %4590, %v6513_v49  }
 0x534   : > { %v6815_v48 = vpop.permute.xlu0 %3518 }
 0x535   : > { %10476 = vst [vmem:[#allocation379_spill] sm:$0xff] %v6815_v48 }
 0x537   : > { %3698 = vperm.xlu0 %4746, %v6612_v28   ;;  %2297 = vperm.xlu1 %4590, %v6540_v6   ;;  %v6819_v43 = vpop.permute.xlu1 %2090 }
 0x538   : > { %10477 = vst [vmem:[#allocation380_spill] sm:$0xff] %v6819_v43 }
 0x539   : > { %v6821_v60 = vpop.permute.xlu0 %1223 }
 0x53a   : > { %10478 = vst [vmem:[#allocation381_spill] sm:$0xff] %v6821_v60 }
 0x53b   : > { %4748 = vset.pattern.permute.xlu0 %v10479_v4  ;;  %4593 = vset.pattern.permute.xlu1 %v10480_v53  ;;  %v6825_v13 = vpop.permute.xlu1 %2095  ;;  %v10485_v4 = vmov 98  }
 0x53c   : > { %10481 = vst [vmem:[#allocation382_spill] sm:$0xff] %v6825_v13  ;;  %1403 = vperm.xlu0 %4748, %v6535_v24   ;;  %2306 = vperm.xlu1 %4593, %v6519_v33  }
 0x53d   : > { %v6829_v8 = vpop.permute.xlu0 %1235 }
 0x53e   : > { %10482 = vst [vmem:[#allocation383_spill] sm:$0xff] %v6829_v8 }
 0x540   : > { %1415 = vperm.xlu0 %4748, %v6540_v6   ;;  %2311 = vperm.xlu1 %4593, %v6513_v49   ;;  %v6833_v48 = vpop.permute.xlu1 %2105 }
 0x541   : > { %10483 = vst [vmem:[#allocation384_spill] sm:$0xff] %v6833_v48  ;;  %v6835_v43 = vpop.permute.xlu0 %3533  ;;  %v10489_v48 = vmov 48  }
 0x542   : > { %10484 = vst [vmem:[#allocation385_spill] sm:$0xff] %v6835_v43 }
 0x544   : > { %3713 = vperm.xlu0 %4748, %v6635_v26   ;;  %4594 = vset.pattern.permute.xlu1 %v10485_v4  ;;  %v6839_v53 = vpop.permute.xlu1 %2113 }
 0x545   : > { %10486 = vst [vmem:[#allocation386_spill] sm:$0xff] %v6839_v53  ;;  %2321 = vperm.xlu1 %4594, %v6535_v24   ;;  %v6842_v13 = vpop.permute.xlu0 %3545 }
 0x546   : > { %10487 = vst [vmem:[#allocation387_spill] sm:$0xff] %v6842_v13  ;;  %v10492_v13 = vmov 99  }
 0x548   : > { %3725 = vperm.xlu0 %4748, %v6643_v23   ;;  %v6845_v8 = vpop.permute.xlu1 %2117 }
 0x549   : > { %10488 = vst [vmem:[#allocation388_spill] sm:$0xff] %v6845_v8  ;;  %2329 = vperm.xlu1 %4594, %v6513_v49  }
 0x54a   : > { %v6848_v60 = vpop.permute.xlu0 %1244 }
 0x54b   : > { %vm1247_vm5 = vcmp.eq.s32.totalorder %v6848_v60, %v5109_v7 }
 0x54c   : > { %4750 = vset.pattern.permute.xlu0 %v10489_v48 }
 0x54d   : > { %1424 = vperm.xlu0 %4750, %v6519_v33   ;;  %2333 = vperm.xlu1 %4594, %v6540_v6   ;;  %v6853_v4 = vpop.permute.xlu1 %2126 }
 0x54e   : > { %10490 = vst [vmem:[#allocation389_spill] sm:$0xff] %v6853_v4  ;;  %v6855_v43 = vpop.permute.xlu0 %3554 }
 0x54f   : > { %10491 = vst [vmem:[#allocation390_spill] sm:$0xff] %v6855_v43  ;;  %v10498_v43 = vmov 100  }
 0x551   : > { %3734 = vperm.xlu0 %4750, %v6612_v28   ;;  %4597 = vset.pattern.permute.xlu1 %v10492_v13  ;;  %v6859_v53 = vpop.permute.xlu1 %2131 }
 0x552   : > { %10493 = vst [vmem:[#allocation391_spill] sm:$0xff] %v6859_v53  ;;  %2342 = vperm.xlu1 %4597, %v6519_v33  }
 0x553   : > { %v6862_v8 = vpop.permute.xlu0 %1259 }
 0x554   : > { %10494 = vst [vmem:[#allocation392_spill] sm:$0xff] %v6862_v8 }
 0x555   : > { %4752 = vset.pattern.permute.xlu0 %v10495_v1 }
 0x556   : > { %1439 = vperm.xlu0 %4752, %v6535_v24   ;;  %2347 = vperm.xlu1 %4597, %v6513_v49   ;;  %v6867_v48 = vpop.permute.xlu1 %2141 }
 0x557   : > { %10496 = vst [vmem:[#allocation393_spill] sm:$0xff] %v6867_v48  ;;  %v6869_v4 = vpop.permute.xlu0 %1271 }
 0x558   : > { %10497 = vst [vmem:[#allocation394_spill] sm:$0xff] %v6869_v4 }
 0x55a   : > { %1451 = vperm.xlu0 %4752, %v6540_v6   ;;  %4598 = vset.pattern.permute.xlu1 %v10498_v43  ;;  %v6873_v13 = vpop.permute.xlu1 %2149 }
 0x55b   : > { %10499 = vst [vmem:[#allocation395_spill] sm:$0xff] %v6873_v13  ;;  %2357 = vperm.xlu1 %4598, %v6535_v24   ;;  %v6876_v53 = vpop.permute.xlu0 %3569  ;;  %v10505_v13 = vmov 50   ;;  %v10613_v55 = vld [vmem:[#allocation392_spill] sm:$0xff] }
 0x55c   : > { %10500 = vst [vmem:[#allocation396_spill] sm:$0xff] %v6876_v53  ;;  %v10506_v53 = vmov 101  }
 0x55e   : > { %3749 = vperm.xlu0 %4752, %v6635_v26   ;;  %v6879_v1 = vpop.permute.xlu1 %2153 }
 0x55f   : > { %10501 = vst [vmem:[#allocation397_spill] sm:$0xff] %v6879_v1  ;;  %2365 = vperm.xlu1 %4598, %v6513_v49   ;;  %v6882_v8 = vpop.permute.xlu0 %3581 }
 0x560   : > { %10502 = vst [vmem:[#allocation398_spill] sm:$0xff] %v6882_v8 }
 0x562   : > { %3761 = vperm.xlu0 %4752, %v6643_v23  }
 0x563   : > { %2369 = vperm.xlu1 %4598, %v6540_v6   ;;  %v6886_v48 = vpop.permute.xlu1 %2162 }
 0x564   : > { %10503 = vst [vmem:[#allocation399_spill] sm:$0xff] %v6886_v48  ;;  %v6888_v43 = vpop.permute.xlu0 %1280 }
 0x565   : > { %10504 = vst [vmem:[#allocation400_spill] sm:$0xff] %v6888_v43  ;;  %v10511_v43 = vmov 51  }
 0x566   : > { %4754 = vset.pattern.permute.xlu0 %v10505_v13  ;;  %v10512_v13 = vmov 102  }
 0x567   : > { %1460 = vperm.xlu0 %4754, %v6519_v33   ;;  %4601 = vset.pattern.permute.xlu1 %v10506_v53  ;;  %v6893_v4 = vpop.permute.xlu1 %2167 }
 0x568   : > { %10507 = vst [vmem:[#allocation401_spill] sm:$0xff] %v6893_v4  ;;  %2378 = vperm.xlu1 %4601, %v6519_v33   ;;  %v6896_v1 = vpop.permute.xlu0 %3590 }
 0x569   : > { %10508 = vst [vmem:[#allocation402_spill] sm:$0xff] %v6896_v1 }
 0x56b   : > { %3770 = vperm.xlu0 %4754, %v6612_v28  }
 0x56c   : > { %2383 = vperm.xlu1 %4601, %v6513_v49   ;;  %v6900_v8 = vpop.permute.xlu1 %2177 }
 0x56d   : > { %10509 = vst [vmem:[#allocation403_spill] sm:$0xff] %v6900_v8  ;;  %v6902_v48 = vpop.permute.xlu0 %1295 }
 0x56e   : > { %10510 = vst [vmem:[#allocation404_spill] sm:$0xff] %v6902_v48 }
 0x56f   : > { %4756 = vset.pattern.permute.xlu0 %v10511_v43 }
 0x570   : > { %1475 = vperm.xlu0 %4756, %v6535_v24   ;;  %4602 = vset.pattern.permute.xlu1 %v10512_v13  ;;  %v6907_v53 = vpop.permute.xlu1 %2185 }
 0x571   : > { %10513 = vst [vmem:[#allocation405_spill] sm:$0xff] %v6907_v53  ;;  %v6909_v4 = vpop.permute.xlu0 %1307  ;;  %2393 = vperm.xlu1 %4602, %v6535_v24   ;;  %v10519_v53 = vmov 103  }
 0x572   : > { %10514 = vst [vmem:[#allocation406_spill] sm:$0xff] %v6909_v4 }
 0x574   : > { %1487 = vperm.xlu0 %4756, %v6540_v6   ;;  %v6913_v1 = vpop.permute.xlu1 %2189 }
 0x575   : > { %10515 = vst [vmem:[#allocation407_spill] sm:$0xff] %v6913_v1  ;;  %2401 = vperm.xlu1 %4602, %v6513_v49   ;;  %v6916_v8 = vpop.permute.xlu0 %3605  ;;  %v10521_v1 = vmov 52  }
 0x576   : > { %10516 = vst [vmem:[#allocation408_spill] sm:$0xff] %v6916_v8 }
 0x578   : > { %3785 = vperm.xlu0 %4756, %v6635_v26  }
 0x579   : > { %2405 = vperm.xlu1 %4602, %v6540_v6   ;;  %v6920_v43 = vpop.permute.xlu1 %2198  ;;  %v6922_v13 = vpop.permute.xlu0 %3617 }
 0x57a   : > { %10517 = vst [vmem:[#allocation409_spill] sm:$0xff] %v6920_v43  ;;  %10518 = vst [vmem:[#allocation410_spill] sm:$0xff] %v6922_v13  ;;  %v10524_v13 = vmov 104  }
 0x57c   : > { %3797 = vperm.xlu0 %4756, %v6643_v23  }
 0x57d   : > { %4605 = vset.pattern.permute.xlu1 %v10519_v53  ;;  %v6926_v4 = vpop.permute.xlu1 %2203 }
 0x57e   : > { %10520 = vst [vmem:[#allocation411_spill] sm:$0xff] %v6926_v4  ;;  %v6928_v48 = vpop.permute.xlu0 %1316  ;;  %2414 = vperm.xlu1 %4605, %v6519_v33  }
 0x57f   : > { %vm1319_vm8 = vcmp.eq.s32.totalorder %v6928_v48, %v5109_v7 }
 0x580   : > { %4758 = vset.pattern.permute.xlu0 %v10521_v1 }
 0x581   : > { %1496 = vperm.xlu0 %4758, %v6519_v33  }
 0x582   : > { %2419 = vperm.xlu1 %4605, %v6513_v49   ;;  %v6934_v8 = vpop.permute.xlu1 %2213  ;;  %v6936_v43 = vpop.permute.xlu0 %3626 }
 0x583   : > { %10522 = vst [vmem:[#allocation412_spill] sm:$0xff] %v6934_v8  ;;  %10523 = vst [vmem:[#allocation413_spill] sm:$0xff] %v6936_v43 }
 0x585   : > { %3806 = vperm.xlu0 %4758, %v6612_v28  }
 0x586   : > { %4606 = vset.pattern.permute.xlu1 %v10524_v13  ;;  %v6940_v53 = vpop.permute.xlu1 %2221 }
 0x587   : > { %10525 = vst [vmem:[#allocation414_spill] sm:$0xff] %v6940_v53  ;;  %v6942_v4 = vpop.permute.xlu0 %1331  ;;  %2429 = vperm.xlu1 %4606, %v6535_v24   ;;  %v10532_v53 = vmov 105  }
 0x588   : > { %10526 = vst [vmem:[#allocation415_spill] sm:$0xff] %v6942_v4  ;;  %v10560_v4 = vmov 109  }
 0x589   : > { %4760 = vset.pattern.permute.xlu0 %v10527_v63 }
 0x58a   : > { %1511 = vperm.xlu0 %4760, %v6535_v24   ;;  %v6947_v1 = vpop.permute.xlu1 %2225 }
 0x58b   : > { %10528 = vst [vmem:[#allocation416_spill] sm:$0xff] %v6947_v1  ;;  %v6949_v41 = vpop.permute.xlu0 %1343  ;;  %2437 = vperm.xlu1 %4606, %v6513_v49  }
 0x58c   : > { %10529 = vst [vmem:[#allocation417_spill] sm:$0xff] %v6949_v41 }
 0x58e   : > { %1523 = vperm.xlu0 %4760, %v6540_v6  }
 0x58f   : > { %2441 = vperm.xlu1 %4606, %v6540_v6   ;;  %v6954_v13 = vpop.permute.xlu1 %2234  ;;  %v6956_v43 = vpop.permute.xlu0 %3641  ;;  %v10618_v45 = vld [vmem:[#allocation415_spill] sm:$0xff] }
 0x590   : > { %10530 = vst [vmem:[#allocation418_spill] sm:$0xff] %v6954_v13  ;;  %10531 = vst [vmem:[#allocation419_spill] sm:$0xff] %v6956_v43  ;;  %v10537_v13 = vmov 54   ;;  %v10538_v43 = vmov 106  }
 0x592   : > { %3821 = vperm.xlu0 %4760, %v6635_v26  }
 0x593   : > { %4609 = vset.pattern.permute.xlu1 %v10532_v53  ;;  %v6960_v8 = vpop.permute.xlu1 %2239  ;;  %v6962_v63 = vpop.permute.xlu0 %3653 }
 0x594   : > { %10533 = vst [vmem:[#allocation420_spill] sm:$0xff] %v6960_v8  ;;  %10534 = vst [vmem:[#allocation421_spill] sm:$0xff] %v6962_v63  ;;  %2450 = vperm.xlu1 %4609, %v6519_v33  }
 0x596   : > { %3833 = vperm.xlu0 %4760, %v6643_v23  }
 0x598   : > { %v6966_v1 = vpop.permute.xlu0 %1352  ;;  %2455 = vperm.xlu1 %4609, %v6513_v49   ;;  %v6969_v41 = vpop.permute.xlu1 %2249 }
 0x599   : > { %10535 = vst [vmem:[#allocation422_spill] sm:$0xff] %v6966_v1  ;;  %10536 = vst [vmem:[#allocation423_spill] sm:$0xff] %v6969_v41  ;;  %v10543_v41 = vmov 55  }
 0x59a   : > { %4762 = vset.pattern.permute.xlu0 %v10537_v13 }
 0x59b   : > { %1532 = vperm.xlu0 %4762, %v6519_v33  }
 0x59c   : > { %4610 = vset.pattern.permute.xlu1 %v10538_v43  ;;  %v6974_v53 = vpop.permute.xlu1 %2257  ;;  %v6976_v8 = vpop.permute.xlu0 %3662 }
 0x59d   : > { %10539 = vst [vmem:[#allocation424_spill] sm:$0xff] %v6974_v53  ;;  %10540 = vst [vmem:[#allocation425_spill] sm:$0xff] %v6976_v8  ;;  %2465 = vperm.xlu1 %4610, %v6535_v24   ;;  %v10546_v8 = vmov 107  }
 0x59f   : > { %3842 = vperm.xlu0 %4762, %v6612_v28  }
 0x5a0   : > { %v6980_v63 = vpop.permute.xlu1 %2261 }
 0x5a1   : > { %10541 = vst [vmem:[#allocation426_spill] sm:$0xff] %v6980_v63  ;;  %v6982_v1 = vpop.permute.xlu0 %1367  ;;  %2473 = vperm.xlu1 %4610, %v6513_v49  }
 0x5a2   : > { %10542 = vst [vmem:[#allocation427_spill] sm:$0xff] %v6982_v1  ;;  %v10551_v1 = vmov 108  }
 0x5a3   : > { %4764 = vset.pattern.permute.xlu0 %v10543_v41 }
 0x5a4   : > { %1547 = vperm.xlu0 %4764, %v6535_v24  }
 0x5a5   : > { %v6987_v13 = vpop.permute.xlu0 %1379  ;;  %2477 = vperm.xlu1 %4610, %v6540_v6   ;;  %v6990_v43 = vpop.permute.xlu1 %2270 }
 0x5a6   : > { %10544 = vst [vmem:[#allocation428_spill] sm:$0xff] %v6987_v13  ;;  %10545 = vst [vmem:[#allocation429_spill] sm:$0xff] %v6990_v43 }
 0x5a8   : > { %1559 = vperm.xlu0 %4764, %v6540_v6  }
 0x5a9   : > { %4613 = vset.pattern.permute.xlu1 %v10546_v8  ;;  %v6994_v53 = vpop.permute.xlu1 %2275  ;;  %v6996_v63 = vpop.permute.xlu0 %3677 }
 0x5aa   : > { %10547 = vst [vmem:[#allocation430_spill] sm:$0xff] %v6994_v53  ;;  %10548 = vst [vmem:[#allocation431_spill] sm:$0xff] %v6996_v63  ;;  %2486 = vperm.xlu1 %4613, %v6519_v33   ;;  %v10553_v63 = vmov 56  }
 0x5ac   : > { %3857 = vperm.xlu0 %4764, %v6635_v26  }
 0x5ad   : > { %v7000_v41 = vpop.permute.xlu0 %3689 }
 0x5ae   : > { %10549 = vst [vmem:[#allocation432_spill] sm:$0xff] %v7000_v41  ;;  %2491 = vperm.xlu1 %4613, %v6513_v49   ;;  %v7003_v13 = vpop.permute.xlu1 %2285 }
 0x5af   : > { %10550 = vst [vmem:[#allocation433_spill] sm:$0xff] %v7003_v13 }
 0x5b0   : > { %3869 = vperm.xlu0 %4764, %v6643_v23  }
 0x5b2   : > { %v7006_v43 = vpop.permute.xlu0 %1388  ;;  %4614 = vset.pattern.permute.xlu1 %v10551_v1  ;;  %v7009_v8 = vpop.permute.xlu1 %2293 }
 0x5b3   : > { %10552 = vst [vmem:[#allocation434_spill] sm:$0xff] %v7009_v8  ;;  %2501 = vperm.xlu1 %4614, %v6535_v24   ;;  %v10558_v8 = vmov 57  }
 0x5b4   : > { %4766 = vset.pattern.permute.xlu0 %v10553_v63 }
 0x5b5   : > { %1568 = vperm.xlu0 %4766, %v6519_v33  }
 0x5b6   : > { %v7014_v53 = vpop.permute.xlu1 %2297  ;;  %v7016_v41 = vpop.permute.xlu0 %3698 }
 0x5b7   : > { %10554 = vst [vmem:[#allocation435_spill] sm:$0xff] %v7014_v53  ;;  %10555 = vst [vmem:[#allocation436_spill] sm:$0xff] %v7016_v41  ;;  %2509 = vperm.xlu1 %4614, %v6513_v49  }
 0x5b9   : > { %3878 = vperm.xlu0 %4766, %v6612_v28  }
 0x5bb   : > { %v7020_v13 = vpop.permute.xlu0 %1403  ;;  %2513 = vperm.xlu1 %4614, %v6540_v6   ;;  %v7023_v1 = vpop.permute.xlu1 %2306 }
 0x5bc   : > { %10556 = vst [vmem:[#allocation437_spill] sm:$0xff] %v7020_v13  ;;  %10557 = vst [vmem:[#allocation438_spill] sm:$0xff] %v7023_v1 }
 0x5bd   : > { %4768 = vset.pattern.permute.xlu0 %v10558_v8  ;;  %v10565_v8 = vmov 110  }
 0x5be   : > { %1583 = vperm.xlu0 %4768, %v6535_v24  }
 0x5bf   : > { %v7027_v63 = vpop.permute.xlu0 %1415  ;;  %4617 = vset.pattern.permute.xlu1 %v10560_v4  ;;  %v7030_v53 = vpop.permute.xlu1 %2311 }
 0x5c0   : > { %10559 = vst [vmem:[#allocation439_spill] sm:$0xff] %v7027_v63  ;;  %10561 = vst [vmem:[#allocation440_spill] sm:$0xff] %v7030_v53  ;;  %2522 = vperm.xlu1 %4617, %v6519_v33  }
 0x5c2   : > { %1595 = vperm.xlu0 %4768, %v6540_v6  }
 0x5c3   : > { %v7034_v41 = vpop.permute.xlu0 %3713 }
 0x5c4   : > { %10562 = vst [vmem:[#allocation441_spill] sm:$0xff] %v7034_v41  ;;  %2527 = vperm.xlu1 %4617, %v6513_v49   ;;  %v7037_v13 = vpop.permute.xlu1 %2321  ;;  %v10569_v41 = vmov 58  }
 0x5c5   : > { %10563 = vst [vmem:[#allocation442_spill] sm:$0xff] %v7037_v13 }
 0x5c6   : > { %3893 = vperm.xlu0 %4768, %v6635_v26  }
 0x5c7   : > { %v7040_v1 = vpop.permute.xlu0 %3725 }
 0x5c8   : > { %10564 = vst [vmem:[#allocation443_spill] sm:$0xff] %v7040_v1  ;;  %4618 = vset.pattern.permute.xlu1 %v10565_v8  ;;  %v7043_v63 = vpop.permute.xlu1 %2329 }
 0x5c9   : > { %10566 = vst [vmem:[#allocation444_spill] sm:$0xff] %v7043_v63  ;;  %2537 = vperm.xlu1 %4618, %v6535_v24   ;;  %v10573_v63 = vmov 111  }
 0x5ca   : > { %3905 = vperm.xlu0 %4768, %v6643_v23  }
 0x5cc   : > { %v7047_v4 = vpop.permute.xlu0 %1424  ;;  %v7049_v53 = vpop.permute.xlu1 %2333 }
 0x5cd   : > { %10567 = vst [vmem:[#allocation445_spill] sm:$0xff] %v7047_v4  ;;  %10568 = vst [vmem:[#allocation446_spill] sm:$0xff] %v7049_v53  ;;  %2545 = vperm.xlu1 %4618, %v6513_v49   ;;  %v10575_v53 = vmov 59  }
 0x5ce   : > { %4770 = vset.pattern.permute.xlu0 %v10569_v41 }
 0x5cf   : > { %1604 = vperm.xlu0 %4770, %v6519_v33  }
 0x5d0   : > { %v7054_v13 = vpop.permute.xlu0 %3734 }
 0x5d1   : > { %10570 = vst [vmem:[#allocation447_spill] sm:$0xff] %v7054_v13  ;;  %2549 = vperm.xlu1 %4618, %v6540_v6   ;;  %v7057_v8 = vpop.permute.xlu1 %2342 }
 0x5d2   : > { %10571 = vst [vmem:[#allocation448_spill] sm:$0xff] %v7057_v8 }
 0x5d3   : > { %3914 = vperm.xlu0 %4770, %v6612_v28  }
 0x5d5   : > { %v7060_v1 = vpop.permute.xlu0 %1439  ;;  %4621 = vset.pattern.permute.xlu1 %v10573_v63  ;;  %v7063_v4 = vpop.permute.xlu1 %2347 }
 0x5d6   : > { %10572 = vst [vmem:[#allocation449_spill] sm:$0xff] %v7060_v1  ;;  %10574 = vst [vmem:[#allocation450_spill] sm:$0xff] %v7063_v4  ;;  %2558 = vperm.xlu1 %4621, %v6519_v33   ;;  %v10579_v1 = vmov 112  }
 0x5d7   : > { %4772 = vset.pattern.permute.xlu0 %v10575_v53 }
 0x5d8   : > { %1619 = vperm.xlu0 %4772, %v6535_v24  }
 0x5d9   : > { %v7068_v41 = vpop.permute.xlu0 %1451 }
 0x5da   : > { %10576 = vst [vmem:[#allocation451_spill] sm:$0xff] %v7068_v41  ;;  %2563 = vperm.xlu1 %4621, %v6513_v49   ;;  %v7071_v13 = vpop.permute.xlu1 %2357  ;;  %v10586_v41 = vmov 113  }
 0x5db   : > { %10577 = vst [vmem:[#allocation452_spill] sm:$0xff] %v7071_v13 }
 0x5dc   : > { %1631 = vperm.xlu0 %4772, %v6540_v6  }
 0x5dd   : > { %v7074_v8 = vpop.permute.xlu0 %3749 }
 0x5de   : > { %10578 = vst [vmem:[#allocation453_spill] sm:$0xff] %v7074_v8  ;;  %4622 = vset.pattern.permute.xlu1 %v10579_v1  ;;  %v7077_v63 = vpop.permute.xlu1 %2365  ;;  %v10584_v1 = vmov 60  }
 0x5df   : > { %10580 = vst [vmem:[#allocation454_spill] sm:$0xff] %v7077_v63  ;;  %2573 = vperm.xlu1 %4622, %v6535_v24  }
 0x5e0   : > { %3929 = vperm.xlu0 %4772, %v6635_v26  }
 0x5e1   : > { %v7081_v53 = vpop.permute.xlu0 %3761 }
 0x5e2   : > { %10581 = vst [vmem:[#allocation455_spill] sm:$0xff] %v7081_v53  ;;  %v7083_v4 = vpop.permute.xlu1 %2369 }
 0x5e3   : > { %10582 = vst [vmem:[#allocation456_spill] sm:$0xff] %v7083_v4  ;;  %2581 = vperm.xlu1 %4622, %v6513_v49  }
 0x5e4   : > { %3941 = vperm.xlu0 %4772, %v6643_v23  }
 0x5e6   : > { %v7087_v13 = vpop.permute.xlu0 %1460 }
 0x5e7   : > { %2585 = vperm.xlu1 %4622, %v6540_v6   ;;  %v7090_v8 = vpop.permute.xlu1 %2378 }
 0x5e8   : > { %10583 = vst [vmem:[#allocation457_spill] sm:$0xff] %v7090_v8  ;;  %4774 = vset.pattern.permute.xlu0 %v10584_v1  ;;  %v10590_v8 = vmov 61  }
 0x5e9   : > { %1640 = vperm.xlu0 %4774, %v6519_v33  }
 0x5ea   : > { %v7094_v63 = vpop.permute.xlu0 %3770 }
 0x5eb   : > { %10585 = vst [vmem:[#allocation458_spill] sm:$0xff] %v7094_v63  ;;  %4625 = vset.pattern.permute.xlu1 %v10586_v41  ;;  %v7097_v53 = vpop.permute.xlu1 %2383  ;;  %v10592_v63 = vmov 114  }
 0x5ec   : > { %10587 = vst [vmem:[#allocation459_spill] sm:$0xff] %v7097_v53  ;;  %2594 = vperm.xlu1 %4625, %v6519_v33  }
 0x5ed   : > { %3950 = vperm.xlu0 %4774, %v6612_v28  }
 0x5ef   : > { %v7101_v4 = vpop.permute.xlu0 %1475 }
 0x5f0   : > { %10588 = vst [vmem:[#allocation460_spill] sm:$0xff] %v7101_v4  ;;  %2599 = vperm.xlu1 %4625, %v6513_v49   ;;  %v7104_v58 = vpop.permute.xlu1 %2393 }
 0x5f1   : > { %10589 = vst [vmem:[#allocation461_spill] sm:$0xff] %v7104_v58  ;;  %4776 = vset.pattern.permute.xlu0 %v10590_v8 }
 0x5f2   : > { %1655 = vperm.xlu0 %4776, %v6535_v24  }
 0x5f3   : > { %v7108_v1 = vpop.permute.xlu0 %1487 }
 0x5f4   : > { %10591 = vst [vmem:[#allocation462_spill] sm:$0xff] %v7108_v1  ;;  %4626 = vset.pattern.permute.xlu1 %v10592_v63  ;;  %v7111_v41 = vpop.permute.xlu1 %2401 }
 0x5f5   : > { %10593 = vst [vmem:[#allocation463_spill] sm:$0xff] %v7111_v41  ;;  %2609 = vperm.xlu1 %4626, %v6535_v24   ;;  %v10599_v41 = vmov 115  }
 0x5f6   : > { %1667 = vperm.xlu0 %4776, %v6540_v6  }
 0x5f7   : > { %v7115_v53 = vpop.permute.xlu0 %3785 }
 0x5f8   : > { %10594 = vst [vmem:[#allocation464_spill] sm:$0xff] %v7115_v53  ;;  %v7117_v4 = vpop.permute.xlu1 %2405  ;;  %v10601_v53 = vmov 62  }
 0x5f9   : > { %10595 = vst [vmem:[#allocation465_spill] sm:$0xff] %v7117_v4  ;;  %2617 = vperm.xlu1 %4626, %v6513_v49  }
 0x5fa   : > { %3965 = vperm.xlu0 %4776, %v6635_v26  }
 0x5fb   : > { %v7121_v8 = vpop.permute.xlu0 %3797 }
 0x5fc   : > { %10596 = vst [vmem:[#allocation466_spill] sm:$0xff] %v7121_v8 }
 0x5fd   : > { %2621 = vperm.xlu1 %4626, %v6540_v6   ;;  %v7124_v58 = vpop.permute.xlu1 %2414 }
 0x5fe   : > { %10597 = vst [vmem:[#allocation467_spill] sm:$0xff] %v7124_v58  ;;  %3977 = vperm.xlu0 %4776, %v6643_v23  }
 0x600   : > { %v7127_v63 = vpop.permute.xlu0 %1496 }
 0x601   : > { %10598 = vst [vmem:[#allocation468_spill] sm:$0xff] %v7127_v63  ;;  %4629 = vset.pattern.permute.xlu1 %v10599_v41  ;;  %v7130_v1 = vpop.permute.xlu1 %2419  ;;  %v10603_v63 = vmov 116  }
 0x602   : > { %10600 = vst [vmem:[#allocation469_spill] sm:$0xff] %v7130_v1  ;;  %4778 = vset.pattern.permute.xlu0 %v10601_v53  ;;  %2630 = vperm.xlu1 %4629, %v6519_v33   ;;  %v10604_v1 = vmov 63   ;;  %v609_v53 = vsel %vm599_vm9, %v5392_v15, 0.0  ;;  %vm833_vm9 = vcmp.eq.s32.totalorder %v5605_v11, %v5109_v7 }
 0x603   : > { %1676 = vperm.xlu0 %4778, %v6519_v33   ;;  %v681_v22 = vsel %vm671_vm10, %v5460_v52, %v609_v53  ;;  %vm760_vm10 = vcmp.eq.s32.totalorder %v6286_v57, %v5109_v7  ;;  %v10608_v57 = vld [vmem:[#allocation101_spill] sm:$0xff]  ;;  %v10623_v53 = vmov 118  }
 0x604   : > { %v7135_v4 = vpop.permute.xlu0 %3806 }
 0x605   : > { %10602 = vst [vmem:[#allocation470_spill] sm:$0xff] %v7135_v4 }
 0x606   : > { %2635 = vperm.xlu1 %4629, %v6513_v49   ;;  %v7138_v8 = vpop.permute.xlu1 %2429 }
 0x607   : > { %3986 = vperm.xlu0 %4778, %v6612_v28  }
 0x609   : > { %v7141_v58 = vpop.permute.xlu0 %1511 }
 0x60a   : > { %4630 = vset.pattern.permute.xlu1 %v10603_v63  ;;  %v7144_v41 = vpop.permute.xlu1 %2437 }
 0x60b   : > { %4780 = vset.pattern.permute.xlu0 %v10604_v1  ;;  %2645 = vperm.xlu1 %4630, %v6535_v24   ;;  %v10778_v1 = vmov 8  }
 0x60c   : > { %1691 = vperm.xlu0 %4780, %v6535_v24   ;;  %v753_v24 = vsel %vm743_vm11, %v5529_v38, %v681_v22  ;;  %vm1391_vm11 = vcmp.eq.s32.totalorder %v7006_v43, %v5109_v7  ;;  %v10624_v22 = vld [vmem:[#allocation326_spill] sm:$0xff] }
 0x60d   : > { %v7153_v4 = vpop.permute.xlu0 %1523  ;;  %v825_v61 = vsel %vm815_vm12, %v5597_v25, %v753_v24  ;;  %vm832_vm12 = vcmp.eq.s32.totalorder %v6366_v50, %v5109_v7  ;;  %v10625_v24 = vld [vmem:[#allocation174_spill] sm:$0xff] }
 0x60e   : > { %v7157_v63 = vpop.permute.xlu1 %2441  ;;  %v897_v15 = vsel %vm887_vm13, %v5665_v35, %v825_v61  ;;  %vm1463_vm13 = vcmp.eq.s32.totalorder %v7087_v13, %v5109_v7  ;;  %v10622_v13 = vld [vmem:[#allocation437_spill] sm:$0xff] }
 0x60f   : > { %2653 = vperm.xlu1 %4630, %v6513_v49   ;;  %v969_v38 = vsel %vm959_vm14, %v5734_v42, %v897_v15  ;;  %vm904_vm14 = vcmp.eq.s32.totalorder %v6447_v44, %v5109_v7  ;;  %v10626_v15 = vld [vmem:[#allocation460_spill] sm:$0xff] }
 0x610   : > { %1703 = vperm.xlu0 %4780, %v6540_v6   ;;  %v1041_v25 = vsel %vm1031_vm15, %v5803_v29, %v969_v38  ;;  %vm976_vm15 = vcmp.eq.s32.totalorder %v6531_v5, %v5109_v7  ;;  %v7310_v38 = vld [vmem:[#allocation3] sm:$0xff] }
 0x611   : > { %v7170_v46 = vpop.permute.xlu0 %3821  ;;  %v1113_v42 = vsel %vm1103_vm0, %v5881_v40, %v1041_v25  ;;  %v626_v40 = vsel %vm616_vm4, %v5406_v21, 0.0  ;;  %vm1048_vm0 = vcmp.eq.s32.totalorder %v6615_v47, %v5109_v7  ;;  %v10620_v47 = vld [vmem:[#allocation304_spill] sm:$0xff]  ;;  %v10627_v25 = vmov 67  }
 0x612   : > { %10605 = vst [vmem:[#allocation471_spill] sm:$0xff] %v7170_v46  ;;  %v1185_v31 = vsel %vm1175_vm2, %v5951_v14, %v1113_v42  ;;  %v627_v14 = vsel %vm617_vm1, %v6131_v54, 0.0  ;;  %v698_v21 = vsel %vm688_vm7, %v5474_v30, %v626_v40  ;;  %vm1120_vm2 = vcmp.eq.s32.totalorder %v6700_v20, %v5109_v7  ;;  %v10628_v42 = vld [vmem:[#allocation154_spill] sm:$0xff]  ;;  %v10630_v40 = vld [vmem:[#allocation193_spill] sm:$0xff] }
 0x613   : > { %2657 = vperm.xlu1 %4630, %v6540_v6   ;;  %v7179_v52 = vpop.permute.xlu1 %2450  ;;  %v1257_v29 = vsel %vm1247_vm5, %v6019_v12, %v1185_v31  ;;  %v699_v50 = vsel %vm689_vm3, %v6212_v32, %v627_v14  ;;  %v770_v54 = vsel %vm760_vm10, %v5542_v27, %v698_v21  ;;  %vm905_vm3 = vcmp.eq.s32.totalorder %v5673_v2, %v5109_v7  ;;  %v10629_v31 = vld [vmem:[#allocation348_spill] sm:$0xff]  ;;  %v10631_v14 = vld [vmem:[#allocation173_spill] sm:$0xff]  ;;  %v10632_v21 = vld [vmem:[#allocation371_spill] sm:$0xff] }
 0x614   : > { %4001 = vperm.xlu0 %4780, %v6635_v26   ;;  %v1329_v12 = vsel %vm1319_vm8, %v6084_v10, %v1257_v29  ;;  %v842_v48 = vsel %vm832_vm12, %v5611_v37, %v770_v54  ;;  %v771_v37 = vsel %vm761_vm6, %v6293_v51, %v699_v50  ;;  %v10612_v10 = vld [vmem:[#allocation119_spill] sm:$0xff]  ;;  %vm1264_vm6 = vcmp.eq.s32.totalorder %v10613_v55, %v5109_v7  ;;  %v10633_v50 = vld [vmem:[#allocation210_spill] sm:$0xff]  ;;  %v10642_v55 = vld [vmem:[#allocation224_spill] sm:$0xff] }
 0x615   : > { %v7194_v35 = vpop.permute.xlu0 %3833  ;;  %v1401_v30 = vsel %vm1391_vm11, %v6153_v34, %v1329_v12  ;;  %v914_v27 = vsel %vm904_vm14, %v5679_v0, %v842_v48  ;;  %v10609_v0 = vld [vmem:[#allocation369_spill] sm:$0xff]  ;;  %vm1049_vm7 = vcmp.eq.s32.totalorder %v10615_v16, %v5109_v7  ;;  %vm1336_vm8 = vcmp.eq.s32.totalorder %v10618_v45, %v5109_v7  ;;  %v10635_v48 = vld [vmem:[#allocation394_spill] sm:$0xff]  ;;  %v10643_v16 = vld [vmem:[#allocation439_spill] sm:$0xff] }
 0x616   : > { %10606 = vst [vmem:[#allocation472_spill] sm:$0xff] %v7194_v35  ;;  %v1473_v32 = vsel %vm1463_vm13, %v6221_v18, %v1401_v30  ;;  %v986_v62 = vsel %vm976_vm15, %v10608_v57, %v914_v27  ;;  %vm1192_vm4 = vcmp.eq.s32.totalorder %v10609_v0, %v5109_v7  ;;  %v10616_v18 = vld [vmem:[#allocation283_spill] sm:$0xff]  ;;  %vm1408_vm10 = vcmp.eq.s32.totalorder %v10622_v13, %v5109_v7  ;;  %v10636_v27 = vld [vmem:[#allocation226_spill] sm:$0xff]  ;;  %v10639_v0 = vld [vmem:[#allocation417_spill] sm:$0xff] }
 0x617   : > { %4633 = vset.pattern.permute.xlu1 %v10607_v19  ;;  %v7211_v6 = vpop.permute.xlu1 %2455  ;;  %v1058_v51 = vsel %vm1048_vm0, %v10612_v10, %v986_v62  ;;  %vm1480_vm11 = vcmp.eq.s32.totalorder %v10626_v15, %v5109_v7  ;;  %vm1193_vm12 = vcmp.eq.s32.totalorder %v10628_v42, %v5109_v7  ;;  %vm1265_vm13 = vcmp.eq.s32.totalorder %v10631_v14, %v5109_v7  ;;  %v10638_v62 = vld [vmem:[#allocation208_spill] sm:$0xff]  ;;  %v7338_v10 = vld [vmem:[#allocation2] sm:$0xff]  ;;  %v10652_v42 = vld [vmem:[#allocation39_spill] sm:$0xff] }
 0x618   : > { %2666 = vperm.xlu1 %4633, %v6519_v33   ;;  %4013 = vperm.xlu0 %4780, %v6643_v23   ;;  %v10617_v33 = vld [vmem:[#allocation138_spill] sm:$0xff]  ;;  %v10646_v45 = vld [vmem:[#allocation240_spill] sm:$0xff]  ;;  %v10649_v13 = vld [vmem:[#allocation245_spill] sm:$0xff] }
 0x619   : > { %v1130_v11 = vsel %vm1120_vm2, %v10617_v33, %v1058_v51  ;;  %v10641_v51 = vld [vmem:[#allocation206_spill] sm:$0xff]  ;;  %v10644_v33 = vmov 65  }
 0x61a   : > { %v1533_v44 = vpop.permute.xlu0 %1532  ;;  %v1202_v60 = vsel %vm1192_vm4, %v10621_v3, %v1130_v11  ;;  %vm635_vm2 = vcmp.eq.s32.totalorder %v10641_v51, %v5109_v7  ;;  %v10645_v11 = vld [vmem:[#allocation225_spill] sm:$0xff]  ;;  %v10648_v3 = vld [vmem:[#allocation6_spill] sm:$0xff] }
 0x61b   : > { %vm1535_vm1 = vcmp.eq.s32.totalorder %v1533_v44, %v5109_v7  ;;  %v1274_v61 = vsel %vm1264_vm6, %v10625_v24, %v1202_v60  ;;  %v10634_v44 = vld [vmem:[#allocation192_spill] sm:$0xff]  ;;  %vm707_vm4 = vcmp.eq.s32.totalorder %v10645_v11, %v5109_v7  ;;  %vm779_vm6 = vcmp.eq.s32.totalorder %v10649_v13, %v5109_v7  ;;  %v10651_v24 = vld [vmem:[#allocation267_spill] sm:$0xff]  ;;  %v10655_v14 = vld [vmem:[#allocation310_spill] sm:$0xff] }
 0x61c   : > { %v7258_v36 = vsel %vm1535_vm1, %v6288_v9, %v1473_v32  ;;  %2671 = vperm.xlu1 %4633, %v6513_v49   ;;  %v7261_v34 = vpop.permute.xlu1 %2465  ;;  %4783 = vset.pattern.permute.xlu0 %v10266_v17  ;;  %v10610_v49 = vld [vmem:[#allocation99_spill] sm:$0xff]  ;;  %v10611_v9 = vld [vmem:[#allocation261_spill] sm:$0xff]  ;;  %v1346_v29 = vsel %vm1336_vm8, %v10630_v40, %v1274_v61  ;;  %vm1337_vm14 = vcmp.eq.s32.totalorder %v10634_v44, %v5109_v7  ;;  %v7366_v61 = vld [vmem:[#allocation2 + $0x8] sm:$0x3] }
 0x61d   : > { %4022 = vperm.xlu0 %4783, %v6612_v28   ;;  %vm977_vm5 = vcmp.eq.s32.totalorder %v10610_v49, %v5109_v7  ;;  %v843_v2 = vsel %vm833_vm9, %v10611_v9, %v771_v37  ;;  %vm1121_vm9 = vcmp.eq.s32.totalorder %v10619_v56, %v5109_v7  ;;  %v1418_v54 = vsel %vm1408_vm10, %v10633_v50, %v1346_v29  ;;  %v10640_v9 = vld [vmem:[#allocation242_spill] sm:$0xff]  ;;  %v10654_v40 = vld [vmem:[#allocation55_spill] sm:$0xff]  ;;  %v10658_v50 = vld [vmem:[#allocation72_spill] sm:$0xff] }
 0x61e   : > { %v7286_v5 = vpop.permute.xlu0 %3842  ;;  %v915_v39 = vsel %vm905_vm3, %v10616_v18, %v843_v2  ;;  %v1490_v37 = vsel %vm1480_vm11, %v10636_v27, %v1418_v54  ;;  %vm1409_vm1 = vcmp.eq.s32.totalorder %v10638_v62, %v5109_v7  ;;  %vm1481_vm3 = vcmp.eq.s32.totalorder %v10642_v55, %v5109_v7  ;;  %v10647_v56 = vld [vmem:[#allocation462_spill] sm:$0xff]  ;;  %v10660_v44 = vld [vmem:[#allocation8_spill] sm:$0xff]  ;;  %v10668_v55 = vld [vmem:[#allocation41_spill] sm:$0xff] }
 0x61f   : > { %10614 = vst [vmem:[#allocation101_spill] sm:$0xff] %v7286_v5  ;;  %v987_v59 = vsel %vm977_vm5, %v10620_v47, %v915_v39  ;;  %v7346_v39 = vld [vmem:[#allocation2 + $0x10] sm:$0xff]  ;;  %vm1553_vm5 = vcmp.eq.s32.totalorder %v10646_v45, %v5109_v7  ;;  %vm581_vm11 = vcmp.eq.s32.totalorder %v10660_v44, %v5109_v7  ;;  %v10662_v27 = vld [vmem:[#allocation354_spill] sm:$0xff]  ;;  %v10664_v62 = vld [vmem:[#allocation24_spill] sm:$0xff]  ;;  %v10768_v5 = vmov 5  }
 0x620   : > { %4634 = vset.pattern.permute.xlu1 %v10623_v53  ;;  %v7304_v43 = vpop.permute.xlu1 %2473  ;;  %v1059_v20 = vsel %vm1049_vm7, %v10624_v22, %v987_v59  ;;  %v10650_v22 = vld [vmem:[#allocation22_spill] sm:$0xff]  ;;  %vm851_vm7 = vcmp.eq.s32.totalorder %v10651_v24, %v5109_v7  ;;  %v10671_v45 = vld [vmem:[#allocation400_spill] sm:$0xff]  ;;  %v10678_v24 = vld [vmem:[#allocation249_spill] sm:$0xff] }
 0x621   : > { %2681 = vperm.xlu1 %4634, %v7310_v38   ;;  %4787 = vset.pattern.permute.xlu0 %v10627_v25  ;;  %v1131_v19 = vsel %vm1121_vm9, %v10629_v31, %v1059_v20  ;;  %vm995_vm9 = vcmp.eq.s32.totalorder %v10655_v14, %v5109_v7  ;;  %v7399_v51 = vld [vmem:[#allocation3 + $0x8] sm:$0x3]  ;;  %v10682_v14 = vld [vmem:[#allocation271_spill] sm:$0xff] }
 0x622   : > { %4076 = vperm.xlu0 %4787, %v6612_v28   ;;  %v1203_v12 = vsel %vm1193_vm12, %v10632_v21, %v1131_v19  ;;  %v10637_v28 = vld [vmem:[#allocation186_spill] sm:$0xff]  ;;  %v10653_v19 = vld [vmem:[#allocation289_spill] sm:$0xff]  ;;  %vm1139_vm12 = vcmp.eq.s32.totalorder %v10662_v27, %v5109_v7  ;;  %v10686_v27 = vld [vmem:[#allocation43_spill] sm:$0xff] }
 0x623   : > { %v1548_v30 = vpop.permute.xlu0 %1547  ;;  %v1275_v32 = vsel %vm1265_vm13, %v10635_v48, %v1203_v12  ;;  %vm561_vm0 = vcmp.eq.s32.totalorder %v10637_v28, %v5109_v7  ;;  %vm923_vm8 = vcmp.eq.s32.totalorder %v10653_v19, %v5109_v7  ;;  %v10657_v12 = vmov 66   ;;  %v10661_v48 = vld [vmem:[#allocation88_spill] sm:$0xff]  ;;  %v10676_v13 = vld [vmem:[#allocation422_spill] sm:$0xff]  ;;  %v10680_v19 = vld [vmem:[#allocation445_spill] sm:$0xff] }
 0x624   : > { %vm1552_vm15 = vcmp.eq.s32.totalorder %v1548_v30, %v5109_v7  ;;  %v7328_v57 = vpop.permute.xlu1 %2477  ;;  %v1347_v49 = vsel %vm1337_vm14, %v10639_v0, %v1275_v32  ;;  %v573_v60 = vsel %vm561_vm0, %v10648_v3, 0.0  ;;  %v10659_v30 = vld [vmem:[#allocation332_spill] sm:$0xff]  ;;  %vm653_vm13 = vcmp.eq.s32.totalorder %v10664_v62, %v5109_v7  ;;  %v10665_v0 = vld [vmem:[#allocation190_spill] sm:$0xff]  ;;  %v10675_v3 = vld [vmem:[#allocation143_spill] sm:$0xff] }
 0x625   : > { %v7336_v2 = vsel %vm1552_vm15, %v10640_v9, %v1490_v37  ;;  %2689 = vperm.xlu1 %4634, %v7338_v10   ;;  %v1419_v18 = vsel %vm1409_vm1, %v10643_v16, %v1347_v49  ;;  %v645_v20 = vsel %vm635_vm2, %v10650_v22, %v573_v60  ;;  %vm1067_vm10 = vcmp.eq.s32.totalorder %v10659_v30, %v5109_v7  ;;  %v10666_v49 = vld [vmem:[#allocation107_spill] sm:$0xff]  ;;  %v10667_v9 = vld [vmem:[#allocation377_spill] sm:$0xff]  ;;  %v10677_v22 = vld [vmem:[#allocation10_spill] sm:$0xff] }
 0x626   : > { %4789 = vset.pattern.permute.xlu0 %v10644_v33  ;;  %v1491_v47 = vsel %vm1481_vm3, %v10647_v56, %v1419_v18  ;;  %v717_v31 = vsel %vm707_vm4, %v10652_v42, %v645_v20  ;;  %v10663_v37 = vmov 119   ;;  %vm580_vm14 = vcmp.eq.s32.totalorder %v10665_v0, %v5109_v7  ;;  %v10669_v16 = vld [vmem:[#allocation209_spill] sm:$0xff]  ;;  %v10679_v42 = vld [vmem:[#allocation162_spill] sm:$0xff]  ;;  %v10684_v30 = vld [vmem:[#allocation468_spill] sm:$0xff] }
 0x627   : > { %v1560_v59 = vpop.permute.xlu0 %1559  ;;  %4045 = vperm.xlu0 %4789, %v7346_v39   ;;  %v789_v29 = vsel %vm779_vm6, %v10654_v40, %v717_v31  ;;  %vm1211_vm15 = vcmp.eq.s32.totalorder %v10667_v9, %v5109_v7  ;;  %vm725_vm0 = vcmp.eq.s32.totalorder %v10668_v55, %v5109_v7  ;;  %vm652_vm1 = vcmp.eq.s32.totalorder %v10669_v16, %v5109_v7  ;;  %v10670_v18 = vld [vmem:[#allocation125_spill] sm:$0xff]  ;;  %v10681_v40 = vld [vmem:[#allocation26_spill] sm:$0xff]  ;;  %v10689_v9 = vld [vmem:[#allocation211_spill] sm:$0xff] }
 0x628   : > { %v7361_v53 = vsel %vm1553_vm5, %v1560_v59, %v1491_v47  ;;  %v861_v54 = vsel %vm851_vm7, %v10658_v50, %v789_v29  ;;  %vm1283_vm2 = vcmp.eq.s32.totalorder %v10671_v45, %v5109_v7  ;;  %v10673_v47 = vld [vmem:[#allocation57_spill] sm:$0xff]  ;;  %vm1355_vm5 = vcmp.eq.s32.totalorder %v10676_v13, %v5109_v7  ;;  %v10683_v50 = vld [vmem:[#allocation180_spill] sm:$0xff]  ;;  %v10691_v45 = vld [vmem:[#allocation314_spill] sm:$0xff] }
 0x629   : > { %2693 = vperm.xlu1 %4634, %v7366_v61   ;;  %v7369_v15 = vpop.permute.xlu1 %2486  ;;  %v933_v32 = vsel %vm923_vm8, %v10661_v48, %v861_v54  ;;  %vm797_vm3 = vcmp.eq.s32.totalorder %v10673_v47, %v5109_v7  ;;  %v10674_v59 = vld [vmem:[#allocation229_spill] sm:$0xff]  ;;  %v590_v20 = vsel %vm580_vm14, %v10677_v22, 0.0  ;;  %vm796_vm6 = vcmp.eq.s32.totalorder %v10678_v24, %v5109_v7  ;;  %v10685_v48 = vld [vmem:[#allocation191_spill] sm:$0xff]  ;;  %v10694_v22 = vld [vmem:[#allocation336_spill] sm:$0xff] }
 0x62a   : > { %vm724_vm4 = vcmp.eq.s32.totalorder %v10674_v59, %v5109_v7  ;;  %vm1427_vm7 = vcmp.eq.s32.totalorder %v10680_v19, %v5109_v7  ;;  %v662_v29 = vsel %vm652_vm1, %v10681_v40, %v590_v20  ;;  %vm868_vm8 = vcmp.eq.s32.totalorder %v10682_v14, %v5109_v7  ;;  %v10687_v0 = vld [vmem:[#allocation293_spill] sm:$0xff]  ;;  %v10692_v59 = vld [vmem:[#allocation216_spill] sm:$0xff]  ;;  %v10696_v62 = vld [vmem:[#allocation231_spill] sm:$0xff] }
 0x62b   : > { %v7377_v21 = vpop.permute.xlu0 %3857  ;;  %4790 = vset.pattern.permute.xlu0 %v10657_v12  ;;  %v10695_v20 = vld [vmem:[#allocation232_spill] sm:$0xff]  ;;  %v10698_v40 = vld [vmem:[#allocation358_spill] sm:$0xff]  ;;  %v10771_v12 = vmov 6   ;;  %v10775_v33 = vmov 7  }
 0x62c   : > { %10656 = vst [vmem:[#allocation369_spill] sm:$0xff] %v7377_v21  ;;  %4055 = vperm.xlu0 %4790, %v6635_v26   ;;  %v1005_v26 = vsel %vm995_vm9, %v10666_v49, %v933_v32  ;;  %vm1499_vm9 = vcmp.eq.s32.totalorder %v10684_v30, %v5109_v7  ;;  %v591_v32 = vsel %vm581_vm11, %v10685_v48, 0.0  ;;  %v10688_v49 = vld [vmem:[#allocation198_spill] sm:$0xff]  ;;  %vm1084_vm11 = vcmp.eq.s32.totalorder %v10694_v22, %v5109_v7  ;;  %v10702_v48 = vld [vmem:[#allocation251_spill] sm:$0xff]  ;;  %v10715_v22 = vld [vmem:[#allocation316_spill] sm:$0xff] }
 0x62d   : > { %4637 = vset.pattern.permute.xlu1 %v10663_v37  ;;  %v7390_v28 = vpop.permute.xlu1 %2491  ;;  %v1077_v11 = vsel %vm1067_vm10, %v10670_v18, %v1005_v26  ;;  %v734_v37 = vsel %vm724_vm4, %v10686_v27, %v662_v29  ;;  %vm940_vm10 = vcmp.eq.s32.totalorder %v10687_v0, %v5109_v7  ;;  %v663_v16 = vsel %vm653_vm13, %v10689_v9, %v591_v32  ;;  %v10690_v18 = vld [vmem:[#allocation59_spill] sm:$0xff]  ;;  %v10699_v29 = vld [vmem:[#allocation248_spill] sm:$0xff]  ;;  %v10701_v30 = vld [vmem:[#allocation74_spill] sm:$0xff] }
 0x62e   : > { %2702 = vperm.xlu1 %4637, %v7399_v51   ;;  %v1149_v60 = vsel %vm1139_vm12, %v10675_v3, %v1077_v11  ;;  %v806_v11 = vsel %vm796_vm6, %v10690_v18, %v734_v37  ;;  %vm1012_vm12 = vcmp.eq.s32.totalorder %v10691_v45, %v5109_v7  ;;  %vm1156_vm13 = vcmp.eq.s32.totalorder %v10698_v40, %v5109_v7  ;;  %v10703_v32 = vld [vmem:[#allocation110_spill] sm:$0xff]  ;;  %v10704_v37 = vld [vmem:[#allocation381_spill] sm:$0xff]  ;;  %v10711_v45 = vld [vmem:[#allocation295_spill] sm:$0xff] }
 0x62f   : > { %v7409_v56 = vpop.permute.xlu0 %3869  ;;  %v1221_v31 = vsel %vm1211_vm15, %v10679_v42, %v1149_v60  ;;  %v10693_v60 = vld [vmem:[#allocation76_spill] sm:$0xff]  ;;  %v735_v42 = vsel %vm725_vm0, %v10696_v62, %v663_v16  ;;  %vm869_vm15 = vcmp.eq.s32.totalorder %v10701_v30, %v5109_v7  ;;  %vm1228_vm0 = vcmp.eq.s32.totalorder %v10704_v37, %v5109_v7  ;;  %v10705_v0 = vld [vmem:[#allocation90_spill] sm:$0xff]  ;;  %v10707_v9 = vld [vmem:[#allocation129_spill] sm:$0xff] }
 0x630   : > { %10672 = vst [vmem:[#allocation99_spill] sm:$0xff] %v7409_v56  ;;  %4067 = vperm.xlu0 %4790, %v6643_v23   ;;  %v1293_v54 = vsel %vm1283_vm2, %v10683_v50, %v1221_v31  ;;  %v878_v13 = vsel %vm868_vm8, %v10693_v60, %v806_v11  ;;  %v10697_v31 = vld [vmem:[#allocation92_spill] sm:$0xff]  ;;  %v10700_v50 = vmov 120   ;;  %v807_v55 = vsel %vm797_vm3, %v10702_v48, %v735_v42  ;;  %v10710_v11 = vld [vmem:[#allocation109_spill] sm:$0xff]  ;;  %v10713_v60 = vld [vmem:[#allocation427_spill] sm:$0xff] }
 0x631   : > { %v1365_v26 = vsel %vm1355_vm5, %v10688_v49, %v1293_v54  ;;  %v950_v19 = vsel %vm940_vm10, %v10697_v31, %v878_v13  ;;  %vm941_vm1 = vcmp.eq.s32.totalorder %v10705_v0, %v5109_v7  ;;  %v10706_v49 = vld [vmem:[#allocation273_spill] sm:$0xff]  ;;  %v10708_v16 = vld [vmem:[#allocation404_spill] sm:$0xff]  ;;  %vm1013_vm3 = vcmp.eq.s32.totalorder %v10710_v11, %v5109_v7  ;;  %v10714_v13 = vld [vmem:[#allocation127_spill] sm:$0xff] }
 0x632   : > { %2707 = vperm.xlu1 %4637, %v7338_v10   ;;  %v7435_v23 = vpop.permute.xlu1 %2501  ;;  %v1437_v44 = vsel %vm1427_vm7, %v10692_v59, %v1365_v26  ;;  %v1022_v27 = vsel %vm1012_vm12, %v10703_v32, %v950_v19  ;;  %v879_v26 = vsel %vm869_vm15, %v10706_v49, %v807_v55  ;;  %vm1300_vm2 = vcmp.eq.s32.totalorder %v10708_v16, %v5109_v7  ;;  %v10717_v42 = vld [vmem:[#allocation449_spill] sm:$0xff]  ;;  %v10719_v40 = vld [vmem:[#allocation338_spill] sm:$0xff]  ;;  %v10721_v48 = vld [vmem:[#allocation164_spill] sm:$0xff] }
 0x633   : > { %v1509_v24 = vsel %vm1499_vm9, %v10695_v20, %v1437_v44  ;;  %v1094_v47 = vsel %vm1084_vm11, %v10707_v9, %v1022_v27  ;;  %v951_v59 = vsel %vm941_vm1, %v10711_v45, %v879_v26  ;;  %v10712_v44 = vld [vmem:[#allocation147_spill] sm:$0xff]  ;;  %vm1372_vm4 = vcmp.eq.s32.totalorder %v10713_v60, %v5109_v7  ;;  %v10718_v19 = vld [vmem:[#allocation145_spill] sm:$0xff]  ;;  %v10722_v55 = vld [vmem:[#allocation360_spill] sm:$0xff] }
 0x634   : > { %v1569_v3 = vpop.permute.xlu0 %1568  ;;  %4794 = vset.pattern.permute.xlu0 %v10627_v25  ;;  %vm1085_vm5 = vcmp.eq.s32.totalorder %v10714_v13, %v5109_v7  ;;  %v1023_v20 = vsel %vm1013_vm3, %v10715_v22, %v951_v59  ;;  %vm1444_vm6 = vcmp.eq.s32.totalorder %v10717_v42, %v5109_v7  ;;  %vm1157_vm7 = vcmp.eq.s32.totalorder %v10718_v19, %v5109_v7  ;;  %v10723_v27 = vld [vmem:[#allocation201_spill] sm:$0xff]  ;;  %v10724_v0 = vld [vmem:[#allocation182_spill] sm:$0xff]  ;;  %v10725_v49 = vld [vmem:[#allocation383_spill] sm:$0xff] }
 0x635   : > { %vm1571_vm14 = vcmp.eq.s32.totalorder %v1569_v3, %v5109_v7  ;;  %v1166_v3 = vsel %vm1156_vm13, %v10712_v44, %v1094_v47  ;;  %vm1516_vm8 = vcmp.eq.s32.totalorder %v7141_v58, %v5109_v7  ;;  %vm1229_vm9 = vcmp.eq.s32.totalorder %v10721_v48, %v5109_v7  ;;  %v10726_v9 = vld [vmem:[#allocation219_spill] sm:$0xff]  ;;  %v10727_v11 = vld [vmem:[#allocation200_spill] sm:$0xff]  ;;  %v10728_v58 = vld [vmem:[#allocation406_spill] sm:$0xff] }
 0x636   : > { %v7467_v14 = vsel %vm1571_vm14, %v10699_v29, %v1509_v24  ;;  %4638 = vset.pattern.permute.xlu1 %v10700_v50  ;;  %v7470_v54 = vpop.permute.xlu1 %2509  ;;  %v10716_v24 = vld [vmem:[#allocation166_spill] sm:$0xff]  ;;  %v1095_v29 = vsel %vm1085_vm5, %v10719_v40, %v1023_v20  ;;  %v10720_v50 = vld [vmem:[#allocation184_spill] sm:$0xff]  ;;  %vm1301_vm10 = vcmp.eq.s32.totalorder %v10724_v0, %v5109_v7  ;;  %vm1373_vm12 = vcmp.eq.s32.totalorder %v10727_v11, %v5109_v7  ;;  %v10734_v42 = vld [vmem:[#allocation451_spill] sm:$0xff] }
 0x637   : > { %2717 = vperm.xlu1 %4638, %v7310_v38   ;;  %v1238_v62 = vsel %vm1228_vm0, %v10716_v24, %v1166_v3  ;;  %v1167_v32 = vsel %vm1157_vm7, %v10722_v55, %v1095_v29  ;;  %v10729_v59 = vld [vmem:[#allocation236_spill] sm:$0xff]  ;;  %v10730_v3 = vld [vmem:[#allocation217_spill] sm:$0xff]  ;;  %v10735_v40 = vld [vmem:[#allocation250_spill] sm:$0xff]  ;;  %v10736_v48 = vmov 121  }
 0x638   : > { %v7494_v18 = vpop.permute.xlu0 %3878  ;;  %v1310_v30 = vsel %vm1300_vm2, %v10720_v50, %v1238_v62  ;;  %v1239_v26 = vsel %vm1229_vm9, %v10725_v49, %v1167_v32  ;;  %vm1445_vm14 = vcmp.eq.s32.totalorder %v10730_v3, %v5109_v7  ;;  %v10731_v60 = vld [vmem:[#allocation428_spill] sm:$0xff]  ;;  %v10733_v62 = vld [vmem:[#allocation234_spill] sm:$0xff]  ;;  %vm1589_vm15 = vcmp.eq.s32.totalorder %v10735_v40, %v5109_v7 }
 0x639   : > { %10709 = vst [vmem:[#allocation261_spill] sm:$0xff] %v7494_v18  ;;  %v1382_v37 = vsel %vm1372_vm4, %v10723_v27, %v1310_v30  ;;  %v1311_v45 = vsel %vm1301_vm10, %v10728_v58, %v1239_v26  ;;  %v10732_v22 = vld [vmem:[#allocation252_spill] sm:$0xff]  ;;  %vm1517_vm13 = vcmp.eq.s32.totalorder %v10733_v62, %v5109_v7  ;;  %v10737_v27 = vmov 122  }
 0x63a   : > { %v7511_v31 = vpop.permute.xlu1 %2513  ;;  %v1454_v47 = vsel %vm1444_vm6, %v10726_v9, %v1382_v37  ;;  %v1383_v13 = vsel %vm1373_vm12, %v10731_v60, %v1311_v45  ;;  %v10739_v49 = vmov 123   ;;  %v10742_v45 = vmov 125  }
 0x63b   : > { %2725 = vperm.xlu1 %4638, %v7338_v10   ;;  %v1526_v44 = vsel %vm1516_vm8, %v10729_v59, %v1454_v47  ;;  %v1455_v19 = vsel %vm1445_vm14, %v10734_v42, %v1383_v13  ;;  %v10741_v47 = vmov 124   ;;  %v10744_v3 = vmov 126  }
 0x63c   : > { %v1527_v29 = vsel %vm1517_vm13, %v7153_v4, %v1455_v19  ;;  %v10747_v62 = vmov 127   ;;  %v10750_v40 = vmov 0   ;;  %v10764_v18 = vmov 4  }
 0x63d   : > { %v1584_v16 = vpop.permute.xlu0 %1583 }
 0x63e   : > { %vm1588_vm11 = vcmp.eq.s32.totalorder %v1584_v16, %v5109_v7 }
 0x63f   : > { %v7537_v20 = vsel %vm1588_vm11, %v10732_v22, %v1526_v44  ;;  %2729 = vperm.xlu1 %4638, %v7366_v61   ;;  %v7540_v24 = vpop.permute.xlu1 %2522 }
 0x641   : > { %v1596_v50 = vpop.permute.xlu0 %1595 }
 0x642   : > { %v7548_v30 = vsel %vm1589_vm15, %v1596_v50, %v1527_v29  ;;  %v7611_v29 = vld [vmem:[#allocation3 + $0x10] sm:$0xff]  ;;  %v7617_v50 = vld [vmem:[#allocation2 + $0x18] sm:$0x3] }
 0x643   : > { %4641 = vset.pattern.permute.xlu1 %v10736_v48  ;;  %v7551_v55 = vpop.permute.xlu1 %2527 }
 0x644   : > { %2738 = vperm.xlu1 %4641, %v7399_v51  }
 0x648   : > { %2743 = vperm.xlu1 %4641, %v7338_v10   ;;  %v7555_v32 = vpop.permute.xlu1 %2537 }
 0x64c   : > { %4642 = vset.pattern.permute.xlu1 %v10737_v27  ;;  %v7558_v37 = vpop.permute.xlu1 %2545  ;;  %v7625_v27 = vld [vmem:[#allocation3 + $0x18] sm:$0x3] }
 0x64d   : > { %2753 = vperm.xlu1 %4642, %v7310_v38  }
 0x650   : > { %v7561_v4 = vpop.permute.xlu1 %2549 }
 0x651   : > { %10738 = vst [vmem:[#allocation119_spill] sm:$0xff] %v7561_v4  ;;  %2761 = vperm.xlu1 %4642, %v7338_v10  }
 0x655   : > { %2765 = vperm.xlu1 %4642, %v7366_v61   ;;  %v7565_v0 = vpop.permute.xlu1 %2558 }
 0x659   : > { %4645 = vset.pattern.permute.xlu1 %v10739_v49  ;;  %v7568_v26 = vpop.permute.xlu1 %2563 }
 0x65a   : > { %10740 = vst [vmem:[#allocation392_spill] sm:$0xff] %v7568_v26  ;;  %2774 = vperm.xlu1 %4645, %v7399_v51   ;;  %v11034_v26 = vld [vmem:[#allocation290_spill] sm:$0xff] }
 0x65e   : > { %2779 = vperm.xlu1 %4645, %v7338_v10   ;;  %v7572_v9 = vpop.permute.xlu1 %2573 }
 0x662   : > { %4646 = vset.pattern.permute.xlu1 %v10741_v47  ;;  %v7575_v16 = vpop.permute.xlu1 %2581  ;;  %v10757_v47 = vmov 2  }
 0x663   : > { %2789 = vperm.xlu1 %4646, %v7310_v38  }
 0x666   : > { %v7578_v11 = vpop.permute.xlu1 %2585 }
 0x667   : > { %2797 = vperm.xlu1 %4646, %v7338_v10  }
 0x66b   : > { %2801 = vperm.xlu1 %4646, %v7366_v61   ;;  %v7582_v58 = vpop.permute.xlu1 %2594 }
 0x66f   : > { %4649 = vset.pattern.permute.xlu1 %v10742_v45  ;;  %v7585_v59 = vpop.permute.xlu1 %2599 }
 0x670   : > { %10743 = vst [vmem:[#allocation117_spill] sm:$0xff] %v7585_v59  ;;  %2810 = vperm.xlu1 %4649, %v7399_v51   ;;  %v11035_v59 = vld [vmem:[#allocation270_spill] sm:$0xff] }
 0x674   : > { %2815 = vperm.xlu1 %4649, %v7338_v10   ;;  %v7589_v44 = vpop.permute.xlu1 %2609 }
 0x678   : > { %4650 = vset.pattern.permute.xlu1 %v10744_v3  ;;  %v7592_v60 = vpop.permute.xlu1 %2617 }
 0x679   : > { %2825 = vperm.xlu1 %4650, %v7310_v38  }
 0x67c   : > { %v7595_v13 = vpop.permute.xlu1 %2621 }
 0x67d   : > { %10745 = vst [vmem:[#allocation283_spill] sm:$0xff] %v7595_v13  ;;  %2833 = vperm.xlu1 %4650, %v7338_v10   ;;  %v10979_v13 = vld [vmem:[#allocation113_spill] sm:$0xff] }
 0x67e   : > { %vm1030_vm15 = vcmp.eq.s32.totalorder %v10979_v13, %v5109_v7  ;;  %v10986_v13 = vld [vmem:[#allocation160_spill] sm:$0xff] }
 0x681   : > { %2837 = vperm.xlu1 %4650, %v7366_v61   ;;  %v7599_v22 = vpop.permute.xlu1 %2630 }
 0x682   : > { %10746 = vst [vmem:[#allocation138_spill] sm:$0xff] %v7599_v22  ;;  %v11033_v22 = vld [vmem:[#allocation282_spill] sm:$0xff] }
 0x685   : > { %4653 = vset.pattern.permute.xlu1 %v10747_v62  ;;  %v7602_v42 = vpop.permute.xlu1 %2635 }
 0x686   : > { %10748 = vst [vmem:[#allocation415_spill] sm:$0xff] %v7602_v42  ;;  %2846 = vperm.xlu1 %4653, %v7399_v51   ;;  %v10952_v42 = vld [vmem:[#allocation70_spill] sm:$0xff] }
 0x68a   : > { %2851 = vperm.xlu1 %4653, %v7338_v10   ;;  %v7606_v19 = vpop.permute.xlu1 %2645  ;;  %v10754_v10 = vmov 1  }
 0x68b   : > { %10749 = vst [vmem:[#allocation136_spill] sm:$0xff] %v7606_v19  ;;  %v11026_v19 = vld [vmem:[#allocation278_spill] sm:$0xff] }
 0x68e   : > { %4655 = vset.pattern.permute.xlu1 %v10750_v40  ;;  %v7609_v38 = vpop.permute.xlu1 %2653  ;;  %v10761_v40 = vmov 3  }
 0x68f   : > { %10751 = vst [vmem:[#allocation304_spill] sm:$0xff] %v7609_v38  ;;  %2865 = vperm.xlu1 %4655, %v7611_v29  }
 0x692   : > { %v7614_v61 = vpop.permute.xlu1 %2657 }
 0x693   : > { %10752 = vst [vmem:[#allocation156_spill] sm:$0xff] %v7614_v61  ;;  %2874 = vperm.xlu1 %4655, %v7346_v39   ;;  %v11038_v61 = vld [vmem:[#allocation257_spill] sm:$0xff] }
 0x697   : > { %2879 = vperm.xlu1 %4655, %v7617_v50   ;;  %v7620_v51 = vpop.permute.xlu1 %2666 }
 0x698   : > { %10753 = vst [vmem:[#allocation437_spill] sm:$0xff] %v7620_v51 }
 0x69b   : > { %4657 = vset.pattern.permute.xlu1 %v10754_v10  ;;  %v7623_v48 = vpop.permute.xlu1 %2671 }
 0x69c   : > { %10755 = vst [vmem:[#allocation326_spill] sm:$0xff] %v7623_v48  ;;  %2888 = vperm.xlu1 %4657, %v7625_v27  }
 0x6a0   : > { %2893 = vperm.xlu1 %4657, %v7346_v39   ;;  %v7629_v49 = vpop.permute.xlu1 %2681 }
 0x6a1   : > { %10756 = vst [vmem:[#allocation174_spill] sm:$0xff] %v7629_v49 }
 0x6a4   : > { %4659 = vset.pattern.permute.xlu1 %v10757_v47  ;;  %v7632_v45 = vpop.permute.xlu1 %2689 }
 0x6a5   : > { %10758 = vst [vmem:[#allocation460_spill] sm:$0xff] %v7632_v45  ;;  %2903 = vperm.xlu1 %4659, %v7611_v29  }
 0x6a8   : > { %v7635_v3 = vpop.permute.xlu1 %2693 }
 0x6a9   : > { %10759 = vst [vmem:[#allocation154_spill] sm:$0xff] %v7635_v3  ;;  %2911 = vperm.xlu1 %4659, %v7346_v39   ;;  %v8011_v3 = vpop.permute.xlu0 %3893 }
 0x6aa   : > { %10914 = vst [vmem:[#allocation483_spill] sm:$0xff] %v8011_v3  ;;  %v10920_v3 = vmov 48  }
 0x6ad   : > { %2915 = vperm.xlu1 %4659, %v7617_v50   ;;  %v7639_v62 = vpop.permute.xlu1 %2702 }
 0x6ae   : > { %10760 = vst [vmem:[#allocation348_spill] sm:$0xff] %v7639_v62 }
 0x6b1   : > { %4661 = vset.pattern.permute.xlu1 %v10761_v40  ;;  %v7642_v10 = vpop.permute.xlu1 %2707 }
 0x6b2   : > { %10762 = vst [vmem:[#allocation193_spill] sm:$0xff] %v7642_v10  ;;  %2924 = vperm.xlu1 %4661, %v7625_v27  }
 0x6b6   : > { %2929 = vperm.xlu1 %4661, %v7346_v39   ;;  %v7646_v47 = vpop.permute.xlu1 %2717 }
 0x6b7   : > { %10763 = vst [vmem:[#allocation173_spill] sm:$0xff] %v7646_v47 }
 0x6ba   : > { %4663 = vset.pattern.permute.xlu1 %v10764_v18  ;;  %v7649_v56 = vpop.permute.xlu1 %2725 }
 0x6bb   : > { %10765 = vst [vmem:[#allocation371_spill] sm:$0xff] %v7649_v56  ;;  %2939 = vperm.xlu1 %4663, %v7611_v29  }
 0x6be   : > { %v7652_v21 = vpop.permute.xlu1 %2729 }
 0x6bf   : > { %10766 = vst [vmem:[#allocation210_spill] sm:$0xff] %v7652_v21  ;;  %2947 = vperm.xlu1 %4663, %v7346_v39   ;;  %v10992_v21 = vld [vmem:[#allocation187_spill] sm:$0xff] }
 0x6c3   : > { %2951 = vperm.xlu1 %4663, %v7617_v50   ;;  %v7656_v40 = vpop.permute.xlu1 %2738 }
 0x6c4   : > { %10767 = vst [vmem:[#allocation192_spill] sm:$0xff] %v7656_v40 }
 0x6c7   : > { %4665 = vset.pattern.permute.xlu1 %v10768_v5  ;;  %v7659_v25 = vpop.permute.xlu1 %2743 }
 0x6c8   : > { %10769 = vst [vmem:[#allocation394_spill] sm:$0xff] %v7659_v25  ;;  %2960 = vperm.xlu1 %4665, %v7625_v27  }
 0x6cc   : > { %2965 = vperm.xlu1 %4665, %v7346_v39   ;;  %v7663_v18 = vpop.permute.xlu1 %2753 }
 0x6cd   : > { %10770 = vst [vmem:[#allocation226_spill] sm:$0xff] %v7663_v18 }
 0x6d0   : > { %4667 = vset.pattern.permute.xlu1 %v10771_v12  ;;  %v7666_v46 = vpop.permute.xlu1 %2761 }
 0x6d1   : > { %10772 = vst [vmem:[#allocation186_spill] sm:$0xff] %v7666_v46  ;;  %2975 = vperm.xlu1 %4667, %v7611_v29  }
 0x6d4   : > { %v7669_v35 = vpop.permute.xlu1 %2765 }
 0x6d5   : > { %10773 = vst [vmem:[#allocation208_spill] sm:$0xff] %v7669_v35  ;;  %2983 = vperm.xlu1 %4667, %v7346_v39  }
 0x6d9   : > { %2987 = vperm.xlu1 %4667, %v7617_v50   ;;  %v7673_v5 = vpop.permute.xlu1 %2774 }
 0x6da   : > { %10774 = vst [vmem:[#allocation417_spill] sm:$0xff] %v7673_v5 }
 0x6dd   : > { %4669 = vset.pattern.permute.xlu1 %v10775_v33  ;;  %v7676_v17 = vpop.permute.xlu1 %2779 }
 0x6de   : > { %10776 = vst [vmem:[#allocation242_spill] sm:$0xff] %v7676_v17  ;;  %2996 = vperm.xlu1 %4669, %v7625_v27   ;;  %v10782_v17 = vmov 9  }
 0x6e2   : > { %3001 = vperm.xlu1 %4669, %v7346_v39   ;;  %v7680_v12 = vpop.permute.xlu1 %2789 }
 0x6e3   : > { %10777 = vst [vmem:[#allocation206_spill] sm:$0xff] %v7680_v12 }
 0x6e6   : > { %4671 = vset.pattern.permute.xlu1 %v10778_v1  ;;  %v7683_v56 = vpop.permute.xlu1 %2797 }
 0x6e7   : > { %10779 = vst [vmem:[#allocation224_spill] sm:$0xff] %v7683_v56  ;;  %3011 = vperm.xlu1 %4671, %v7611_v29   ;;  %v10785_v56 = vmov 10  }
 0x6ea   : > { %v7686_v47 = vpop.permute.xlu1 %2801 }
 0x6eb   : > { %10780 = vst [vmem:[#allocation439_spill] sm:$0xff] %v7686_v47  ;;  %3019 = vperm.xlu1 %4671, %v7346_v39   ;;  %v10953_v47 = vmov 53  }
 0x6ef   : > { %3023 = vperm.xlu1 %4671, %v7617_v50   ;;  %v7690_v33 = vpop.permute.xlu1 %2810 }
 0x6f0   : > { %10781 = vst [vmem:[#allocation225_spill] sm:$0xff] %v7690_v33 }
 0x6f3   : > { %4673 = vset.pattern.permute.xlu1 %v10782_v17  ;;  %v7693_v35 = vpop.permute.xlu1 %2815 }
 0x6f4   : > { %10783 = vst [vmem:[#allocation240_spill] sm:$0xff] %v7693_v35  ;;  %3032 = vperm.xlu1 %4673, %v7625_v27   ;;  %v10789_v35 = vmov 11  }
 0x6f8   : > { %3037 = vperm.xlu1 %4673, %v7346_v39   ;;  %v7697_v1 = vpop.permute.xlu1 %2825 }
 0x6f9   : > { %10784 = vst [vmem:[#allocation462_spill] sm:$0xff] %v7697_v1 }
 0x6fc   : > { %4675 = vset.pattern.permute.xlu1 %v10785_v56  ;;  %v7700_v12 = vpop.permute.xlu1 %2833 }
 0x6fd   : > { %10786 = vst [vmem:[#allocation6_spill] sm:$0xff] %v7700_v12  ;;  %3047 = vperm.xlu1 %4675, %v7611_v29   ;;  %v10792_v12 = vmov 12  }
 0x700   : > { %v7703_v46 = vpop.permute.xlu1 %2837 }
 0x701   : > { %10787 = vst [vmem:[#allocation245_spill] sm:$0xff] %v7703_v46  ;;  %3055 = vperm.xlu1 %4675, %v7346_v39  }
 0x705   : > { %3059 = vperm.xlu1 %4675, %v7617_v50   ;;  %v7707_v17 = vpop.permute.xlu1 %2846 }
 0x706   : > { %10788 = vst [vmem:[#allocation22_spill] sm:$0xff] %v7707_v17 }
 0x709   : > { %4677 = vset.pattern.permute.xlu1 %v10789_v35  ;;  %v7710_v5 = vpop.permute.xlu1 %2851 }
 0x70a   : > { %10790 = vst [vmem:[#allocation267_spill] sm:$0xff] %v7710_v5  ;;  %3068 = vperm.xlu1 %4677, %v7625_v27   ;;  %v10796_v5 = vmov 13  }
 0x70e   : > { %3073 = vperm.xlu1 %4677, %v7346_v39   ;;  %v7714_v56 = vpop.permute.xlu1 %2865 }
 0x70f   : > { %10791 = vst [vmem:[#allocation39_spill] sm:$0xff] %v7714_v56 }
 0x712   : > { %4679 = vset.pattern.permute.xlu1 %v10792_v12  ;;  %v7717_v1 = vpop.permute.xlu1 %2874 }
 0x713   : > { %10793 = vst [vmem:[#allocation289_spill] sm:$0xff] %v7717_v1  ;;  %3083 = vperm.xlu1 %4679, %v7611_v29   ;;  %v10799_v1 = vmov 14  }
 0x716   : > { %v7720_v46 = vpop.permute.xlu1 %2879 }
 0x717   : > { %10794 = vst [vmem:[#allocation55_spill] sm:$0xff] %v7720_v46  ;;  %3091 = vperm.xlu1 %4679, %v7346_v39  }
 0x71b   : > { %3095 = vperm.xlu1 %4679, %v7617_v50   ;;  %v7724_v35 = vpop.permute.xlu1 %2888 }
 0x71c   : > { %10795 = vst [vmem:[#allocation310_spill] sm:$0xff] %v7724_v35 }
 0x71f   : > { %4681 = vset.pattern.permute.xlu1 %v10796_v5  ;;  %v7727_v17 = vpop.permute.xlu1 %2893 }
 0x720   : > { %10797 = vst [vmem:[#allocation72_spill] sm:$0xff] %v7727_v17  ;;  %3104 = vperm.xlu1 %4681, %v7625_v27   ;;  %v10803_v17 = vmov 15  }
 0x724   : > { %3109 = vperm.xlu1 %4681, %v7346_v39   ;;  %v7731_v12 = vpop.permute.xlu1 %2903 }
 0x725   : > { %10798 = vst [vmem:[#allocation332_spill] sm:$0xff] %v7731_v12 }
 0x728   : > { %4683 = vset.pattern.permute.xlu1 %v10799_v1  ;;  %v7734_v56 = vpop.permute.xlu1 %2911 }
 0x729   : > { %10800 = vst [vmem:[#allocation8_spill] sm:$0xff] %v7734_v56  ;;  %3119 = vperm.xlu1 %4683, %v7611_v29   ;;  %v10806_v56 = vmov 16  }
 0x72c   : > { %v7737_v18 = vpop.permute.xlu1 %2915 }
 0x72d   : > { %10801 = vst [vmem:[#allocation88_spill] sm:$0xff] %v7737_v18  ;;  %3127 = vperm.xlu1 %4683, %v7346_v39  }
 0x731   : > { %3131 = vperm.xlu1 %4683, %v7617_v50   ;;  %v7741_v5 = vpop.permute.xlu1 %2924 }
 0x732   : > { %10802 = vst [vmem:[#allocation354_spill] sm:$0xff] %v7741_v5 }
 0x735   : > { %4685 = vset.pattern.permute.xlu1 %v10803_v17  ;;  %v7744_v25 = vpop.permute.xlu1 %2929 }
 0x736   : > { %10804 = vst [vmem:[#allocation24_spill] sm:$0xff] %v7744_v25  ;;  %3140 = vperm.xlu1 %4685, %v7625_v27   ;;  %v10810_v25 = vmov 17  }
 0x73a   : > { %3145 = vperm.xlu1 %4685, %v7346_v39   ;;  %v7748_v1 = vpop.permute.xlu1 %2939 }
 0x73b   : > { %10805 = vst [vmem:[#allocation190_spill] sm:$0xff] %v7748_v1 }
 0x73e   : > { %4687 = vset.pattern.permute.xlu1 %v10806_v56  ;;  %v7751_v12 = vpop.permute.xlu1 %2947 }
 0x73f   : > { %10807 = vst [vmem:[#allocation107_spill] sm:$0xff] %v7751_v12  ;;  %3155 = vperm.xlu1 %4687, %v7611_v29   ;;  %v10813_v12 = vmov 18  }
 0x742   : > { %v7754_v18 = vpop.permute.xlu1 %2951 }
 0x743   : > { %10808 = vst [vmem:[#allocation377_spill] sm:$0xff] %v7754_v18  ;;  %3163 = vperm.xlu1 %4687, %v7346_v39   ;;  %v10939_v18 = vmov 52  }
 0x747   : > { %3167 = vperm.xlu1 %4687, %v7617_v50   ;;  %v7758_v17 = vpop.permute.xlu1 %2960 }
 0x748   : > { %10809 = vst [vmem:[#allocation41_spill] sm:$0xff] %v7758_v17 }
 0x74b   : > { %4689 = vset.pattern.permute.xlu1 %v10810_v25  ;;  %v7761_v5 = vpop.permute.xlu1 %2965 }
 0x74c   : > { %10811 = vst [vmem:[#allocation209_spill] sm:$0xff] %v7761_v5  ;;  %3176 = vperm.xlu1 %4689, %v7625_v27   ;;  %v10817_v5 = vmov 19  }
 0x750   : > { %3181 = vperm.xlu1 %4689, %v7346_v39   ;;  %v7765_v56 = vpop.permute.xlu1 %2975 }
 0x751   : > { %10812 = vst [vmem:[#allocation125_spill] sm:$0xff] %v7765_v56 }
 0x754   : > { %4691 = vset.pattern.permute.xlu1 %v10813_v12  ;;  %v7768_v1 = vpop.permute.xlu1 %2983 }
 0x755   : > { %10814 = vst [vmem:[#allocation400_spill] sm:$0xff] %v7768_v1  ;;  %3191 = vperm.xlu1 %4691, %v7611_v29   ;;  %v10820_v1 = vmov 20  }
 0x758   : > { %v7771_v10 = vpop.permute.xlu1 %2987 }
 0x759   : > { %10815 = vst [vmem:[#allocation57_spill] sm:$0xff] %v7771_v10  ;;  %3199 = vperm.xlu1 %4691, %v7346_v39  }
 0x75d   : > { %3203 = vperm.xlu1 %4691, %v7617_v50   ;;  %v7775_v25 = vpop.permute.xlu1 %2996 }
 0x75e   : > { %10816 = vst [vmem:[#allocation229_spill] sm:$0xff] %v7775_v25 }
 0x761   : > { %4693 = vset.pattern.permute.xlu1 %v10817_v5  ;;  %v7778_v17 = vpop.permute.xlu1 %3001 }
 0x762   : > { %10818 = vst [vmem:[#allocation143_spill] sm:$0xff] %v7778_v17  ;;  %3212 = vperm.xlu1 %4693, %v7625_v27   ;;  %v10824_v17 = vmov 21  }
 0x766   : > { %3217 = vperm.xlu1 %4693, %v7346_v39   ;;  %v7782_v12 = vpop.permute.xlu1 %3011 }
 0x767   : > { %10819 = vst [vmem:[#allocation422_spill] sm:$0xff] %v7782_v12 }
 0x76a   : > { %4695 = vset.pattern.permute.xlu1 %v10820_v1  ;;  %v7785_v56 = vpop.permute.xlu1 %3019 }
 0x76b   : > { %10821 = vst [vmem:[#allocation10_spill] sm:$0xff] %v7785_v56  ;;  %3227 = vperm.xlu1 %4695, %v7611_v29   ;;  %v10827_v56 = vmov 22  }
 0x76e   : > { %v7788_v10 = vpop.permute.xlu1 %3023 }
 0x76f   : > { %10822 = vst [vmem:[#allocation249_spill] sm:$0xff] %v7788_v10  ;;  %3235 = vperm.xlu1 %4695, %v7346_v39  }
 0x773   : > { %3239 = vperm.xlu1 %4695, %v7617_v50   ;;  %v7792_v5 = vpop.permute.xlu1 %3032 }
 0x774   : > { %10823 = vst [vmem:[#allocation162_spill] sm:$0xff] %v7792_v5 }
 0x777   : > { %4697 = vset.pattern.permute.xlu1 %v10824_v17  ;;  %v7795_v25 = vpop.permute.xlu1 %3037 }
 0x778   : > { %10825 = vst [vmem:[#allocation445_spill] sm:$0xff] %v7795_v25  ;;  %3248 = vperm.xlu1 %4697, %v7625_v27   ;;  %v10831_v25 = vmov 23  }
 0x77c   : > { %3253 = vperm.xlu1 %4697, %v7346_v39   ;;  %v7799_v1 = vpop.permute.xlu1 %3047 }
 0x77d   : > { %10826 = vst [vmem:[#allocation26_spill] sm:$0xff] %v7799_v1 }
 0x780   : > { %4699 = vset.pattern.permute.xlu1 %v10827_v56  ;;  %v7802_v12 = vpop.permute.xlu1 %3055 }
 0x781   : > { %10828 = vst [vmem:[#allocation271_spill] sm:$0xff] %v7802_v12  ;;  %3263 = vperm.xlu1 %4699, %v7611_v29   ;;  %v10834_v12 = vmov 24  }
 0x784   : > { %v7805_v35 = vpop.permute.xlu1 %3059 }
 0x785   : > { %10829 = vst [vmem:[#allocation180_spill] sm:$0xff] %v7805_v35  ;;  %3271 = vperm.xlu1 %4699, %v7346_v39  }
 0x789   : > { %3275 = vperm.xlu1 %4699, %v7617_v50   ;;  %v7809_v17 = vpop.permute.xlu1 %3068 }
 0x78a   : > { %10830 = vst [vmem:[#allocation468_spill] sm:$0xff] %v7809_v17 }
 0x78d   : > { %4701 = vset.pattern.permute.xlu1 %v10831_v25  ;;  %v7812_v5 = vpop.permute.xlu1 %3073 }
 0x78e   : > { %10832 = vst [vmem:[#allocation191_spill] sm:$0xff] %v7812_v5  ;;  %3284 = vperm.xlu1 %4701, %v7625_v27   ;;  %v10838_v5 = vmov 25  }
 0x792   : > { %3289 = vperm.xlu1 %4701, %v7346_v39   ;;  %v7816_v56 = vpop.permute.xlu1 %3083 }
 0x793   : > { %10833 = vst [vmem:[#allocation43_spill] sm:$0xff] %v7816_v56 }
 0x796   : > { %4703 = vset.pattern.permute.xlu1 %v10834_v12  ;;  %v7819_v1 = vpop.permute.xlu1 %3091 }
 0x797   : > { %10835 = vst [vmem:[#allocation293_spill] sm:$0xff] %v7819_v1  ;;  %3299 = vperm.xlu1 %4703, %v7611_v29   ;;  %v10841_v1 = vmov 26  }
 0x79a   : > { %v7822_v35 = vpop.permute.xlu1 %3095 }
 0x79b   : > { %10836 = vst [vmem:[#allocation198_spill] sm:$0xff] %v7822_v35  ;;  %3307 = vperm.xlu1 %4703, %v7346_v39  }
 0x79f   : > { %3311 = vperm.xlu1 %4703, %v7617_v50   ;;  %v7826_v25 = vpop.permute.xlu1 %3104 }
 0x7a0   : > { %10837 = vst [vmem:[#allocation211_spill] sm:$0xff] %v7826_v25 }
 0x7a3   : > { %4705 = vset.pattern.permute.xlu1 %v10838_v5  ;;  %v7829_v17 = vpop.permute.xlu1 %3109 }
 0x7a4   : > { %10839 = vst [vmem:[#allocation59_spill] sm:$0xff] %v7829_v17  ;;  %3320 = vperm.xlu1 %4705, %v7625_v27   ;;  %v10845_v17 = vmov 27  }
 0x7a8   : > { %3325 = vperm.xlu1 %4705, %v7346_v39   ;;  %v7833_v12 = vpop.permute.xlu1 %3119 }
 0x7a9   : > { %10840 = vst [vmem:[#allocation314_spill] sm:$0xff] %v7833_v12 }
 0x7ac   : > { %4707 = vset.pattern.permute.xlu1 %v10841_v1  ;;  %v7836_v56 = vpop.permute.xlu1 %3127 }
 0x7ad   : > { %10842 = vst [vmem:[#allocation216_spill] sm:$0xff] %v7836_v56  ;;  %3335 = vperm.xlu1 %4707, %v7611_v29   ;;  %v10848_v56 = vmov 28  }
 0x7b0   : > { %v7839_v35 = vpop.permute.xlu1 %3131 }
 0x7b1   : > { %10843 = vst [vmem:[#allocation76_spill] sm:$0xff] %v7839_v35  ;;  %3343 = vperm.xlu1 %4707, %v7346_v39  }
 0x7b5   : > { %3347 = vperm.xlu1 %4707, %v7617_v50   ;;  %v7843_v5 = vpop.permute.xlu1 %3140 }
 0x7b6   : > { %10844 = vst [vmem:[#allocation336_spill] sm:$0xff] %v7843_v5 }
 0x7b9   : > { %4709 = vset.pattern.permute.xlu1 %v10845_v17  ;;  %v7846_v25 = vpop.permute.xlu1 %3145 }
 0x7ba   : > { %10846 = vst [vmem:[#allocation232_spill] sm:$0xff] %v7846_v25  ;;  %3356 = vperm.xlu1 %4709, %v7625_v27   ;;  %v10852_v25 = vmov 29  }
 0x7be   : > { %3361 = vperm.xlu1 %4709, %v7346_v39   ;;  %v7850_v1 = vpop.permute.xlu1 %3155 }
 0x7bf   : > { %10847 = vst [vmem:[#allocation231_spill] sm:$0xff] %v7850_v1 }
 0x7c2   : > { %4711 = vset.pattern.permute.xlu1 %v10848_v56  ;;  %v7853_v12 = vpop.permute.xlu1 %3163 }
 0x7c3   : > { %10849 = vst [vmem:[#allocation92_spill] sm:$0xff] %v7853_v12  ;;  %3371 = vperm.xlu1 %4711, %v7611_v29   ;;  %v10855_v12 = vmov 30  }
 0x7c6   : > { %v7856_v35 = vpop.permute.xlu1 %3167 }
 0x7c7   : > { %10850 = vst [vmem:[#allocation358_spill] sm:$0xff] %v7856_v35  ;;  %3379 = vperm.xlu1 %4711, %v7346_v39  }
 0x7cb   : > { %3383 = vperm.xlu1 %4711, %v7617_v50   ;;  %v7860_v17 = vpop.permute.xlu1 %3176 }
 0x7cc   : > { %10851 = vst [vmem:[#allocation248_spill] sm:$0xff] %v7860_v17 }
 0x7cf   : > { %4713 = vset.pattern.permute.xlu1 %v10852_v25  ;;  %v7863_v5 = vpop.permute.xlu1 %3181 }
 0x7d0   : > { %10853 = vst [vmem:[#allocation74_spill] sm:$0xff] %v7863_v5  ;;  %3392 = vperm.xlu1 %4713, %v7625_v27   ;;  %v10859_v5 = vmov 31  }
 0x7d4   : > { %3397 = vperm.xlu1 %4713, %v7346_v39   ;;  %v7867_v56 = vpop.permute.xlu1 %3191 }
 0x7d5   : > { %10854 = vst [vmem:[#allocation251_spill] sm:$0xff] %v7867_v56 }
 0x7d8   : > { %4715 = vset.pattern.permute.xlu1 %v10855_v12  ;;  %v7870_v1 = vpop.permute.xlu1 %3199 }
 0x7d9   : > { %10856 = vst [vmem:[#allocation110_spill] sm:$0xff] %v7870_v1  ;;  %3407 = vperm.xlu1 %4715, %v7611_v29   ;;  %v10862_v1 = vmov 32  }
 0x7dc   : > { %v7873_v35 = vpop.permute.xlu1 %3203 }
 0x7dd   : > { %10857 = vst [vmem:[#allocation381_spill] sm:$0xff] %v7873_v35  ;;  %3415 = vperm.xlu1 %4715, %v7346_v39  }
 0x7e1   : > { %3419 = vperm.xlu1 %4715, %v7617_v50   ;;  %v7877_v25 = vpop.permute.xlu1 %3212 }
 0x7e2   : > { %10858 = vst [vmem:[#allocation90_spill] sm:$0xff] %v7877_v25 }
 0x7e5   : > { %4717 = vset.pattern.permute.xlu1 %v10859_v5  ;;  %v7880_v17 = vpop.permute.xlu1 %3217 }
 0x7e6   : > { %10860 = vst [vmem:[#allocation273_spill] sm:$0xff] %v7880_v17  ;;  %3428 = vperm.xlu1 %4717, %v7625_v27   ;;  %v10866_v17 = vmov 33  }
 0x7ea   : > { %3433 = vperm.xlu1 %4717, %v7346_v39   ;;  %v7884_v12 = vpop.permute.xlu1 %3227 }
 0x7eb   : > { %10861 = vst [vmem:[#allocation129_spill] sm:$0xff] %v7884_v12 }
 0x7ee   : > { %4719 = vset.pattern.permute.xlu1 %v10862_v1  ;;  %v7887_v56 = vpop.permute.xlu1 %3235 }
 0x7ef   : > { %10863 = vst [vmem:[#allocation404_spill] sm:$0xff] %v7887_v56  ;;  %3443 = vperm.xlu1 %4719, %v7611_v29   ;;  %v10869_v56 = vmov 34  }
 0x7f2   : > { %v7890_v35 = vpop.permute.xlu1 %3239 }
 0x7f3   : > { %10864 = vst [vmem:[#allocation109_spill] sm:$0xff] %v7890_v35  ;;  %3451 = vperm.xlu1 %4719, %v7346_v39  }
 0x7f7   : > { %3455 = vperm.xlu1 %4719, %v7617_v50   ;;  %v7894_v5 = vpop.permute.xlu1 %3248 }
 0x7f8   : > { %10865 = vst [vmem:[#allocation295_spill] sm:$0xff] %v7894_v5 }
 0x7fb   : > { %4721 = vset.pattern.permute.xlu1 %v10866_v17  ;;  %v7897_v25 = vpop.permute.xlu1 %3253 }
 0x7fc   : > { %10867 = vst [vmem:[#allocation147_spill] sm:$0xff] %v7897_v25  ;;  %3464 = vperm.xlu1 %4721, %v7625_v27   ;;  %v10873_v25 = vmov 35  }
 0x800   : > { %3469 = vperm.xlu1 %4721, %v7346_v39   ;;  %v7901_v1 = vpop.permute.xlu1 %3263 }
 0x801   : > { %10868 = vst [vmem:[#allocation427_spill] sm:$0xff] %v7901_v1 }
 0x804   : > { %4723 = vset.pattern.permute.xlu1 %v10869_v56  ;;  %v7904_v12 = vpop.permute.xlu1 %3271 }
 0x805   : > { %10870 = vst [vmem:[#allocation127_spill] sm:$0xff] %v7904_v12  ;;  %3479 = vperm.xlu1 %4723, %v7611_v29   ;;  %v10876_v12 = vmov 36  }
 0x808   : > { %v7907_v35 = vpop.permute.xlu1 %3275 }
 0x809   : > { %10871 = vst [vmem:[#allocation316_spill] sm:$0xff] %v7907_v35  ;;  %3487 = vperm.xlu1 %4723, %v7346_v39  }
 0x80d   : > { %3491 = vperm.xlu1 %4723, %v7617_v50   ;;  %v7911_v17 = vpop.permute.xlu1 %3284 }
 0x80e   : > { %10872 = vst [vmem:[#allocation166_spill] sm:$0xff] %v7911_v17 }
 0x811   : > { %4725 = vset.pattern.permute.xlu1 %v10873_v25  ;;  %v7914_v5 = vpop.permute.xlu1 %3289 }
 0x812   : > { %10874 = vst [vmem:[#allocation449_spill] sm:$0xff] %v7914_v5  ;;  %3500 = vperm.xlu1 %4725, %v7625_v27   ;;  %v10880_v5 = vmov 37  }
 0x816   : > { %3505 = vperm.xlu1 %4725, %v7346_v39   ;;  %v7918_v56 = vpop.permute.xlu1 %3299 }
 0x817   : > { %10875 = vst [vmem:[#allocation145_spill] sm:$0xff] %v7918_v56 }
 0x81a   : > { %4727 = vset.pattern.permute.xlu1 %v10876_v12  ;;  %v7921_v1 = vpop.permute.xlu1 %3307 }
 0x81b   : > { %10877 = vst [vmem:[#allocation338_spill] sm:$0xff] %v7921_v1  ;;  %3515 = vperm.xlu1 %4727, %v7611_v29   ;;  %v10883_v1 = vmov 38  }
 0x81e   : > { %v7924_v35 = vpop.permute.xlu1 %3311 }
 0x81f   : > { %10878 = vst [vmem:[#allocation184_spill] sm:$0xff] %v7924_v35  ;;  %3523 = vperm.xlu1 %4727, %v7346_v39  }
 0x823   : > { %3527 = vperm.xlu1 %4727, %v7617_v50   ;;  %v7928_v25 = vpop.permute.xlu1 %3320 }
 0x824   : > { %10879 = vst [vmem:[#allocation164_spill] sm:$0xff] %v7928_v25 }
 0x827   : > { %4729 = vset.pattern.permute.xlu1 %v10880_v5  ;;  %v7931_v17 = vpop.permute.xlu1 %3325 }
 0x828   : > { %10881 = vst [vmem:[#allocation360_spill] sm:$0xff] %v7931_v17  ;;  %3536 = vperm.xlu1 %4729, %v7625_v27   ;;  %v10887_v17 = vmov 39  }
 0x82c   : > { %3541 = vperm.xlu1 %4729, %v7346_v39   ;;  %v7935_v12 = vpop.permute.xlu1 %3335 }
 0x82d   : > { %10882 = vst [vmem:[#allocation201_spill] sm:$0xff] %v7935_v12 }
 0x830   : > { %4731 = vset.pattern.permute.xlu1 %v10883_v1  ;;  %v7938_v56 = vpop.permute.xlu1 %3343 }
 0x831   : > { %10884 = vst [vmem:[#allocation182_spill] sm:$0xff] %v7938_v56  ;;  %3551 = vperm.xlu1 %4731, %v7611_v29   ;;  %v10890_v56 = vmov 40  }
 0x834   : > { %v7941_v35 = vpop.permute.xlu1 %3347 }
 0x835   : > { %10885 = vst [vmem:[#allocation383_spill] sm:$0xff] %v7941_v35  ;;  %3559 = vperm.xlu1 %4731, %v7346_v39  }
 0x839   : > { %3563 = vperm.xlu1 %4731, %v7617_v50   ;;  %v7945_v5 = vpop.permute.xlu1 %3356 }
 0x83a   : > { %10886 = vst [vmem:[#allocation219_spill] sm:$0xff] %v7945_v5 }
 0x83d   : > { %4733 = vset.pattern.permute.xlu1 %v10887_v17  ;;  %v7948_v25 = vpop.permute.xlu1 %3361 }
 0x83e   : > { %10888 = vst [vmem:[#allocation200_spill] sm:$0xff] %v7948_v25  ;;  %3572 = vperm.xlu1 %4733, %v7625_v27   ;;  %v10894_v25 = vmov 41  }
 0x842   : > { %3577 = vperm.xlu1 %4733, %v7346_v39   ;;  %v7952_v1 = vpop.permute.xlu1 %3371 }
 0x843   : > { %10889 = vst [vmem:[#allocation406_spill] sm:$0xff] %v7952_v1 }
 0x846   : > { %4735 = vset.pattern.permute.xlu1 %v10890_v56  ;;  %v7955_v12 = vpop.permute.xlu1 %3379 }
 0x847   : > { %10891 = vst [vmem:[#allocation236_spill] sm:$0xff] %v7955_v12  ;;  %3587 = vperm.xlu1 %4735, %v7611_v29   ;;  %v10897_v12 = vmov 42  }
 0x84a   : > { %v7958_v35 = vpop.permute.xlu1 %3383 }
 0x84b   : > { %10892 = vst [vmem:[#allocation217_spill] sm:$0xff] %v7958_v35  ;;  %3595 = vperm.xlu1 %4735, %v7346_v39  }
 0x84f   : > { %3599 = vperm.xlu1 %4735, %v7617_v50   ;;  %v7962_v17 = vpop.permute.xlu1 %3392 }
 0x850   : > { %10893 = vst [vmem:[#allocation428_spill] sm:$0xff] %v7962_v17 }
 0x853   : > { %4737 = vset.pattern.permute.xlu1 %v10894_v25  ;;  %v7965_v5 = vpop.permute.xlu1 %3397 }
 0x854   : > { %10895 = vst [vmem:[#allocation252_spill] sm:$0xff] %v7965_v5  ;;  %3608 = vperm.xlu1 %4737, %v7625_v27   ;;  %v10901_v5 = vmov 43  }
 0x858   : > { %3613 = vperm.xlu1 %4737, %v7346_v39   ;;  %v7969_v56 = vpop.permute.xlu1 %3407 }
 0x859   : > { %10896 = vst [vmem:[#allocation234_spill] sm:$0xff] %v7969_v56 }
 0x85c   : > { %4739 = vset.pattern.permute.xlu1 %v10897_v12  ;;  %v7972_v1 = vpop.permute.xlu1 %3415 }
 0x85d   : > { %10898 = vst [vmem:[#allocation451_spill] sm:$0xff] %v7972_v1  ;;  %3623 = vperm.xlu1 %4739, %v7611_v29   ;;  %v10904_v1 = vmov 44  }
 0x860   : > { %v7975_v35 = vpop.permute.xlu1 %3419 }
 0x861   : > { %10899 = vst [vmem:[#allocation250_spill] sm:$0xff] %v7975_v35  ;;  %3631 = vperm.xlu1 %4739, %v7346_v39  }
 0x865   : > { %3635 = vperm.xlu1 %4739, %v7617_v50   ;;  %v7979_v25 = vpop.permute.xlu1 %3428 }
 0x866   : > { %10900 = vst [vmem:[#allocation473_spill] sm:$0xff] %v7979_v25 }
 0x869   : > { %4741 = vset.pattern.permute.xlu1 %v10901_v5  ;;  %v7982_v17 = vpop.permute.xlu1 %3433 }
 0x86a   : > { %10902 = vst [vmem:[#allocation474_spill] sm:$0xff] %v7982_v17  ;;  %3644 = vperm.xlu1 %4741, %v7625_v27   ;;  %v10908_v17 = vmov 45  }
 0x86e   : > { %3649 = vperm.xlu1 %4741, %v7346_v39   ;;  %v7986_v12 = vpop.permute.xlu1 %3443 }
 0x86f   : > { %10903 = vst [vmem:[#allocation475_spill] sm:$0xff] %v7986_v12 }
 0x872   : > { %4743 = vset.pattern.permute.xlu1 %v10904_v1  ;;  %v7989_v56 = vpop.permute.xlu1 %3451 }
 0x873   : > { %10905 = vst [vmem:[#allocation476_spill] sm:$0xff] %v7989_v56  ;;  %3659 = vperm.xlu1 %4743, %v7611_v29   ;;  %v10911_v56 = vmov 46  }
 0x876   : > { %v7992_v35 = vpop.permute.xlu1 %3455 }
 0x877   : > { %10906 = vst [vmem:[#allocation477_spill] sm:$0xff] %v7992_v35  ;;  %3667 = vperm.xlu1 %4743, %v7346_v39  }
 0x87b   : > { %3671 = vperm.xlu1 %4743, %v7617_v50   ;;  %v7996_v5 = vpop.permute.xlu1 %3464 }
 0x87c   : > { %10907 = vst [vmem:[#allocation478_spill] sm:$0xff] %v7996_v5  ;;  %v10917_v5 = vmov 47  }
 0x87f   : > { %4745 = vset.pattern.permute.xlu1 %v10908_v17  ;;  %v7999_v25 = vpop.permute.xlu1 %3469 }
 0x880   : > { %10909 = vst [vmem:[#allocation479_spill] sm:$0xff] %v7999_v25  ;;  %3680 = vperm.xlu1 %4745, %v7625_v27   ;;  %v8017_v25 = vpop.permute.xlu0 %3905 }
 0x881   : > { %10916 = vst [vmem:[#allocation485_spill] sm:$0xff] %v8017_v25 }
 0x884   : > { %3685 = vperm.xlu1 %4745, %v7346_v39   ;;  %v8003_v1 = vpop.permute.xlu1 %3479 }
 0x885   : > { %10910 = vst [vmem:[#allocation480_spill] sm:$0xff] %v8003_v1 }
 0x888   : > { %4747 = vset.pattern.permute.xlu1 %v10911_v56  ;;  %v8006_v12 = vpop.permute.xlu1 %3487  ;;  %v8023_v56 = vpop.permute.xlu0 %1604 }
 0x889   : > { %10912 = vst [vmem:[#allocation481_spill] sm:$0xff] %v8006_v12  ;;  %3695 = vperm.xlu1 %4747, %v7611_v29  }
 0x88c   : > { %v8009_v35 = vpop.permute.xlu1 %3491  ;;  %v8031_v10 = vpop.permute.xlu0 %3914 }
 0x88d   : > { %10913 = vst [vmem:[#allocation482_spill] sm:$0xff] %v8009_v35  ;;  %3703 = vperm.xlu1 %4747, %v7346_v39   ;;  %10922 = vst [vmem:[#allocation489_spill] sm:$0xff] %v8031_v10 }
 0x891   : > { %3707 = vperm.xlu1 %4747, %v7617_v50   ;;  %v8015_v17 = vpop.permute.xlu1 %3500 }
 0x892   : > { %10915 = vst [vmem:[#allocation484_spill] sm:$0xff] %v8015_v17 }
 0x895   : > { %4749 = vset.pattern.permute.xlu1 %v10917_v5  ;;  %v8020_v1 = vpop.permute.xlu1 %3505  ;;  %v8037_v5 = vpop.permute.xlu0 %1619 }
 0x896   : > { %10918 = vst [vmem:[#allocation486_spill] sm:$0xff] %v8020_v1  ;;  %3716 = vperm.xlu1 %4749, %v7625_v27  }
 0x899   : > { %v8042_v17 = vpop.permute.xlu0 %1631 }
 0x89a   : > { %3721 = vperm.xlu1 %4749, %v7346_v39   ;;  %v8026_v35 = vpop.permute.xlu1 %3515 }
 0x89b   : > { %10919 = vst [vmem:[#allocation487_spill] sm:$0xff] %v8026_v35  ;;  %v10925_v35 = vmov 49  }
 0x89e   : > { %4751 = vset.pattern.permute.xlu1 %v10920_v3  ;;  %v8029_v12 = vpop.permute.xlu1 %3523 }
 0x89f   : > { %10921 = vst [vmem:[#allocation488_spill] sm:$0xff] %v8029_v12  ;;  %3731 = vperm.xlu1 %4751, %v7611_v29   ;;  %v8051_v12 = vpop.permute.xlu0 %3929 }
 0x8a0   : > { %10928 = vst [vmem:[#allocation494_spill] sm:$0xff] %v8051_v12 }
 0x8a2   : > { %v8034_v25 = vpop.permute.xlu1 %3527 }
 0x8a3   : > { %10923 = vst [vmem:[#allocation490_spill] sm:$0xff] %v8034_v25  ;;  %3739 = vperm.xlu1 %4751, %v7346_v39   ;;  %v10929_v25 = vmov 50  }
 0x8a7   : > { %3743 = vperm.xlu1 %4751, %v7617_v50   ;;  %v8040_v1 = vpop.permute.xlu1 %3536 }
 0x8a8   : > { %10924 = vst [vmem:[#allocation491_spill] sm:$0xff] %v8040_v1  ;;  %v8057_v1 = vpop.permute.xlu0 %3941 }
 0x8a9   : > { %10931 = vst [vmem:[#allocation496_spill] sm:$0xff] %v8057_v1 }
 0x8ab   : > { %4753 = vset.pattern.permute.xlu1 %v10925_v35  ;;  %v8045_v3 = vpop.permute.xlu1 %3541 }
 0x8ac   : > { %10926 = vst [vmem:[#allocation492_spill] sm:$0xff] %v8045_v3  ;;  %3752 = vperm.xlu1 %4753, %v7625_v27   ;;  %v8062_v35 = vpop.permute.xlu0 %1640 }
 0x8b0   : > { %3757 = vperm.xlu1 %4753, %v7346_v39   ;;  %v8049_v10 = vpop.permute.xlu1 %3551 }
 0x8b1   : > { %10927 = vst [vmem:[#allocation493_spill] sm:$0xff] %v8049_v10  ;;  %v10934_v10 = vmov 51  }
 0x8b4   : > { %4755 = vset.pattern.permute.xlu1 %v10929_v25  ;;  %v8054_v33 = vpop.permute.xlu1 %3559  ;;  %v8071_v25 = vpop.permute.xlu0 %3950 }
 0x8b5   : > { %10930 = vst [vmem:[#allocation495_spill] sm:$0xff] %v8054_v33  ;;  %3767 = vperm.xlu1 %4755, %v7611_v29   ;;  %10936 = vst [vmem:[#allocation500_spill] sm:$0xff] %v8071_v25  ;;  %v10943_v25 = vld [vmem:[#allocation21_spill] sm:$0xff] }
 0x8b8   : > { %v8059_v45 = vpop.permute.xlu1 %3563  ;;  %v8078_v33 = vpop.permute.xlu0 %1655 }
 0x8b9   : > { %10932 = vst [vmem:[#allocation497_spill] sm:$0xff] %v8059_v45  ;;  %3775 = vperm.xlu1 %4755, %v7346_v39   ;;  %v10938_v45 = vld [vmem:[#allocation185_spill] sm:$0xff] }
 0x8ba   : > { %vm560_vm0 = vcmp.eq.s32.totalorder %v10938_v45, %v5109_v7  ;;  %v10945_v45 = vld [vmem:[#allocation35_spill] sm:$0xff] }
 0x8bb   : > { %vm706_vm2 = vcmp.eq.s32.totalorder %v10945_v45, %v5109_v7 }
 0x8bd   : > { %3779 = vperm.xlu1 %4755, %v7617_v50   ;;  %v8065_v3 = vpop.permute.xlu1 %3572 }
 0x8be   : > { %10933 = vst [vmem:[#allocation498_spill] sm:$0xff] %v8065_v3 }
 0x8c1   : > { %4757 = vset.pattern.permute.xlu1 %v10934_v10  ;;  %v8068_v12 = vpop.permute.xlu1 %3577  ;;  %v10941_v10 = vld [vmem:[#allocation5_spill] sm:$0xff] }
 0x8c2   : > { %10935 = vst [vmem:[#allocation499_spill] sm:$0xff] %v8068_v12  ;;  %3788 = vperm.xlu1 %4757, %v7625_v27   ;;  %v572_v40 = vsel %vm560_vm0, %v10941_v10, 0.0  ;;  %v10942_v12 = vld [vmem:[#allocation19_spill] sm:$0xff]  ;;  %v10947_v10 = vld [vmem:[#allocation52_spill] sm:$0xff] }
 0x8c3   : > { %vm634_vm1 = vcmp.eq.s32.totalorder %v10942_v12, %v5109_v7  ;;  %vm778_vm3 = vcmp.eq.s32.totalorder %v10947_v10, %v5109_v7  ;;  %v10949_v12 = vld [vmem:[#allocation53_spill] sm:$0xff] }
 0x8c4   : > { %v644_v49 = vsel %vm634_vm1, %v10943_v25, %v572_v40 }
 0x8c6   : > { %3793 = vperm.xlu1 %4757, %v7346_v39   ;;  %v8074_v1 = vpop.permute.xlu1 %3587 }
 0x8c7   : > { %10937 = vst [vmem:[#allocation501_spill] sm:$0xff] %v8074_v1  ;;  %v8090_v1 = vpop.permute.xlu0 %1667 }
 0x8ca   : > { %4759 = vset.pattern.permute.xlu1 %v10939_v18  ;;  %v8081_v3 = vpop.permute.xlu1 %3595  ;;  %v10946_v18 = vld [vmem:[#allocation37_spill] sm:$0xff] }
 0x8cb   : > { %10940 = vst [vmem:[#allocation185_spill] sm:$0xff] %v8081_v3  ;;  %3803 = vperm.xlu1 %4759, %v7611_v29   ;;  %v716_v3 = vsel %vm706_vm2, %v10946_v18, %v644_v49  ;;  %v8102_v25 = vpop.permute.xlu0 %3965  ;;  %v10955_v49 = vld [vmem:[#allocation84_spill] sm:$0xff]  ;;  %v10956_v18 = vld [vmem:[#allocation86_spill] sm:$0xff] }
 0x8cc   : > { %v788_v40 = vsel %vm778_vm3, %v10949_v12, %v716_v3  ;;  %10950 = vst [vmem:[#allocation21_spill] sm:$0xff] %v8102_v25  ;;  %vm922_vm5 = vcmp.eq.s32.totalorder %v10955_v49, %v5109_v7  ;;  %v10958_v3 = vld [vmem:[#allocation103_spill] sm:$0xff]  ;;  %v10961_v12 = vld [vmem:[#allocation12_spill] sm:$0xff] }
 0x8cd   : > { %vm994_vm6 = vcmp.eq.s32.totalorder %v10958_v3, %v5109_v7  ;;  %vm598_vm7 = vcmp.eq.s32.totalorder %v10961_v12, %v5109_v7  ;;  %v10963_v49 = vld [vmem:[#allocation28_spill] sm:$0xff]  ;;  %v10966_v3 = vld [vmem:[#allocation45_spill] sm:$0xff] }
 0x8ce   : > { %v8088_v48 = vpop.permute.xlu1 %3599  ;;  %vm670_vm8 = vcmp.eq.s32.totalorder %v10963_v49, %v5109_v7  ;;  %vm742_vm10 = vcmp.eq.s32.totalorder %v10966_v3, %v5109_v7 }
 0x8cf   : > { %10944 = vst [vmem:[#allocation5_spill] sm:$0xff] %v8088_v48  ;;  %3811 = vperm.xlu1 %4759, %v7346_v39   ;;  %v10951_v48 = vld [vmem:[#allocation68_spill] sm:$0xff] }
 0x8d0   : > { %vm850_vm4 = vcmp.eq.s32.totalorder %v10951_v48, %v5109_v7 }
 0x8d1   : > { %v860_v62 = vsel %vm850_vm4, %v10952_v42, %v788_v40  ;;  %v10960_v42 = vld [vmem:[#allocation105_spill] sm:$0xff]  ;;  %v10962_v40 = vld [vmem:[#allocation14_spill] sm:$0xff] }
 0x8d2   : > { %v932_v10 = vsel %vm922_vm5, %v10956_v18, %v860_v62  ;;  %v608_v25 = vsel %vm598_vm7, %v10962_v40, 0.0  ;;  %v10964_v62 = vld [vmem:[#allocation121_spill] sm:$0xff]  ;;  %v10965_v18 = vld [vmem:[#allocation30_spill] sm:$0xff]  ;;  %vm1318_vm5 = vcmp.eq.s32.totalorder %v10992_v21, %v5109_v7 }
 0x8d3   : > { %3815 = vperm.xlu1 %4759, %v7617_v50   ;;  %v8099_v46 = vpop.permute.xlu1 %3608  ;;  %vm1066_vm9 = vcmp.eq.s32.totalorder %v10964_v62, %v5109_v7  ;;  %v10971_v40 = vld [vmem:[#allocation61_spill] sm:$0xff]  ;;  %v10972_v62 = vld [vmem:[#allocation63_spill] sm:$0xff] }
 0x8d4   : > { %10948 = vst [vmem:[#allocation19_spill] sm:$0xff] %v8099_v46  ;;  %v8114_v46 = vpop.permute.xlu0 %3977  ;;  %vm814_vm12 = vcmp.eq.s32.totalorder %v10971_v40, %v5109_v7  ;;  %v10978_v40 = vld [vmem:[#allocation96_spill] sm:$0xff]  ;;  %v11000_v21 = vld [vmem:[#allocation205_spill] sm:$0xff] }
 0x8d5   : > { %10957 = vst [vmem:[#allocation37_spill] sm:$0xff] %v8114_v46  ;;  %v680_v46 = vsel %vm670_vm8, %v10965_v18, %v608_v25  ;;  %v10973_v18 = vld [vmem:[#allocation78_spill] sm:$0xff] }
 0x8d6   : > { %vm886_vm11 = vcmp.eq.s32.totalorder %v10973_v18, %v5109_v7  ;;  %v10982_v18 = vld [vmem:[#allocation131_spill] sm:$0xff] }
 0x8d7   : > { %4761 = vset.pattern.permute.xlu1 %v10953_v47  ;;  %v8108_v45 = vpop.permute.xlu1 %3613  ;;  %v1004_v47 = vsel %vm994_vm6, %v10960_v42, %v932_v10  ;;  %v10970_v42 = vld [vmem:[#allocation47_spill] sm:$0xff]  ;;  %vm1102_vm0 = vcmp.eq.s32.totalorder %v10982_v18, %v5109_v7  ;;  %v10990_v18 = vld [vmem:[#allocation170_spill] sm:$0xff] }
 0x8d8   : > { %10954 = vst [vmem:[#allocation35_spill] sm:$0xff] %v8108_v45  ;;  %3824 = vperm.xlu1 %4761, %v7625_v27   ;;  %v10968_v45 = vmov 54   ;;  %v752_v12 = vsel %vm742_vm10, %v10970_v42, %v680_v46  ;;  %v8139_v49 = vpop.permute.xlu0 %1676  ;;  %v10977_v46 = vld [vmem:[#allocation142_spill] sm:$0xff] }
 0x8d9   : > { %v824_v25 = vsel %vm814_vm12, %v10972_v62, %v752_v12  ;;  %v10981_v12 = vld [vmem:[#allocation114_spill] sm:$0xff] }
 0x8dc   : > { %3829 = vperm.xlu1 %4761, %v7346_v39   ;;  %v8119_v48 = vpop.permute.xlu1 %3623  ;;  %v10967_v39 = vld [vmem:[#allocation123_spill] sm:$0xff] }
 0x8dd   : > { %10959 = vst [vmem:[#allocation52_spill] sm:$0xff] %v8119_v48  ;;  %v1076_v48 = vsel %vm1066_vm9, %v10967_v39, %v1004_v47  ;;  %v10974_v47 = vld [vmem:[#allocation140_spill] sm:$0xff]  ;;  %v10976_v39 = vld [vmem:[#allocation94_spill] sm:$0xff] }
 0x8de   : > { %vm1138_vm14 = vcmp.eq.s32.totalorder %v10974_v47, %v5109_v7  ;;  %vm958_vm13 = vcmp.eq.s32.totalorder %v10976_v39, %v5109_v7  ;;  %v10983_v47 = vld [vmem:[#allocation158_spill] sm:$0xff] }
 0x8df   : > { %v1148_v42 = vsel %vm1138_vm14, %v10977_v46, %v1076_v48  ;;  %vm1210_vm1 = vcmp.eq.s32.totalorder %v10983_v47, %v5109_v7  ;;  %v10984_v48 = vld [vmem:[#allocation133_spill] sm:$0xff]  ;;  %v10987_v46 = vld [vmem:[#allocation151_spill] sm:$0xff] }
 0x8e0   : > { %4763 = vset.pattern.permute.xlu1 %v10968_v45  ;;  %v8134_v10 = vpop.permute.xlu1 %3631  ;;  %v10975_v45 = vld [vmem:[#allocation80_spill] sm:$0xff]  ;;  %v1220_v39 = vsel %vm1210_vm1, %v10986_v13, %v1148_v42  ;;  %v10995_v42 = vld [vmem:[#allocation178_spill] sm:$0xff]  ;;  %v10996_v13 = vld [vmem:[#allocation203_spill] sm:$0xff] }
 0x8e1   : > { %10969 = vst [vmem:[#allocation53_spill] sm:$0xff] %v8134_v10  ;;  %3839 = vperm.xlu1 %4763, %v7611_v29   ;;  %v896_v3 = vsel %vm886_vm11, %v10975_v45, %v824_v25  ;;  %v8161_v25 = vld [vmem:[#allocation2 + $0x10] sm:$0xff]  ;;  %vm1390_vm7 = vcmp.eq.s32.totalorder %v10996_v13, %v5109_v7 }
 0x8e2   : > { %v968_v10 = vsel %vm958_vm13, %v10978_v40, %v896_v3  ;;  %v10985_v3 = vld [vmem:[#allocation149_spill] sm:$0xff] }
 0x8e3   : > { %v1040_v62 = vsel %vm1030_vm15, %v10981_v12, %v968_v10  ;;  %vm1174_vm2 = vcmp.eq.s32.totalorder %v10985_v3, %v5109_v7  ;;  %v10988_v10 = vld [vmem:[#allocation168_spill] sm:$0xff]  ;;  %v8171_v12 = vpop.permute.xlu0 %3986 }
 0x8e4   : > { %v8154_v38 = vpop.permute.xlu1 %3635  ;;  %v1112_v45 = vsel %vm1102_vm0, %v10984_v48, %v1040_v62  ;;  %vm1246_vm3 = vcmp.eq.s32.totalorder %v10988_v10, %v5109_v7  ;;  %10989 = vst [vmem:[#allocation70_spill] sm:$0xff] %v8171_v12  ;;  %v10993_v62 = vld [vmem:[#allocation188_spill] sm:$0xff] }
 0x8e5   : > { %10980 = vst [vmem:[#allocation68_spill] sm:$0xff] %v8154_v38  ;;  %3847 = vperm.xlu1 %4763, %v8161_v25   ;;  %v1184_v40 = vsel %vm1174_vm2, %v10987_v46, %v1112_v45  ;;  %v10991_v38 = vld [vmem:[#allocation177_spill] sm:$0xff]  ;;  %v10994_v3 = vld [vmem:[#allocation196_spill] sm:$0xff] }
 0x8e6   : > { %v1256_v47 = vsel %vm1246_vm3, %v10990_v18, %v1184_v40  ;;  %vm1282_vm4 = vcmp.eq.s32.totalorder %v10991_v38, %v5109_v7  ;;  %vm1354_vm6 = vcmp.eq.s32.totalorder %v10994_v3, %v5109_v7  ;;  %v10998_v40 = vld [vmem:[#allocation7_spill] sm:$0xff]  ;;  %v10999_v38 = vld [vmem:[#allocation197_spill] sm:$0xff]  ;;  %v11004_v3 = vld [vmem:[#allocation214_spill] sm:$0xff]  ;;  %vm1643_vm3 = vcmp.eq.s32.totalorder %v8062_v35, %v5109_v7 }
 0x8e7   : > { %v1328_v48 = vsel %vm1318_vm5, %v10993_v62, %v1256_v47  ;;  %v1292_v45 = vsel %vm1282_vm4, %v10995_v42, %v1220_v39  ;;  %vm1715_vm8 = vcmp.eq.s32.totalorder %v10998_v40, %v5109_v7  ;;  %v11001_v47 = vld [vmem:[#allocation212_spill] sm:$0xff]  ;;  %v11003_v39 = vld [vmem:[#allocation9_spill] sm:$0xff]  ;;  %vm1624_vm4 = vcmp.eq.s32.totalorder %v8037_v5, %v5109_v7  ;;  %v11036_v35 = vld [vmem:[#allocation286_spill] sm:$0xff] }
 0x8e8   : > { %v1364_v10 = vsel %vm1354_vm6, %v10999_v38, %v1292_v45  ;;  %v1400_v18 = vsel %vm1390_vm7, %v11000_v21, %v1328_v48  ;;  %vm1426_vm9 = vcmp.eq.s32.totalorder %v11001_v47, %v5109_v7  ;;  %v11002_v62 = vld [vmem:[#allocation220_spill] sm:$0xff]  ;;  %vm1732_vm12 = vcmp.eq.s32.totalorder %v11003_v39, %v5109_v7  ;;  %v11005_v42 = vld [vmem:[#allocation221_spill] sm:$0xff]  ;;  %v11008_v48 = vld [vmem:[#allocation230_spill] sm:$0xff] }
 0x8e9   : > { %3851 = vperm.xlu1 %4763, %v7617_v50   ;;  %v8185_v46 = vpop.permute.xlu1 %3644  ;;  %vm1462_vm10 = vcmp.eq.s32.totalorder %v11002_v62, %v5109_v7  ;;  %v1436_v50 = vsel %vm1426_vm9, %v11004_v3, %v1364_v10  ;;  %v11006_v12 = vld [vmem:[#allocation228_spill] sm:$0xff]  ;;  %v11007_v45 = vld [vmem:[#allocation237_spill] sm:$0xff]  ;;  %v11009_v21 = vld [vmem:[#allocation239_spill] sm:$0xff]  ;;  %vm1660_vm9 = vcmp.eq.s32.totalorder %v8078_v33, %v5109_v7  ;;  %vm1750_vm5 = vcmp.eq.s32.totalorder %v11034_v26, %v5109_v7 }
 0x8ea   : > { %10997 = vst [vmem:[#allocation84_spill] sm:$0xff] %v8185_v46  ;;  %v1472_v13 = vsel %vm1462_vm10, %v11005_v42, %v1400_v18  ;;  %vm1498_vm11 = vcmp.eq.s32.totalorder %v11006_v12, %v5109_v7  ;;  %vm1534_vm14 = vcmp.eq.s32.totalorder %v11007_v45, %v5109_v7  ;;  %v11010_v46 = vld [vmem:[#allocation244_spill] sm:$0xff]  ;;  %v11011_v62 = vld [vmem:[#allocation254_spill] sm:$0xff]  ;;  %v11012_v10 = vld [vmem:[#allocation13_spill] sm:$0xff] }
 0x8eb   : > { %v1508_v38 = vsel %vm1498_vm11, %v11008_v48, %v1436_v50  ;;  %v1544_v47 = vsel %vm1534_vm14, %v11009_v21, %v1472_v13  ;;  %vm1570_vm13 = vcmp.eq.s32.totalorder %v11010_v46, %v5109_v7  ;;  %vm1606_vm15 = vcmp.eq.s32.totalorder %v11011_v62, %v5109_v7  ;;  %v11013_v18 = vld [vmem:[#allocation17_spill] sm:$0xff]  ;;  %v11014_v12 = vld [vmem:[#allocation246_spill] sm:$0xff]  ;;  %v11015_v42 = vld [vmem:[#allocation256_spill] sm:$0xff]  ;;  %v1692_v46 = vpop.permute.xlu0 %1691 }
 0x8ec   : > { %vm1751_vm0 = vcmp.eq.s32.totalorder %v11012_v10, %v5109_v7  ;;  %vm1787_vm1 = vcmp.eq.s32.totalorder %v11013_v18, %v5109_v7  ;;  %v1580_v3 = vsel %vm1570_vm13, %v11014_v12, %v1508_v38  ;;  %v1616_v45 = vsel %vm1606_vm15, %v11015_v42, %v1544_v47  ;;  %v11016_v50 = vld [vmem:[#allocation262_spill] sm:$0xff]  ;;  %v11019_v21 = vld [vmem:[#allocation15_spill] sm:$0xff]  ;;  %v11022_v47 = vld [vmem:[#allocation264_spill] sm:$0xff] }
 0x8ed   : > { %vm1642_vm2 = vcmp.eq.s32.totalorder %v11016_v50, %v5109_v7  ;;  %v11017_v13 = vmov 55   ;;  %v8220_v48 = vpop.permute.xlu1 %3649  ;;  %v11020_v62 = vld [vmem:[#allocation18_spill] sm:$0xff]  ;;  %v11021_v38 = vld [vmem:[#allocation259_spill] sm:$0xff]  ;;  %v11023_v42 = vld [vmem:[#allocation272_spill] sm:$0xff]  ;;  %vm1607_vm14 = vcmp.eq.s32.totalorder %v8023_v56, %v5109_v7  ;;  %vm1733_vm11 = vcmp.eq.s32.totalorder %v11036_v35, %v5109_v7 }
 0x8ee   : > { %4765 = vset.pattern.permute.xlu1 %v11017_v13  ;;  %11018 = vst [vmem:[#allocation86_spill] sm:$0xff] %v8220_v48  ;;  %vm1625_vm6 = vcmp.eq.s32.totalorder %v11021_v38, %v5109_v7  ;;  %v1652_v12 = vsel %vm1642_vm2, %v11022_v47, %v1580_v3  ;;  %vm1678_vm7 = vcmp.eq.s32.totalorder %v11023_v42, %v5109_v7  ;;  %v11024_v50 = vld [vmem:[#allocation268_spill] sm:$0xff]  ;;  %v11025_v13 = vld [vmem:[#allocation274_spill] sm:$0xff]  ;;  %v11027_v3 = vld [vmem:[#allocation23_spill] sm:$0xff]  ;;  %v11061_v35 = vmov 56  }
 0x8ef   : > { %3860 = vperm.xlu1 %4765, %v7625_v27   ;;  %vm1661_vm10 = vcmp.eq.s32.totalorder %v11024_v50, %v5109_v7  ;;  %v1688_v48 = vsel %vm1678_vm7, %v11025_v13, %v1616_v45  ;;  %v11028_v47 = vld [vmem:[#allocation29_spill] sm:$0xff]  ;;  %v11030_v27 = vld [vmem:[#allocation266_spill] sm:$0xff]  ;;  %vm1679_vm7 = vcmp.eq.s32.totalorder %v8139_v49, %v5109_v7  ;;  %v11032_v13 = vld [vmem:[#allocation31_spill] sm:$0xff]  ;;  %v1617_v4 = vsel %vm1607_vm14, %v11038_v61, %v7258_v36  ;;  %v1704_v50 = vpop.permute.xlu0 %1703 }
 0x8f0   : > { %v11029_v42 = vld [vmem:[#allocation281_spill] sm:$0xff]  ;;  %v1653_v45 = vsel %vm1643_vm3, %v11030_v27, %v7467_v14  ;;  %vm1876_vm15 = vcmp.eq.s32.totalorder %v11032_v13, %v5109_v7  ;;  %v1670_v14 = vsel %vm1660_vm9, %v11035_v59, %v7537_v20  ;;  %vm1696_vm3 = vcmp.eq.s32.totalorder %v1692_v46, %v5109_v7  ;;  %v11037_v27 = vld [vmem:[#allocation292_spill] sm:$0xff]  ;;  %v11041_v59 = vld [vmem:[#allocation38_spill] sm:$0xff] }
 0x8f1   : > { %vm1714_vm2 = vcmp.eq.s32.totalorder %v11029_v42, %v5109_v7  ;;  %v11031_v56 = vld [vmem:[#allocation25_spill] sm:$0xff]  ;;  %v1760_v51 = vsel %vm1750_vm5, %v11037_v27, %v1688_v48  ;;  %v1671_v26 = vsel %vm1661_vm10, %v8090_v1, %v7548_v30  ;;  %v11042_v33 = vld [vmem:[#allocation300_spill] sm:$0xff]  ;;  %v11046_v27 = vld [vmem:[#allocation34_spill] sm:$0xff] }
 0x8f2   : > { %vm1840_vm13 = vcmp.eq.s32.totalorder %v11031_v56, %v5109_v7  ;;  %v1724_v42 = vsel %vm1714_vm2, %v11033_v22, %v1652_v12  ;;  %v8280_v22 = vpop.permute.xlu1 %3659  ;;  %v11040_v20 = vld [vmem:[#allocation33_spill] sm:$0xff]  ;;  %vm1931_vm2 = vcmp.eq.s32.totalorder %v11041_v59, %v5109_v7  ;;  %vm1786_vm5 = vcmp.eq.s32.totalorder %v11042_v33, %v5109_v7  ;;  %v11043_v36 = vld [vmem:[#allocation260_spill] sm:$0xff]  ;;  %v11059_v38 = vld [vmem:[#allocation294_spill] sm:$0xff] }
 0x8f3   : > { %3865 = vperm.xlu1 %4765, %v8161_v25   ;;  %11039 = vst [vmem:[#allocation103_spill] sm:$0xff] %v8280_v22  ;;  %vm1895_vm9 = vcmp.eq.s32.totalorder %v11040_v20, %v5109_v7  ;;  %v1634_v61 = vsel %vm1624_vm4, %v11043_v36, %v7336_v2  ;;  %v11044_v30 = vld [vmem:[#allocation284_spill] sm:$0xff]  ;;  %vm1912_vm10 = vcmp.eq.s32.totalorder %v11046_v27, %v5109_v7  ;;  %v11049_v2 = vld [vmem:[#allocation301_spill] sm:$0xff]  ;;  %v11065_v18 = vld [vmem:[#allocation315_spill] sm:$0xff] }
 0x8f4   : > { %v1725_v1 = vsel %vm1715_vm8, %v11044_v30, %v1653_v45  ;;  %v11045_v48 = vld [vmem:[#allocation276_spill] sm:$0xff]  ;;  %v1796_v36 = vsel %vm1786_vm5, %v11049_v2, %v1724_v42  ;;  %v11051_v45 = vld [vmem:[#allocation279_spill] sm:$0xff]  ;;  %v11052_v49 = vld [vmem:[#allocation305_spill] sm:$0xff]  ;;  %v1635_v42 = vsel %vm1625_vm6, %v8042_v17, %v7361_v53  ;;  %vm11060_vm6 = vcmp.eq.s32.totalorder %v11026_v19, %v5109_v7 }
 0x8f5   : > { %v1689_v12 = vsel %vm1679_vm7, %v11045_v48, %v1617_v4  ;;  %v11047_v33 = vld [vmem:[#allocation40_spill] sm:$0xff]  ;;  %v1706_v4 = vsel %vm1696_vm3, %v11051_v45, %v1634_v61  ;;  %vm1805_vm8 = vcmp.eq.s32.totalorder %v11052_v49, %v5109_v7  ;;  %v11053_v30 = vld [vmem:[#allocation309_spill] sm:$0xff]  ;;  %v11054_v48 = vld [vmem:[#allocation11_spill] sm:$0xff]  ;;  %v1707_v17 = vsel %vm11060_vm6, %v1704_v50, %v1635_v42 }
 0x8f6   : > { %vm1948_vm14 = vcmp.eq.s32.totalorder %v11047_v33, %v5109_v7  ;;  %v11048_v5 = vld [vmem:[#allocation296_spill] sm:$0xff]  ;;  %vm1822_vm7 = vcmp.eq.s32.totalorder %v11053_v30, %v5109_v7  ;;  %v1743_v39 = vsel %vm1733_vm11, %v11054_v48, %v1671_v26  ;;  %v11058_v2 = vld [vmem:[#allocation303_spill] sm:$0xff]  ;;  %v1761_v53 = vsel %vm1751_vm0, %v11059_v38, %v1689_v12  ;;  %v8345_v26 = vpop.permute.xlu1 %3667  ;;  %v11064_v30 = vld [vmem:[#allocation50_spill] sm:$0xff] }
 0x8f7   : > { %vm1769_vm4 = vcmp.eq.s32.totalorder %v11048_v5, %v5109_v7  ;;  %v11050_v22 = vld [vmem:[#allocation288_spill] sm:$0xff]  ;;  %v1797_v45 = vsel %vm1787_vm1, %v11058_v2, %v1725_v1  ;;  %4767 = vset.pattern.permute.xlu1 %v11061_v35  ;;  %11062 = vst [vmem:[#allocation105_spill] sm:$0xff] %v8345_v26  ;;  %vm1841_vm1 = vcmp.eq.s32.totalorder %v11065_v18, %v5109_v7  ;;  %v11066_v10 = vld [vmem:[#allocation319_spill] sm:$0xff]  ;;  %v11067_v1 = vld [vmem:[#allocation306_spill] sm:$0xff] }
 0x8f8   : > { %v1742_v40 = vsel %vm1732_vm12, %v11050_v22, %v1670_v14  ;;  %v11055_v46 = vld [vmem:[#allocation44_spill] sm:$0xff]  ;;  %v11056_v14 = vld [vmem:[#allocation49_spill] sm:$0xff]  ;;  %v11057_v22 = vld [vmem:[#allocation311_spill] sm:$0xff]  ;;  %vm1858_vm0 = vcmp.eq.s32.totalorder %v11066_v10, %v5109_v7  ;;  %vm11070_vm6 = vcmp.eq.s32.totalorder %v11019_v21, %v5109_v7  ;;  %3875 = vperm.xlu1 %4767, %v7611_v29   ;;  %vm11081_vm12 = vcmp.eq.s32.totalorder %v11027_v3, %v5109_v7 }
 0x8f9   : > { %vm2003_vm3 = vcmp.eq.s32.totalorder %v11056_v14, %v5109_v7  ;;  %v1832_v61 = vsel %vm1822_vm7, %v11057_v22, %v1760_v51  ;;  %v11063_v51 = vld [vmem:[#allocation46_spill] sm:$0xff]  ;;  %vm11068_vm7 = vcmp.eq.s32.totalorder %v11020_v62, %v5109_v7  ;;  %v11071_v42 = vld [vmem:[#allocation321_spill] sm:$0xff]  ;;  %v11072_v22 = vld [vmem:[#allocation324_spill] sm:$0xff] }
 0x8fa   : > { %v1814_v19 = vsel %vm11068_vm7, %v11067_v1, %v1742_v40  ;;  %v11069_v12 = vld [vmem:[#allocation298_spill] sm:$0xff]  ;;  %v1868_v48 = vsel %vm1858_vm0, %v11071_v42, %v1796_v36  ;;  %vm1877_vm11 = vcmp.eq.s32.totalorder %v11072_v22, %v5109_v7  ;;  %v11073_v2 = vld [vmem:[#allocation327_spill] sm:$0xff]  ;;  %v11074_v38 = vld [vmem:[#allocation20_spill] sm:$0xff]  ;;  %vm11079_vm0 = vcmp.eq.s32.totalorder %v11028_v47, %v5109_v7 }
 0x8fb   : > { %v1778_v50 = vsel %vm11070_vm6, %v11069_v12, %v1706_v4  ;;  %vm1894_vm5 = vcmp.eq.s32.totalorder %v11073_v2, %v5109_v7  ;;  %v1815_v62 = vsel %vm1805_vm8, %v11074_v38, %v1743_v39  ;;  %v11075_v40 = vld [vmem:[#allocation54_spill] sm:$0xff]  ;;  %v11076_v21 = vld [vmem:[#allocation60_spill] sm:$0xff]  ;;  %v11077_v29 = vld [vmem:[#allocation329_spill] sm:$0xff] }
 0x8fc   : > { %vm2075_vm6 = vcmp.eq.s32.totalorder %v11076_v21, %v5109_v7  ;;  %v1904_v4 = vsel %vm1894_vm5, %v11077_v29, %v1832_v61  ;;  %v11078_v36 = vld [vmem:[#allocation322_spill] sm:$0xff]  ;;  %v11080_v10 = vld [vmem:[#allocation312_spill] sm:$0xff]  ;;  %v11085_v42 = vld [vmem:[#allocation333_spill] sm:$0xff]  ;;  %3883 = vperm.xlu1 %4767, %v8161_v25  }
 0x8fd   : > { %v1869_v35 = vsel %vm11079_vm0, %v11078_v36, %v1797_v45  ;;  %v1833_v1 = vsel %vm11081_vm12, %v11080_v10, %v1761_v53  ;;  %v11082_v49 = vld [vmem:[#allocation16_spill] sm:$0xff]  ;;  %v11084_v61 = vld [vmem:[#allocation62_spill] sm:$0xff]  ;;  %vm1913_vm7 = vcmp.eq.s32.totalorder %v11085_v42, %v5109_v7  ;;  %v11086_v47 = vld [vmem:[#allocation337_spill] sm:$0xff] }
 0x8fe   : > { %v1779_v39 = vsel %vm1769_vm4, %v11082_v49, %v1707_v17  ;;  %v11083_v12 = vld [vmem:[#allocation56_spill] sm:$0xff]  ;;  %vm2092_vm5 = vcmp.eq.s32.totalorder %v11084_v61, %v5109_v7  ;;  %vm1930_vm0 = vcmp.eq.s32.totalorder %v11086_v47, %v5109_v7  ;;  %v11087_v45 = vld [vmem:[#allocation325_spill] sm:$0xff]  ;;  %v8406_v17 = vpop.permute.xlu1 %3671  ;;  %v11090_v2 = vld [vmem:[#allocation339_spill] sm:$0xff] }
 0x8ff   : > { %vm2056_vm8 = vcmp.eq.s32.totalorder %v11083_v12, %v5109_v7  ;;  %v1886_v3 = vsel %vm1876_vm15, %v11087_v45, %v1814_v19  ;;  %v11088_v53 = vld [vmem:[#allocation317_spill] sm:$0xff]  ;;  %11089 = vst [vmem:[#allocation12_spill] sm:$0xff] %v8406_v17  ;;  %v1940_v38 = vsel %vm1930_vm0, %v11090_v2, %v1868_v48  ;;  %v11091_v29 = vld [vmem:[#allocation343_spill] sm:$0xff]  ;;  %v11092_v36 = vld [vmem:[#allocation346_spill] sm:$0xff] }
 0x900   : > { %v1850_v5 = vsel %vm1840_vm13, %v11088_v53, %v1778_v50  ;;  %vm1949_vm4 = vcmp.eq.s32.totalorder %v11091_v29, %v5109_v7  ;;  %vm1966_vm12 = vcmp.eq.s32.totalorder %v11092_v36, %v5109_v7  ;;  %v11093_v10 = vld [vmem:[#allocation32_spill] sm:$0xff]  ;;  %v11094_v56 = vld [vmem:[#allocation65_spill] sm:$0xff]  ;;  %v11096_v50 = vld [vmem:[#allocation347_spill] sm:$0xff] }
 0x901   : > { %v1887_v13 = vsel %vm1877_vm11, %v11093_v10, %v1815_v62  ;;  %vm2111_vm13 = vcmp.eq.s32.totalorder %v11094_v56, %v5109_v7  ;;  %v11095_v19 = vld [vmem:[#allocation69_spill] sm:$0xff]  ;;  %v1976_v48 = vsel %vm1966_vm12, %v11096_v50, %v1904_v4  ;;  %v11098_v45 = vld [vmem:[#allocation331_spill] sm:$0xff]  ;;  %v11100_v2 = vld [vmem:[#allocation66_spill] sm:$0xff] }
 0x902   : > { %vm2147_vm15 = vcmp.eq.s32.totalorder %v11095_v19, %v5109_v7  ;;  %v11097_v49 = vld [vmem:[#allocation341_spill] sm:$0xff]  ;;  %v1905_v22 = vsel %vm1895_vm9, %v11098_v45, %v1833_v1  ;;  %v11099_v62 = vld [vmem:[#allocation27_spill] sm:$0xff]  ;;  %vm2128_vm11 = vcmp.eq.s32.totalorder %v11100_v2, %v5109_v7  ;;  %v11109_v45 = vld [vmem:[#allocation42_spill] sm:$0xff] }
 0x903   : > { %v1941_v47 = vsel %vm1931_vm2, %v11097_v49, %v1869_v35  ;;  %v1851_v53 = vsel %vm1841_vm1, %v11099_v62, %v1779_v39  ;;  %v11101_v4 = vld [vmem:[#allocation71_spill] sm:$0xff]  ;;  %v11104_v35 = vld [vmem:[#allocation344_spill] sm:$0xff]  ;;  %v11106_v39 = vld [vmem:[#allocation357_spill] sm:$0xff]  ;;  %v1959_v62 = vsel %vm1949_vm4, %v11109_v45, %v1887_v13 }
 0x904   : > { %v11102_v36 = vld [vmem:[#allocation351_spill] sm:$0xff]  ;;  %v1958_v20 = vsel %vm1948_vm14, %v11104_v35, %v1886_v3  ;;  %v11107_v50 = vld [vmem:[#allocation361_spill] sm:$0xff]  ;;  %v11112_v27 = vld [vmem:[#allocation366_spill] sm:$0xff] }
 0x905   : > { %vm1985_vm12 = vcmp.eq.s32.totalorder %v11102_v36, %v5109_v7  ;;  %v11103_v59 = vld [vmem:[#allocation355_spill] sm:$0xff]  ;;  %vm2021_vm9 = vcmp.eq.s32.totalorder %v11107_v50, %v5109_v7  ;;  %v11108_v49 = vld [vmem:[#allocation365_spill] sm:$0xff]  ;;  %v11116_v29 = vld [vmem:[#allocation36_spill] sm:$0xff] }
 0x906   : > { %vm2002_vm2 = vcmp.eq.s32.totalorder %v11103_v59, %v5109_v7  ;;  %v11105_v1 = vld [vmem:[#allocation335_spill] sm:$0xff]  ;;  %vm2038_vm1 = vcmp.eq.s32.totalorder %v11108_v49, %v5109_v7  ;;  %v11111_v3 = vld [vmem:[#allocation81_spill] sm:$0xff]  ;;  %v1923_v13 = vsel %vm1913_vm7, %v11116_v29, %v1851_v53  ;;  %v11119_v14 = vld [vmem:[#allocation82_spill] sm:$0xff]  ;;  %vm11123_vm7 = vcmp.eq.s32.totalorder %v11064_v30, %v5109_v7 }
 0x907   : > { %v1922_v18 = vsel %vm1912_vm10, %v11105_v1, %v1850_v5  ;;  %v2012_v10 = vsel %vm2002_vm2, %v11106_v39, %v1940_v38  ;;  %v11110_v33 = vld [vmem:[#allocation75_spill] sm:$0xff]  ;;  %vm2219_vm0 = vcmp.eq.s32.totalorder %v11111_v3, %v5109_v7  ;;  %v2048_v5 = vsel %vm2038_vm1, %v11112_v27, %v1976_v48  ;;  %v11114_v35 = vld [vmem:[#allocation349_spill] sm:$0xff]  ;;  %v8477_v39 = vld [vmem:[#allocation2 + $0x18] sm:$0x3]  ;;  %v8480_v48 = vpop.permute.xlu1 %3680 }
 0x908   : > { %v11113_v38 = vld [vmem:[#allocation359_spill] sm:$0xff]  ;;  %vm11115_vm10 = vcmp.eq.s32.totalorder %v11055_v46, %v5109_v7  ;;  %3887 = vperm.xlu1 %4767, %v8477_v39   ;;  %11117 = vst [vmem:[#allocation14_spill] sm:$0xff] %v8480_v48  ;;  %v11118_v49 = vld [vmem:[#allocation77_spill] sm:$0xff]  ;;  %v11120_v46 = vld [vmem:[#allocation370_spill] sm:$0xff] }
 0x909   : > { %v2013_v59 = vsel %vm2003_vm3, %v11113_v38, %v1941_v47  ;;  %v1977_v1 = vsel %vm11115_vm10, %v11114_v35, %v1905_v22  ;;  %vm2057_vm2 = vcmp.eq.s32.totalorder %v11120_v46, %v5109_v7  ;;  %v11121_v47 = vld [vmem:[#allocation374_spill] sm:$0xff]  ;;  %v11122_v42 = vld [vmem:[#allocation363_spill] sm:$0xff]  ;;  %v11124_v53 = vld [vmem:[#allocation353_spill] sm:$0xff]  ;;  %vm11125_vm10 = vcmp.eq.s32.totalorder %v11063_v51, %v5109_v7 }
 0x90a   : > { %vm2074_vm1 = vcmp.eq.s32.totalorder %v11121_v47, %v5109_v7  ;;  %v2030_v22 = vsel %vm11123_vm7, %v11122_v42, %v1958_v20  ;;  %v1994_v45 = vsel %vm11125_vm10, %v11124_v53, %v1922_v18  ;;  %v11126_v27 = vld [vmem:[#allocation376_spill] sm:$0xff]  ;;  %v11129_v26 = vld [vmem:[#allocation51_spill] sm:$0xff]  ;;  %v11130_v30 = vld [vmem:[#allocation85_spill] sm:$0xff] }
 0x90b   : > { %v2084_v38 = vsel %vm2074_vm1, %v11126_v27, %v2012_v10  ;;  %v11127_v35 = vld [vmem:[#allocation380_spill] sm:$0xff]  ;;  %v2031_v47 = vsel %vm2021_vm9, %v11129_v26, %v1959_v62  ;;  %vm2255_vm7 = vcmp.eq.s32.totalorder %v11130_v30, %v5109_v7  ;;  %v11131_v20 = vld [vmem:[#allocation91_spill] sm:$0xff]  ;;  %v11132_v51 = vld [vmem:[#allocation386_spill] sm:$0xff]  ;;  %vm11135_vm1 = vcmp.eq.s32.totalorder %v11075_v40, %v5109_v7 }
 0x90c   : > { %vm2093_vm4 = vcmp.eq.s32.totalorder %v11127_v35, %v5109_v7  ;;  %v11128_v29 = vld [vmem:[#allocation384_spill] sm:$0xff]  ;;  %vm2291_vm14 = vcmp.eq.s32.totalorder %v11131_v20, %v5109_v7  ;;  %v11133_v10 = vld [vmem:[#allocation378_spill] sm:$0xff]  ;;  %v11137_v62 = vld [vmem:[#allocation87_spill] sm:$0xff] }
 0x90d   : > { %vm2110_vm3 = vcmp.eq.s32.totalorder %v11128_v29, %v5109_v7  ;;  %v2085_v42 = vsel %vm2075_vm6, %v11133_v10, %v2013_v59  ;;  %v11134_v53 = vld [vmem:[#allocation368_spill] sm:$0xff]  ;;  %vm2272_vm9 = vcmp.eq.s32.totalorder %v11137_v62, %v5109_v7  ;;  %v11139_v29 = vld [vmem:[#allocation389_spill] sm:$0xff]  ;;  %v11141_v59 = vld [vmem:[#allocation382_spill] sm:$0xff] }
 0x90e   : > { %v2120_v18 = vsel %vm2110_vm3, %v11132_v51, %v2048_v5  ;;  %v2049_v27 = vsel %vm11135_vm1, %v11134_v53, %v1977_v1  ;;  %v11136_v50 = vld [vmem:[#allocation48_spill] sm:$0xff]  ;;  %v11138_v5 = vld [vmem:[#allocation93_spill] sm:$0xff]  ;;  %vm2129_vm10 = vcmp.eq.s32.totalorder %v11139_v29, %v5109_v7  ;;  %v2102_v40 = vsel %vm2092_vm5, %v11141_v59, %v2030_v22  ;;  %v8541_v51 = vpop.permute.xlu1 %3685  ;;  %v11145_v10 = vld [vmem:[#allocation395_spill] sm:$0xff] }
 0x90f   : > { %v1995_v26 = vsel %vm1985_vm12, %v11136_v50, %v1923_v13  ;;  %vm2308_vm3 = vcmp.eq.s32.totalorder %v11138_v5, %v5109_v7  ;;  %v11140_v21 = vld [vmem:[#allocation393_spill] sm:$0xff]  ;;  %v11142_v1 = vld [vmem:[#allocation372_spill] sm:$0xff]  ;;  %v11143_v13 = vmov 57   ;;  %11144 = vst [vmem:[#allocation28_spill] sm:$0xff] %v8541_v51  ;;  %v11146_v50 = vld [vmem:[#allocation399_spill] sm:$0xff] }
 0x910   : > { %vm2146_vm6 = vcmp.eq.s32.totalorder %v11140_v21, %v5109_v7  ;;  %v2066_v36 = vsel %vm2056_vm8, %v11142_v1, %v1994_v45  ;;  %4769 = vset.pattern.permute.xlu1 %v11143_v13  ;;  %vm2165_vm12 = vcmp.eq.s32.totalorder %v11146_v50, %v5109_v7  ;;  %v11147_v21 = vld [vmem:[#allocation403_spill] sm:$0xff]  ;;  %v11148_v48 = vld [vmem:[#allocation64_spill] sm:$0xff]  ;;  %v11149_v12 = vld [vmem:[#allocation97_spill] sm:$0xff] }
 0x911   : > { %v2156_v53 = vsel %vm2146_vm6, %v11145_v10, %v2084_v38  ;;  %vm2182_vm1 = vcmp.eq.s32.totalorder %v11147_v21, %v5109_v7  ;;  %v2103_v61 = vsel %vm2093_vm4, %v11148_v48, %v2031_v47  ;;  %v8552_v22 = vld [vmem:[#allocation3 + $0x18] sm:$0x3]  ;;  %vm2327_vm8 = vcmp.eq.s32.totalorder %v11149_v12, %v5109_v7  ;;  %v11150_v45 = vld [vmem:[#allocation102_spill] sm:$0xff]  ;;  %v11151_v38 = vld [vmem:[#allocation405_spill] sm:$0xff] }
 0x912   : > { %3896 = vperm.xlu1 %4769, %v8552_v22   ;;  %vm2363_vm5 = vcmp.eq.s32.totalorder %v11150_v45, %v5109_v7  ;;  %v2192_v59 = vsel %vm2182_vm1, %v11151_v38, %v2120_v18  ;;  %v11152_v1 = vld [vmem:[#allocation388_spill] sm:$0xff]  ;;  %v11153_v10 = vld [vmem:[#allocation58_spill] sm:$0xff]  ;;  %v11154_v35 = vld [vmem:[#allocation397_spill] sm:$0xff] }
 0x913   : > { %v2121_v13 = vsel %vm2111_vm13, %v11152_v1, %v2049_v27  ;;  %v2067_v48 = vsel %vm2057_vm2, %v11153_v10, %v1995_v26  ;;  %v2157_v47 = vsel %vm2147_vm15, %v11154_v35, %v2085_v42  ;;  %v11155_v21 = vld [vmem:[#allocation98_spill] sm:$0xff]  ;;  %v11156_v18 = vld [vmem:[#allocation104_spill] sm:$0xff]  ;;  %v11157_v38 = vld [vmem:[#allocation409_spill] sm:$0xff]  ;;  %vm11161_vm15 = vcmp.eq.s32.totalorder %v11101_v4, %v5109_v7 }
 0x914   : > { %vm2201_vm1 = vcmp.eq.s32.totalorder %v11157_v38, %v5109_v7  ;;  %v11158_v56 = vld [vmem:[#allocation412_spill] sm:$0xff]  ;;  %v11159_v27 = vld [vmem:[#allocation391_spill] sm:$0xff]  ;;  %v11160_v26 = vld [vmem:[#allocation401_spill] sm:$0xff] }
 0x915   : > { %vm2218_vm13 = vcmp.eq.s32.totalorder %v11158_v56, %v5109_v7  ;;  %v2138_v46 = vsel %vm2128_vm11, %v11159_v27, %v2066_v36  ;;  %v2174_v19 = vsel %vm11161_vm15, %v11160_v26, %v2102_v40  ;;  %v11162_v42 = vld [vmem:[#allocation414_spill] sm:$0xff]  ;;  %v11164_v35 = vld [vmem:[#allocation423_spill] sm:$0xff]  ;;  %v11165_v51 = vld [vmem:[#allocation73_spill] sm:$0xff]  ;;  %vm11179_vm15 = vcmp.eq.s32.totalorder %v11119_v14, %v5109_v7 }
 0x916   : > { %v2228_v1 = vsel %vm2218_vm13, %v11162_v42, %v2156_v53  ;;  %v11163_v10 = vld [vmem:[#allocation418_spill] sm:$0xff]  ;;  %vm2254_vm4 = vcmp.eq.s32.totalorder %v11164_v35, %v5109_v7  ;;  %v2175_v56 = vsel %vm2165_vm12, %v11165_v51, %v2103_v61  ;;  %v11166_v2 = vld [vmem:[#allocation108_spill] sm:$0xff]  ;;  %v11167_v36 = vld [vmem:[#allocation115_spill] sm:$0xff]  ;;  %vm11172_vm12 = vcmp.eq.s32.totalorder %v11110_v33, %v5109_v7  ;;  %3901 = vperm.xlu1 %4769, %v8161_v25   ;;  %v8615_v61 = vpop.permute.xlu1 %3695 }
 0x917   : > { %vm2237_vm2 = vcmp.eq.s32.totalorder %v11163_v10, %v5109_v7  ;;  %vm2435_vm6 = vcmp.eq.s32.totalorder %v11167_v36, %v5109_v7  ;;  %v11168_v4 = vld [vmem:[#allocation424_spill] sm:$0xff]  ;;  %v11169_v53 = vld [vmem:[#allocation67_spill] sm:$0xff]  ;;  %11173 = vst [vmem:[#allocation121_spill] sm:$0xff] %v8615_v61  ;;  %v11177_v3 = vld [vmem:[#allocation433_spill] sm:$0xff] }
 0x918   : > { %v2264_v40 = vsel %vm2254_vm4, %v11168_v4, %v2192_v59  ;;  %v2139_v27 = vsel %vm2129_vm10, %v11169_v53, %v2067_v48  ;;  %v11170_v26 = vld [vmem:[#allocation416_spill] sm:$0xff]  ;;  %v11171_v50 = vld [vmem:[#allocation407_spill] sm:$0xff]  ;;  %v11176_v48 = vld [vmem:[#allocation429_spill] sm:$0xff] }
 0x919   : > { %v2229_v42 = vsel %vm2219_vm0, %v11170_v26, %v2157_v47  ;;  %v2193_v51 = vsel %vm11172_vm12, %v11171_v50, %v2121_v13  ;;  %v11174_v59 = vld [vmem:[#allocation111_spill] sm:$0xff]  ;;  %v11175_v29 = vld [vmem:[#allocation116_spill] sm:$0xff]  ;;  %vm2273_vm13 = vcmp.eq.s32.totalorder %v11176_v48, %v5109_v7  ;;  %vm2290_vm0 = vcmp.eq.s32.totalorder %v11177_v3, %v5109_v7  ;;  %v11182_v4 = vld [vmem:[#allocation434_spill] sm:$0xff] }
 0x91a   : > { %v11178_v47 = vld [vmem:[#allocation420_spill] sm:$0xff]  ;;  %v11180_v13 = vld [vmem:[#allocation411_spill] sm:$0xff]  ;;  %vm11181_vm12 = vcmp.eq.s32.totalorder %v11118_v49, %v5109_v7  ;;  %v2300_v53 = vsel %vm2290_vm0, %v11182_v4, %v2228_v1  ;;  %v11183_v26 = vld [vmem:[#allocation438_spill] sm:$0xff] }
 0x91b   : > { %v2246_v33 = vsel %vm11179_vm15, %v11178_v47, %v2174_v19  ;;  %v2210_v35 = vsel %vm11181_vm12, %v11180_v13, %v2138_v46  ;;  %vm2309_vm4 = vcmp.eq.s32.totalorder %v11183_v26, %v5109_v7  ;;  %v11184_v50 = vld [vmem:[#allocation442_spill] sm:$0xff]  ;;  %v11185_v61 = vld [vmem:[#allocation83_spill] sm:$0xff]  ;;  %v11186_v14 = vld [vmem:[#allocation120_spill] sm:$0xff]  ;;  %vm2453_vm12 = vcmp.eq.s32.totalorder %v7179_v52, %v5109_v7 }
 0x91c   : > { %vm2326_vm10 = vcmp.eq.s32.totalorder %v11184_v50, %v5109_v7  ;;  %v2247_v3 = vsel %vm2237_vm2, %v11185_v61, %v2175_v56  ;;  %vm2471_vm15 = vcmp.eq.s32.totalorder %v11186_v14, %v5109_v7  ;;  %v11187_v19 = vld [vmem:[#allocation126_spill] sm:$0xff]  ;;  %v11188_v49 = vld [vmem:[#allocation444_spill] sm:$0xff]  ;;  %v11189_v1 = vld [vmem:[#allocation79_spill] sm:$0xff] }
 0x91d   : > { %vm2507_vm11 = vcmp.eq.s32.totalorder %v11187_v19, %v5109_v7  ;;  %v2336_v46 = vsel %vm2326_vm10, %v11188_v49, %v2264_v40  ;;  %v2211_v47 = vsel %vm2201_vm1, %v11189_v1, %v2139_v27  ;;  %v11190_v13 = vld [vmem:[#allocation435_spill] sm:$0xff]  ;;  %v11191_v10 = vld [vmem:[#allocation426_spill] sm:$0xff]  ;;  %v11193_v40 = vld [vmem:[#allocation128_spill] sm:$0xff]  ;;  %v8676_v49 = vpop.permute.xlu1 %3703 }
 0x91e   : > { %v2301_v4 = vsel %vm2291_vm14, %v11190_v13, %v2229_v42  ;;  %v2265_v56 = vsel %vm2255_vm7, %v11191_v10, %v2193_v51  ;;  %v11192_v61 = vld [vmem:[#allocation122_spill] sm:$0xff]  ;;  %vm2524_vm10 = vcmp.eq.s32.totalorder %v11193_v40, %v5109_v7  ;;  %v11194_v50 = vld [vmem:[#allocation448_spill] sm:$0xff]  ;;  %v11198_v51 = vmov 58   ;;  %v11200_v10 = vld [vmem:[#allocation457_spill] sm:$0xff] }
 0x91f   : > { %vm2488_vm2 = vcmp.eq.s32.totalorder %v11192_v61, %v5109_v7  ;;  %vm2345_vm0 = vcmp.eq.s32.totalorder %v11194_v50, %v5109_v7  ;;  %v11195_v38 = vld [vmem:[#allocation452_spill] sm:$0xff]  ;;  %v11197_v42 = vld [vmem:[#allocation430_spill] sm:$0xff]  ;;  %4771 = vset.pattern.permute.xlu1 %v11198_v51  ;;  %vm2381_vm14 = vcmp.eq.s32.totalorder %v11200_v10, %v5109_v7  ;;  %v11202_v17 = vld [vmem:[#allocation95_spill] sm:$0xff] }
 0x920   : > { %vm2362_vm1 = vcmp.eq.s32.totalorder %v11195_v38, %v5109_v7  ;;  %v11196_v27 = vld [vmem:[#allocation440_spill] sm:$0xff]  ;;  %v2282_v30 = vsel %vm2272_vm9, %v11197_v42, %v2210_v35  ;;  %v11199_v1 = vld [vmem:[#allocation454_spill] sm:$0xff]  ;;  %v11201_v38 = vld [vmem:[#allocation461_spill] sm:$0xff]  ;;  %v2319_v5 = vsel %vm2309_vm4, %v11202_v17, %v2247_v3  ;;  %vm2542_vm4 = vcmp.eq.s32.totalorder %v7555_v32, %v5109_v7 }
 0x921   : > { %v2318_v20 = vsel %vm2308_vm3, %v11196_v27, %v2246_v33  ;;  %v2372_v13 = vsel %vm2362_vm1, %v11199_v1, %v2300_v53  ;;  %vm2398_vm7 = vcmp.eq.s32.totalorder %v11201_v38, %v5109_v7  ;;  %v8687_v33 = vld [vmem:[#allocation3 + $0x10] sm:$0xff]  ;;  %v11203_v62 = vld [vmem:[#allocation132_spill] sm:$0xff]  ;;  %v11204_v35 = vld [vmem:[#allocation137_spill] sm:$0xff]  ;;  %vm2470_vm1 = vcmp.eq.s32.totalorder %v7261_v34, %v5109_v7 }
 0x922   : > { %3911 = vperm.xlu1 %4771, %v8687_v33   ;;  %vm2543_vm9 = vcmp.eq.s32.totalorder %v11203_v62, %v5109_v7  ;;  %vm2579_vm3 = vcmp.eq.s32.totalorder %v11204_v35, %v5109_v7  ;;  %v11205_v53 = vld [vmem:[#allocation463_spill] sm:$0xff]  ;;  %v11206_v42 = vld [vmem:[#allocation456_spill] sm:$0xff]  ;;  %v11207_v1 = vld [vmem:[#allocation446_spill] sm:$0xff] }
 0x923   : > { %v2408_v27 = vsel %vm2398_vm7, %v11205_v53, %v2336_v46  ;;  %v2373_v51 = vsel %vm2363_vm5, %v11206_v42, %v2301_v4  ;;  %v2337_v17 = vsel %vm2327_vm8, %v11207_v1, %v2265_v56  ;;  %v11208_v26 = vld [vmem:[#allocation89_spill] sm:$0xff]  ;;  %v11209_v38 = vld [vmem:[#allocation134_spill] sm:$0xff]  ;;  %v11210_v46 = vld [vmem:[#allocation139_spill] sm:$0xff]  ;;  %vm2434_vm8 = vcmp.eq.s32.totalorder %v7138_v8, %v5109_v7 }
 0x924   : > { %v2283_v3 = vsel %vm2273_vm13, %v11208_v26, %v2211_v47  ;;  %v11211_v53 = vld [vmem:[#allocation150_spill] sm:$0xff]  ;;  %v11212_v45 = vld [vmem:[#allocation467_spill] sm:$0xff]  ;;  %vm11214_vm7 = vcmp.eq.s32.totalorder %v11156_v18, %v5109_v7  ;;  %vm11216_vm13 = vcmp.eq.s32.totalorder %v11155_v21, %v5109_v7  ;;  %v11217_v56 = vld [vmem:[#allocation161_spill] sm:$0xff]  ;;  %v2444_v42 = vsel %vm2434_vm8, %v7144_v41, %v2372_v13 }
 0x925   : > { %vm2417_vm5 = vcmp.eq.s32.totalorder %v11212_v45, %v5109_v7  ;;  %v11213_v12 = vld [vmem:[#allocation459_spill] sm:$0xff]  ;;  %v11215_v47 = vld [vmem:[#allocation450_spill] sm:$0xff]  ;;  %v11219_v21 = vld [vmem:[#allocation144_spill] sm:$0xff]  ;;  %v2480_v41 = vsel %vm2470_vm1, %v7304_v43, %v2408_v27  ;;  %v2445_v34 = vsel %vm2435_vm6, %v7157_v63, %v2373_v51  ;;  %vm11222_vm8 = vcmp.eq.s32.totalorder %v11166_v2, %v5109_v7 }
 0x926   : > { %v2390_v48 = vsel %vm11214_vm7, %v11213_v12, %v2318_v20  ;;  %v2354_v4 = vsel %vm11216_vm13, %v11215_v47, %v2282_v30  ;;  %v11218_v8 = vld [vmem:[#allocation106_spill] sm:$0xff]  ;;  %v8736_v20 = vpop.permute.xlu1 %3707  ;;  %v11220_v30 = vld [vmem:[#allocation172_spill] sm:$0xff]  ;;  %v11221_v13 = vld [vmem:[#allocation465_spill] sm:$0xff]  ;;  %3919 = vperm.xlu1 %4771, %v8161_v25   ;;  %vm2489_vm6 = vcmp.eq.s32.totalorder %v7369_v15, %v5109_v7  ;;  %vm2506_vm13 = vcmp.eq.s32.totalorder %v7435_v23, %v5109_v7 }
 0x927   : > { %v2391_v18 = vsel %vm2381_vm14, %v11218_v8, %v2319_v5  ;;  %v2409_v10 = vsel %vm11222_vm8, %v11221_v13, %v2337_v17  ;;  %v11223_v5 = vld [vmem:[#allocation100_spill] sm:$0xff]  ;;  %v11224_v26 = vld [vmem:[#allocation146_spill] sm:$0xff]  ;;  %v11225_v43 = vld [vmem:[#allocation189_spill] sm:$0xff]  ;;  %vm11226_vm8 = vcmp.eq.s32.totalorder %v11175_v29, %v5109_v7  ;;  %v2516_v51 = vsel %vm2506_vm13, %v7470_v54, %v2444_v42 }
 0x928   : > { %v2355_v1 = vsel %vm2345_vm0, %v11223_v5, %v2283_v3  ;;  %v2462_v63 = vsel %vm11226_vm8, %v7211_v6, %v2390_v48  ;;  %v11227_v2 = vld [vmem:[#allocation469_spill] sm:$0xff]  ;;  %vm11228_vm0 = vcmp.eq.s32.totalorder %v11174_v59, %v5109_v7  ;;  %v11229_v50 = vld [vmem:[#allocation152_spill] sm:$0xff]  ;;  %v11230_v27 = vld [vmem:[#allocation207_spill] sm:$0xff]  ;;  %vm2525_vm7 = vcmp.eq.s32.totalorder %v7540_v24, %v5109_v7 }
 0x929   : > { %v2426_v36 = vsel %vm11228_vm0, %v11227_v2, %v2354_v4  ;;  %vm2668_vm14 = vcmp.eq.s32.totalorder %v11229_v50, %v5109_v7  ;;  %vm2945_vm1 = vcmp.eq.s32.totalorder %v11230_v27, %v5109_v7  ;;  %v11231_v6 = vld [vmem:[#allocation118_spill] sm:$0xff]  ;;  %v11232_v59 = vld [vmem:[#allocation227_spill] sm:$0xff]  ;;  %v2552_v29 = vsel %vm2542_vm4, %v7558_v37, %v2480_v41  ;;  %v11233_v17 = vld [vmem:[#allocation112_spill] sm:$0xff] }
 0x92a   : > { %v2463_v23 = vsel %vm2453_vm12, %v11231_v6, %v2391_v18  ;;  %vm3017_vm8 = vcmp.eq.s32.totalorder %v11232_v59, %v5109_v7  ;;  %v2517_v54 = vsel %vm2507_vm11, %v7511_v31, %v2445_v34  ;;  %v2481_v32 = vsel %vm2471_vm15, %v7328_v57, %v2409_v10  ;;  %v11234_v3 = vld [vmem:[#allocation155_spill] sm:$0xff]  ;;  %3923 = vperm.xlu1 %4771, %v8477_v39   ;;  %v8817_v14 = vpop.permute.xlu1 %3716  ;;  %v11236_v19 = vld [vmem:[#allocation157_spill] sm:$0xff]  ;;  %v11242_v24 = vld [vmem:[#allocation124_spill] sm:$0xff] }
 0x92b   : > { %v2427_v52 = vsel %vm2417_vm5, %v11233_v17, %v2355_v1  ;;  %vm2687_vm12 = vcmp.eq.s32.totalorder %v11234_v3, %v5109_v7  ;;  %v11235_v37 = vld [vmem:[#allocation247_spill] sm:$0xff]  ;;  %vm2561_vm13 = vcmp.eq.s32.totalorder %v7565_v0, %v5109_v7  ;;  %vm2578_vm11 = vcmp.eq.s32.totalorder %v7572_v9, %v5109_v7  ;;  %v11237_v45 = vld [vmem:[#allocation269_spill] sm:$0xff]  ;;  %v11244_v42 = vld [vmem:[#allocation156_spill] sm:$0xff] }
 0x92c   : > { %vm3089_vm4 = vcmp.eq.s32.totalorder %v11235_v37, %v5109_v7  ;;  %v2534_v57 = vsel %vm2524_vm10, %v7551_v55, %v2462_v63  ;;  %v2498_v31 = vsel %vm2488_vm2, %v7390_v28, %v2426_v36  ;;  %vm3161_vm5 = vcmp.eq.s32.totalorder %v11237_v45, %v5109_v7  ;;  %v11238_v55 = vld [vmem:[#allocation130_spill] sm:$0xff]  ;;  %v11239_v61 = vld [vmem:[#allocation163_spill] sm:$0xff]  ;;  %v11243_v4 = vld [vmem:[#allocation313_spill] sm:$0xff] }
 0x92d   : > { %v2588_v9 = vsel %vm2578_vm11, %v7575_v16, %v2516_v51  ;;  %vm2597_vm10 = vcmp.eq.s32.totalorder %v7582_v58, %v5109_v7  ;;  %vm2614_vm0 = vcmp.eq.s32.totalorder %v7589_v44, %v5109_v7  ;;  %v2535_v28 = vsel %vm2525_vm7, %v11238_v55, %v2463_v23  ;;  %v11240_v40 = vld [vmem:[#allocation291_spill] sm:$0xff]  ;;  %v11247_v35 = vld [vmem:[#allocation117_spill] sm:$0xff]  ;;  %v11249_v8 = vld [vmem:[#allocation392_spill] sm:$0xff] }
 0x92e   : > { %vm2740_vm2 = vcmp.eq.s32.totalorder %v11239_v61, %v5109_v7  ;;  %vm3233_vm15 = vcmp.eq.s32.totalorder %v11240_v40, %v5109_v7  ;;  %v2624_v12 = vsel %vm2614_vm0, %v7592_v60, %v2552_v29  ;;  %v2589_v16 = vsel %vm2579_vm3, %v7578_v11, %v2517_v54  ;;  %v11241_v48 = vld [vmem:[#allocation119_spill] sm:$0xff]  ;;  %v11246_v11 = vld [vmem:[#allocation437_spill] sm:$0xff]  ;;  %v11251_v18 = vld [vmem:[#allocation334_spill] sm:$0xff]  ;;  %v8880_v5 = vpop.permute.xlu1 %3721 }
 0x92f   : > { %v2553_v44 = vsel %vm2543_vm9, %v11241_v48, %v2481_v32  ;;  %v2499_v47 = vsel %vm2489_vm6, %v11242_v24, %v2427_v52  ;;  %vm11245_vm11 = vcmp.eq.s32.totalorder %v11211_v53, %v5109_v7  ;;  %vm2669_vm3 = vcmp.eq.s32.totalorder %v11246_v11, %v5109_v7  ;;  %v11252_v41 = vld [vmem:[#allocation138_spill] sm:$0xff]  ;;  %v11253_v53 = vld [vmem:[#allocation136_spill] sm:$0xff]  ;;  %v11254_v34 = vld [vmem:[#allocation141_spill] sm:$0xff] }
 0x930   : > { %v2661_v60 = vsel %vm11245_vm11, %v11244_v42, %v2589_v16  ;;  %vm11248_vm9 = vcmp.eq.s32.totalorder %v11210_v46, %v5109_v7  ;;  %vm11250_vm6 = vcmp.eq.s32.totalorder %v11209_v38, %v5109_v7  ;;  %vm2633_vm7 = vcmp.eq.s32.totalorder %v11252_v41, %v5109_v7  ;;  %v11255_v13 = vld [vmem:[#allocation210_spill] sm:$0xff]  ;;  %v11258_v1 = vld [vmem:[#allocation175_spill] sm:$0xff]  ;;  %v11259_v63 = vld [vmem:[#allocation356_spill] sm:$0xff] }
 0x931   : > { %v2606_v62 = vsel %vm11248_vm9, %v11247_v35, %v2534_v57  ;;  %v2570_v15 = vsel %vm11250_vm6, %v11249_v8, %v2498_v31  ;;  %vm2650_vm11 = vcmp.eq.s32.totalorder %v11253_v53, %v5109_v7  ;;  %v2607_v46 = vsel %vm2597_vm10, %v11254_v34, %v2535_v28  ;;  %v11260_v2 = vld [vmem:[#allocation304_spill] sm:$0xff]  ;;  %v11261_v58 = vld [vmem:[#allocation283_spill] sm:$0xff]  ;;  %v11266_v54 = vld [vmem:[#allocation194_spill] sm:$0xff] }
 0x932   : > { %vm11256_vm9 = vcmp.eq.s32.totalorder %v11217_v56, %v5109_v7  ;;  %v11257_v10 = vmov 59   ;;  %vm2812_vm6 = vcmp.eq.s32.totalorder %v11258_v1, %v5109_v7  ;;  %v8887_v36 = vsel %vm2650_vm11, %v11260_v2, %v2588_v9  ;;  %v11263_v56 = vld [vmem:[#allocation135_spill] sm:$0xff]  ;;  %v11269_v0 = vld [vmem:[#allocation348_spill] sm:$0xff]  ;;  %v11274_v9 = vld [vmem:[#allocation213_spill] sm:$0xff] }
 0x933   : > { %v2733_v38 = vsel %vm11256_vm9, %v11255_v13, %v2661_v60  ;;  %4773 = vset.pattern.permute.xlu1 %v11257_v10  ;;  %vm11262_vm10 = vcmp.eq.s32.totalorder %v11219_v21, %v5109_v7  ;;  %v2571_v6 = vsel %vm2561_vm13, %v11263_v56, %v2499_v47  ;;  %v11264_v23 = vld [vmem:[#allocation439_spill] sm:$0xff]  ;;  %vm11265_vm9 = vcmp.eq.s32.totalorder %v11220_v30, %v5109_v7  ;;  %v11268_v21 = vld [vmem:[#allocation153_spill] sm:$0xff]  ;;  %v11275_v55 = vld [vmem:[#allocation402_spill] sm:$0xff] }
 0x934   : > { %v2625_v51 = vsel %vm11262_vm10, %v11261_v58, %v2553_v44  ;;  %v2805_v29 = vsel %vm11265_vm9, %v11264_v23, %v2733_v38  ;;  %3932 = vperm.xlu1 %4773, %v8552_v22   ;;  %v11267_v32 = vld [vmem:[#allocation379_spill] sm:$0xff]  ;;  %v2679_v17 = vsel %vm2669_vm3, %v11268_v21, %v2607_v46  ;;  %vm2705_vm13 = vcmp.eq.s32.totalorder %v11269_v0, %v5109_v7  ;;  %v11276_v28 = vld [vmem:[#allocation326_spill] sm:$0xff]  ;;  %v11279_v44 = vld [vmem:[#allocation377_spill] sm:$0xff]  ;;  %v8976_v38 = vpop.permute.xlu1 %3731 }
 0x935   : > { %v11270_v52 = vld [vmem:[#allocation415_spill] sm:$0xff]  ;;  %vm11271_vm10 = vcmp.eq.s32.totalorder %v11224_v26, %v5109_v7  ;;  %vm11273_vm9 = vcmp.eq.s32.totalorder %v11225_v43, %v5109_v7  ;;  %vm2962_vm0 = vcmp.eq.s32.totalorder %v11274_v9, %v5109_v7  ;;  %v2678_v16 = vsel %vm2668_vm14, %v11276_v28, %v2606_v62  ;;  %v11277_v48 = vld [vmem:[#allocation174_spill] sm:$0xff]  ;;  %v11278_v26 = vld [vmem:[#allocation192_spill] sm:$0xff] }
 0x936   : > { %v2642_v30 = vsel %vm11271_vm10, %v11270_v52, %v2570_v15  ;;  %v11272_v57 = vld [vmem:[#allocation55_spill] sm:$0xff]  ;;  %vm2686_vm3 = vcmp.eq.s32.totalorder %v11277_v48, %v5109_v7  ;;  %vm2741_vm10 = vcmp.eq.s32.totalorder %v11278_v26, %v5109_v7  ;;  %v11280_v24 = vld [vmem:[#allocation233_spill] sm:$0xff]  ;;  %v11282_v42 = vld [vmem:[#allocation460_spill] sm:$0xff] }
 0x937   : > { %v2883_v31 = vsel %vm11273_vm9, %v11272_v57, %v2805_v29  ;;  %vm3034_vm9 = vcmp.eq.s32.totalorder %v11280_v24, %v5109_v7  ;;  %v11281_v47 = vld [vmem:[#allocation425_spill] sm:$0xff]  ;;  %v8941_v50 = vsel %vm2686_vm3, %v11282_v42, %v2624_v12  ;;  %v11283_v60 = vld [vmem:[#allocation148_spill] sm:$0xff]  ;;  %v11287_v15 = vld [vmem:[#allocation447_spill] sm:$0xff] }
 0x938   : > { %v2955_v43 = vsel %vm2945_vm1, %v11279_v44, %v2883_v31  ;;  %vm3665_vm11 = vcmp.eq.s32.totalorder %v11281_v47, %v5109_v7  ;;  %v2643_v11 = vsel %vm2633_vm7, %v11283_v60, %v2571_v6  ;;  %v11284_v35 = vld [vmem:[#allocation225_spill] sm:$0xff]  ;;  %vm3737_vm3 = vcmp.eq.s32.totalorder %v11287_v15, %v5109_v7  ;;  %v11288_v12 = vld [vmem:[#allocation154_spill] sm:$0xff]  ;;  %v11289_v53 = vld [vmem:[#allocation159_spill] sm:$0xff]  ;;  %3937 = vperm.xlu1 %4773, %v8161_v25  }
 0x939   : > { %vm2813_vm14 = vcmp.eq.s32.totalorder %v11284_v35, %v5109_v7  ;;  %v11285_v62 = vld [vmem:[#allocation249_spill] sm:$0xff]  ;;  %v8961_v41 = vsel %vm2687_vm12, %v11288_v12, %v2625_v51  ;;  %v8967_v34 = vsel %vm2705_vm13, %v11289_v53, %v2643_v11  ;;  %v11290_v59 = vld [vmem:[#allocation310_spill] sm:$0xff]  ;;  %v11292_v3 = vld [vmem:[#allocation275_spill] sm:$0xff]  ;;  %vm11294_vm7 = vcmp.eq.s32.totalorder %v11236_v19, %v5109_v7 }
 0x93a   : > { %v3027_v27 = vsel %vm3017_vm8, %v11285_v62, %v2955_v43  ;;  %v11286_v8 = vld [vmem:[#allocation253_spill] sm:$0xff]  ;;  %vm2891_vm8 = vcmp.eq.s32.totalorder %v11290_v59, %v5109_v7  ;;  %v11291_v46 = vld [vmem:[#allocation198_spill] sm:$0xff]  ;;  %vm3178_vm12 = vcmp.eq.s32.totalorder %v11292_v3, %v5109_v7  ;;  %v11298_v23 = vld [vmem:[#allocation167_spill] sm:$0xff]  ;;  %v11316_v62 = vmov 60  }
 0x93b   : > { %vm3106_vm1 = vcmp.eq.s32.totalorder %v11286_v8, %v5109_v7  ;;  %v3099_v13 = vsel %vm3089_vm4, %v11291_v46, %v3027_v27  ;;  %v11293_v10 = vld [vmem:[#allocation193_spill] sm:$0xff]  ;;  %v11297_v56 = vld [vmem:[#allocation358_spill] sm:$0xff]  ;;  %v11306_v61 = vld [vmem:[#allocation195_spill] sm:$0xff] }
 0x93c   : > { %v8984_v2 = vsel %vm11294_vm7, %v11293_v10, %v2642_v30  ;;  %v11295_v58 = vld [vmem:[#allocation165_spill] sm:$0xff]  ;;  %v3171_v6 = vsel %vm3161_vm5, %v11297_v56, %v3099_v13  ;;  %v11300_v29 = vld [vmem:[#allocation394_spill] sm:$0xff]  ;;  %v11308_v48 = vld [vmem:[#allocation184_spill] sm:$0xff]  ;;  %4775 = vset.pattern.permute.xlu1 %v11316_v62 }
 0x93d   : > { %v2751_v51 = vsel %vm2741_vm10, %v11295_v58, %v2679_v17  ;;  %v11296_v37 = vld [vmem:[#allocation41_spill] sm:$0xff]  ;;  %v2750_v21 = vsel %vm2740_vm2, %v11300_v29, %v2678_v16  ;;  %v11301_v17 = vld [vmem:[#allocation176_spill] sm:$0xff]  ;;  %v11302_v52 = vld [vmem:[#allocation162_spill] sm:$0xff]  ;;  %3947 = vperm.xlu1 %4775, %v8687_v33  }
 0x93e   : > { %vm2963_vm4 = vcmp.eq.s32.totalorder %v11296_v37, %v5109_v7  ;;  %v11299_v19 = vld [vmem:[#allocation297_spill] sm:$0xff]  ;;  %v2823_v0 = vsel %vm2813_vm14, %v11301_v17, %v2751_v51  ;;  %vm3035_vm10 = vcmp.eq.s32.totalorder %v11302_v52, %v5109_v7  ;;  %v11304_v57 = vld [vmem:[#allocation318_spill] sm:$0xff]  ;;  %v11307_v16 = vld [vmem:[#allocation211_spill] sm:$0xff]  ;;  %vm11309_vm14 = vcmp.eq.s32.totalorder %v11243_v4, %v5109_v7  ;;  %v9040_v4 = vpop.permute.xlu1 %3739 }
 0x93f   : > { %v11303_v45 = vld [vmem:[#allocation109_spill] sm:$0xff]  ;;  %v11305_v31 = vld [vmem:[#allocation226_spill] sm:$0xff]  ;;  %v2901_v28 = vsel %vm2891_vm8, %v11306_v61, %v2823_v0  ;;  %vm3107_vm2 = vcmp.eq.s32.totalorder %v11307_v16, %v5109_v7  ;;  %v11310_v26 = vld [vmem:[#allocation340_spill] sm:$0xff]  ;;  %vm11315_vm8 = vcmp.eq.s32.totalorder %v11251_v18, %v5109_v7 }
 0x940   : > { %v3243_v30 = vsel %vm3233_vm15, %v11303_v45, %v3171_v6  ;;  %vm2758_vm7 = vcmp.eq.s32.totalorder %v11305_v31, %v5109_v7  ;;  %v11311_v44 = vld [vmem:[#allocation417_spill] sm:$0xff]  ;;  %v11312_v43 = vld [vmem:[#allocation215_spill] sm:$0xff]  ;;  %v11313_v60 = vld [vmem:[#allocation248_spill] sm:$0xff] }
 0x941   : > { %v3315_v40 = vsel %vm11309_vm14, %v11308_v48, %v3243_v30  ;;  %vm2777_vm5 = vcmp.eq.s32.totalorder %v11311_v44, %v5109_v7  ;;  %v2973_v42 = vsel %vm2963_vm4, %v11312_v43, %v2901_v28  ;;  %vm3179_vm13 = vcmp.eq.s32.totalorder %v11313_v60, %v5109_v7  ;;  %v11314_v11 = vld [vmem:[#allocation217_spill] sm:$0xff]  ;;  %v11317_v27 = vld [vmem:[#allocation362_spill] sm:$0xff]  ;;  %v11318_v12 = vld [vmem:[#allocation240_spill] sm:$0xff]  ;;  %3955 = vperm.xlu1 %4775, %v8161_v25  }
 0x942   : > { %v3387_v35 = vsel %vm11315_vm8, %v11314_v11, %v3315_v40  ;;  %v2822_v53 = vsel %vm2812_vm6, %v11318_v12, %v2750_v21  ;;  %v11319_v59 = vld [vmem:[#allocation235_spill] sm:$0xff]  ;;  %v11321_v13 = vld [vmem:[#allocation477_spill] sm:$0xff]  ;;  %vm11322_vm8 = vcmp.eq.s32.totalorder %v11259_v63, %v5109_v7  ;;  %v11324_v1 = vld [vmem:[#allocation72_spill] sm:$0xff]  ;;  %vm11325_vm6 = vcmp.eq.s32.totalorder %v11266_v54, %v5109_v7  ;;  %v3744_v11 = vpop.permute.xlu1 %3743 }
 0x943   : > { %v3045_v46 = vsel %vm3035_vm10, %v11319_v59, %v2973_v42  ;;  %v11320_v18 = vld [vmem:[#allocation295_spill] sm:$0xff]  ;;  %v3459_v10 = vsel %vm11322_vm8, %v11321_v13, %v3387_v35  ;;  %v11323_v58 = vld [vmem:[#allocation385_spill] sm:$0xff]  ;;  %v2900_v51 = vsel %vm11325_vm6, %v11324_v1, %v2822_v53  ;;  %v11327_v6 = vld [vmem:[#allocation164_spill] sm:$0xff]  ;;  %vm11329_vm8 = vcmp.eq.s32.totalorder %v11267_v32, %v5109_v7 }
 0x944   : > { %vm3251_vm4 = vcmp.eq.s32.totalorder %v11320_v18, %v5109_v7  ;;  %v11326_v37 = vld [vmem:[#allocation255_spill] sm:$0xff]  ;;  %vm3323_vm10 = vcmp.eq.s32.totalorder %v11327_v6, %v5109_v7  ;;  %v11328_v63 = vld [vmem:[#allocation490_spill] sm:$0xff]  ;;  %v11330_v21 = vld [vmem:[#allocation169_spill] sm:$0xff]  ;;  %vm11336_vm6 = vcmp.eq.s32.totalorder %v11275_v55, %v5109_v7 }
 0x945   : > { %v3117_v56 = vsel %vm3107_vm2, %v11326_v37, %v3045_v46  ;;  %v3531_v29 = vsel %vm11329_vm8, %v11328_v63, %v3459_v10  ;;  %vm2776_vm14 = vcmp.eq.s32.totalorder %v11330_v21, %v5109_v7  ;;  %v11331_v17 = vld [vmem:[#allocation408_spill] sm:$0xff]  ;;  %v11332_v54 = vld [vmem:[#allocation209_spill] sm:$0xff]  ;;  %v11337_v28 = vld [vmem:[#allocation179_spill] sm:$0xff]  ;;  %3959 = vperm.xlu1 %4775, %v8477_v39  }
 0x946   : > { %v2972_v0 = vsel %vm2962_vm0, %v11332_v54, %v2900_v51  ;;  %v11333_v52 = vld [vmem:[#allocation277_spill] sm:$0xff]  ;;  %v11334_v30 = vld [vmem:[#allocation428_spill] sm:$0xff]  ;;  %vm2831_vm8 = vcmp.eq.s32.totalorder %v11337_v28, %v5109_v7  ;;  %v11338_v16 = vld [vmem:[#allocation431_spill] sm:$0xff] }
 0x947   : > { %v3189_v45 = vsel %vm3179_vm13, %v11333_v52, %v3117_v56  ;;  %vm3395_vm2 = vcmp.eq.s32.totalorder %v11334_v30, %v5109_v7  ;;  %v11335_v32 = vld [vmem:[#allocation5_spill] sm:$0xff]  ;;  %vm3682_vm15 = vcmp.eq.s32.totalorder %v11338_v16, %v5109_v7  ;;  %v11340_v40 = vld [vmem:[#allocation299_spill] sm:$0xff]  ;;  %v11341_v42 = vld [vmem:[#allocation478_spill] sm:$0xff] }
 0x948   : > { %v3603_v61 = vsel %vm11336_vm6, %v11335_v32, %v3531_v29  ;;  %v11339_v9 = vld [vmem:[#allocation445_spill] sm:$0xff]  ;;  %v3261_v43 = vsel %vm3251_vm4, %v11340_v40, %v3189_v45  ;;  %vm3467_vm0 = vcmp.eq.s32.totalorder %v11341_v42, %v5109_v7  ;;  %v11342_v55 = vld [vmem:[#allocation12_spill] sm:$0xff]  ;;  %v11344_v62 = vld [vmem:[#allocation59_spill] sm:$0xff]  ;;  %v3753_v42 = vpop.permute.xlu1 %3752 }
 0x949   : > { %v3044_v48 = vsel %vm3034_vm9, %v11339_v9, %v2972_v0  ;;  %v3675_v60 = vsel %vm3665_vm11, %v11342_v55, %v3603_v61  ;;  %v11343_v35 = vld [vmem:[#allocation453_spill] sm:$0xff]  ;;  %v11345_v12 = vld [vmem:[#allocation320_spill] sm:$0xff]  ;;  %v11346_v59 = vld [vmem:[#allocation491_spill] sm:$0xff] }
 0x94a   : > { %vm3754_vm13 = vcmp.eq.s32.totalorder %v11343_v35, %v5109_v7  ;;  %v3116_v24 = vsel %vm3106_vm1, %v11344_v62, %v3044_v48  ;;  %v3333_v53 = vsel %vm3323_vm10, %v11345_v12, %v3261_v43  ;;  %vm3539_vm9 = vcmp.eq.s32.totalorder %v11346_v59, %v5109_v7  ;;  %v11347_v46 = vld [vmem:[#allocation199_spill] sm:$0xff]  ;;  %v11348_v8 = vld [vmem:[#allocation186_spill] sm:$0xff]  ;;  %v11353_v56 = vld [vmem:[#allocation208_spill] sm:$0xff] }
 0x94b   : > { %v9126_v47 = vsel %vm3737_vm3, %v3744_v11, %v3675_v60  ;;  %vm2909_vm11 = vcmp.eq.s32.totalorder %v11347_v46, %v5109_v7  ;;  %v2768_v18 = vsel %vm2758_vm7, %v11348_v8, %v8941_v50  ;;  %v11349_v13 = vld [vmem:[#allocation74_spill] sm:$0xff]  ;;  %v11351_v51 = vld [vmem:[#allocation19_spill] sm:$0xff]  ;;  %vm11354_vm7 = vcmp.eq.s32.totalorder %v11298_v23, %v5109_v7  ;;  %v11357_v6 = vld [vmem:[#allocation364_spill] sm:$0xff] }
 0x94c   : > { %v3188_v10 = vsel %vm3178_vm12, %v11349_v13, %v3116_v24  ;;  %v11350_v1 = vld [vmem:[#allocation342_spill] sm:$0xff]  ;;  %vm3611_vm1 = vcmp.eq.s32.totalorder %v11351_v51, %v5109_v7  ;;  %v2769_v50 = vsel %vm11354_vm7, %v11353_v56, %v8961_v41  ;;  %v11355_v31 = vld [vmem:[#allocation147_spill] sm:$0xff]  ;;  %vm11356_vm12 = vcmp.eq.s32.totalorder %v11299_v19, %v5109_v7  ;;  %v11359_v54 = vld [vmem:[#allocation181_spill] sm:$0xff] }
 0x94d   : > { %v3405_v15 = vsel %vm3395_vm2, %v11350_v1, %v3333_v53  ;;  %v11352_v37 = vld [vmem:[#allocation218_spill] sm:$0xff]  ;;  %v3260_v3 = vsel %vm11356_vm12, %v11355_v31, %v3188_v10  ;;  %vm2848_vm10 = vcmp.eq.s32.totalorder %v11359_v54, %v5109_v7  ;;  %v11361_v41 = vld [vmem:[#allocation171_spill] sm:$0xff]  ;;  %v11363_v52 = vld [vmem:[#allocation360_spill] sm:$0xff]  ;;  %vm11370_vm12 = vcmp.eq.s32.totalorder %v11310_v26, %v5109_v7 }
 0x94e   : > { %vm2981_vm3 = vcmp.eq.s32.totalorder %v11352_v37, %v5109_v7  ;;  %v3477_v63 = vsel %vm3467_vm0, %v11357_v6, %v3405_v15  ;;  %v11358_v29 = vld [vmem:[#allocation14_spill] sm:$0xff]  ;;  %v2787_v23 = vsel %vm2777_vm5, %v11361_v41, %v8967_v34  ;;  %vm11364_vm0 = vcmp.eq.s32.totalorder %v11304_v57, %v5109_v7  ;;  %v11365_v30 = vld [vmem:[#allocation387_spill] sm:$0xff]  ;;  %v11369_v44 = vld [vmem:[#allocation252_spill] sm:$0xff] }
 0x94f   : > { %vm3683_vm4 = vcmp.eq.s32.totalorder %v11358_v29, %v5109_v7  ;;  %v11360_v0 = vld [vmem:[#allocation238_spill] sm:$0xff]  ;;  %v3332_v45 = vsel %vm11364_vm0, %v11363_v52, %v3260_v3  ;;  %v3549_v32 = vsel %vm3539_vm9, %v11365_v30, %v3477_v63  ;;  %v11372_v55 = vld [vmem:[#allocation280_spill] sm:$0xff]  ;;  %v11374_v11 = vld [vmem:[#allocation479_spill] sm:$0xff]  ;;  %vm11375_vm0 = vcmp.eq.s32.totalorder %v11317_v27, %v5109_v7  ;;  %v3758_v30 = vpop.permute.xlu1 %3757 }
 0x950   : > { %vm3053_vm2 = vcmp.eq.s32.totalorder %v11360_v0, %v5109_v7  ;;  %v11362_v19 = vld [vmem:[#allocation462_spill] sm:$0xff]  ;;  %v3404_v40 = vsel %vm11370_vm12, %v11369_v44, %v3332_v45  ;;  %v11373_v60 = vld [vmem:[#allocation332_spill] sm:$0xff]  ;;  %v11379_v8 = vld [vmem:[#allocation125_spill] sm:$0xff]  ;;  %vm11381_vm7 = vcmp.eq.s32.totalorder %v11323_v58, %v5109_v7 }
 0x951   : > { %vm2830_vm6 = vcmp.eq.s32.totalorder %v11362_v19, %v5109_v7  ;;  %v11366_v61 = vld [vmem:[#allocation258_spill] sm:$0xff]  ;;  %v3476_v26 = vsel %vm11375_vm0, %v11374_v11, %v3404_v40  ;;  %v11376_v62 = vld [vmem:[#allocation432_spill] sm:$0xff]  ;;  %vm2980_vm9 = vcmp.eq.s32.totalorder %v11379_v8, %v5109_v7  ;;  %v11382_v13 = vld [vmem:[#allocation455_spill] sm:$0xff] }
 0x952   : > { %v11367_v9 = vld [vmem:[#allocation6_spill] sm:$0xff]  ;;  %v11378_v53 = vld [vmem:[#allocation8_spill] sm:$0xff]  ;;  %v11383_v1 = vld [vmem:[#allocation323_spill] sm:$0xff] }
 0x953   : > { %v2840_v48 = vsel %vm2830_vm6, %v11367_v9, %v2768_v18  ;;  %v11368_v34 = vld [vmem:[#allocation22_spill] sm:$0xff]  ;;  %vm2908_vm6 = vcmp.eq.s32.totalorder %v11373_v60, %v5109_v7  ;;  %v11380_v18 = vld [vmem:[#allocation492_spill] sm:$0xff]  ;;  %v11387_v6 = vld [vmem:[#allocation35_spill] sm:$0xff] }
 0x954   : > { %vm2849_vm5 = vcmp.eq.s32.totalorder %v11368_v34, %v5109_v7  ;;  %v11371_v57 = vld [vmem:[#allocation410_spill] sm:$0xff]  ;;  %v2918_v59 = vsel %vm2908_vm6, %v11378_v53, %v2840_v48  ;;  %v3548_v27 = vsel %vm11381_vm7, %v11380_v18, %v3476_v26  ;;  %v11385_v56 = vld [vmem:[#allocation400_spill] sm:$0xff]  ;;  %vm11388_vm7 = vcmp.eq.s32.totalorder %v11331_v17, %v5109_v7  ;;  %v11389_v63 = vld [vmem:[#allocation345_spill] sm:$0xff] }
 0x955   : > { %v3621_v43 = vsel %vm3611_vm1, %v11371_v57, %v3549_v32  ;;  %vm3755_vm1 = vcmp.eq.s32.totalorder %v3753_v42, %v5109_v7  ;;  %v11377_v12 = vld [vmem:[#allocation302_spill] sm:$0xff]  ;;  %v2990_v31 = vsel %vm2980_vm9, %v11385_v56, %v2918_v59  ;;  %v3620_v58 = vsel %vm11388_vm7, %v11387_v6, %v3548_v27  ;;  %v11390_v29 = vld [vmem:[#allocation245_spill] sm:$0xff]  ;;  %v11391_v21 = vld [vmem:[#allocation271_spill] sm:$0xff] }
 0x956   : > { %v3693_v24 = vsel %vm3683_vm4, %v11376_v62, %v3621_v43  ;;  %vm3269_vm12 = vcmp.eq.s32.totalorder %v11377_v12, %v5109_v7  ;;  %vm3341_vm4 = vcmp.eq.s32.totalorder %v11383_v1, %v5109_v7  ;;  %v11384_v15 = vld [vmem:[#allocation242_spill] sm:$0xff]  ;;  %vm3413_vm0 = vcmp.eq.s32.totalorder %v11389_v63, %v5109_v7  ;;  %v11393_v52 = vld [vmem:[#allocation28_spill] sm:$0xff]  ;;  %v11395_v32 = vld [vmem:[#allocation367_spill] sm:$0xff] }
 0x957   : > { %v9219_v10 = vsel %vm3755_vm1, %v11382_v13, %v3693_v24  ;;  %v2786_v51 = vsel %vm2776_vm14, %v11384_v15, %v8984_v2  ;;  %v11386_v3 = vld [vmem:[#allocation26_spill] sm:$0xff]  ;;  %v2841_v41 = vsel %vm2831_vm8, %v11390_v29, %v2769_v50  ;;  %v3692_v45 = vsel %vm3682_vm15, %v11393_v52, %v3620_v58  ;;  %v11396_v9 = vld [vmem:[#allocation183_spill] sm:$0xff]  ;;  %v11397_v50 = vld [vmem:[#allocation216_spill] sm:$0xff]  ;;  %v3768_v52 = vpop.permute.xlu1 %3767 }
 0x958   : > { %vm3052_vm6 = vcmp.eq.s32.totalorder %v11386_v3, %v5109_v7  ;;  %v11392_v19 = vld [vmem:[#allocation314_spill] sm:$0xff]  ;;  %v11394_v17 = vmov 61   ;;  %vm3485_vm9 = vcmp.eq.s32.totalorder %v11395_v32, %v5109_v7  ;;  %v2859_v28 = vsel %vm2849_vm5, %v11396_v9, %v2787_v23  ;;  %v11398_v44 = vld [vmem:[#allocation251_spill] sm:$0xff]  ;;  %v11401_v34 = vld [vmem:[#allocation88_spill] sm:$0xff] }
 0x959   : > { %v3062_v2 = vsel %vm3052_vm6, %v11391_v21, %v2990_v31  ;;  %vm3124_vm14 = vcmp.eq.s32.totalorder %v11392_v19, %v5109_v7  ;;  %4777 = vset.pattern.permute.xlu1 %v11394_v17  ;;  %vm3196_vm8 = vcmp.eq.s32.totalorder %v11398_v44, %v5109_v7  ;;  %v9261_v16 = vsel %vm3754_vm13, %v3758_v30, %v3692_v45  ;;  %v11399_v40 = vld [vmem:[#allocation202_spill] sm:$0xff]  ;;  %v11404_v60 = vld [vmem:[#allocation427_spill] sm:$0xff]  ;;  %v11406_v26 = vld [vmem:[#allocation413_spill] sm:$0xff] }
 0x95a   : > { %v3134_v48 = vsel %vm3124_vm14, %v11397_v50, %v3062_v2  ;;  %3968 = vperm.xlu1 %4777, %v8552_v22   ;;  %vm2926_vm15 = vcmp.eq.s32.totalorder %v11399_v40, %v5109_v7  ;;  %v11400_v57 = vld [vmem:[#allocation390_spill] sm:$0xff]  ;;  %v2919_v23 = vsel %vm2909_vm11, %v11401_v34, %v2841_v41  ;;  %vm3268_vm13 = vcmp.eq.s32.totalorder %v11404_v60, %v5109_v7  ;;  %v11407_v62 = vld [vmem:[#allocation57_spill] sm:$0xff]  ;;  %v11409_v53 = vld [vmem:[#allocation127_spill] sm:$0xff] }
 0x95b   : > { %vm3557_vm1 = vcmp.eq.s32.totalorder %v11400_v57, %v5109_v7  ;;  %v11402_v43 = vld [vmem:[#allocation354_spill] sm:$0xff]  ;;  %vm3629_vm7 = vcmp.eq.s32.totalorder %v11406_v26, %v5109_v7  ;;  %v2991_v46 = vsel %vm2981_vm3, %v11407_v62, %v2919_v23  ;;  %v11408_v24 = vld [vmem:[#allocation229_spill] sm:$0xff]  ;;  %v11412_v27 = vld [vmem:[#allocation436_spill] sm:$0xff]  ;;  %v11444_v1 = vmov 62  }
 0x95c   : > { %vm2927_vm5 = vcmp.eq.s32.totalorder %v11402_v43, %v5109_v7  ;;  %v11403_v42 = vld [vmem:[#allocation110_spill] sm:$0xff]  ;;  %vm2999_vm11 = vcmp.eq.s32.totalorder %v11408_v24, %v5109_v7  ;;  %v11410_v8 = vld [vmem:[#allocation201_spill] sm:$0xff]  ;;  %v11413_v13 = vld [vmem:[#allocation267_spill] sm:$0xff] }
 0x95d   : > { %v3206_v35 = vsel %vm3196_vm8, %v11403_v42, %v3134_v48  ;;  %v11405_v11 = vld [vmem:[#allocation222_spill] sm:$0xff]  ;;  %vm3340_vm14 = vcmp.eq.s32.totalorder %v11410_v8, %v5109_v7  ;;  %v11411_v18 = vld [vmem:[#allocation241_spill] sm:$0xff]  ;;  %v2858_v37 = vsel %vm2848_vm10, %v11413_v13, %v2786_v51  ;;  %v11414_v15 = vld [vmem:[#allocation180_spill] sm:$0xff]  ;;  %vm11421_vm10 = vcmp.eq.s32.totalorder %v11366_v61, %v5109_v7 }
 0x95e   : > { %v3278_v59 = vsel %vm3268_vm13, %v11409_v53, %v3206_v35  ;;  %vm3070_vm8 = vcmp.eq.s32.totalorder %v11411_v18, %v5109_v7  ;;  %v3063_v56 = vsel %vm3053_vm2, %v11414_v15, %v2991_v46  ;;  %v11415_v31 = vld [vmem:[#allocation182_spill] sm:$0xff]  ;;  %v11417_v58 = vld [vmem:[#allocation263_spill] sm:$0xff]  ;;  %v11419_v41 = vld [vmem:[#allocation204_spill] sm:$0xff]  ;;  %3973 = vperm.xlu1 %4777, %v8161_v25  }
 0x95f   : > { %v3350_v3 = vsel %vm3340_vm14, %v11415_v31, %v3278_v59  ;;  %v11416_v6 = vld [vmem:[#allocation234_spill] sm:$0xff]  ;;  %vm3142_vm13 = vcmp.eq.s32.totalorder %v11417_v58, %v5109_v7  ;;  %v2937_v54 = vsel %vm2927_vm5, %v11419_v41, %v2859_v28  ;;  %v11420_v51 = vld [vmem:[#allocation76_spill] sm:$0xff]  ;;  %v11422_v21 = vld [vmem:[#allocation451_spill] sm:$0xff]  ;;  %vm11428_vm5 = vcmp.eq.s32.totalorder %v11372_v55, %v5109_v7 }
 0x960   : > { %vm3412_vm3 = vcmp.eq.s32.totalorder %v11416_v6, %v5109_v7  ;;  %v11418_v29 = vld [vmem:[#allocation458_spill] sm:$0xff]  ;;  %v3135_v0 = vsel %vm11421_vm10, %v11420_v51, %v3063_v56  ;;  %v11423_v19 = vld [vmem:[#allocation480_spill] sm:$0xff]  ;;  %v11424_v45 = vld [vmem:[#allocation285_spill] sm:$0xff] }
 0x961   : > { %v3422_v2 = vsel %vm3412_vm3, %v11422_v21, %v3350_v3  ;;  %vm3484_vm2 = vcmp.eq.s32.totalorder %v11423_v19, %v5109_v7  ;;  %v11425_v17 = vld [vmem:[#allocation173_spill] sm:$0xff]  ;;  %v11426_v30 = vld [vmem:[#allocation223_spill] sm:$0xff]  ;;  %v11432_v34 = vld [vmem:[#allocation468_spill] sm:$0xff]  ;;  %v3776_v3 = vpop.permute.xlu1 %3775 }
 0x962   : > { %vm2722_vm6 = vcmp.eq.s32.totalorder %v11425_v17, %v5109_v7  ;;  %v3009_v61 = vsel %vm2999_vm11, %v11426_v30, %v2937_v54  ;;  %v11427_v9 = vld [vmem:[#allocation381_spill] sm:$0xff]  ;;  %v11431_v44 = vld [vmem:[#allocation307_spill] sm:$0xff]  ;;  %vm3071_vm14 = vcmp.eq.s32.totalorder %v11432_v34, %v5109_v7  ;;  %v11433_v23 = vld [vmem:[#allocation316_spill] sm:$0xff]  ;;  %4779 = vset.pattern.permute.xlu1 %v11444_v1 }
 0x963   : > { %v3207_v28 = vsel %vm11428_vm5, %v11427_v9, %v3135_v0  ;;  %v11429_v50 = vld [vmem:[#allocation481_spill] sm:$0xff]  ;;  %v11434_v42 = vld [vmem:[#allocation495_spill] sm:$0xff]  ;;  %v11435_v55 = vld [vmem:[#allocation52_spill] sm:$0xff]  ;;  %3983 = vperm.xlu1 %4779, %v8687_v33  }
 0x964   : > { %v3494_v48 = vsel %vm3484_vm2, %v11429_v50, %v3422_v2  ;;  %v11430_v25 = vld [vmem:[#allocation493_spill] sm:$0xff]  ;;  %v3279_v43 = vsel %vm3269_vm12, %v11433_v23, %v3207_v28  ;;  %vm3628_vm11 = vcmp.eq.s32.totalorder %v11435_v55, %v5109_v7  ;;  %v11436_v60 = vld [vmem:[#allocation328_spill] sm:$0xff]  ;;  %v11438_v46 = vld [vmem:[#allocation383_spill] sm:$0xff] }
 0x965   : > { %vm3556_vm3 = vcmp.eq.s32.totalorder %v11430_v25, %v5109_v7  ;;  %vm3358_vm2 = vcmp.eq.s32.totalorder %v11436_v60, %v5109_v7  ;;  %v11437_v62 = vld [vmem:[#allocation336_spill] sm:$0xff]  ;;  %v3351_v24 = vsel %vm3341_vm4, %v11438_v46, %v3279_v43  ;;  %v11439_v53 = vld [vmem:[#allocation53_spill] sm:$0xff]  ;;  %v11441_v8 = vld [vmem:[#allocation350_spill] sm:$0xff]  ;;  %vm3772_vm4 = vcmp.eq.s32.totalorder %v3768_v52, %v5109_v7  ;;  %v3780_v55 = vpop.permute.xlu1 %3779 }
 0x966   : > { %v3566_v35 = vsel %vm3556_vm3, %v11434_v42, %v3494_v48  ;;  %vm3143_vm5 = vcmp.eq.s32.totalorder %v11437_v62, %v5109_v7  ;;  %v11440_v12 = vld [vmem:[#allocation121_spill] sm:$0xff]  ;;  %v11442_v13 = vld [vmem:[#allocation90_spill] sm:$0xff]  ;;  %v11446_v41 = vld [vmem:[#allocation243_spill] sm:$0xff] }
 0x967   : > { %v3638_v59 = vsel %vm3628_vm11, %v11439_v53, %v3566_v35  ;;  %vm3700_vm12 = vcmp.eq.s32.totalorder %v11440_v12, %v5109_v7  ;;  %vm3215_vm10 = vcmp.eq.s32.totalorder %v11442_v13, %v5109_v7  ;;  %v11443_v15 = vld [vmem:[#allocation250_spill] sm:$0xff]  ;;  %v11445_v6 = vld [vmem:[#allocation373_spill] sm:$0xff]  ;;  %v3081_v54 = vsel %vm3071_vm14, %v11446_v41, %v3009_v61  ;;  %v11449_v21 = vld [vmem:[#allocation396_spill] sm:$0xff] }
 0x968   : > { %v3423_v56 = vsel %vm3413_vm0, %v11443_v15, %v3351_v24  ;;  %v3710_v31 = vsel %vm3700_vm12, %v8676_v49, %v3638_v59  ;;  %vm3502_vm11 = vcmp.eq.s32.totalorder %v11445_v6, %v5109_v7  ;;  %v11447_v51 = vld [vmem:[#allocation166_spill] sm:$0xff]  ;;  %vm3574_vm0 = vcmp.eq.s32.totalorder %v11449_v21, %v5109_v7  ;;  %v11450_v2 = vld [vmem:[#allocation24_spill] sm:$0xff]  ;;  %v11451_v52 = vld [vmem:[#allocation265_spill] sm:$0xff] }
 0x969   : > { %vm3287_vm3 = vcmp.eq.s32.totalorder %v11447_v51, %v5109_v7  ;;  %v11448_v63 = vld [vmem:[#allocation482_spill] sm:$0xff]  ;;  %v9381_v0 = vsel %vm3772_vm4, %v3776_v3, %v3710_v31  ;;  %v2936_v19 = vsel %vm2926_vm15, %v11450_v2, %v2858_v37  ;;  %v3153_v30 = vsel %vm3143_vm5, %v11451_v52, %v3081_v54  ;;  %v11452_v32 = vld [vmem:[#allocation219_spill] sm:$0xff]  ;;  %v11453_v61 = vld [vmem:[#allocation497_spill] sm:$0xff] }
 0x96a   : > { %v3495_v49 = vsel %vm3485_vm9, %v11448_v63, %v3423_v56  ;;  %vm3359_vm9 = vcmp.eq.s32.totalorder %v11452_v32, %v5109_v7  ;;  %v11454_v28 = vld [vmem:[#allocation143_spill] sm:$0xff]  ;;  %vm11455_vm14 = vcmp.eq.s32.totalorder %v11405_v11, %v5109_v7  ;;  %v11457_v48 = vld [vmem:[#allocation473_spill] sm:$0xff]  ;;  %v11458_v25 = vld [vmem:[#allocation68_spill] sm:$0xff] }
 0x96b   : > { %v3567_v9 = vsel %vm3557_vm1, %v11453_v61, %v3495_v49  ;;  %v3008_v50 = vsel %vm11455_vm14, %v11454_v28, %v2936_v19  ;;  %v11456_v40 = vld [vmem:[#allocation287_spill] sm:$0xff]  ;;  %vm3431_vm15 = vcmp.eq.s32.totalorder %v11457_v48, %v5109_v7  ;;  %v11460_v11 = vld [vmem:[#allocation308_spill] sm:$0xff]  ;;  %v11464_v46 = vld [vmem:[#allocation330_spill] sm:$0xff]  ;;  %vm11483_vm14 = vcmp.eq.s32.totalorder %v11441_v8, %v5109_v7  ;;  %v3789_v61 = vpop.permute.xlu1 %3788 }
 0x96c   : > { %v3225_v37 = vsel %vm3215_vm10, %v11456_v40, %v3153_v30  ;;  %v3639_v34 = vsel %vm3629_vm7, %v11458_v25, %v3567_v9  ;;  %v11459_v57 = vld [vmem:[#allocation191_spill] sm:$0xff]  ;;  %v11461_v42 = vld [vmem:[#allocation484_spill] sm:$0xff]  ;;  %vm11462_vm10 = vcmp.eq.s32.totalorder %v11412_v27, %v5109_v7  ;;  %v11465_v18 = vld [vmem:[#allocation498_spill] sm:$0xff] }
 0x96d   : > { %v3080_v23 = vsel %vm3070_vm8, %v11459_v57, %v3008_v50  ;;  %v3297_v43 = vsel %vm3287_vm3, %v11460_v11, %v3225_v37  ;;  %vm3503_vm1 = vcmp.eq.s32.totalorder %v11461_v42, %v5109_v7  ;;  %v3711_v35 = vsel %vm11462_vm10, %v8736_v20, %v3639_v34  ;;  %v11463_v62 = vld [vmem:[#allocation232_spill] sm:$0xff]  ;;  %v9437_v59 = vld [vmem:[#allocation2 + $0x10] sm:$0xff]  ;;  %v11468_v58 = vld [vmem:[#allocation273_spill] sm:$0xff] }
 0x96e   : > { %v3152_v26 = vsel %vm3142_vm13, %v11463_v62, %v3080_v23  ;;  %v3369_v24 = vsel %vm3359_vm9, %v11464_v46, %v3297_v43  ;;  %vm3575_vm7 = vcmp.eq.s32.totalorder %v11465_v18, %v5109_v7  ;;  %vm11466_vm8 = vcmp.eq.s32.totalorder %v11418_v29, %v5109_v7  ;;  %3991 = vperm.xlu1 %4779, %v9437_v59   ;;  %v11467_v20 = vld [vmem:[#allocation371_spill] sm:$0xff]  ;;  %v11470_v13 = vld [vmem:[#allocation352_spill] sm:$0xff]  ;;  %v11472_v56 = vld [vmem:[#allocation206_spill] sm:$0xff] }
 0x96f   : > { %v9435_v53 = vsel %vm11466_vm8, %v3780_v55, %v3711_v35  ;;  %v2732_v27 = vsel %vm2722_vm6, %v11467_v20, %v8887_v36  ;;  %vm11469_vm13 = vcmp.eq.s32.totalorder %v11424_v45, %v5109_v7  ;;  %v3441_v15 = vsel %vm3431_vm15, %v11470_v13, %v3369_v24  ;;  %v11471_v29 = vld [vmem:[#allocation84_spill] sm:$0xff]  ;;  %v11473_v31 = vld [vmem:[#allocation449_spill] sm:$0xff]  ;;  %v11475_v17 = vld [vmem:[#allocation375_spill] sm:$0xff]  ;;  %v3794_v20 = vpop.permute.xlu1 %3793 }
 0x970   : > { %v3224_v12 = vsel %vm11469_vm13, %v11468_v58, %v3152_v26  ;;  %vm3647_vm5 = vcmp.eq.s32.totalorder %v11471_v29, %v5109_v7  ;;  %vm2794_vm12 = vcmp.eq.s32.totalorder %v11472_v56, %v5109_v7  ;;  %vm11474_vm3 = vcmp.eq.s32.totalorder %v11431_v44, %v5109_v7  ;;  %v11476_v45 = vld [vmem:[#allocation224_spill] sm:$0xff]  ;;  %v11477_v41 = vld [vmem:[#allocation39_spill] sm:$0xff]  ;;  %v11479_v63 = vld [vmem:[#allocation398_spill] sm:$0xff] }
 0x971   : > { %v3296_v1 = vsel %vm11474_vm3, %v11473_v31, %v3224_v12  ;;  %v3513_v36 = vsel %vm3503_vm1, %v11475_v17, %v3441_v15  ;;  %vm3719_vm6 = vcmp.eq.s32.totalorder %v8817_v14, %v5109_v7  ;;  %v2804_v3 = vsel %vm2794_vm12, %v11476_v45, %v2732_v27  ;;  %v11478_v54 = vld [vmem:[#allocation200_spill] sm:$0xff]  ;;  %v11480_v44 = vld [vmem:[#allocation419_spill] sm:$0xff]  ;;  %v11481_v2 = vld [vmem:[#allocation289_spill] sm:$0xff] }
 0x972   : > { %vm2870_vm4 = vcmp.eq.s32.totalorder %v11477_v41, %v5109_v7  ;;  %v3368_v51 = vsel %vm3358_vm2, %v11478_v54, %v3296_v1  ;;  %v3585_v49 = vsel %vm3575_vm7, %v11479_v63, %v3513_v36  ;;  %vm3646_vm9 = vcmp.eq.s32.totalorder %v11480_v44, %v5109_v7  ;;  %v11482_v52 = vld [vmem:[#allocation474_spill] sm:$0xff]  ;;  %v11484_v30 = vld [vmem:[#allocation421_spill] sm:$0xff]  ;;  %3995 = vperm.xlu1 %4779, %v8477_v39   ;;  %v11487_v50 = vld [vmem:[#allocation443_spill] sm:$0xff] }
 0x973   : > { %v2882_v19 = vsel %vm2870_vm4, %v11481_v2, %v2804_v3  ;;  %v3440_v14 = vsel %vm11483_vm14, %v11482_v52, %v3368_v51  ;;  %v3657_v32 = vsel %vm3647_vm5, %v11484_v30, %v3585_v49  ;;  %v11485_v60 = vld [vmem:[#allocation190_spill] sm:$0xff]  ;;  %vm3791_vm15 = vcmp.eq.s32.totalorder %v3789_v61, %v5109_v7  ;;  %v11488_v37 = vld [vmem:[#allocation107_spill] sm:$0xff]  ;;  %v11492_v6 = vld [vmem:[#allocation441_spill] sm:$0xff]  ;;  %v3804_v51 = vpop.permute.xlu1 %3803 }
 0x974   : > { %vm2944_vm2 = vcmp.eq.s32.totalorder %v11485_v60, %v5109_v7  ;;  %v11486_v9 = vld [vmem:[#allocation486_spill] sm:$0xff]  ;;  %v3729_v40 = vsel %vm3719_vm6, %v11487_v50, %v3657_v32  ;;  %v11490_v25 = vld [vmem:[#allocation499_spill] sm:$0xff]  ;;  %v11496_v62 = vld [vmem:[#allocation464_spill] sm:$0xff]  ;;  %v11499_v18 = vmov 63   ;;  %vm3808_vm14 = vcmp.eq.s32.totalorder %v3804_v51, %v5109_v7 }
 0x975   : > { %v3512_v28 = vsel %vm3502_vm11, %v11486_v9, %v3440_v14  ;;  %v2954_v8 = vsel %vm2944_vm2, %v11488_v37, %v2882_v19  ;;  %v11489_v48 = vld [vmem:[#allocation422_spill] sm:$0xff]  ;;  %vm3718_vm11 = vcmp.eq.s32.totalorder %v11492_v6, %v5109_v7  ;;  %v11494_v42 = vld [vmem:[#allocation43_spill] sm:$0xff]  ;;  %vm3790_vm7 = vcmp.eq.s32.totalorder %v11496_v62, %v5109_v7  ;;  %v11497_v21 = vld [vmem:[#allocation293_spill] sm:$0xff] }
 0x976   : > { %vm3016_vm1 = vcmp.eq.s32.totalorder %v11489_v48, %v5109_v7  ;;  %v3584_v34 = vsel %vm3574_vm0, %v11490_v25, %v3512_v28  ;;  %v11491_v57 = vld [vmem:[#allocation466_spill] sm:$0xff]  ;;  %vm3088_vm10 = vcmp.eq.s32.totalorder %v11494_v42, %v5109_v7  ;;  %v11498_v46 = vld [vmem:[#allocation231_spill] sm:$0xff]  ;;  %4781 = vset.pattern.permute.xlu1 %v11499_v18  ;;  %v11500_v27 = vld [vmem:[#allocation92_spill] sm:$0xff]  ;;  %v11515_v61 = vmov 64  }
 0x977   : > { %v9494_v23 = vsel %vm3791_vm15, %v11491_v57, %v3729_v40  ;;  %v11493_v11 = vld [vmem:[#allocation10_spill] sm:$0xff]  ;;  %vm3160_vm0 = vcmp.eq.s32.totalorder %v11498_v46, %v5109_v7  ;;  %v11501_v12 = vld [vmem:[#allocation129_spill] sm:$0xff]  ;;  %4004 = vperm.xlu1 %4781, %v8552_v22   ;;  %v11502_v15 = vld [vmem:[#allocation404_spill] sm:$0xff]  ;;  %v3812_v60 = vpop.permute.xlu1 %3811  ;;  %v11517_v37 = vmov 65   ;;  %v11520_v57 = vmov 66  }
 0x978   : > { %v3026_v43 = vsel %vm3016_vm1, %v11493_v11, %v2954_v8  ;;  %v11495_v35 = vld [vmem:[#allocation86_spill] sm:$0xff]  ;;  %vm3232_vm8 = vcmp.eq.s32.totalorder %v11501_v12, %v5109_v7  ;;  %v11503_v56 = vld [vmem:[#allocation145_spill] sm:$0xff]  ;;  %v11506_v17 = vld [vmem:[#allocation236_spill] sm:$0xff]  ;;  %v11521_v6 = vmov 67  }
 0x979   : > { %v3656_v55 = vsel %vm3646_vm9, %v11495_v35, %v3584_v34  ;;  %v3098_v26 = vsel %vm3088_vm10, %v11497_v21, %v3026_v43  ;;  %vm3304_vm13 = vcmp.eq.s32.totalorder %v11503_v56, %v5109_v7  ;;  %v11504_v31 = vld [vmem:[#allocation338_spill] sm:$0xff]  ;;  %v11507_v45 = vld [vmem:[#allocation475_spill] sm:$0xff]  ;;  %v11508_v3 = vld [vmem:[#allocation476_spill] sm:$0xff]  ;;  %vm3736_vm9 = vcmp.eq.s32.totalorder %v8976_v38, %v5109_v7 }
 0x97a   : > { %v3728_v24 = vsel %vm3718_vm11, %v8880_v5, %v3656_v55  ;;  %v3170_v58 = vsel %vm3160_vm0, %v11500_v27, %v3098_v26  ;;  %v11505_v5 = vld [vmem:[#allocation406_spill] sm:$0xff]  ;;  %vm3448_vm12 = vcmp.eq.s32.totalorder %v11507_v45, %v5109_v7  ;;  %v11509_v54 = vld [vmem:[#allocation487_spill] sm:$0xff]  ;;  %v11510_v63 = vld [vmem:[#allocation488_spill] sm:$0xff] }
 0x97b   : > { %v3800_v13 = vsel %vm3790_vm7, %v3794_v20, %v3728_v24  ;;  %v3242_v29 = vsel %vm3232_vm8, %v11502_v15, %v3170_v58  ;;  %vm3376_vm5 = vcmp.eq.s32.totalorder %v11505_v5, %v5109_v7  ;;  %vm3520_vm3 = vcmp.eq.s32.totalorder %v11509_v54, %v5109_v7  ;;  %4009 = vperm.xlu1 %4781, %v9437_v59   ;;  %v11511_v44 = vld [vmem:[#allocation501_spill] sm:$0xff]  ;;  %v11513_v52 = vld [vmem:[#allocation103_spill] sm:$0xff]  ;;  %v11516_v28 = vld [vmem:[#allocation470_spill] sm:$0xff]  ;;  %v3816_v50 = vpop.permute.xlu1 %3815 }
 0x97c   : > { %v3314_v1 = vsel %vm3304_vm13, %v11504_v31, %v3242_v29  ;;  %vm3592_vm6 = vcmp.eq.s32.totalorder %v11511_v44, %v5109_v7  ;;  %v11512_v2 = vld [vmem:[#allocation185_spill] sm:$0xff]  ;;  %vm3664_vm4 = vcmp.eq.s32.totalorder %v11513_v52, %v5109_v7  ;;  %vm3809_vm2 = vcmp.eq.s32.totalorder %v11516_v28, %v5109_v7  ;;  %v11519_v48 = vld [vmem:[#allocation471_spill] sm:$0xff]  ;;  %v11529_v5 = vld [vmem:[#allocation494_spill] sm:$0xff]  ;;  %v4002_v28 = vpop.permute.xlu0 %4001 }
 0x97d   : > { %v3386_v36 = vsel %vm3376_vm5, %v11506_v17, %v3314_v1  ;;  %v11514_v14 = vld [vmem:[#allocation105_spill] sm:$0xff]  ;;  %v3819_v40 = vsel %vm3809_vm2, %v3816_v50, %v9126_v47  ;;  %vm3826_vm1 = vcmp.eq.s32.totalorder %v11519_v48, %v5109_v7  ;;  %v11526_v20 = vld [vmem:[#allocation483_spill] sm:$0xff]  ;;  %v11530_v17 = vld [vmem:[#allocation496_spill] sm:$0xff] }
 0x97e   : > { %v3458_v41 = vsel %vm3448_vm12, %v11508_v3, %v3386_v36  ;;  %v11522_v43 = vld [vmem:[#allocation101_spill] sm:$0xff]  ;;  %vm3898_vm12 = vcmp.eq.s32.totalorder %v11526_v20, %v5109_v7 }
 0x97f   : > { %v3530_v49 = vsel %vm3520_vm3, %v11510_v63, %v3458_v41  ;;  %4782 = vset.pattern.permute.xlu1 %v11515_v61  ;;  %v3825_v38 = vpop.permute.xlu1 %3824  ;;  %vm3845_vm10 = vcmp.eq.s32.totalorder %v11522_v43, %v5109_v7  ;;  %v11527_v27 = vld [vmem:[#allocation485_spill] sm:$0xff]  ;;  %v11531_v63 = vld [vmem:[#allocation500_spill] sm:$0xff] }
 0x980   : > { %v3602_v19 = vsel %vm3592_vm6, %v11512_v2, %v3530_v49  ;;  %4019 = vperm.xlu1 %4782, %v8687_v33   ;;  %vm3827_vm15 = vcmp.eq.s32.totalorder %v3825_v38, %v5109_v7  ;;  %v11528_v56 = vld [vmem:[#allocation489_spill] sm:$0xff]  ;;  %vm3953_vm2 = vcmp.eq.s32.totalorder %v11531_v63, %v5109_v7 }
 0x981   : > { %v3674_v30 = vsel %vm3664_vm4, %v11514_v14, %v3602_v19  ;;  %vm3917_vm6 = vcmp.eq.s32.totalorder %v11528_v56, %v5109_v7  ;;  %v11532_v19 = vld [vmem:[#allocation37_spill] sm:$0xff] }
 0x982   : > { %v3746_v32 = vsel %vm3736_vm9, %v9040_v4, %v3674_v30  ;;  %v11518_v4 = vld [vmem:[#allocation472_spill] sm:$0xff]  ;;  %vm3934_vm9 = vcmp.eq.s32.totalorder %v11529_v5, %v5109_v7 }
 0x983   : > { %v3818_v9 = vsel %vm3808_vm14, %v3812_v60, %v3746_v32  ;;  %v3837_v8 = vsel %vm3827_vm15, %v11518_v4, %v9219_v10  ;;  %v3830_v25 = vpop.permute.xlu1 %3829 }
 0x984   : > { %4784 = vset.pattern.permute.xlu1 %v11517_v37  ;;  %v3836_v34 = vsel %vm3826_vm1, %v3830_v25, %v9261_v16 }
 0x985   : > { %4037 = vperm.xlu1 %4784, %v8687_v33  }
 0x987   : > { %v3840_v47 = vpop.permute.xlu1 %3839 }
 0x988   : > { %vm3844_vm11 = vcmp.eq.s32.totalorder %v3840_v47, %v5109_v7 }
 0x989   : > { %4040 = vperm.xlu1 %4784, %v8552_v22  }
 0x98b   : > { %v3848_v11 = vpop.permute.xlu1 %3847 }
 0x98c   : > { %v3854_v10 = vsel %vm3844_vm11, %v3848_v11, %v9381_v0  ;;  %v11524_v0 = vld [vmem:[#allocation99_spill] sm:$0xff] }
 0x98d   : > { %4785 = vset.pattern.permute.xlu1 %v11520_v57 }
 0x98e   : > { %4058 = vperm.xlu1 %4785, %v8552_v22  }
 0x98f   : > { %v3852_v16 = vpop.permute.xlu1 %3851 }
 0x990   : > { %v3855_v22 = vsel %vm3845_vm10, %v3852_v16, %v9435_v53 }
 0x992   : > { %4786 = vset.pattern.permute.xlu1 %v11521_v6 }
 0x993   : > { %4073 = vperm.xlu1 %4786, %v8687_v33   ;;  %v3861_v42 = vpop.permute.xlu1 %3860  ;;  %v11523_v33 = vld [vmem:[#allocation369_spill] sm:$0xff] }
 0x994   : > { %vm3863_vm7 = vcmp.eq.s32.totalorder %v3861_v42, %v5109_v7  ;;  %vm3862_vm0 = vcmp.eq.s32.totalorder %v11523_v33, %v5109_v7 }
 0x995   : > { %v3873_v35 = vsel %vm3863_vm7, %v11524_v0, %v9494_v23  ;;  %v11525_v23 = vld [vmem:[#allocation261_spill] sm:$0xff] }
 0x996   : > { %vm3881_vm13 = vcmp.eq.s32.totalorder %v11525_v23, %v5109_v7 }
 0x997   : > { %4788 = vset.pattern.permute.xlu1 %v11515_v61  ;;  %v3866_v55 = vpop.permute.xlu1 %3865 }
 0x998   : > { %4027 = vperm.xlu1 %4788, %v9437_v59   ;;  %v3872_v62 = vsel %vm3862_vm0, %v3866_v55, %v3800_v13 }
 0x99b   : > { %v3876_v53 = vpop.permute.xlu1 %3875 }
 0x99c   : > { %4031 = vperm.xlu1 %4788, %v8477_v39   ;;  %vm3880_vm8 = vcmp.eq.s32.totalorder %v3876_v53, %v5109_v7 }
 0x99f   : > { %v3884_v21 = vpop.permute.xlu1 %3883 }
 0x9a0   : > { %4791 = vset.pattern.permute.xlu1 %v11517_v37  ;;  %v3890_v26 = vsel %vm3880_vm8, %v3884_v21, %v3818_v9  ;;  %v4014_v37 = vpop.permute.xlu0 %4013  ;;  %vm4006_vm8 = vcmp.eq.s32.totalorder %v4002_v28, %v5109_v7 }
 0x9a1   : > { %4049 = vperm.xlu1 %4791, %v8477_v39  }
 0x9a3   : > { %v3888_v46 = vpop.permute.xlu1 %3887 }
 0x9a4   : > { %v3891_v24 = vsel %vm3881_vm13, %v3888_v46, %v3819_v40  ;;  %v4023_v4 = vpop.permute.xlu0 %4022 }
 0x9a5   : > { %4792 = vset.pattern.permute.xlu1 %v11520_v57  ;;  %vm4025_vm7 = vcmp.eq.s32.totalorder %v4023_v4, %v5109_v7 }
 0x9a6   : > { %4063 = vperm.xlu1 %4792, %v9437_v59  }
 0x9a7   : > { %v3897_v18 = vpop.permute.xlu1 %3896 }
 0x9a8   : > { %vm3899_vm5 = vcmp.eq.s32.totalorder %v3897_v18, %v5109_v7  ;;  %v4077_v48 = vpop.permute.xlu0 %4076 }
 0x9a9   : > { %v3909_v58 = vsel %vm3899_vm5, %v11527_v27, %v3837_v8 }
 0x9aa   : > { %4793 = vset.pattern.permute.xlu1 %v11521_v6 }
 0x9ab   : > { %4081 = vperm.xlu1 %4793, %v9437_v59   ;;  %v3902_v12 = vpop.permute.xlu1 %3901 }
 0x9ac   : > { %v3908_v13 = vsel %vm3898_vm12, %v3902_v12, %v3836_v34  ;;  %v11533_v34 = vld [vmem:[#allocation21_spill] sm:$0xff]  ;;  %v4046_v57 = vpop.permute.xlu0 %4045 }
 0x9ad   : > { %vm3970_vm1 = vcmp.eq.s32.totalorder %v11533_v34, %v5109_v7 }
 0x9af   : > { %4085 = vperm.xlu1 %4793, %v8477_v39   ;;  %v3912_v59 = vpop.permute.xlu1 %3911 }
 0x9b0   : > { %vm3916_vm3 = vcmp.eq.s32.totalorder %v3912_v59, %v5109_v7  ;;  %v4056_v55 = vpop.permute.xlu0 %4055 }
 0x9b1   : > { %vm4060_vm13 = vcmp.eq.s32.totalorder %v4056_v55, %v5109_v7 }
 0x9b3   : > { %v3920_v15 = vpop.permute.xlu1 %3919 }
 0x9b4   : > { %v3926_v29 = vsel %vm3916_vm3, %v3920_v15, %v3854_v10 }
 0x9b7   : > { %v3924_v39 = vpop.permute.xlu1 %3923 }
 0x9b8   : > { %v9588_v31 = vsel %vm3917_vm6, %v3924_v39, %v3855_v22 }
 0x9bb   : > { %v3933_v1 = vpop.permute.xlu1 %3932 }
 0x9bc   : > { %vm3935_vm4 = vcmp.eq.s32.totalorder %v3933_v1, %v5109_v7 }
 0x9bd   : > { %v3945_v36 = vsel %vm3935_vm4, %v11530_v17, %v3873_v35 }
 0x9bf   : > { %v3938_v45 = vpop.permute.xlu1 %3937 }
 0x9c0   : > { %v3944_v3 = vsel %vm3934_vm9, %v3938_v45, %v3872_v62  ;;  %vm4079_vm9 = vcmp.eq.s32.totalorder %v4077_v48, %v5109_v7 }
 0x9c3   : > { %v3948_v41 = vpop.permute.xlu1 %3947 }
 0x9c4   : > { %vm3952_vm14 = vcmp.eq.s32.totalorder %v3948_v41, %v5109_v7 }
 0x9c7   : > { %v3956_v54 = vpop.permute.xlu1 %3955 }
 0x9c8   : > { %v3962_v51 = vsel %vm3952_vm14, %v3956_v54, %v3890_v26  ;;  %v11534_v26 = vld [vmem:[#allocation70_spill] sm:$0xff] }
 0x9c9   : > { %vm3989_vm3 = vcmp.eq.s32.totalorder %v11534_v26, %v5109_v7 }
 0x9cb   : > { %v3960_v49 = vpop.permute.xlu1 %3959 }
 0x9cc   : > { %v3963_v44 = vsel %vm3953_vm2, %v3960_v49, %v3891_v24  ;;  %v4068_v24 = vpop.permute.xlu0 %4067 }
 0x9d9   : > { %v3969_v2 = vpop.permute.xlu1 %3968 }
 0x9da   : > { %vm3971_vm15 = vcmp.eq.s32.totalorder %v3969_v2, %v5109_v7 }
 0x9db   : > { %v3981_v52 = vsel %vm3971_vm15, %v11532_v19, %v3909_v58 }
 0x9dd   : > { %v3974_v14 = vpop.permute.xlu1 %3973 }
 0x9de   : > { %v3980_v47 = vsel %vm3970_vm1, %v3974_v14, %v3908_v13 }
 0x9e2   : > { %v3984_v30 = vpop.permute.xlu1 %3983 }
 0x9e3   : > { %vm3988_vm5 = vcmp.eq.s32.totalorder %v3984_v30, %v5109_v7 }
 0x9ed   : > { %v3992_v32 = vpop.permute.xlu1 %3991 }
 0x9ee   : > { %v3998_v62 = vsel %vm3988_vm5, %v3992_v32, %v3926_v29 }
 0x9f1   : > { %v3996_v61 = vpop.permute.xlu1 %3995 }
 0x9f2   : > { %v3999_v20 = vsel %vm3989_vm3, %v3996_v61, %v9588_v31 }
 0x9f6   : > { %v4005_v60 = vpop.permute.xlu1 %4004 }
 0x9f7   : > { %vm4007_vm6 = vcmp.eq.s32.totalorder %v4005_v60, %v5109_v7 }
 0x9f8   : > { %v4017_v27 = vsel %vm4007_vm6, %v4014_v37, %v3945_v36 }
 0x9fa   : > { %v4010_v9 = vpop.permute.xlu1 %4009 }
 0x9fb   : > { %v4016_v53 = vsel %vm4006_vm8, %v4010_v9, %v3944_v3 }
 0x9ff   : > { %v4020_v50 = vpop.permute.xlu1 %4019 }
 0xa00   : > { %vm4024_vm10 = vcmp.eq.s32.totalorder %v4020_v50, %v5109_v7 }
 0xa04   : > { %v4038_v40 = vpop.permute.xlu1 %4037 }
 0xa05   : > { %vm4042_vm11 = vcmp.eq.s32.totalorder %v4038_v40, %v5109_v7 }
 0xa06   : > { %v4052_v11 = vsel %vm4042_vm11, %v4046_v57, %v3980_v47 }
 0xa08   : > { %v4041_v38 = vpop.permute.xlu1 %4040 }
 0xa09   : > { %vm4043_vm0 = vcmp.eq.s32.totalorder %v4041_v38, %v5109_v7 }
 0xa0d   : > { %v4059_v8 = vpop.permute.xlu1 %4058 }
 0xa0e   : > { %vm4061_vm4 = vcmp.eq.s32.totalorder %v4059_v8, %v5109_v7 }
 0xa0f   : > { %v4071_v13 = vsel %vm4061_vm4, %v4068_v24, %v3999_v20 }
 0xa12   : > { %v4074_v25 = vpop.permute.xlu1 %4073 }
 0xa13   : > { %vm4078_vm12 = vcmp.eq.s32.totalorder %v4074_v25, %v5109_v7 }
 0xa17   : > { %v4028_v6 = vpop.permute.xlu1 %4027 }
 0xa18   : > { %v4034_v10 = vsel %vm4024_vm10, %v4028_v6, %v3962_v51 }
 0xa19   : > { %v4090_v43 = vadd.f32 %v4052_v11, %v4034_v10 }
 0xa1b   : > { %v4032_v16 = vpop.permute.xlu1 %4031 }
 0xa1c   : > { %v4035_v42 = vsel %vm4025_vm7, %v4032_v16, %v3963_v44 }
 0xa20   : > { %v4050_v22 = vpop.permute.xlu1 %4049 }
 0xa21   : > { %v4053_v33 = vsel %vm4043_vm0, %v4050_v22, %v3981_v52 }
 0xa22   : > { %v4091_v0 = vadd.f32 %v4053_v33, %v4035_v42 }
 0xa25   : > { %v4064_v35 = vpop.permute.xlu1 %4063 }
 0xa26   : > { %v4070_v23 = vsel %vm4060_vm13, %v4064_v35, %v3998_v62 }
 0xa2a   : > { %v4082_v21 = vpop.permute.xlu1 %4081 }
 0xa2b   : > { %v4088_v46 = vsel %vm4078_vm12, %v4082_v21, %v4016_v53 }
 0xa2c   : > { %v4092_v18 = vadd.f32 %v4088_v46, %v4070_v23 }
 0xa2e   : > { %v4094_v58 = vadd.f32 %v4092_v18, %v4090_v43  ;;  %v4086_v12 = vpop.permute.xlu1 %4085 }
 0xa2f   : > { %v4089_v59 = vsel %vm4079_vm9, %v4086_v12, %v4017_v27 }
 0xa30   : > { %4096 = vst [vmem:[%s5250_s9] sm:$0xff] %v4094_v58  ;;  %v4093_v15 = vadd.f32 %v4089_v59, %v4071_v13 }
 0xa32   : > { %v4095_v29 = vadd.f32 %v4093_v15, %v4091_v0 }
 0xa34   : > { %4097 = vst [vmem:[%s5250_s9 + $0x8] sm:$0x3] %v4095_v29 }
 0xa35 PF: > { %4104 = sbr.rel (!%p5083_p5) target bundleno = 2621 (0xa3d), region = 48  ;;  %s4240_s12 = sshll.u32 (%p5083_p5), %s4861_s18, 2 }
 0xa36   : > { %s4106_s13 = sadd.s32 (%p5083_p5), %s4857_s17, %s4240_s12 }
 0xa37   : > { %v4138_v56 = vld [vmem:[%s5250_s9] sm:$0xff] (%p5083_p5)  ;;  %s4241_s14 = sshll.u32 (%p5083_p5), %s4106_s13, 3 }
 0xa38   : > { %s4108_s27 = scalar_lea.vmem (%p5083_p5), %s9651_s4, %s4241_s14 }
 0xa39   : > { %4139 = vst [vmem:[%s4108_s27] sm:$0xff] (%p5083_p5), %v4138_v56 }
 0xa3b   : > { %v4140_v7 = vld [vmem:[%s5250_s9 + $0x8] sm:$0xff] (%p5083_p5) }
 0xa3c   : > { %4141 = vst [vmem:[%s4108_s27 + $0x10] sm:$0xff] %v4140_v7 }
 0xa3d PF: > { %s14_s21 = sadd.s32 1, %s4873_s21   ;;  %s11535_s15 = smov %s4853_s16 }
 0xa3e   : > { %p11_p12 = scmp.ge.s32.totalorder %s14_s21, 6   ;;  %s11536_s16 = smov %s5094_s30 }
 0xa3f   : > { %s11537_s17 = smov %s4865_s19  ;;  %s11538_s18 = smov %s4869_s20 }
 0xa40   : > { %s11539_s19 = smov %s11542_s22  ;;  %s11540_s20 = smov %s11546_s23 }
 0xa41   :  { %13 = sbr.rel (!%p11_p12) target bundleno = 4 (0x4), region = 118 }

</bundles_post_ra>
